<compile_context>
chip_gen: v5e
topology: v5e:2x2
jax: 0.10.0
libtpu: 0.0.40
codegen_flags: <defaults>
</compile_context>

<pallas_src>
import jax
import jax.numpy as jnp
from jax import lax
from jax.experimental import pallas as pl
from jax.experimental.pallas import tpu as pltpu

# ----------------------------- small config ---------------------------------
IMG = 32                     # img_size
PATCH = 8                    # patch_size
INPUT = IMG // PATCH         # input_size = 4
N_TOK = INPUT * INPUT        # 16  (h*w) == TABlock dim
EMB = 32                     # embed_dim
VIT_DIM = EMB                # surrogate ViT width (so 4*VIT_DIM == embed_dim*4)
VIT_DEPTH = 12
VIT_MLP = 64
PATCH_FEAT = 3 * PATCH * PATCH   # 192
PROJ_DIM = 128               # self.L = Linear(embed_dim, 128)
NUM_TAB = 2
B = 2
B2 = 2 * B                   # both images run through the ViT in one batch


# =============================================================================
# Single fused kernel: surrogate ViT (12 blocks, both images) + full pipeline
# =============================================================================
def _maniqa_kernel(patches_ref, pw_ref, pb_ref, clstok_ref, pos_ref,
                   w1_ref, b1_ref, w2_ref, b2_ref,
                   lw_ref, lb_ref,
                   tabw_ref, tabb_ref,
                   c1w_ref, c1b_ref, c2w_ref, c2b_ref, c3w_ref, c3b_ref,
                   ws1_ref, bs1_ref, ws2_ref, bs2_ref,
                   ww1_ref, bw1_ref, ww2_ref, bw2_ref,
                   score_ref, p_ref,
                   feat_ref, hook_ref):
    f32 = jnp.float32
    d = pl.program_id(0)

    # ---- step 0: patch embed + cls token + positional embedding --------------
    @pl.when(d == 0)
    def _():
        tok = jnp.einsum('bnp,pd->bnd', patches_ref[...], pw_ref[...],
                         preferred_element_type=f32) + pb_ref[...]
        feat_ref[:, 0:1, :] = jnp.broadcast_to(
            clstok_ref[...][None] + pos_ref[0:1, :][None], (B2, 1, VIT_DIM))
        feat_ref[:, 1:, :] = tok + pos_ref[1:, :][None]

    # ---- residual MLP block d (surrogate timm Block) --------------------------
    x = feat_ref[...]                                                  # (2B,17,D)
    h = jnp.einsum('bnd,dh->bnh', x, w1_ref[0],
                   preferred_element_type=f32) + b1_ref[0]
    h = jnp.maximum(h, 0.0)
    h = jnp.einsum('bnh,hd->bnd', h, w2_ref[0],
                   preferred_element_type=f32) + b2_ref[0]
    x = x + h
    feat_ref[...] = x

    # ---- forward hooks on blocks 6..9 (first image only) ----------------------
    # extract_feature: drop cls token, concat blocks 6..9 along channels,
    # rearrange 'b (h w) c -> b c (h w)'.  We store directly in that layout.
    for a in range(4):
        @pl.when(d == 6 + a)
        def _(a=a):
            hook_ref[:, a * VIT_DIM:(a + 1) * VIT_DIM, :] = (
                jnp.swapaxes(x[0:B, 1:, :], 1, 2))

    # ---- final step: L projection/normalize + full post-ViT pipeline ----------
    @pl.when(d == VIT_DEPTH - 1)
    def _():
        # self.L + F.normalize(dim=1) on cls tokens of both images
        cls_x = x[:, 0, :]                                             # (2B, D)
        p = jnp.dot(cls_x, lw_ref[...], preferred_element_type=f32) + lb_ref[...]
        nrm = jnp.sqrt(jnp.sum(p * p, axis=1, keepdims=True))
        p_ref[...] = p / jnp.maximum(nrm, 1e-12)

        # ---- exact TABlock (fused QKV; PyTorch transpose/reshape semantics) ---
        def tab(xv, idx):
            Bb, C, N = xv.shape
            wqkv = tabw_ref[idx]                                       # (N, 3N)
            bqkv = tabb_ref[idx]                                       # (1, 3N)
            qkv = jnp.einsum('bcn,nm->bcm', xv, wqkv,
                             preferred_element_type=f32) + bqkv
            q = qkv[:, :, :N]
            k = qkv[:, :, N:2 * N]
            v = qkv[:, :, 2 * N:]
            attn = jnp.einsum('bcn,bdn->bcd', q, k,
                              preferred_element_type=f32) * (float(N) ** -0.5)
            attn = attn - jnp.max(attn, axis=-1, keepdims=True)
            e = jnp.exp(attn)
            attn = e * pl.reciprocal(jnp.sum(e, axis=-1, keepdims=True),
                                     approx=True)
            av = jnp.einsum('bcd,bdn->bcn', attn, v,
                            preferred_element_type=f32)                # (B, C, N)
            # exact PyTorch: (attn @ v).transpose(1, 2).reshape(B, C, N)
            kk = C // N
            if kk == 1:
                z = jnp.swapaxes(av, 1, 2)
            else:
                n_idx = lax.broadcasted_iota(jnp.int32, (N, C), 0)
                m_idx = lax.broadcasted_iota(jnp.int32, (N, C), 1)
                zT = jnp.zeros((Bb, N, C), f32)
                for g in range(kk):
                    sel = (m_idx == n_idx * kk + g).astype(f32)        # (N, C)
                    blk = av[:, g * N:(g + 1) * N, :]                  # (B, N, N)
                    zT = zT + jnp.einsum('bjn,nm->bjm', blk, sel,
                                         preferred_element_type=f32)
                z = jnp.swapaxes(zT, 1, 2)                             # (B, C, N)
            return z + xv

        # ---- 1x1 conv over (B, Cin, h*w) -> (B, Cout, h*w) ---------------------
        def conv1x1(xv, wT_ref, b_ref):
            y = jnp.einsum('bcn,co->bno', xv, wT_ref[...],
                           preferred_element_type=f32) + b_ref[...]
            return jnp.swapaxes(y, 1, 2)                               # (B, O, N)

        xp = hook_ref[...]                                             # (B,4*EMB,N)
        xp = tab(xp, 0)
        xp = tab(xp, 1)
        xp = conv1x1(xp, c1w_ref, c1b_ref)                             # (B,EMB,N)
        # TODO(synk): swintransformer1 (external, code not provided) -> identity
        xp = tab(xp, 2)
        xp = tab(xp, 3)
        xp = conv1x1(xp, c2w_ref, c2b_ref)                             # (B,EMB/2,N)
        # TODO(synk): swintransformer2 -> identity
        xp = tab(xp, 4)
        xp = tab(xp, 5)
        xp = conv1x1(xp, c3w_ref, c3b_ref)                             # (B,EMB/2,N)
        # TODO(synk): swintransformer3 -> identity

        # ---- fc_score / fc_weight heads + weighted score -----------------------
        xh = jnp.swapaxes(xp, 1, 2)                                    # (B,N,EMB/2)
        hs = jnp.maximum(jnp.einsum('bnd,dh->bnh', xh, ws1_ref[...],
                                    preferred_element_type=f32) + bs1_ref[...], 0.0)
        fsc = jnp.maximum(jnp.einsum('bnh,ho->bno', hs, ws2_ref[...],
                                     preferred_element_type=f32) + bs2_ref[...], 0.0)
        hw = jnp.maximum(jnp.einsum('bnd,dh->bnh', xh, ww1_ref[...],
                                    preferred_element_type=f32) + bw1_ref[...], 0.0)
        wsig = jax.nn.sigmoid(jnp.einsum('bnh,ho->bno', hw, ww2_ref[...],
                                         preferred_element_type=f32) + bw2_ref[...])
        fw = (fsc * wsig)[:, :, 0]                                     # (B, N)
        wv = wsig[:, :, 0]                                             # (B, N)
        num = jnp.sum(fw, axis=-1, keepdims=True)                      # (B, 1)
        den = jnp.sum(wv, axis=-1, keepdims=True)                      # (B, 1)
        score_ref[...] = num / den


def _const_spec(shape):
    nd = len(shape)
    return pl.BlockSpec(shape, lambda d, _nd=nd: (0,) * _nd)


def maniqa_fused_call(patches, pp):
    args = (patches,
            pp["patch_wT"], pp["patch_b"], pp["cls"], pp["pos"],
            pp["w1T"], pp["b1"], pp["w2T"], pp["b2"],
            pp["LwT"], pp["Lb"],
            pp["tab_w"], pp["tab_b"],
            pp["c1wT"], pp["c1b"], pp["c2wT"], pp["c2b"], pp["c3wT"], pp["c3b"],
            pp["ws1T"], pp["bs1"], pp["ws2T"], pp["bs2"],
            pp["ww1T"], pp["bw1"], pp["ww2T"], pp["bw2"])

    in_specs = [
        _const_spec(patches.shape),                                    # patches
        _const_spec(pp["patch_wT"].shape), _const_spec(pp["patch_b"].shape),
        _const_spec(pp["cls"].shape), _const_spec(pp["pos"].shape),
        pl.BlockSpec((1, VIT_DIM, VIT_MLP), lambda d: (d, 0, 0)),      # w1T
        pl.BlockSpec((1, 1, VIT_MLP), lambda d: (d, 0, 0)),            # b1
        pl.BlockSpec((1, VIT_MLP, VIT_DIM), lambda d: (d, 0, 0)),      # w2T
        pl.BlockSpec((1, 1, VIT_DIM), lambda d: (d, 0, 0)),            # b2
        _const_spec(pp["LwT"].shape), _const_spec(pp["Lb"].shape),
        _const_spec(pp["tab_w"].shape), _const_spec(pp["tab_b"].shape),
        _const_spec(pp["c1wT"].shape), _const_spec(pp["c1b"].shape),
        _const_spec(pp["c2wT"].shape), _const_spec(pp["c2b"].shape),
        _const_spec(pp["c3wT"].shape), _const_spec(pp["c3b"].shape),
        _const_spec(pp["ws1T"].shape), _const_spec(pp["bs1"].shape),
        _const_spec(pp["ws2T"].shape), _const_spec(pp["bs2"].shape),
        _const_spec(pp["ww1T"].shape), _const_spec(pp["bw1"].shape),
        _const_spec(pp["ww2T"].shape), _const_spec(pp["bw2"].shape),
    ]
    out_shape = (jax.ShapeDtypeStruct((B, 1), jnp.float32),
                 jax.ShapeDtypeStruct((B2, PROJ_DIM), jnp.float32))
    out_specs = (pl.BlockSpec((B, 1), lambda d: (0, 0)),
                 pl.BlockSpec((B2, PROJ_DIM), lambda d: (0, 0)))
    scratch_shapes = [
        pltpu.VMEM((B2, N_TOK + 1, VIT_DIM), jnp.float32),     # running ViT tokens
        pltpu.VMEM((B, 4 * VIT_DIM, N_TOK), jnp.float32),      # hooked features (b,c,n)
    ]
    return pl.pallas_call(
        _maniqa_kernel,
        out_shape=out_shape,
        grid=(VIT_DEPTH,),
        in_specs=in_specs,
        out_specs=out_specs,
        scratch_shapes=scratch_shapes,
        compiler_params=pltpu.CompilerParams(dimension_semantics=("arbitrary",)),
    )(*args)


# =============================================================================
# Full forward
# =============================================================================
def maniqa_forward(pp, x_img, x2_img):
    # both images go through the ViT in one batch (hooks of the first image are
    # exactly save_output.outputs[6..9] of the original PyTorch model)
    imgs = jnp.concatenate([x_img, x2_img], axis=0)                    # (2B,3,H,W)
    patches = imgs.reshape(B2, 3, INPUT, PATCH, INPUT, PATCH)
    patches = jnp.transpose(patches, (0, 2, 4, 1, 3, 5)).reshape(
        B2, N_TOK, PATCH_FEAT)

    score2d, p = maniqa_fused_call(patches, pp)
    return score2d[:, 0], p[:B], p[B:]


# =============================================================================
# Parameters (torch-layout init, packed ONCE into kernel-ready layouts)
# =============================================================================
def init_params(key):
    keys = iter(jax.random.split(key, 128))
    nk = lambda: next(keys)
    dense = lambda o, i, s=0.02: (
        s * jax.random.normal(nk(), (o, i), jnp.float32),
        jnp.zeros((o,), jnp.float32))

    vit_blocks = []
    for _ in range(VIT_DEPTH):
        w1, b1 = dense(VIT_MLP, VIT_DIM)
        w2, b2 = dense(VIT_DIM, VIT_MLP)
        vit_blocks.append({"w1": w1, "b1": b1, "w2": w2, "b2": b2})
    pw, pb = dense(VIT_DIM, PATCH_FEAT)
    vit = {"patch_w": pw, "patch_b": pb,
           "cls": 0.02 * jax.random.normal(nk(), (1, 1, VIT_DIM), jnp.float32),
           "pos": 0.02 * jax.random.normal(nk(), (1, N_TOK + 1, VIT_DIM),
                                           jnp.float32),
           "blocks": vit_blocks}

    def tab_params():
        wq, bq = dense(N_TOK, N_TOK)
        wk, bk = dense(N_TOK, N_TOK)
        wv, bv = dense(N_TOK, N_TOK)
        return {"wq": wq, "bq": bq, "wk": wk, "bk": bk, "wv": wv, "bv": bv}

    Lw, Lb = dense(PROJ_DIM, VIT_DIM)
    c1w, c1b = dense(EMB, EMB * 4)
    c2w, c2b = dense(EMB // 2, EMB)
    c3w, c3b = dense(EMB // 2, EMB // 2)
    hs1, hb1 = dense(EMB // 2, EMB // 2)
    hs2, hb2 = dense(1, EMB // 2)
    hw1, hwb1 = dense(EMB // 2, EMB // 2)
    hw2, hwb2 = dense(1, EMB // 2)

    return {"vit": vit,
            "L_w": Lw, "L_b": Lb,
            "tab1": [tab_params() for _ in range(NUM_TAB)],
            "tab2": [tab_params() for _ in range(NUM_TAB)],
            "tab3": [tab_params() for _ in range(NUM_TAB)],
            "conv1_w": c1w, "conv1_b": c1b,
            "conv2_w": c2w, "conv2_b": c2b,
            "conv3_w": c3w, "conv3_b": c3b,
            "head": {"ws1": hs1, "bs1": hb1, "ws2": hs2, "bs2": hb2,
                     "ww1": hw1, "bw1": hwb1, "ww2": hw2, "bw2": hwb2}}


def pack_params(p):
    """One-time conversion into pre-transposed / stacked kernel layouts."""
    vit = p["vit"]
    w1T = jnp.stack([jnp.transpose(b["w1"]) for b in vit["blocks"]])       # (12,32,64)
    b1 = jnp.stack([b["b1"].reshape(1, VIT_MLP) for b in vit["blocks"]])   # (12,1,64)
    w2T = jnp.stack([jnp.transpose(b["w2"]) for b in vit["blocks"]])       # (12,64,32)
    b2 = jnp.stack([b["b2"].reshape(1, VIT_DIM) for b in vit["blocks"]])   # (12,1,32)

    tab_w, tab_b = [], []
    for group in ("tab1", "tab2", "tab3"):
        for t in p[group]:
            tab_w.append(jnp.concatenate(
                [jnp.transpose(t["wq"]), jnp.transpose(t["wk"]),
                 jnp.transpose(t["wv"])], axis=1))                          # (16,48)
            tab_b.append(jnp.concatenate(
                [t["bq"], t["bk"], t["bv"]]).reshape(1, 3 * N_TOK))         # (1,48)

    h = p["head"]
    return {
        "patch_wT": jnp.transpose(vit["patch_w"]),
        "patch_b": vit["patch_b"].reshape(1, VIT_DIM),
        "cls": vit["cls"].reshape(1, VIT_DIM),
        "pos": vit["pos"].reshape(N_TOK + 1, VIT_DIM),
        "w1T": w1T, "b1": b1, "w2T": w2T, "b2": b2,
        "LwT": jnp.transpose(p["L_w"]), "Lb": p["L_b"].reshape(1, PROJ_DIM),
        "tab_w": jnp.stack(tab_w),                                         # (6,16,48)
        "tab_b": jnp.stack(tab_b),                                         # (6,1,48)
        "c1wT": jnp.transpose(p["conv1_w"]), "c1b": p["conv1_b"].reshape(1, EMB),
        "c2wT": jnp.transpose(p["conv2_w"]), "c2b": p["conv2_b"].reshape(1, EMB // 2),
        "c3wT": jnp.transpose(p["conv3_w"]), "c3b": p["conv3_b"].reshape(1, EMB // 2),
        "ws1T": jnp.transpose(h["ws1"]), "bs1": h["bs1"].reshape(1, EMB // 2),
        "ws2T": jnp.transpose(h["ws2"]), "bs2": h["bs2"].reshape(1, 1),
        "ww1T": jnp.transpose(h["ww1"]), "bw1": h["bw1"].reshape(1, EMB // 2),
        "ww2T": jnp.transpose(h["ww2"]), "bw2": h["bw2"].reshape(1, 1),
    }


# ---------------------------------- main -------------------------------------
if __name__ == "__main__":
    root = jax.random.PRNGKey(0)
    k_params, k_x, k_x2 = jax.random.split(root, 3)
    params = pack_params(init_params(k_params))
    x = jax.random.normal(k_x, (B, 3, IMG, IMG), jnp.float32)
    x2 = jax.random.normal(k_x2, (B, 3, IMG, IMG), jnp.float32)

    fwd = jax.jit(maniqa_forward)
    score, p_1, p_2 = fwd(params, x, x2)
    jax.block_until_ready((score, p_1, p_2))

    assert score.shape == (B,)
    assert p_1.shape == (B, PROJ_DIM) and p_2.shape == (B, PROJ_DIM)
    assert bool(jnp.all(jnp.isfinite(score)))
    assert bool(jnp.all(jnp.isfinite(p_1))) and bool(jnp.all(jnp.isfinite(p_2)))
    print("KERNEL_OK")
</pallas_src>

<mosaic_0001>
module attributes {stable_mosaic.version = 11 : i64} {
  func.func @_maniqa_kernel(%arg0: i32, %arg1: memref<4x16x192xf32, #tpu.memory_space<vmem>>, %arg2: memref<192x32xf32, #tpu.memory_space<vmem>>, %arg3: memref<1x32xf32, #tpu.memory_space<vmem>>, %arg4: memref<1x32xf32, #tpu.memory_space<vmem>>, %arg5: memref<17x32xf32, #tpu.memory_space<vmem>>, %arg6: memref<1x32x64xf32, #tpu.memory_space<vmem>>, %arg7: memref<1x1x64xf32, #tpu.memory_space<vmem>>, %arg8: memref<1x64x32xf32, #tpu.memory_space<vmem>>, %arg9: memref<1x1x32xf32, #tpu.memory_space<vmem>>, %arg10: memref<32x128xf32, #tpu.memory_space<vmem>>, %arg11: memref<1x128xf32, #tpu.memory_space<vmem>>, %arg12: memref<6x16x48xf32, #tpu.memory_space<vmem>>, %arg13: memref<6x1x48xf32, #tpu.memory_space<vmem>>, %arg14: memref<128x32xf32, #tpu.memory_space<vmem>>, %arg15: memref<1x32xf32, #tpu.memory_space<vmem>>, %arg16: memref<32x16xf32, #tpu.memory_space<vmem>>, %arg17: memref<1x16xf32, #tpu.memory_space<vmem>>, %arg18: memref<16x16xf32, #tpu.memory_space<vmem>>, %arg19: memref<1x16xf32, #tpu.memory_space<vmem>>, %arg20: memref<16x16xf32, #tpu.memory_space<vmem>>, %arg21: memref<1x16xf32, #tpu.memory_space<vmem>>, %arg22: memref<16x1xf32, #tpu.memory_space<vmem>>, %arg23: memref<1x1xf32, #tpu.memory_space<vmem>>, %arg24: memref<16x16xf32, #tpu.memory_space<vmem>>, %arg25: memref<1x16xf32, #tpu.memory_space<vmem>>, %arg26: memref<16x1xf32, #tpu.memory_space<vmem>>, %arg27: memref<1x1xf32, #tpu.memory_space<vmem>>, %arg28: memref<2x1xf32, #tpu.memory_space<vmem>>, %arg29: memref<4x128xf32, #tpu.memory_space<vmem>>, %arg30: memref<4x17x32xf32, #tpu.memory_space<vmem>>, %arg31: memref<2x128x16xf32, #tpu.memory_space<vmem>>) attributes {dimension_semantics = [#tpu.dimension_semantics<arbitrary>], iteration_bounds = array<i64: 12>, scalar_prefetch = 0 : i64, scratch_operands = 2 : i64, tpu.core_type = #tpu.core_type<tc>, window_params = [{pipeline_mode = #tpu.pipeline_mode<synchronous>, transform_indices = @transform_0, window_bounds = array<i64: 4, 16, 192>}, {pipeline_mode = #tpu.pipeline_mode<synchronous>, transform_indices = @transform_1, window_bounds = array<i64: 192, 32>}, {pipeline_mode = #tpu.pipeline_mode<synchronous>, transform_indices = @transform_2, window_bounds = array<i64: 1, 32>}, {pipeline_mode = #tpu.pipeline_mode<synchronous>, transform_indices = @transform_3, window_bounds = array<i64: 1, 32>}, {pipeline_mode = #tpu.pipeline_mode<synchronous>, transform_indices = @transform_4, window_bounds = array<i64: 17, 32>}, {transform_indices = @transform_5, window_bounds = array<i64: 1, 32, 64>}, {transform_indices = @transform_6, window_bounds = array<i64: 1, 1, 64>}, {transform_indices = @transform_7, window_bounds = array<i64: 1, 64, 32>}, {transform_indices = @transform_8, window_bounds = array<i64: 1, 1, 32>}, {pipeline_mode = #tpu.pipeline_mode<synchronous>, transform_indices = @transform_9, window_bounds = array<i64: 32, 128>}, {pipeline_mode = #tpu.pipeline_mode<synchronous>, transform_indices = @transform_10, window_bounds = array<i64: 1, 128>}, {pipeline_mode = #tpu.pipeline_mode<synchronous>, transform_indices = @transform_11, window_bounds = array<i64: 6, 16, 48>}, {pipeline_mode = #tpu.pipeline_mode<synchronous>, transform_indices = @transform_12, window_bounds = array<i64: 6, 1, 48>}, {pipeline_mode = #tpu.pipeline_mode<synchronous>, transform_indices = @transform_13, window_bounds = array<i64: 128, 32>}, {pipeline_mode = #tpu.pipeline_mode<synchronous>, transform_indices = @transform_14, window_bounds = array<i64: 1, 32>}, {pipeline_mode = #tpu.pipeline_mode<synchronous>, transform_indices = @transform_15, window_bounds = array<i64: 32, 16>}, {pipeline_mode = #tpu.pipeline_mode<synchronous>, transform_indices = @transform_16, window_bounds = array<i64: 1, 16>}, {pipeline_mode = #tpu.pipeline_mode<synchronous>, transform_indices = @transform_17, window_bounds = array<i64: 16, 16>}, {pipeline_mode = #tpu.pipeline_mode<synchronous>, transform_indices = @transform_18, window_bounds = array<i64: 1, 16>}, {pipeline_mode = #tpu.pipeline_mode<synchronous>, transform_indices = @transform_19, window_bounds = array<i64: 16, 16>}, {pipeline_mode = #tpu.pipeline_mode<synchronous>, transform_indices = @transform_20, window_bounds = array<i64: 1, 16>}, {pipeline_mode = #tpu.pipeline_mode<synchronous>, transform_indices = @transform_21, window_bounds = array<i64: 16, 1>}, {pipeline_mode = #tpu.pipeline_mode<synchronous>, transform_indices = @transform_22, window_bounds = array<i64: 1, 1>}, {pipeline_mode = #tpu.pipeline_mode<synchronous>, transform_indices = @transform_23, window_bounds = array<i64: 16, 16>}, {pipeline_mode = #tpu.pipeline_mode<synchronous>, transform_indices = @transform_24, window_bounds = array<i64: 1, 16>}, {pipeline_mode = #tpu.pipeline_mode<synchronous>, transform_indices = @transform_25, window_bounds = array<i64: 16, 1>}, {pipeline_mode = #tpu.pipeline_mode<synchronous>, transform_indices = @transform_26, window_bounds = array<i64: 1, 1>}, {pipeline_mode = #tpu.pipeline_mode<synchronous>, transform_indices = @transform_27, window_bounds = array<i64: 2, 1>}, {pipeline_mode = #tpu.pipeline_mode<synchronous>, transform_indices = @transform_28, window_bounds = array<i64: 4, 128>}]} {
    %c0_i32 = arith.constant 0 : i32
    %0 = arith.cmpi eq, %arg0, %c0_i32 : i32
    %1 = arith.extui %0 : i1 to i32
    %c0_i32_0 = arith.constant 0 : i32
    %2 = arith.cmpi ne, %1, %c0_i32_0 : i32
    scf.if %2 {
      %c0_25 = arith.constant 0 : index
      %c0_26 = arith.constant 0 : index
      %c0_27 = arith.constant 0 : index
      %39 = vector.load %arg1[%c0_25, %c0_26, %c0_27] : memref<4x16x192xf32, #tpu.memory_space<vmem>>, vector<4x16x192xf32>
      %c0_28 = arith.constant 0 : index
      %c0_29 = arith.constant 0 : index
      %40 = vector.load %arg2[%c0_28, %c0_29] : memref<192x32xf32, #tpu.memory_space<vmem>>, vector<192x32xf32>
      "tpu.trace_start"() <{level = 10 : i32, message = "bnp,pd->bnd"}> : () -> ()
      %cst_30 = arith.constant dense<0.000000e+00> : vector<4x16x32xf32>
      %41 = tpu.matmul %39, %40, %cst_30 {dimension_numbers = #tpu.dot_dimension_numbers<[2], [0], [0, 1], [1], [0, 0, 0, 1, 1, 1], [], []>} : vector<4x16x192xf32>, vector<192x32xf32>, vector<4x16x32xf32> -> vector<4x16x32xf32>
      "tpu.trace_stop"() : () -> ()
      %c0_31 = arith.constant 0 : index
      %c0_32 = arith.constant 0 : index
      %42 = vector.load %arg3[%c0_31, %c0_32] : memref<1x32xf32, #tpu.memory_space<vmem>>, vector<1x32xf32>
      %43 = vector.shape_cast %42 : vector<1x32xf32> to vector<1x1x32xf32>
      %44 = vector.broadcast %43 : vector<1x1x32xf32> to vector<4x16x32xf32>
      %45 = arith.addf %41, %44 : vector<4x16x32xf32>
      %c0_33 = arith.constant 0 : index
      %c0_34 = arith.constant 0 : index
      %46 = vector.load %arg4[%c0_33, %c0_34] : memref<1x32xf32, #tpu.memory_space<vmem>>, vector<1x32xf32>
      %47 = vector.shape_cast %46 : vector<1x32xf32> to vector<1x1x32xf32>
      %c0_35 = arith.constant 0 : index
      %c0_36 = arith.constant 0 : index
      %48 = vector.load %arg5[%c0_35, %c0_36] : memref<17x32xf32, #tpu.memory_space<vmem>>, vector<1x32xf32>
      %49 = vector.shape_cast %48 : vector<1x32xf32> to vector<1x1x32xf32>
      %50 = arith.addf %47, %49 : vector<1x1x32xf32>
      %51 = vector.shape_cast %50 : vector<1x1x32xf32> to vector<1x1x32xf32>
      %52 = vector.broadcast %51 : vector<1x1x32xf32> to vector<4x1x32xf32>
      %c0_37 = arith.constant 0 : index
      %c0_38 = arith.constant 0 : index
      %c0_39 = arith.constant 0 : index
      %53 = vector.load %arg30[%c0_37, %c0_38, %c0_39] : memref<4x17x32xf32, #tpu.memory_space<vmem>>, vector<4x1x32xf32>
      tpu.vector_store %arg30[%c0_37, %c0_38, %c0_39], %52 {strides = array<i32>} : memref<4x17x32xf32, #tpu.memory_space<vmem>>, vector<4x1x32xf32>,
      %c1 = arith.constant 1 : index
      %c0_40 = arith.constant 0 : index
      %54 = vector.load %arg5[%c1, %c0_40] : memref<17x32xf32, #tpu.memory_space<vmem>>, vector<16x32xf32>
      %55 = vector.shape_cast %54 : vector<16x32xf32> to vector<1x16x32xf32>
      %56 = vector.broadcast %55 : vector<1x16x32xf32> to vector<4x16x32xf32>
      %57 = arith.addf %45, %56 : vector<4x16x32xf32>
      %c0_41 = arith.constant 0 : index
      %c1_42 = arith.constant 1 : index
      %c0_43 = arith.constant 0 : index
      %58 = vector.load %arg30[%c0_41, %c1_42, %c0_43] : memref<4x17x32xf32, #tpu.memory_space<vmem>>, vector<4x16x32xf32>
      tpu.vector_store %arg30[%c0_41, %c1_42, %c0_43], %57 {strides = array<i32>} : memref<4x17x32xf32, #tpu.memory_space<vmem>>, vector<4x16x32xf32>,
    } else {
    }
    %c0 = arith.constant 0 : index
    %c0_1 = arith.constant 0 : index
    %c0_2 = arith.constant 0 : index
    %3 = vector.load %arg30[%c0, %c0_1, %c0_2] : memref<4x17x32xf32, #tpu.memory_space<vmem>>, vector<4x17x32xf32>
    %c0_3 = arith.constant 0 : index
    %c0_4 = arith.constant 0 : index
    %c0_5 = arith.constant 0 : index
    %4 = vector.load %arg6[%c0_3, %c0_4, %c0_5] : memref<1x32x64xf32, #tpu.memory_space<vmem>>, vector<1x32x64xf32>
    %5 = vector.shape_cast %4 : vector<1x32x64xf32> to vector<32x64xf32>
    "tpu.trace_start"() <{level = 10 : i32, message = "bnd,dh->bnh"}> : () -> ()
    %cst = arith.constant dense<0.000000e+00> : vector<4x17x64xf32>
    %6 = tpu.matmul %3, %5, %cst {dimension_numbers = #tpu.dot_dimension_numbers<[2], [0], [0, 1], [1], [0, 0, 0, 1, 1, 1], [], []>} : vector<4x17x32xf32>, vector<32x64xf32>, vector<4x17x64xf32> -> vector<4x17x64xf32>
    "tpu.trace_stop"() : () -> ()
    %c0_6 = arith.constant 0 : index
    %c0_7 = arith.constant 0 : index
    %c0_8 = arith.constant 0 : index
    %7 = vector.load %arg7[%c0_6, %c0_7, %c0_8] : memref<1x1x64xf32, #tpu.memory_space<vmem>>, vector<1x1x64xf32>
    %8 = vector.shape_cast %7 : vector<1x1x64xf32> to vector<1x64xf32>
    %9 = vector.shape_cast %8 : vector<1x64xf32> to vector<1x1x64xf32>
    %10 = vector.broadcast %9 : vector<1x1x64xf32> to vector<4x17x64xf32>
    %11 = arith.addf %6, %10 : vector<4x17x64xf32>
    %cst_9 = arith.constant 0.000000e+00 : f32
    %12 = vector.broadcast %cst_9 : f32 to vector<4x17x64xf32>
    %13 = arith.maximumf %11, %12 : vector<4x17x64xf32>
    %c0_10 = arith.constant 0 : index
    %c0_11 = arith.constant 0 : index
    %c0_12 = arith.constant 0 : index
    %14 = vector.load %arg8[%c0_10, %c0_11, %c0_12] : memref<1x64x32xf32, #tpu.memory_space<vmem>>, vector<1x64x32xf32>
    %15 = vector.shape_cast %14 : vector<1x64x32xf32> to vector<64x32xf32>
    "tpu.trace_start"() <{level = 10 : i32, message = "bnh,hd->bnd"}> : () -> ()
    %cst_13 = arith.constant dense<0.000000e+00> : vector<4x17x32xf32>
    %16 = tpu.matmul %13, %15, %cst_13 {dimension_numbers = #tpu.dot_dimension_numbers<[2], [0], [0, 1], [1], [0, 0, 0, 1, 1, 1], [], []>} : vector<4x17x64xf32>, vector<64x32xf32>, vector<4x17x32xf32> -> vector<4x17x32xf32>
    "tpu.trace_stop"() : () -> ()
    %c0_14 = arith.constant 0 : index
    %c0_15 = arith.constant 0 : index
    %c0_16 = arith.constant 0 : index
    %17 = vector.load %arg9[%c0_14, %c0_15, %c0_16] : memref<1x1x32xf32, #tpu.memory_space<vmem>>, vector<1x1x32xf32>
    %18 = vector.shape_cast %17 : vector<1x1x32xf32> to vector<1x32xf32>
    %19 = vector.shape_cast %18 : vector<1x32xf32> to vector<1x1x32xf32>
    %20 = vector.broadcast %19 : vector<1x1x32xf32> to vector<4x17x32xf32>
    %21 = arith.addf %16, %20 : vector<4x17x32xf32>
    %22 = arith.addf %3, %21 : vector<4x17x32xf32>
    %c0_17 = arith.constant 0 : index
    %c0_18 = arith.constant 0 : index
    %c0_19 = arith.constant 0 : index
    %23 = vector.load %arg30[%c0_17, %c0_18, %c0_19] : memref<4x17x32xf32, #tpu.memory_space<vmem>>, vector<4x17x32xf32>
    tpu.vector_store %arg30[%c0_17, %c0_18, %c0_19], %22 {strides = array<i32>} : memref<4x17x32xf32, #tpu.memory_space<vmem>>, vector<4x17x32xf32>,
    %c6_i32 = arith.constant 6 : i32
    %24 = arith.cmpi eq, %arg0, %c6_i32 : i32
    %25 = arith.extui %24 : i1 to i32
    %c0_i32_20 = arith.constant 0 : i32
    %26 = arith.cmpi ne, %25, %c0_i32_20 : i32
    scf.if %26 {
      %39 = vector.extract_strided_slice %22 {offsets = [0, 1, 0], sizes = [2, 16, 32], strides = [1, 1, 1]} : vector<4x17x32xf32> to vector<2x16x32xf32>
      %40 = tpu.transpose %39, [0, 2, 1] : vector<2x16x32xf32> -> vector<2x32x16xf32>
      %c0_25 = arith.constant 0 : index
      %c0_26 = arith.constant 0 : index
      %c0_27 = arith.constant 0 : index
      %41 = vector.load %arg31[%c0_25, %c0_26, %c0_27] : memref<2x128x16xf32, #tpu.memory_space<vmem>>, vector<2x32x16xf32>
      tpu.vector_store %arg31[%c0_25, %c0_26, %c0_27], %40 {strides = array<i32>} : memref<2x128x16xf32, #tpu.memory_space<vmem>>, vector<2x32x16xf32>,
    } else {
    }
    %c7_i32 = arith.constant 7 : i32
    %27 = arith.cmpi eq, %arg0, %c7_i32 : i32
    %28 = arith.extui %27 : i1 to i32
    %c0_i32_21 = arith.constant 0 : i32
    %29 = arith.cmpi ne, %28, %c0_i32_21 : i32
    scf.if %29 {
      %39 = vector.extract_strided_slice %22 {offsets = [0, 1, 0], sizes = [2, 16, 32], strides = [1, 1, 1]} : vector<4x17x32xf32> to vector<2x16x32xf32>
      %40 = tpu.transpose %39, [0, 2, 1] : vector<2x16x32xf32> -> vector<2x32x16xf32>
      %c0_25 = arith.constant 0 : index
      %c32 = arith.constant 32 : index
      %c0_26 = arith.constant 0 : index
      %41 = vector.load %arg31[%c0_25, %c32, %c0_26] : memref<2x128x16xf32, #tpu.memory_space<vmem>>, vector<2x32x16xf32>
      tpu.vector_store %arg31[%c0_25, %c32, %c0_26], %40 {strides = array<i32>} : memref<2x128x16xf32, #tpu.memory_space<vmem>>, vector<2x32x16xf32>,
    } else {
    }
    %c8_i32 = arith.constant 8 : i32
    %30 = arith.cmpi eq, %arg0, %c8_i32 : i32
    %31 = arith.extui %30 : i1 to i32
    %c0_i32_22 = arith.constant 0 : i32
    %32 = arith.cmpi ne, %31, %c0_i32_22 : i32
    scf.if %32 {
      %39 = vector.extract_strided_slice %22 {offsets = [0, 1, 0], sizes = [2, 16, 32], strides = [1, 1, 1]} : vector<4x17x32xf32> to vector<2x16x32xf32>
      %40 = tpu.transpose %39, [0, 2, 1] : vector<2x16x32xf32> -> vector<2x32x16xf32>
      %c0_25 = arith.constant 0 : index
      %c64 = arith.constant 64 : index
      %c0_26 = arith.constant 0 : index
      %41 = vector.load %arg31[%c0_25, %c64, %c0_26] : memref<2x128x16xf32, #tpu.memory_space<vmem>>, vector<2x32x16xf32>
      tpu.vector_store %arg31[%c0_25, %c64, %c0_26], %40 {strides = array<i32>} : memref<2x128x16xf32, #tpu.memory_space<vmem>>, vector<2x32x16xf32>,
    } else {
    }
    %c9_i32 = arith.constant 9 : i32
    %33 = arith.cmpi eq, %arg0, %c9_i32 : i32
    %34 = arith.extui %33 : i1 to i32
    %c0_i32_23 = arith.constant 0 : i32
    %35 = arith.cmpi ne, %34, %c0_i32_23 : i32
    scf.if %35 {
      %39 = vector.extract_strided_slice %22 {offsets = [0, 1, 0], sizes = [2, 16, 32], strides = [1, 1, 1]} : vector<4x17x32xf32> to vector<2x16x32xf32>
      %40 = tpu.transpose %39, [0, 2, 1] : vector<2x16x32xf32> -> vector<2x32x16xf32>
      %c0_25 = arith.constant 0 : index
      %c96 = arith.constant 96 : index
      %c0_26 = arith.constant 0 : index
      %41 = vector.load %arg31[%c0_25, %c96, %c0_26] : memref<2x128x16xf32, #tpu.memory_space<vmem>>, vector<2x32x16xf32>
      tpu.vector_store %arg31[%c0_25, %c96, %c0_26], %40 {strides = array<i32>} : memref<2x128x16xf32, #tpu.memory_space<vmem>>, vector<2x32x16xf32>,
    } else {
    }
    %c11_i32 = arith.constant 11 : i32
    %36 = arith.cmpi eq, %arg0, %c11_i32 : i32
    %37 = arith.extui %36 : i1 to i32
    %c0_i32_24 = arith.constant 0 : i32
    %38 = arith.cmpi ne, %37, %c0_i32_24 : i32
    scf.if %38 {
      %39 = vector.extract_strided_slice %22 {offsets = [0, 0, 0], sizes = [4, 1, 32], strides = [1, 1, 1]} : vector<4x17x32xf32> to vector<4x1x32xf32>
      %40 = vector.shape_cast %39 : vector<4x1x32xf32> to vector<4x32xf32>
      %c0_25 = arith.constant 0 : index
      %c0_26 = arith.constant 0 : index
      %41 = vector.load %arg10[%c0_25, %c0_26] : memref<32x128xf32, #tpu.memory_space<vmem>>, vector<32x128xf32>
      %cst_27 = arith.constant dense<0.000000e+00> : vector<4x128xf32>
      %42 = tpu.matmul %40, %41, %cst_27 {dimension_numbers = #tpu.dot_dimension_numbers<[1], [0], [0], [1], [0, 0, 1, 1], [], []>} : vector<4x32xf32>, vector<32x128xf32>, vector<4x128xf32> -> vector<4x128xf32>
      %c0_28 = arith.constant 0 : index
      %c0_29 = arith.constant 0 : index
      %43 = vector.load %arg11[%c0_28, %c0_29] : memref<1x128xf32, #tpu.memory_space<vmem>>, vector<1x128xf32>
      %44 = vector.broadcast %43 : vector<1x128xf32> to vector<4x128xf32>
      %45 = arith.addf %42, %44 : vector<4x128xf32>
      %46 = arith.mulf %45, %45 : vector<4x128xf32>
      %cst_30 = arith.constant dense<0.000000e+00> : vector<4xf32>
      %47 = vector.multi_reduction <add>, %46, %cst_30 [1] : vector<4x128xf32> to vector<4xf32>
      %48 = vector.shape_cast %47 : vector<4xf32> to vector<4x1xf32>
      %49 = math.sqrt %48 : vector<4x1xf32>
      %cst_31 = arith.constant 9.99999996E-13 : f32
      %50 = vector.broadcast %cst_31 : f32 to vector<4x1xf32>
      %51 = arith.maximumf %49, %50 : vector<4x1xf32>
      %52 = vector.broadcast %51 : vector<4x1xf32> to vector<4x128xf32>
      %53 = arith.divf %45, %52 : vector<4x128xf32>
      %c0_32 = arith.constant 0 : index
      %c0_33 = arith.constant 0 : index
      %54 = vector.load %arg29[%c0_32, %c0_33] : memref<4x128xf32, #tpu.memory_space<vmem>>, vector<4x128xf32>
      tpu.vector_store %arg29[%c0_32, %c0_33], %53 {strides = array<i32>} : memref<4x128xf32, #tpu.memory_space<vmem>>, vector<4x128xf32>,
      %c0_34 = arith.constant 0 : index
      %c0_35 = arith.constant 0 : index
      %c0_36 = arith.constant 0 : index
      %55 = vector.load %arg31[%c0_34, %c0_35, %c0_36] : memref<2x128x16xf32, #tpu.memory_space<vmem>>, vector<2x128x16xf32>
      %c0_37 = arith.constant 0 : index
      %c0_38 = arith.constant 0 : index
      %c0_39 = arith.constant 0 : index
      %56 = vector.load %arg12[%c0_37, %c0_38, %c0_39] : memref<6x16x48xf32, #tpu.memory_space<vmem>>, vector<1x16x48xf32>
      %57 = vector.shape_cast %56 : vector<1x16x48xf32> to vector<16x48xf32>
      %c0_40 = arith.constant 0 : index
      %c0_41 = arith.constant 0 : index
      %c0_42 = arith.constant 0 : index
      %58 = vector.load %arg13[%c0_40, %c0_41, %c0_42] : memref<6x1x48xf32, #tpu.memory_space<vmem>>, vector<1x1x48xf32>
      %59 = vector.shape_cast %58 : vector<1x1x48xf32> to vector<1x48xf32>
      "tpu.trace_start"() <{level = 10 : i32, message = "bcn,nm->bcm"}> : () -> ()
      %cst_43 = arith.constant dense<0.000000e+00> : vector<2x128x48xf32>
      %60 = tpu.matmul %55, %57, %cst_43 {dimension_numbers = #tpu.dot_dimension_numbers<[2], [0], [0, 1], [1], [0, 0, 0, 1, 1, 1], [], []>} : vector<2x128x16xf32>, vector<16x48xf32>, vector<2x128x48xf32> -> vector<2x128x48xf32>
      "tpu.trace_stop"() : () -> ()
      %61 = vector.shape_cast %59 : vector<1x48xf32> to vector<1x1x48xf32>
      %62 = vector.broadcast %61 : vector<1x1x48xf32> to vector<2x128x48xf32>
      %63 = arith.addf %60, %62 : vector<2x128x48xf32>
      %64 = vector.extract_strided_slice %63 {offsets = [0, 0, 0], sizes = [2, 128, 16], strides = [1, 1, 1]} : vector<2x128x48xf32> to vector<2x128x16xf32>
      %65 = vector.extract_strided_slice %63 {offsets = [0, 0, 16], sizes = [2, 128, 16], strides = [1, 1, 1]} : vector<2x128x48xf32> to vector<2x128x16xf32>
      %66 = vector.extract_strided_slice %63 {offsets = [0, 0, 32], sizes = [2, 128, 16], strides = [1, 1, 1]} : vector<2x128x48xf32> to vector<2x128x16xf32>
      "tpu.trace_start"() <{level = 10 : i32, message = "bcn,bdn->bcd"}> : () -> ()
      %cst_44 = arith.constant dense<0.000000e+00> : vector<2x128x128xf32>
      %67 = tpu.matmul %64, %65, %cst_44 {dimension_numbers = #tpu.dot_dimension_numbers<[2], [2], [1], [1], [0, 0, 0, 1, 1, 1], [0], [0]>} : vector<2x128x16xf32>, vector<2x128x16xf32>, vector<2x128x128xf32> -> vector<2x128x128xf32>
      "tpu.trace_stop"() : () -> ()
      %cst_45 = arith.constant 2.500000e-01 : f32
      %68 = vector.broadcast %cst_45 : f32 to vector<2x128x128xf32>
      %69 = arith.mulf %67, %68 : vector<2x128x128xf32>
      %cst_46 = arith.constant dense<0xFF800000> : vector<2x128xf32>
      %70 = vector.multi_reduction <maximumf>, %69, %cst_46 [2] : vector<2x128x128xf32> to vector<2x128xf32>
      %71 = vector.shape_cast %70 : vector<2x128xf32> to vector<2x128x1xf32>
      %72 = vector.broadcast %71 : vector<2x128x1xf32> to vector<2x128x128xf32>
      %73 = arith.subf %69, %72 : vector<2x128x128xf32>
      %74 = math.exp %73 : vector<2x128x128xf32>
      %cst_47 = arith.constant dense<0.000000e+00> : vector<2x128xf32>
      %75 = vector.multi_reduction <add>, %74, %cst_47 [2] : vector<2x128x128xf32> to vector<2x128xf32>
      %76 = vector.shape_cast %75 : vector<2x128xf32> to vector<2x128x1xf32>
      %77 = tpu.reciprocal %76 {approx = true} : vector<2x128x1xf32> -> vector<2x128x1xf32>
      %78 = vector.broadcast %77 : vector<2x128x1xf32> to vector<2x128x128xf32>
      %79 = arith.mulf %74, %78 : vector<2x128x128xf32>
      "tpu.trace_start"() <{level = 10 : i32, message = "bcd,bdn->bcn"}> : () -> ()
      %cst_48 = arith.constant dense<0.000000e+00> : vector<2x128x16xf32>
      %80 = tpu.matmul %79, %66, %cst_48 {dimension_numbers = #tpu.dot_dimension_numbers<[2], [1], [1], [2], [0, 0, 0, 1, 1, 2], [0], [0]>} : vector<2x128x128xf32>, vector<2x128x16xf32>, vector<2x128x16xf32> -> vector<2x128x16xf32>
      "tpu.trace_stop"() : () -> ()
      %81 = tpu.iota {dimensions = array<i32: 0>} : vector<16x128xi32>
      %82 = tpu.iota {dimensions = array<i32: 1>} : vector<16x128xi32>
      %cst_49 = arith.constant 0.000000e+00 : f32
      %83 = vector.broadcast %cst_49 : f32 to vector<2x16x128xf32>
      %c8_i32_50 = arith.constant 8 : i32
      %84 = vector.broadcast %c8_i32_50 : i32 to vector<16x128xi32>
      %85 = arith.muli %81, %84 : vector<16x128xi32>
      %c0_i32_51 = arith.constant 0 : i32
      %86 = vector.broadcast %c0_i32_51 : i32 to vector<16x128xi32>
      %87 = arith.addi %85, %86 : vector<16x128xi32>
      %88 = arith.cmpi eq, %82, %87 : vector<16x128xi32>
      %89 = arith.extui %88 : vector<16x128xi1> to vector<16x128xi32>
      %90 = arith.sitofp %89 : vector<16x128xi32> to vector<16x128xf32>
      %91 = vector.extract_strided_slice %80 {offsets = [0, 0, 0], sizes = [2, 16, 16], strides = [1, 1, 1]} : vector<2x128x16xf32> to vector<2x16x16xf32>
      "tpu.trace_start"() <{level = 10 : i32, message = "bjn,nm->bjm"}> : () -> ()
      %cst_52 = arith.constant dense<0.000000e+00> : vector<2x16x128xf32>
      %92 = tpu.matmul %91, %90, %cst_52 {dimension_numbers = #tpu.dot_dimension_numbers<[2], [0], [0, 1], [1], [0, 0, 0, 1, 1, 1], [], []>} : vector<2x16x16xf32>, vector<16x128xf32>, vector<2x16x128xf32> -> vector<2x16x128xf32>
      "tpu.trace_stop"() : () -> ()
      %93 = arith.addf %83, %92 : vector<2x16x128xf32>
      %c8_i32_53 = arith.constant 8 : i32
      %94 = vector.broadcast %c8_i32_53 : i32 to vector<16x128xi32>
      %95 = arith.muli %81, %94 : vector<16x128xi32>
      %c1_i32 = arith.constant 1 : i32
      %96 = vector.broadcast %c1_i32 : i32 to vector<16x128xi32>
      %97 = arith.addi %95, %96 : vector<16x128xi32>
      %98 = arith.cmpi eq, %82, %97 : vector<16x128xi32>
      %99 = arith.extui %98 : vector<16x128xi1> to vector<16x128xi32>
      %100 = arith.sitofp %99 : vector<16x128xi32> to vector<16x128xf32>
      %101 = vector.extract_strided_slice %80 {offsets = [0, 16, 0], sizes = [2, 16, 16], strides = [1, 1, 1]} : vector<2x128x16xf32> to vector<2x16x16xf32>
      "tpu.trace_start"() <{level = 10 : i32, message = "bjn,nm->bjm"}> : () -> ()
      %cst_54 = arith.constant dense<0.000000e+00> : vector<2x16x128xf32>
      %102 = tpu.matmul %101, %100, %cst_54 {dimension_numbers = #tpu.dot_dimension_numbers<[2], [0], [0, 1], [1], [0, 0, 0, 1, 1, 1], [], []>} : vector<2x16x16xf32>, vector<16x128xf32>, vector<2x16x128xf32> -> vector<2x16x128xf32>
      "tpu.trace_stop"() : () -> ()
      %103 = arith.addf %93, %102 : vector<2x16x128xf32>
      %c8_i32_55 = arith.constant 8 : i32
      %104 = vector.broadcast %c8_i32_55 : i32 to vector<16x128xi32>
      %105 = arith.muli %81, %104 : vector<16x128xi32>
      %c2_i32 = arith.constant 2 : i32
      %106 = vector.broadcast %c2_i32 : i32 to vector<16x128xi32>
      %107 = arith.addi %105, %106 : vector<16x128xi32>
      %108 = arith.cmpi eq, %82, %107 : vector<16x128xi32>
      %109 = arith.extui %108 : vector<16x128xi1> to vector<16x128xi32>
      %110 = arith.sitofp %109 : vector<16x128xi32> to vector<16x128xf32>
      %111 = vector.extract_strided_slice %80 {offsets = [0, 32, 0], sizes = [2, 16, 16], strides = [1, 1, 1]} : vector<2x128x16xf32> to vector<2x16x16xf32>
      "tpu.trace_start"() <{level = 10 : i32, message = "bjn,nm->bjm"}> : () -> ()
      %cst_56 = arith.constant dense<0.000000e+00> : vector<2x16x128xf32>
      %112 = tpu.matmul %111, %110, %cst_56 {dimension_numbers = #tpu.dot_dimension_numbers<[2], [0], [0, 1], [1], [0, 0, 0, 1, 1, 1], [], []>} : vector<2x16x16xf32>, vector<16x128xf32>, vector<2x16x128xf32> -> vector<2x16x128xf32>
      "tpu.trace_stop"() : () -> ()
      %113 = arith.addf %103, %112 : vector<2x16x128xf32>
      %c8_i32_57 = arith.constant 8 : i32
      %114 = vector.broadcast %c8_i32_57 : i32 to vector<16x128xi32>
      %115 = arith.muli %81, %114 : vector<16x128xi32>
      %c3_i32 = arith.constant 3 : i32
      %116 = vector.broadcast %c3_i32 : i32 to vector<16x128xi32>
      %117 = arith.addi %115, %116 : vector<16x128xi32>
      %118 = arith.cmpi eq, %82, %117 : vector<16x128xi32>
      %119 = arith.extui %118 : vector<16x128xi1> to vector<16x128xi32>
      %120 = arith.sitofp %119 : vector<16x128xi32> to vector<16x128xf32>
      %121 = vector.extract_strided_slice %80 {offsets = [0, 48, 0], sizes = [2, 16, 16], strides = [1, 1, 1]} : vector<2x128x16xf32> to vector<2x16x16xf32>
      "tpu.trace_start"() <{level = 10 : i32, message = "bjn,nm->bjm"}> : () -> ()
      %cst_58 = arith.constant dense<0.000000e+00> : vector<2x16x128xf32>
      %122 = tpu.matmul %121, %120, %cst_58 {dimension_numbers = #tpu.dot_dimension_numbers<[2], [0], [0, 1], [1], [0, 0, 0, 1, 1, 1], [], []>} : vector<2x16x16xf32>, vector<16x128xf32>, vector<2x16x128xf32> -> vector<2x16x128xf32>
      "tpu.trace_stop"() : () -> ()
      %123 = arith.addf %113, %122 : vector<2x16x128xf32>
      %c8_i32_59 = arith.constant 8 : i32
      %124 = vector.broadcast %c8_i32_59 : i32 to vector<16x128xi32>
      %125 = arith.muli %81, %124 : vector<16x128xi32>
      %c4_i32 = arith.constant 4 : i32
      %126 = vector.broadcast %c4_i32 : i32 to vector<16x128xi32>
      %127 = arith.addi %125, %126 : vector<16x128xi32>
      %128 = arith.cmpi eq, %82, %127 : vector<16x128xi32>
      %129 = arith.extui %128 : vector<16x128xi1> to vector<16x128xi32>
      %130 = arith.sitofp %129 : vector<16x128xi32> to vector<16x128xf32>
      %131 = vector.extract_strided_slice %80 {offsets = [0, 64, 0], sizes = [2, 16, 16], strides = [1, 1, 1]} : vector<2x128x16xf32> to vector<2x16x16xf32>
      "tpu.trace_start"() <{level = 10 : i32, message = "bjn,nm->bjm"}> : () -> ()
      %cst_60 = arith.constant dense<0.000000e+00> : vector<2x16x128xf32>
      %132 = tpu.matmul %131, %130, %cst_60 {dimension_numbers = #tpu.dot_dimension_numbers<[2], [0], [0, 1], [1], [0, 0, 0, 1, 1, 1], [], []>} : vector<2x16x16xf32>, vector<16x128xf32>, vector<2x16x128xf32> -> vector<2x16x128xf32>
      "tpu.trace_stop"() : () -> ()
      %133 = arith.addf %123, %132 : vector<2x16x128xf32>
      %c8_i32_61 = arith.constant 8 : i32
      %134 = vector.broadcast %c8_i32_61 : i32 to vector<16x128xi32>
      %135 = arith.muli %81, %134 : vector<16x128xi32>
      %c5_i32 = arith.constant 5 : i32
      %136 = vector.broadcast %c5_i32 : i32 to vector<16x128xi32>
      %137 = arith.addi %135, %136 : vector<16x128xi32>
      %138 = arith.cmpi eq, %82, %137 : vector<16x128xi32>
      %139 = arith.extui %138 : vector<16x128xi1> to vector<16x128xi32>
      %140 = arith.sitofp %139 : vector<16x128xi32> to vector<16x128xf32>
      %141 = vector.extract_strided_slice %80 {offsets = [0, 80, 0], sizes = [2, 16, 16], strides = [1, 1, 1]} : vector<2x128x16xf32> to vector<2x16x16xf32>
      "tpu.trace_start"() <{level = 10 : i32, message = "bjn,nm->bjm"}> : () -> ()
      %cst_62 = arith.constant dense<0.000000e+00> : vector<2x16x128xf32>
      %142 = tpu.matmul %141, %140, %cst_62 {dimension_numbers = #tpu.dot_dimension_numbers<[2], [0], [0, 1], [1], [0, 0, 0, 1, 1, 1], [], []>} : vector<2x16x16xf32>, vector<16x128xf32>, vector<2x16x128xf32> -> vector<2x16x128xf32>
      "tpu.trace_stop"() : () -> ()
      %143 = arith.addf %133, %142 : vector<2x16x128xf32>
      %c8_i32_63 = arith.constant 8 : i32
      %144 = vector.broadcast %c8_i32_63 : i32 to vector<16x128xi32>
      %145 = arith.muli %81, %144 : vector<16x128xi32>
      %c6_i32_64 = arith.constant 6 : i32
      %146 = vector.broadcast %c6_i32_64 : i32 to vector<16x128xi32>
      %147 = arith.addi %145, %146 : vector<16x128xi32>
      %148 = arith.cmpi eq, %82, %147 : vector<16x128xi32>
      %149 = arith.extui %148 : vector<16x128xi1> to vector<16x128xi32>
      %150 = arith.sitofp %149 : vector<16x128xi32> to vector<16x128xf32>
      %151 = vector.extract_strided_slice %80 {offsets = [0, 96, 0], sizes = [2, 16, 16], strides = [1, 1, 1]} : vector<2x128x16xf32> to vector<2x16x16xf32>
      "tpu.trace_start"() <{level = 10 : i32, message = "bjn,nm->bjm"}> : () -> ()
      %cst_65 = arith.constant dense<0.000000e+00> : vector<2x16x128xf32>
      %152 = tpu.matmul %151, %150, %cst_65 {dimension_numbers = #tpu.dot_dimension_numbers<[2], [0], [0, 1], [1], [0, 0, 0, 1, 1, 1], [], []>} : vector<2x16x16xf32>, vector<16x128xf32>, vector<2x16x128xf32> -> vector<2x16x128xf32>
      "tpu.trace_stop"() : () -> ()
      %153 = arith.addf %143, %152 : vector<2x16x128xf32>
      %c8_i32_66 = arith.constant 8 : i32
      %154 = vector.broadcast %c8_i32_66 : i32 to vector<16x128xi32>
      %155 = arith.muli %81, %154 : vector<16x128xi32>
      %c7_i32_67 = arith.constant 7 : i32
      %156 = vector.broadcast %c7_i32_67 : i32 to vector<16x128xi32>
      %157 = arith.addi %155, %156 : vector<16x128xi32>
      %158 = arith.cmpi eq, %82, %157 : vector<16x128xi32>
      %159 = arith.extui %158 : vector<16x128xi1> to vector<16x128xi32>
      %160 = arith.sitofp %159 : vector<16x128xi32> to vector<16x128xf32>
      %161 = vector.extract_strided_slice %80 {offsets = [0, 112, 0], sizes = [2, 16, 16], strides = [1, 1, 1]} : vector<2x128x16xf32> to vector<2x16x16xf32>
      "tpu.trace_start"() <{level = 10 : i32, message = "bjn,nm->bjm"}> : () -> ()
      %cst_68 = arith.constant dense<0.000000e+00> : vector<2x16x128xf32>
      %162 = tpu.matmul %161, %160, %cst_68 {dimension_numbers = #tpu.dot_dimension_numbers<[2], [0], [0, 1], [1], [0, 0, 0, 1, 1, 1], [], []>} : vector<2x16x16xf32>, vector<16x128xf32>, vector<2x16x128xf32> -> vector<2x16x128xf32>
      "tpu.trace_stop"() : () -> ()
      %163 = arith.addf %153, %162 : vector<2x16x128xf32>
      %164 = tpu.transpose %163, [0, 2, 1] : vector<2x16x128xf32> -> vector<2x128x16xf32>
      %165 = arith.addf %164, %55 : vector<2x128x16xf32>
      %c1 = arith.constant 1 : index
      %c0_69 = arith.constant 0 : index
      %c0_70 = arith.constant 0 : index
      %166 = vector.load %arg12[%c1, %c0_69, %c0_70] : memref<6x16x48xf32, #tpu.memory_space<vmem>>, vector<1x16x48xf32>
      %167 = vector.shape_cast %166 : vector<1x16x48xf32> to vector<16x48xf32>
      %c1_71 = arith.constant 1 : index
      %c0_72 = arith.constant 0 : index
      %c0_73 = arith.constant 0 : index
      %168 = vector.load %arg13[%c1_71, %c0_72, %c0_73] : memref<6x1x48xf32, #tpu.memory_space<vmem>>, vector<1x1x48xf32>
      %169 = vector.shape_cast %168 : vector<1x1x48xf32> to vector<1x48xf32>
      "tpu.trace_start"() <{level = 10 : i32, message = "bcn,nm->bcm"}> : () -> ()
      %cst_74 = arith.constant dense<0.000000e+00> : vector<2x128x48xf32>
      %170 = tpu.matmul %165, %167, %cst_74 {dimension_numbers = #tpu.dot_dimension_numbers<[2], [0], [0, 1], [1], [0, 0, 0, 1, 1, 1], [], []>} : vector<2x128x16xf32>, vector<16x48xf32>, vector<2x128x48xf32> -> vector<2x128x48xf32>
      "tpu.trace_stop"() : () -> ()
      %171 = vector.shape_cast %169 : vector<1x48xf32> to vector<1x1x48xf32>
      %172 = vector.broadcast %171 : vector<1x1x48xf32> to vector<2x128x48xf32>
      %173 = arith.addf %170, %172 : vector<2x128x48xf32>
      %174 = vector.extract_strided_slice %173 {offsets = [0, 0, 0], sizes = [2, 128, 16], strides = [1, 1, 1]} : vector<2x128x48xf32> to vector<2x128x16xf32>
      %175 = vector.extract_strided_slice %173 {offsets = [0, 0, 16], sizes = [2, 128, 16], strides = [1, 1, 1]} : vector<2x128x48xf32> to vector<2x128x16xf32>
      %176 = vector.extract_strided_slice %173 {offsets = [0, 0, 32], sizes = [2, 128, 16], strides = [1, 1, 1]} : vector<2x128x48xf32> to vector<2x128x16xf32>
      "tpu.trace_start"() <{level = 10 : i32, message = "bcn,bdn->bcd"}> : () -> ()
      %cst_75 = arith.constant dense<0.000000e+00> : vector<2x128x128xf32>
      %177 = tpu.matmul %174, %175, %cst_75 {dimension_numbers = #tpu.dot_dimension_numbers<[2], [2], [1], [1], [0, 0, 0, 1, 1, 1], [0], [0]>} : vector<2x128x16xf32>, vector<2x128x16xf32>, vector<2x128x128xf32> -> vector<2x128x128xf32>
      "tpu.trace_stop"() : () -> ()
      %cst_76 = arith.constant 2.500000e-01 : f32
      %178 = vector.broadcast %cst_76 : f32 to vector<2x128x128xf32>
      %179 = arith.mulf %177, %178 : vector<2x128x128xf32>
      %cst_77 = arith.constant dense<0xFF800000> : vector<2x128xf32>
      %180 = vector.multi_reduction <maximumf>, %179, %cst_77 [2] : vector<2x128x128xf32> to vector<2x128xf32>
      %181 = vector.shape_cast %180 : vector<2x128xf32> to vector<2x128x1xf32>
      %182 = vector.broadcast %181 : vector<2x128x1xf32> to vector<2x128x128xf32>
      %183 = arith.subf %179, %182 : vector<2x128x128xf32>
      %184 = math.exp %183 : vector<2x128x128xf32>
      %cst_78 = arith.constant dense<0.000000e+00> : vector<2x128xf32>
      %185 = vector.multi_reduction <add>, %184, %cst_78 [2] : vector<2x128x128xf32> to vector<2x128xf32>
      %186 = vector.shape_cast %185 : vector<2x128xf32> to vector<2x128x1xf32>
      %187 = tpu.reciprocal %186 {approx = true} : vector<2x128x1xf32> -> vector<2x128x1xf32>
      %188 = vector.broadcast %187 : vector<2x128x1xf32> to vector<2x128x128xf32>
      %189 = arith.mulf %184, %188 : vector<2x128x128xf32>
      "tpu.trace_start"() <{level = 10 : i32, message = "bcd,bdn->bcn"}> : () -> ()
      %cst_79 = arith.constant dense<0.000000e+00> : vector<2x128x16xf32>
      %190 = tpu.matmul %189, %176, %cst_79 {dimension_numbers = #tpu.dot_dimension_numbers<[2], [1], [1], [2], [0, 0, 0, 1, 1, 2], [0], [0]>} : vector<2x128x128xf32>, vector<2x128x16xf32>, vector<2x128x16xf32> -> vector<2x128x16xf32>
      "tpu.trace_stop"() : () -> ()
      %191 = tpu.iota {dimensions = array<i32: 0>} : vector<16x128xi32>
      %192 = tpu.iota {dimensions = array<i32: 1>} : vector<16x128xi32>
      %cst_80 = arith.constant 0.000000e+00 : f32
      %193 = vector.broadcast %cst_80 : f32 to vector<2x16x128xf32>
      %c8_i32_81 = arith.constant 8 : i32
      %194 = vector.broadcast %c8_i32_81 : i32 to vector<16x128xi32>
      %195 = arith.muli %191, %194 : vector<16x128xi32>
      %c0_i32_82 = arith.constant 0 : i32
      %196 = vector.broadcast %c0_i32_82 : i32 to vector<16x128xi32>
      %197 = arith.addi %195, %196 : vector<16x128xi32>
      %198 = arith.cmpi eq, %192, %197 : vector<16x128xi32>
      %199 = arith.extui %198 : vector<16x128xi1> to vector<16x128xi32>
      %200 = arith.sitofp %199 : vector<16x128xi32> to vector<16x128xf32>
      %201 = vector.extract_strided_slice %190 {offsets = [0, 0, 0], sizes = [2, 16, 16], strides = [1, 1, 1]} : vector<2x128x16xf32> to vector<2x16x16xf32>
      "tpu.trace_start"() <{level = 10 : i32, message = "bjn,nm->bjm"}> : () -> ()
      %cst_83 = arith.constant dense<0.000000e+00> : vector<2x16x128xf32>
      %202 = tpu.matmul %201, %200, %cst_83 {dimension_numbers = #tpu.dot_dimension_numbers<[2], [0], [0, 1], [1], [0, 0, 0, 1, 1, 1], [], []>} : vector<2x16x16xf32>, vector<16x128xf32>, vector<2x16x128xf32> -> vector<2x16x128xf32>
      "tpu.trace_stop"() : () -> ()
      %203 = arith.addf %193, %202 : vector<2x16x128xf32>
      %c8_i32_84 = arith.constant 8 : i32
      %204 = vector.broadcast %c8_i32_84 : i32 to vector<16x128xi32>
      %205 = arith.muli %191, %204 : vector<16x128xi32>
      %c1_i32_85 = arith.constant 1 : i32
      %206 = vector.broadcast %c1_i32_85 : i32 to vector<16x128xi32>
      %207 = arith.addi %205, %206 : vector<16x128xi32>
      %208 = arith.cmpi eq, %192, %207 : vector<16x128xi32>
      %209 = arith.extui %208 : vector<16x128xi1> to vector<16x128xi32>
      %210 = arith.sitofp %209 : vector<16x128xi32> to vector<16x128xf32>
      %211 = vector.extract_strided_slice %190 {offsets = [0, 16, 0], sizes = [2, 16, 16], strides = [1, 1, 1]} : vector<2x128x16xf32> to vector<2x16x16xf32>
      "tpu.trace_start"() <{level = 10 : i32, message = "bjn,nm->bjm"}> : () -> ()
      %cst_86 = arith.constant dense<0.000000e+00> : vector<2x16x128xf32>
      %212 = tpu.matmul %211, %210, %cst_86 {dimension_numbers = #tpu.dot_dimension_numbers<[2], [0], [0, 1], [1], [0, 0, 0, 1, 1, 1], [], []>} : vector<2x16x16xf32>, vector<16x128xf32>, vector<2x16x128xf32> -> vector<2x16x128xf32>
      "tpu.trace_stop"() : () -> ()
      %213 = arith.addf %203, %212 : vector<2x16x128xf32>
      %c8_i32_87 = arith.constant 8 : i32
      %214 = vector.broadcast %c8_i32_87 : i32 to vector<16x128xi32>
      %215 = arith.muli %191, %214 : vector<16x128xi32>
      %c2_i32_88 = arith.constant 2 : i32
      %216 = vector.broadcast %c2_i32_88 : i32 to vector<16x128xi32>
      %217 = arith.addi %215, %216 : vector<16x128xi32>
      %218 = arith.cmpi eq, %192, %217 : vector<16x128xi32>
      %219 = arith.extui %218 : vector<16x128xi1> to vector<16x128xi32>
      %220 = arith.sitofp %219 : vector<16x128xi32> to vector<16x128xf32>
      %221 = vector.extract_strided_slice %190 {offsets = [0, 32, 0], sizes = [2, 16, 16], strides = [1, 1, 1]} : vector<2x128x16xf32> to vector<2x16x16xf32>
      "tpu.trace_start"() <{level = 10 : i32, message = "bjn,nm->bjm"}> : () -> ()
      %cst_89 = arith.constant dense<0.000000e+00> : vector<2x16x128xf32>
      %222 = tpu.matmul %221, %220, %cst_89 {dimension_numbers = #tpu.dot_dimension_numbers<[2], [0], [0, 1], [1], [0, 0, 0, 1, 1, 1], [], []>} : vector<2x16x16xf32>, vector<16x128xf32>, vector<2x16x128xf32> -> vector<2x16x128xf32>
      "tpu.trace_stop"() : () -> ()
      %223 = arith.addf %213, %222 : vector<2x16x128xf32>
      %c8_i32_90 = arith.constant 8 : i32
      %224 = vector.broadcast %c8_i32_90 : i32 to vector<16x128xi32>
      %225 = arith.muli %191, %224 : vector<16x128xi32>
      %c3_i32_91 = arith.constant 3 : i32
      %226 = vector.broadcast %c3_i32_91 : i32 to vector<16x128xi32>
      %227 = arith.addi %225, %226 : vector<16x128xi32>
      %228 = arith.cmpi eq, %192, %227 : vector<16x128xi32>
      %229 = arith.extui %228 : vector<16x128xi1> to vector<16x128xi32>
      %230 = arith.sitofp %229 : vector<16x128xi32> to vector<16x128xf32>
      %231 = vector.extract_strided_slice %190 {offsets = [0, 48, 0], sizes = [2, 16, 16], strides = [1, 1, 1]} : vector<2x128x16xf32> to vector<2x16x16xf32>
      "tpu.trace_start"() <{level = 10 : i32, message = "bjn,nm->bjm"}> : () -> ()
      %cst_92 = arith.constant dense<0.000000e+00> : vector<2x16x128xf32>
      %232 = tpu.matmul %231, %230, %cst_92 {dimension_numbers = #tpu.dot_dimension_numbers<[2], [0], [0, 1], [1], [0, 0, 0, 1, 1, 1], [], []>} : vector<2x16x16xf32>, vector<16x128xf32>, vector<2x16x128xf32> -> vector<2x16x128xf32>
      "tpu.trace_stop"() : () -> ()
      %233 = arith.addf %223, %232 : vector<2x16x128xf32>
      %c8_i32_93 = arith.constant 8 : i32
      %234 = vector.broadcast %c8_i32_93 : i32 to vector<16x128xi32>
      %235 = arith.muli %191, %234 : vector<16x128xi32>
      %c4_i32_94 = arith.constant 4 : i32
      %236 = vector.broadcast %c4_i32_94 : i32 to vector<16x128xi32>
      %237 = arith.addi %235, %236 : vector<16x128xi32>
      %238 = arith.cmpi eq, %192, %237 : vector<16x128xi32>
      %239 = arith.extui %238 : vector<16x128xi1> to vector<16x128xi32>
      %240 = arith.sitofp %239 : vector<16x128xi32> to vector<16x128xf32>
      %241 = vector.extract_strided_slice %190 {offsets = [0, 64, 0], sizes = [2, 16, 16], strides = [1, 1, 1]} : vector<2x128x16xf32> to vector<2x16x16xf32>
      "tpu.trace_start"() <{level = 10 : i32, message = "bjn,nm->bjm"}> : () -> ()
      %cst_95 = arith.constant dense<0.000000e+00> : vector<2x16x128xf32>
      %242 = tpu.matmul %241, %240, %cst_95 {dimension_numbers = #tpu.dot_dimension_numbers<[2], [0], [0, 1], [1], [0, 0, 0, 1, 1, 1], [], []>} : vector<2x16x16xf32>, vector<16x128xf32>, vector<2x16x128xf32> -> vector<2x16x128xf32>
      "tpu.trace_stop"() : () -> ()
      %243 = arith.addf %233, %242 : vector<2x16x128xf32>
      %c8_i32_96 = arith.constant 8 : i32
      %244 = vector.broadcast %c8_i32_96 : i32 to vector<16x128xi32>
      %245 = arith.muli %191, %244 : vector<16x128xi32>
      %c5_i32_97 = arith.constant 5 : i32
      %246 = vector.broadcast %c5_i32_97 : i32 to vector<16x128xi32>
      %247 = arith.addi %245, %246 : vector<16x128xi32>
      %248 = arith.cmpi eq, %192, %247 : vector<16x128xi32>
      %249 = arith.extui %248 : vector<16x128xi1> to vector<16x128xi32>
      %250 = arith.sitofp %249 : vector<16x128xi32> to vector<16x128xf32>
      %251 = vector.extract_strided_slice %190 {offsets = [0, 80, 0], sizes = [2, 16, 16], strides = [1, 1, 1]} : vector<2x128x16xf32> to vector<2x16x16xf32>
      "tpu.trace_start"() <{level = 10 : i32, message = "bjn,nm->bjm"}> : () -> ()
      %cst_98 = arith.constant dense<0.000000e+00> : vector<2x16x128xf32>
      %252 = tpu.matmul %251, %250, %cst_98 {dimension_numbers = #tpu.dot_dimension_numbers<[2], [0], [0, 1], [1], [0, 0, 0, 1, 1, 1], [], []>} : vector<2x16x16xf32>, vector<16x128xf32>, vector<2x16x128xf32> -> vector<2x16x128xf32>
      "tpu.trace_stop"() : () -> ()
      %253 = arith.addf %243, %252 : vector<2x16x128xf32>
      %c8_i32_99 = arith.constant 8 : i32
      %254 = vector.broadcast %c8_i32_99 : i32 to vector<16x128xi32>
      %255 = arith.muli %191, %254 : vector<16x128xi32>
      %c6_i32_100 = arith.constant 6 : i32
      %256 = vector.broadcast %c6_i32_100 : i32 to vector<16x128xi32>
      %257 = arith.addi %255, %256 : vector<16x128xi32>
      %258 = arith.cmpi eq, %192, %257 : vector<16x128xi32>
      %259 = arith.extui %258 : vector<16x128xi1> to vector<16x128xi32>
      %260 = arith.sitofp %259 : vector<16x128xi32> to vector<16x128xf32>
      %261 = vector.extract_strided_slice %190 {offsets = [0, 96, 0], sizes = [2, 16, 16], strides = [1, 1, 1]} : vector<2x128x16xf32> to vector<2x16x16xf32>
      "tpu.trace_start"() <{level = 10 : i32, message = "bjn,nm->bjm"}> : () -> ()
      %cst_101 = arith.constant dense<0.000000e+00> : vector<2x16x128xf32>
      %262 = tpu.matmul %261, %260, %cst_101 {dimension_numbers = #tpu.dot_dimension_numbers<[2], [0], [0, 1], [1], [0, 0, 0, 1, 1, 1], [], []>} : vector<2x16x16xf32>, vector<16x128xf32>, vector<2x16x128xf32> -> vector<2x16x128xf32>
      "tpu.trace_stop"() : () -> ()
      %263 = arith.addf %253, %262 : vector<2x16x128xf32>
      %c8_i32_102 = arith.constant 8 : i32
      %264 = vector.broadcast %c8_i32_102 : i32 to vector<16x128xi32>
      %265 = arith.muli %191, %264 : vector<16x128xi32>
      %c7_i32_103 = arith.constant 7 : i32
      %266 = vector.broadcast %c7_i32_103 : i32 to vector<16x128xi32>
      %267 = arith.addi %265, %266 : vector<16x128xi32>
      %268 = arith.cmpi eq, %192, %267 : vector<16x128xi32>
      %269 = arith.extui %268 : vector<16x128xi1> to vector<16x128xi32>
      %270 = arith.sitofp %269 : vector<16x128xi32> to vector<16x128xf32>
      %271 = vector.extract_strided_slice %190 {offsets = [0, 112, 0], sizes = [2, 16, 16], strides = [1, 1, 1]} : vector<2x128x16xf32> to vector<2x16x16xf32>
      "tpu.trace_start"() <{level = 10 : i32, message = "bjn,nm->bjm"}> : () -> ()
      %cst_104 = arith.constant dense<0.000000e+00> : vector<2x16x128xf32>
      %272 = tpu.matmul %271, %270, %cst_104 {dimension_numbers = #tpu.dot_dimension_numbers<[2], [0], [0, 1], [1], [0, 0, 0, 1, 1, 1], [], []>} : vector<2x16x16xf32>, vector<16x128xf32>, vector<2x16x128xf32> -> vector<2x16x128xf32>
      "tpu.trace_stop"() : () -> ()
      %273 = arith.addf %263, %272 : vector<2x16x128xf32>
      %274 = tpu.transpose %273, [0, 2, 1] : vector<2x16x128xf32> -> vector<2x128x16xf32>
      %275 = arith.addf %274, %165 : vector<2x128x16xf32>
      %c0_105 = arith.constant 0 : index
      %c0_106 = arith.constant 0 : index
      %276 = vector.load %arg14[%c0_105, %c0_106] : memref<128x32xf32, #tpu.memory_space<vmem>>, vector<128x32xf32>
      "tpu.trace_start"() <{level = 10 : i32, message = "bcn,co->bno"}> : () -> ()
      %cst_107 = arith.constant dense<0.000000e+00> : vector<2x16x32xf32>
      %277 = tpu.matmul %275, %276, %cst_107 {dimension_numbers = #tpu.dot_dimension_numbers<[1], [0], [0, 2], [1], [0, 0, 0, 2, 1, 1], [], []>} : vector<2x128x16xf32>, vector<128x32xf32>, vector<2x16x32xf32> -> vector<2x16x32xf32>
      "tpu.trace_stop"() : () -> ()
      %c0_108 = arith.constant 0 : index
      %c0_109 = arith.constant 0 : index
      %278 = vector.load %arg15[%c0_108, %c0_109] : memref<1x32xf32, #tpu.memory_space<vmem>>, vector<1x32xf32>
      %279 = vector.shape_cast %278 : vector<1x32xf32> to vector<1x1x32xf32>
      %280 = vector.broadcast %279 : vector<1x1x32xf32> to vector<2x16x32xf32>
      %281 = arith.addf %277, %280 : vector<2x16x32xf32>
      %282 = tpu.transpose %281, [0, 2, 1] : vector<2x16x32xf32> -> vector<2x32x16xf32>
      %c2 = arith.constant 2 : index
      %c0_110 = arith.constant 0 : index
      %c0_111 = arith.constant 0 : index
      %283 = vector.load %arg12[%c2, %c0_110, %c0_111] : memref<6x16x48xf32, #tpu.memory_space<vmem>>, vector<1x16x48xf32>
      %284 = vector.shape_cast %283 : vector<1x16x48xf32> to vector<16x48xf32>
      %c2_112 = arith.constant 2 : index
      %c0_113 = arith.constant 0 : index
      %c0_114 = arith.constant 0 : index
      %285 = vector.load %arg13[%c2_112, %c0_113, %c0_114] : memref<6x1x48xf32, #tpu.memory_space<vmem>>, vector<1x1x48xf32>
      %286 = vector.shape_cast %285 : vector<1x1x48xf32> to vector<1x48xf32>
      "tpu.trace_start"() <{level = 10 : i32, message = "bcn,nm->bcm"}> : () -> ()
      %cst_115 = arith.constant dense<0.000000e+00> : vector<2x32x48xf32>
      %287 = tpu.matmul %282, %284, %cst_115 {dimension_numbers = #tpu.dot_dimension_numbers<[2], [0], [0, 1], [1], [0, 0, 0, 1, 1, 1], [], []>} : vector<2x32x16xf32>, vector<16x48xf32>, vector<2x32x48xf32> -> vector<2x32x48xf32>
      "tpu.trace_stop"() : () -> ()
      %288 = vector.shape_cast %286 : vector<1x48xf32> to vector<1x1x48xf32>
      %289 = vector.broadcast %288 : vector<1x1x48xf32> to vector<2x32x48xf32>
      %290 = arith.addf %287, %289 : vector<2x32x48xf32>
      %291 = vector.extract_strided_slice %290 {offsets = [0, 0, 0], sizes = [2, 32, 16], strides = [1, 1, 1]} : vector<2x32x48xf32> to vector<2x32x16xf32>
      %292 = vector.extract_strided_slice %290 {offsets = [0, 0, 16], sizes = [2, 32, 16], strides = [1, 1, 1]} : vector<2x32x48xf32> to vector<2x32x16xf32>
      %293 = vector.extract_strided_slice %290 {offsets = [0, 0, 32], sizes = [2, 32, 16], strides = [1, 1, 1]} : vector<2x32x48xf32> to vector<2x32x16xf32>
      "tpu.trace_start"() <{level = 10 : i32, message = "bcn,bdn->bcd"}> : () -> ()
      %cst_116 = arith.constant dense<0.000000e+00> : vector<2x32x32xf32>
      %294 = tpu.matmul %291, %292, %cst_116 {dimension_numbers = #tpu.dot_dimension_numbers<[2], [2], [1], [1], [0, 0, 0, 1, 1, 1], [0], [0]>} : vector<2x32x16xf32>, vector<2x32x16xf32>, vector<2x32x32xf32> -> vector<2x32x32xf32>
      "tpu.trace_stop"() : () -> ()
      %cst_117 = arith.constant 2.500000e-01 : f32
      %295 = vector.broadcast %cst_117 : f32 to vector<2x32x32xf32>
      %296 = arith.mulf %294, %295 : vector<2x32x32xf32>
      %cst_118 = arith.constant dense<0xFF800000> : vector<2x32xf32>
      %297 = vector.multi_reduction <maximumf>, %296, %cst_118 [2] : vector<2x32x32xf32> to vector<2x32xf32>
      %298 = vector.shape_cast %297 : vector<2x32xf32> to vector<2x32x1xf32>
      %299 = vector.broadcast %298 : vector<2x32x1xf32> to vector<2x32x32xf32>
      %300 = arith.subf %296, %299 : vector<2x32x32xf32>
      %301 = math.exp %300 : vector<2x32x32xf32>
      %cst_119 = arith.constant dense<0.000000e+00> : vector<2x32xf32>
      %302 = vector.multi_reduction <add>, %301, %cst_119 [2] : vector<2x32x32xf32> to vector<2x32xf32>
      %303 = vector.shape_cast %302 : vector<2x32xf32> to vector<2x32x1xf32>
      %304 = tpu.reciprocal %303 {approx = true} : vector<2x32x1xf32> -> vector<2x32x1xf32>
      %305 = vector.broadcast %304 : vector<2x32x1xf32> to vector<2x32x32xf32>
      %306 = arith.mulf %301, %305 : vector<2x32x32xf32>
      "tpu.trace_start"() <{level = 10 : i32, message = "bcd,bdn->bcn"}> : () -> ()
      %cst_120 = arith.constant dense<0.000000e+00> : vector<2x32x16xf32>
      %307 = tpu.matmul %306, %293, %cst_120 {dimension_numbers = #tpu.dot_dimension_numbers<[2], [1], [1], [2], [0, 0, 0, 1, 1, 2], [0], [0]>} : vector<2x32x32xf32>, vector<2x32x16xf32>, vector<2x32x16xf32> -> vector<2x32x16xf32>
      "tpu.trace_stop"() : () -> ()
      %308 = tpu.iota {dimensions = array<i32: 0>} : vector<16x32xi32>
      %309 = tpu.iota {dimensions = array<i32: 1>} : vector<16x32xi32>
      %cst_121 = arith.constant 0.000000e+00 : f32
      %310 = vector.broadcast %cst_121 : f32 to vector<2x16x32xf32>
      %c2_i32_122 = arith.constant 2 : i32
      %311 = vector.broadcast %c2_i32_122 : i32 to vector<16x32xi32>
      %312 = arith.muli %308, %311 : vector<16x32xi32>
      %c0_i32_123 = arith.constant 0 : i32
      %313 = vector.broadcast %c0_i32_123 : i32 to vector<16x32xi32>
      %314 = arith.addi %312, %313 : vector<16x32xi32>
      %315 = arith.cmpi eq, %309, %314 : vector<16x32xi32>
      %316 = arith.extui %315 : vector<16x32xi1> to vector<16x32xi32>
      %317 = arith.sitofp %316 : vector<16x32xi32> to vector<16x32xf32>
      %318 = vector.extract_strided_slice %307 {offsets = [0, 0, 0], sizes = [2, 16, 16], strides = [1, 1, 1]} : vector<2x32x16xf32> to vector<2x16x16xf32>
      "tpu.trace_start"() <{level = 10 : i32, message = "bjn,nm->bjm"}> : () -> ()
      %cst_124 = arith.constant dense<0.000000e+00> : vector<2x16x32xf32>
      %319 = tpu.matmul %318, %317, %cst_124 {dimension_numbers = #tpu.dot_dimension_numbers<[2], [0], [0, 1], [1], [0, 0, 0, 1, 1, 1], [], []>} : vector<2x16x16xf32>, vector<16x32xf32>, vector<2x16x32xf32> -> vector<2x16x32xf32>
      "tpu.trace_stop"() : () -> ()
      %320 = arith.addf %310, %319 : vector<2x16x32xf32>
      %c2_i32_125 = arith.constant 2 : i32
      %321 = vector.broadcast %c2_i32_125 : i32 to vector<16x32xi32>
      %322 = arith.muli %308, %321 : vector<16x32xi32>
      %c1_i32_126 = arith.constant 1 : i32
      %323 = vector.broadcast %c1_i32_126 : i32 to vector<16x32xi32>
      %324 = arith.addi %322, %323 : vector<16x32xi32>
      %325 = arith.cmpi eq, %309, %324 : vector<16x32xi32>
      %326 = arith.extui %325 : vector<16x32xi1> to vector<16x32xi32>
      %327 = arith.sitofp %326 : vector<16x32xi32> to vector<16x32xf32>
      %328 = vector.extract_strided_slice %307 {offsets = [0, 16, 0], sizes = [2, 16, 16], strides = [1, 1, 1]} : vector<2x32x16xf32> to vector<2x16x16xf32>
      "tpu.trace_start"() <{level = 10 : i32, message = "bjn,nm->bjm"}> : () -> ()
      %cst_127 = arith.constant dense<0.000000e+00> : vector<2x16x32xf32>
      %329 = tpu.matmul %328, %327, %cst_127 {dimension_numbers = #tpu.dot_dimension_numbers<[2], [0], [0, 1], [1], [0, 0, 0, 1, 1, 1], [], []>} : vector<2x16x16xf32>, vector<16x32xf32>, vector<2x16x32xf32> -> vector<2x16x32xf32>
      "tpu.trace_stop"() : () -> ()
      %330 = arith.addf %320, %329 : vector<2x16x32xf32>
      %331 = tpu.transpose %330, [0, 2, 1] : vector<2x16x32xf32> -> vector<2x32x16xf32>
      %332 = arith.addf %331, %282 : vector<2x32x16xf32>
      %c3 = arith.constant 3 : index
      %c0_128 = arith.constant 0 : index
      %c0_129 = arith.constant 0 : index
      %333 = vector.load %arg12[%c3, %c0_128, %c0_129] : memref<6x16x48xf32, #tpu.memory_space<vmem>>, vector<1x16x48xf32>
      %334 = vector.shape_cast %333 : vector<1x16x48xf32> to vector<16x48xf32>
      %c3_130 = arith.constant 3 : index
      %c0_131 = arith.constant 0 : index
      %c0_132 = arith.constant 0 : index
      %335 = vector.load %arg13[%c3_130, %c0_131, %c0_132] : memref<6x1x48xf32, #tpu.memory_space<vmem>>, vector<1x1x48xf32>
      %336 = vector.shape_cast %335 : vector<1x1x48xf32> to vector<1x48xf32>
      "tpu.trace_start"() <{level = 10 : i32, message = "bcn,nm->bcm"}> : () -> ()
      %cst_133 = arith.constant dense<0.000000e+00> : vector<2x32x48xf32>
      %337 = tpu.matmul %332, %334, %cst_133 {dimension_numbers = #tpu.dot_dimension_numbers<[2], [0], [0, 1], [1], [0, 0, 0, 1, 1, 1], [], []>} : vector<2x32x16xf32>, vector<16x48xf32>, vector<2x32x48xf32> -> vector<2x32x48xf32>
      "tpu.trace_stop"() : () -> ()
      %338 = vector.shape_cast %336 : vector<1x48xf32> to vector<1x1x48xf32>
      %339 = vector.broadcast %338 : vector<1x1x48xf32> to vector<2x32x48xf32>
      %340 = arith.addf %337, %339 : vector<2x32x48xf32>
      %341 = vector.extract_strided_slice %340 {offsets = [0, 0, 0], sizes = [2, 32, 16], strides = [1, 1, 1]} : vector<2x32x48xf32> to vector<2x32x16xf32>
      %342 = vector.extract_strided_slice %340 {offsets = [0, 0, 16], sizes = [2, 32, 16], strides = [1, 1, 1]} : vector<2x32x48xf32> to vector<2x32x16xf32>
      %343 = vector.extract_strided_slice %340 {offsets = [0, 0, 32], sizes = [2, 32, 16], strides = [1, 1, 1]} : vector<2x32x48xf32> to vector<2x32x16xf32>
      "tpu.trace_start"() <{level = 10 : i32, message = "bcn,bdn->bcd"}> : () -> ()
      %cst_134 = arith.constant dense<0.000000e+00> : vector<2x32x32xf32>
      %344 = tpu.matmul %341, %342, %cst_134 {dimension_numbers = #tpu.dot_dimension_numbers<[2], [2], [1], [1], [0, 0, 0, 1, 1, 1], [0], [0]>} : vector<2x32x16xf32>, vector<2x32x16xf32>, vector<2x32x32xf32> -> vector<2x32x32xf32>
      "tpu.trace_stop"() : () -> ()
      %cst_135 = arith.constant 2.500000e-01 : f32
      %345 = vector.broadcast %cst_135 : f32 to vector<2x32x32xf32>
      %346 = arith.mulf %344, %345 : vector<2x32x32xf32>
      %cst_136 = arith.constant dense<0xFF800000> : vector<2x32xf32>
      %347 = vector.multi_reduction <maximumf>, %346, %cst_136 [2] : vector<2x32x32xf32> to vector<2x32xf32>
      %348 = vector.shape_cast %347 : vector<2x32xf32> to vector<2x32x1xf32>
      %349 = vector.broadcast %348 : vector<2x32x1xf32> to vector<2x32x32xf32>
      %350 = arith.subf %346, %349 : vector<2x32x32xf32>
      %351 = math.exp %350 : vector<2x32x32xf32>
      %cst_137 = arith.constant dense<0.000000e+00> : vector<2x32xf32>
      %352 = vector.multi_reduction <add>, %351, %cst_137 [2] : vector<2x32x32xf32> to vector<2x32xf32>
      %353 = vector.shape_cast %352 : vector<2x32xf32> to vector<2x32x1xf32>
      %354 = tpu.reciprocal %353 {approx = true} : vector<2x32x1xf32> -> vector<2x32x1xf32>
      %355 = vector.broadcast %354 : vector<2x32x1xf32> to vector<2x32x32xf32>
      %356 = arith.mulf %351, %355 : vector<2x32x32xf32>
      "tpu.trace_start"() <{level = 10 : i32, message = "bcd,bdn->bcn"}> : () -> ()
      %cst_138 = arith.constant dense<0.000000e+00> : vector<2x32x16xf32>
      %357 = tpu.matmul %356, %343, %cst_138 {dimension_numbers = #tpu.dot_dimension_numbers<[2], [1], [1], [2], [0, 0, 0, 1, 1, 2], [0], [0]>} : vector<2x32x32xf32>, vector<2x32x16xf32>, vector<2x32x16xf32> -> vector<2x32x16xf32>
      "tpu.trace_stop"() : () -> ()
      %358 = tpu.iota {dimensions = array<i32: 0>} : vector<16x32xi32>
      %359 = tpu.iota {dimensions = array<i32: 1>} : vector<16x32xi32>
      %cst_139 = arith.constant 0.000000e+00 : f32
      %360 = vector.broadcast %cst_139 : f32 to vector<2x16x32xf32>
      %c2_i32_140 = arith.constant 2 : i32
      %361 = vector.broadcast %c2_i32_140 : i32 to vector<16x32xi32>
      %362 = arith.muli %358, %361 : vector<16x32xi32>
      %c0_i32_141 = arith.constant 0 : i32
      %363 = vector.broadcast %c0_i32_141 : i32 to vector<16x32xi32>
      %364 = arith.addi %362, %363 : vector<16x32xi32>
      %365 = arith.cmpi eq, %359, %364 : vector<16x32xi32>
      %366 = arith.extui %365 : vector<16x32xi1> to vector<16x32xi32>
      %367 = arith.sitofp %366 : vector<16x32xi32> to vector<16x32xf32>
      %368 = vector.extract_strided_slice %357 {offsets = [0, 0, 0], sizes = [2, 16, 16], strides = [1, 1, 1]} : vector<2x32x16xf32> to vector<2x16x16xf32>
      "tpu.trace_start"() <{level = 10 : i32, message = "bjn,nm->bjm"}> : () -> ()
      %cst_142 = arith.constant dense<0.000000e+00> : vector<2x16x32xf32>
      %369 = tpu.matmul %368, %367, %cst_142 {dimension_numbers = #tpu.dot_dimension_numbers<[2], [0], [0, 1], [1], [0, 0, 0, 1, 1, 1], [], []>} : vector<2x16x16xf32>, vector<16x32xf32>, vector<2x16x32xf32> -> vector<2x16x32xf32>
      "tpu.trace_stop"() : () -> ()
      %370 = arith.addf %360, %369 : vector<2x16x32xf32>
      %c2_i32_143 = arith.constant 2 : i32
      %371 = vector.broadcast %c2_i32_143 : i32 to vector<16x32xi32>
      %372 = arith.muli %358, %371 : vector<16x32xi32>
      %c1_i32_144 = arith.constant 1 : i32
      %373 = vector.broadcast %c1_i32_144 : i32 to vector<16x32xi32>
      %374 = arith.addi %372, %373 : vector<16x32xi32>
      %375 = arith.cmpi eq, %359, %374 : vector<16x32xi32>
      %376 = arith.extui %375 : vector<16x32xi1> to vector<16x32xi32>
      %377 = arith.sitofp %376 : vector<16x32xi32> to vector<16x32xf32>
      %378 = vector.extract_strided_slice %357 {offsets = [0, 16, 0], sizes = [2, 16, 16], strides = [1, 1, 1]} : vector<2x32x16xf32> to vector<2x16x16xf32>
      "tpu.trace_start"() <{level = 10 : i32, message = "bjn,nm->bjm"}> : () -> ()
      %cst_145 = arith.constant dense<0.000000e+00> : vector<2x16x32xf32>
      %379 = tpu.matmul %378, %377, %cst_145 {dimension_numbers = #tpu.dot_dimension_numbers<[2], [0], [0, 1], [1], [0, 0, 0, 1, 1, 1], [], []>} : vector<2x16x16xf32>, vector<16x32xf32>, vector<2x16x32xf32> -> vector<2x16x32xf32>
      "tpu.trace_stop"() : () -> ()
      %380 = arith.addf %370, %379 : vector<2x16x32xf32>
      %381 = tpu.transpose %380, [0, 2, 1] : vector<2x16x32xf32> -> vector<2x32x16xf32>
      %382 = arith.addf %381, %332 : vector<2x32x16xf32>
      %c0_146 = arith.constant 0 : index
      %c0_147 = arith.constant 0 : index
      %383 = vector.load %arg16[%c0_146, %c0_147] : memref<32x16xf32, #tpu.memory_space<vmem>>, vector<32x16xf32>
      "tpu.trace_start"() <{level = 10 : i32, message = "bcn,co->bno"}> : () -> ()
      %cst_148 = arith.constant dense<0.000000e+00> : vector<2x16x16xf32>
      %384 = tpu.matmul %382, %383, %cst_148 {dimension_numbers = #tpu.dot_dimension_numbers<[1], [0], [0, 2], [1], [0, 0, 0, 2, 1, 1], [], []>} : vector<2x32x16xf32>, vector<32x16xf32>, vector<2x16x16xf32> -> vector<2x16x16xf32>
      "tpu.trace_stop"() : () -> ()
      %c0_149 = arith.constant 0 : index
      %c0_150 = arith.constant 0 : index
      %385 = vector.load %arg17[%c0_149, %c0_150] : memref<1x16xf32, #tpu.memory_space<vmem>>, vector<1x16xf32>
      %386 = vector.shape_cast %385 : vector<1x16xf32> to vector<1x1x16xf32>
      %387 = vector.broadcast %386 : vector<1x1x16xf32> to vector<2x16x16xf32>
      %388 = arith.addf %384, %387 : vector<2x16x16xf32>
      %389 = tpu.transpose %388, [0, 2, 1] : vector<2x16x16xf32> -> vector<2x16x16xf32>
      %c4 = arith.constant 4 : index
      %c0_151 = arith.constant 0 : index
      %c0_152 = arith.constant 0 : index
      %390 = vector.load %arg12[%c4, %c0_151, %c0_152] : memref<6x16x48xf32, #tpu.memory_space<vmem>>, vector<1x16x48xf32>
      %391 = vector.shape_cast %390 : vector<1x16x48xf32> to vector<16x48xf32>
      %c4_153 = arith.constant 4 : index
      %c0_154 = arith.constant 0 : index
      %c0_155 = arith.constant 0 : index
      %392 = vector.load %arg13[%c4_153, %c0_154, %c0_155] : memref<6x1x48xf32, #tpu.memory_space<vmem>>, vector<1x1x48xf32>
      %393 = vector.shape_cast %392 : vector<1x1x48xf32> to vector<1x48xf32>
      "tpu.trace_start"() <{level = 10 : i32, message = "bcn,nm->bcm"}> : () -> ()
      %cst_156 = arith.constant dense<0.000000e+00> : vector<2x16x48xf32>
      %394 = tpu.matmul %389, %391, %cst_156 {dimension_numbers = #tpu.dot_dimension_numbers<[2], [0], [0, 1], [1], [0, 0, 0, 1, 1, 1], [], []>} : vector<2x16x16xf32>, vector<16x48xf32>, vector<2x16x48xf32> -> vector<2x16x48xf32>
      "tpu.trace_stop"() : () -> ()
      %395 = vector.shape_cast %393 : vector<1x48xf32> to vector<1x1x48xf32>
      %396 = vector.broadcast %395 : vector<1x1x48xf32> to vector<2x16x48xf32>
      %397 = arith.addf %394, %396 : vector<2x16x48xf32>
      %398 = vector.extract_strided_slice %397 {offsets = [0, 0, 0], sizes = [2, 16, 16], strides = [1, 1, 1]} : vector<2x16x48xf32> to vector<2x16x16xf32>
      %399 = vector.extract_strided_slice %397 {offsets = [0, 0, 16], sizes = [2, 16, 16], strides = [1, 1, 1]} : vector<2x16x48xf32> to vector<2x16x16xf32>
      %400 = vector.extract_strided_slice %397 {offsets = [0, 0, 32], sizes = [2, 16, 16], strides = [1, 1, 1]} : vector<2x16x48xf32> to vector<2x16x16xf32>
      "tpu.trace_start"() <{level = 10 : i32, message = "bcn,bdn->bcd"}> : () -> ()
      %cst_157 = arith.constant dense<0.000000e+00> : vector<2x16x16xf32>
      %401 = tpu.matmul %398, %399, %cst_157 {dimension_numbers = #tpu.dot_dimension_numbers<[2], [2], [1], [1], [0, 0, 0, 1, 1, 1], [0], [0]>} : vector<2x16x16xf32>, vector<2x16x16xf32>, vector<2x16x16xf32> -> vector<2x16x16xf32>
      "tpu.trace_stop"() : () -> ()
      %cst_158 = arith.constant 2.500000e-01 : f32
      %402 = vector.broadcast %cst_158 : f32 to vector<2x16x16xf32>
      %403 = arith.mulf %401, %402 : vector<2x16x16xf32>
      %cst_159 = arith.constant dense<0xFF800000> : vector<2x16xf32>
      %404 = vector.multi_reduction <maximumf>, %403, %cst_159 [2] : vector<2x16x16xf32> to vector<2x16xf32>
      %405 = vector.shape_cast %404 : vector<2x16xf32> to vector<2x16x1xf32>
      %406 = vector.broadcast %405 : vector<2x16x1xf32> to vector<2x16x16xf32>
      %407 = arith.subf %403, %406 : vector<2x16x16xf32>
      %408 = math.exp %407 : vector<2x16x16xf32>
      %cst_160 = arith.constant dense<0.000000e+00> : vector<2x16xf32>
      %409 = vector.multi_reduction <add>, %408, %cst_160 [2] : vector<2x16x16xf32> to vector<2x16xf32>
      %410 = vector.shape_cast %409 : vector<2x16xf32> to vector<2x16x1xf32>
      %411 = tpu.reciprocal %410 {approx = true} : vector<2x16x1xf32> -> vector<2x16x1xf32>
      %412 = vector.broadcast %411 : vector<2x16x1xf32> to vector<2x16x16xf32>
      %413 = arith.mulf %408, %412 : vector<2x16x16xf32>
      "tpu.trace_start"() <{level = 10 : i32, message = "bcd,bdn->bcn"}> : () -> ()
      %cst_161 = arith.constant dense<0.000000e+00> : vector<2x16x16xf32>
      %414 = tpu.matmul %413, %400, %cst_161 {dimension_numbers = #tpu.dot_dimension_numbers<[2], [1], [1], [2], [0, 0, 0, 1, 1, 2], [0], [0]>} : vector<2x16x16xf32>, vector<2x16x16xf32>, vector<2x16x16xf32> -> vector<2x16x16xf32>
      "tpu.trace_stop"() : () -> ()
      %415 = tpu.transpose %414, [0, 2, 1] : vector<2x16x16xf32> -> vector<2x16x16xf32>
      %416 = arith.addf %415, %389 : vector<2x16x16xf32>
      %c5 = arith.constant 5 : index
      %c0_162 = arith.constant 0 : index
      %c0_163 = arith.constant 0 : index
      %417 = vector.load %arg12[%c5, %c0_162, %c0_163] : memref<6x16x48xf32, #tpu.memory_space<vmem>>, vector<1x16x48xf32>
      %418 = vector.shape_cast %417 : vector<1x16x48xf32> to vector<16x48xf32>
      %c5_164 = arith.constant 5 : index
      %c0_165 = arith.constant 0 : index
      %c0_166 = arith.constant 0 : index
      %419 = vector.load %arg13[%c5_164, %c0_165, %c0_166] : memref<6x1x48xf32, #tpu.memory_space<vmem>>, vector<1x1x48xf32>
      %420 = vector.shape_cast %419 : vector<1x1x48xf32> to vector<1x48xf32>
      "tpu.trace_start"() <{level = 10 : i32, message = "bcn,nm->bcm"}> : () -> ()
      %cst_167 = arith.constant dense<0.000000e+00> : vector<2x16x48xf32>
      %421 = tpu.matmul %416, %418, %cst_167 {dimension_numbers = #tpu.dot_dimension_numbers<[2], [0], [0, 1], [1], [0, 0, 0, 1, 1, 1], [], []>} : vector<2x16x16xf32>, vector<16x48xf32>, vector<2x16x48xf32> -> vector<2x16x48xf32>
      "tpu.trace_stop"() : () -> ()
      %422 = vector.shape_cast %420 : vector<1x48xf32> to vector<1x1x48xf32>
      %423 = vector.broadcast %422 : vector<1x1x48xf32> to vector<2x16x48xf32>
      %424 = arith.addf %421, %423 : vector<2x16x48xf32>
      %425 = vector.extract_strided_slice %424 {offsets = [0, 0, 0], sizes = [2, 16, 16], strides = [1, 1, 1]} : vector<2x16x48xf32> to vector<2x16x16xf32>
      %426 = vector.extract_strided_slice %424 {offsets = [0, 0, 16], sizes = [2, 16, 16], strides = [1, 1, 1]} : vector<2x16x48xf32> to vector<2x16x16xf32>
      %427 = vector.extract_strided_slice %424 {offsets = [0, 0, 32], sizes = [2, 16, 16], strides = [1, 1, 1]} : vector<2x16x48xf32> to vector<2x16x16xf32>
      "tpu.trace_start"() <{level = 10 : i32, message = "bcn,bdn->bcd"}> : () -> ()
      %cst_168 = arith.constant dense<0.000000e+00> : vector<2x16x16xf32>
      %428 = tpu.matmul %425, %426, %cst_168 {dimension_numbers = #tpu.dot_dimension_numbers<[2], [2], [1], [1], [0, 0, 0, 1, 1, 1], [0], [0]>} : vector<2x16x16xf32>, vector<2x16x16xf32>, vector<2x16x16xf32> -> vector<2x16x16xf32>
      "tpu.trace_stop"() : () -> ()
      %cst_169 = arith.constant 2.500000e-01 : f32
      %429 = vector.broadcast %cst_169 : f32 to vector<2x16x16xf32>
      %430 = arith.mulf %428, %429 : vector<2x16x16xf32>
      %cst_170 = arith.constant dense<0xFF800000> : vector<2x16xf32>
      %431 = vector.multi_reduction <maximumf>, %430, %cst_170 [2] : vector<2x16x16xf32> to vector<2x16xf32>
      %432 = vector.shape_cast %431 : vector<2x16xf32> to vector<2x16x1xf32>
      %433 = vector.broadcast %432 : vector<2x16x1xf32> to vector<2x16x16xf32>
      %434 = arith.subf %430, %433 : vector<2x16x16xf32>
      %435 = math.exp %434 : vector<2x16x16xf32>
      %cst_171 = arith.constant dense<0.000000e+00> : vector<2x16xf32>
      %436 = vector.multi_reduction <add>, %435, %cst_171 [2] : vector<2x16x16xf32> to vector<2x16xf32>
      %437 = vector.shape_cast %436 : vector<2x16xf32> to vector<2x16x1xf32>
      %438 = tpu.reciprocal %437 {approx = true} : vector<2x16x1xf32> -> vector<2x16x1xf32>
      %439 = vector.broadcast %438 : vector<2x16x1xf32> to vector<2x16x16xf32>
      %440 = arith.mulf %435, %439 : vector<2x16x16xf32>
      "tpu.trace_start"() <{level = 10 : i32, message = "bcd,bdn->bcn"}> : () -> ()
      %cst_172 = arith.constant dense<0.000000e+00> : vector<2x16x16xf32>
      %441 = tpu.matmul %440, %427, %cst_172 {dimension_numbers = #tpu.dot_dimension_numbers<[2], [1], [1], [2], [0, 0, 0, 1, 1, 2], [0], [0]>} : vector<2x16x16xf32>, vector<2x16x16xf32>, vector<2x16x16xf32> -> vector<2x16x16xf32>
      "tpu.trace_stop"() : () -> ()
      %442 = tpu.transpose %441, [0, 2, 1] : vector<2x16x16xf32> -> vector<2x16x16xf32>
      %443 = arith.addf %442, %416 : vector<2x16x16xf32>
      %c0_173 = arith.constant 0 : index
      %c0_174 = arith.constant 0 : index
      %444 = vector.load %arg18[%c0_173, %c0_174] : memref<16x16xf32, #tpu.memory_space<vmem>>, vector<16x16xf32>
      "tpu.trace_start"() <{level = 10 : i32, message = "bcn,co->bno"}> : () -> ()
      %cst_175 = arith.constant dense<0.000000e+00> : vector<2x16x16xf32>
      %445 = tpu.matmul %443, %444, %cst_175 {dimension_numbers = #tpu.dot_dimension_numbers<[1], [0], [0, 2], [1], [0, 0, 0, 2, 1, 1], [], []>} : vector<2x16x16xf32>, vector<16x16xf32>, vector<2x16x16xf32> -> vector<2x16x16xf32>
      "tpu.trace_stop"() : () -> ()
      %c0_176 = arith.constant 0 : index
      %c0_177 = arith.constant 0 : index
      %446 = vector.load %arg19[%c0_176, %c0_177] : memref<1x16xf32, #tpu.memory_space<vmem>>, vector<1x16xf32>
      %447 = vector.shape_cast %446 : vector<1x16xf32> to vector<1x1x16xf32>
      %448 = vector.broadcast %447 : vector<1x1x16xf32> to vector<2x16x16xf32>
      %449 = arith.addf %445, %448 : vector<2x16x16xf32>
      %450 = tpu.transpose %449, [0, 2, 1] : vector<2x16x16xf32> -> vector<2x16x16xf32>
      %451 = tpu.transpose %450, [0, 2, 1] : vector<2x16x16xf32> -> vector<2x16x16xf32>
      %c0_178 = arith.constant 0 : index
      %c0_179 = arith.constant 0 : index
      %452 = vector.load %arg20[%c0_178, %c0_179] : memref<16x16xf32, #tpu.memory_space<vmem>>, vector<16x16xf32>
      "tpu.trace_start"() <{level = 10 : i32, message = "bnd,dh->bnh"}> : () -> ()
      %cst_180 = arith.constant dense<0.000000e+00> : vector<2x16x16xf32>
      %453 = tpu.matmul %451, %452, %cst_180 {dimension_numbers = #tpu.dot_dimension_numbers<[2], [0], [0, 1], [1], [0, 0, 0, 1, 1, 1], [], []>} : vector<2x16x16xf32>, vector<16x16xf32>, vector<2x16x16xf32> -> vector<2x16x16xf32>
      "tpu.trace_stop"() : () -> ()
      %c0_181 = arith.constant 0 : index
      %c0_182 = arith.constant 0 : index
      %454 = vector.load %arg21[%c0_181, %c0_182] : memref<1x16xf32, #tpu.memory_space<vmem>>, vector<1x16xf32>
      %455 = vector.shape_cast %454 : vector<1x16xf32> to vector<1x1x16xf32>
      %456 = vector.broadcast %455 : vector<1x1x16xf32> to vector<2x16x16xf32>
      %457 = arith.addf %453, %456 : vector<2x16x16xf32>
      %cst_183 = arith.constant 0.000000e+00 : f32
      %458 = vector.broadcast %cst_183 : f32 to vector<2x16x16xf32>
      %459 = arith.maximumf %457, %458 : vector<2x16x16xf32>
      %c0_184 = arith.constant 0 : index
      %c0_185 = arith.constant 0 : index
      %460 = vector.load %arg22[%c0_184, %c0_185] : memref<16x1xf32, #tpu.memory_space<vmem>>, vector<16x1xf32>
      "tpu.trace_start"() <{level = 10 : i32, message = "bnh,ho->bno"}> : () -> ()
      %cst_186 = arith.constant dense<0.000000e+00> : vector<2x16x1xf32>
      %461 = tpu.matmul %459, %460, %cst_186 {dimension_numbers = #tpu.dot_dimension_numbers<[2], [0], [0, 1], [1], [0, 0, 0, 1, 1, 1], [], []>} : vector<2x16x16xf32>, vector<16x1xf32>, vector<2x16x1xf32> -> vector<2x16x1xf32>
      "tpu.trace_stop"() : () -> ()
      %c0_187 = arith.constant 0 : index
      %c0_188 = arith.constant 0 : index
      %462 = vector.load %arg23[%c0_187, %c0_188] : memref<1x1xf32, #tpu.memory_space<vmem>>, vector<1x1xf32>
      %463 = vector.shape_cast %462 : vector<1x1xf32> to vector<1x1x1xf32>
      %464 = vector.broadcast %463 : vector<1x1x1xf32> to vector<2x16x1xf32>
      %465 = arith.addf %461, %464 : vector<2x16x1xf32>
      %cst_189 = arith.constant 0.000000e+00 : f32
      %466 = vector.broadcast %cst_189 : f32 to vector<2x16x1xf32>
      %467 = arith.maximumf %465, %466 : vector<2x16x1xf32>
      %c0_190 = arith.constant 0 : index
      %c0_191 = arith.constant 0 : index
      %468 = vector.load %arg24[%c0_190, %c0_191] : memref<16x16xf32, #tpu.memory_space<vmem>>, vector<16x16xf32>
      "tpu.trace_start"() <{level = 10 : i32, message = "bnd,dh->bnh"}> : () -> ()
      %cst_192 = arith.constant dense<0.000000e+00> : vector<2x16x16xf32>
      %469 = tpu.matmul %451, %468, %cst_192 {dimension_numbers = #tpu.dot_dimension_numbers<[2], [0], [0, 1], [1], [0, 0, 0, 1, 1, 1], [], []>} : vector<2x16x16xf32>, vector<16x16xf32>, vector<2x16x16xf32> -> vector<2x16x16xf32>
      "tpu.trace_stop"() : () -> ()
      %c0_193 = arith.constant 0 : index
      %c0_194 = arith.constant 0 : index
      %470 = vector.load %arg25[%c0_193, %c0_194] : memref<1x16xf32, #tpu.memory_space<vmem>>, vector<1x16xf32>
      %471 = vector.shape_cast %470 : vector<1x16xf32> to vector<1x1x16xf32>
      %472 = vector.broadcast %471 : vector<1x1x16xf32> to vector<2x16x16xf32>
      %473 = arith.addf %469, %472 : vector<2x16x16xf32>
      %cst_195 = arith.constant 0.000000e+00 : f32
      %474 = vector.broadcast %cst_195 : f32 to vector<2x16x16xf32>
      %475 = arith.maximumf %473, %474 : vector<2x16x16xf32>
      %c0_196 = arith.constant 0 : index
      %c0_197 = arith.constant 0 : index
      %476 = vector.load %arg26[%c0_196, %c0_197] : memref<16x1xf32, #tpu.memory_space<vmem>>, vector<16x1xf32>
      "tpu.trace_start"() <{level = 10 : i32, message = "bnh,ho->bno"}> : () -> ()
      %cst_198 = arith.constant dense<0.000000e+00> : vector<2x16x1xf32>
      %477 = tpu.matmul %475, %476, %cst_198 {dimension_numbers = #tpu.dot_dimension_numbers<[2], [0], [0, 1], [1], [0, 0, 0, 1, 1, 1], [], []>} : vector<2x16x16xf32>, vector<16x1xf32>, vector<2x16x1xf32> -> vector<2x16x1xf32>
      "tpu.trace_stop"() : () -> ()
      %c0_199 = arith.constant 0 : index
      %c0_200 = arith.constant 0 : index
      %478 = vector.load %arg27[%c0_199, %c0_200] : memref<1x1xf32, #tpu.memory_space<vmem>>, vector<1x1xf32>
      %479 = vector.shape_cast %478 : vector<1x1xf32> to vector<1x1x1xf32>
      %480 = vector.broadcast %479 : vector<1x1x1xf32> to vector<2x16x1xf32>
      %481 = arith.addf %477, %480 : vector<2x16x1xf32>
      %482 = arith.negf %481 : vector<2x16x1xf32>
      %483 = math.exp %482 : vector<2x16x1xf32>
      %cst_201 = arith.constant 1.000000e+00 : f32
      %484 = vector.broadcast %cst_201 : f32 to vector<2x16x1xf32>
      %485 = arith.addf %484, %483 : vector<2x16x1xf32>
      %486 = arith.divf %484, %485 : vector<2x16x1xf32>
      %487 = arith.mulf %467, %486 : vector<2x16x1xf32>
      %488 = vector.shape_cast %487 : vector<2x16x1xf32> to vector<2x16xf32>
      %489 = vector.shape_cast %486 : vector<2x16x1xf32> to vector<2x16xf32>
      %cst_202 = arith.constant dense<0.000000e+00> : vector<2xf32>
      %490 = vector.multi_reduction <add>, %488, %cst_202 [1] : vector<2x16xf32> to vector<2xf32>
      %491 = vector.shape_cast %490 : vector<2xf32> to vector<2x1xf32>
      %cst_203 = arith.constant dense<0.000000e+00> : vector<2xf32>
      %492 = vector.multi_reduction <add>, %489, %cst_203 [1] : vector<2x16xf32> to vector<2xf32>
      %493 = vector.shape_cast %492 : vector<2xf32> to vector<2x1xf32>
      %494 = arith.divf %491, %493 : vector<2x1xf32>
      %c0_204 = arith.constant 0 : index
      %c0_205 = arith.constant 0 : index
      %495 = vector.load %arg28[%c0_204, %c0_205] : memref<2x1xf32, #tpu.memory_space<vmem>>, vector<2x1xf32>
      tpu.vector_store %arg28[%c0_204, %c0_205], %494 {strides = array<i32>} : memref<2x1xf32, #tpu.memory_space<vmem>>, vector<2x1xf32>,
    } else {
    }
    return
  }
  func.func @transform_0(%arg0: i32) -> (i32, i32, i32) {
    %c0_i32 = arith.constant 0 : i32
    %c0_i32_0 = arith.constant 0 : i32
    %c0_i32_1 = arith.constant 0 : i32
    %c0_i32_2 = arith.constant 0 : i32
    return %c0_i32, %c0_i32_0, %c0_i32_1 : i32, i32, i32
  }
  func.func @transform_1(%arg0: i32) -> (i32, i32) {
    %c0_i32 = arith.constant 0 : i32
    %c0_i32_0 = arith.constant 0 : i32
    %c0_i32_1 = arith.constant 0 : i32
    return %c0_i32, %c0_i32_0 : i32, i32
  }
  func.func @transform_2(%arg0: i32) -> (i32, i32) {
    %c0_i32 = arith.constant 0 : i32
    %c0_i32_0 = arith.constant 0 : i32
    %c0_i32_1 = arith.constant 0 : i32
    return %c0_i32, %c0_i32_0 : i32, i32
  }
  func.func @transform_3(%arg0: i32) -> (i32, i32) {
    %c0_i32 = arith.constant 0 : i32
    %c0_i32_0 = arith.constant 0 : i32
    %c0_i32_1 = arith.constant 0 : i32
    return %c0_i32, %c0_i32_0 : i32, i32
  }
  func.func @transform_4(%arg0: i32) -> (i32, i32) {
    %c0_i32 = arith.constant 0 : i32
    %c0_i32_0 = arith.constant 0 : i32
    %c0_i32_1 = arith.constant 0 : i32
    return %c0_i32, %c0_i32_0 : i32, i32
  }
  func.func @transform_5(%arg0: i32) -> (i32, i32, i32) {
    %c0_i32 = arith.constant 0 : i32
    %c0_i32_0 = arith.constant 0 : i32
    %c0_i32_1 = arith.constant 0 : i32
    return %arg0, %c0_i32, %c0_i32_0 : i32, i32, i32
  }
  func.func @transform_6(%arg0: i32) -> (i32, i32, i32) {
    %c0_i32 = arith.constant 0 : i32
    %c0_i32_0 = arith.constant 0 : i32
    %c0_i32_1 = arith.constant 0 : i32
    return %arg0, %c0_i32, %c0_i32_0 : i32, i32, i32
  }
  func.func @transform_7(%arg0: i32) -> (i32, i32, i32) {
    %c0_i32 = arith.constant 0 : i32
    %c0_i32_0 = arith.constant 0 : i32
    %c0_i32_1 = arith.constant 0 : i32
    return %arg0, %c0_i32, %c0_i32_0 : i32, i32, i32
  }
  func.func @transform_8(%arg0: i32) -> (i32, i32, i32) {
    %c0_i32 = arith.constant 0 : i32
    %c0_i32_0 = arith.constant 0 : i32
    %c0_i32_1 = arith.constant 0 : i32
    return %arg0, %c0_i32, %c0_i32_0 : i32, i32, i32
  }
  func.func @transform_9(%arg0: i32) -> (i32, i32) {
    %c0_i32 = arith.constant 0 : i32
    %c0_i32_0 = arith.constant 0 : i32
    %c0_i32_1 = arith.constant 0 : i32
    return %c0_i32, %c0_i32_0 : i32, i32
  }
  func.func @transform_10(%arg0: i32) -> (i32, i32) {
    %c0_i32 = arith.constant 0 : i32
    %c0_i32_0 = arith.constant 0 : i32
    %c0_i32_1 = arith.constant 0 : i32
    return %c0_i32, %c0_i32_0 : i32, i32
  }
  func.func @transform_11(%arg0: i32) -> (i32, i32, i32) {
    %c0_i32 = arith.constant 0 : i32
    %c0_i32_0 = arith.constant 0 : i32
    %c0_i32_1 = arith.constant 0 : i32
    %c0_i32_2 = arith.constant 0 : i32
    return %c0_i32, %c0_i32_0, %c0_i32_1 : i32, i32, i32
  }
  func.func @transform_12(%arg0: i32) -> (i32, i32, i32) {
    %c0_i32 = arith.constant 0 : i32
    %c0_i32_0 = arith.constant 0 : i32
    %c0_i32_1 = arith.constant 0 : i32
    %c0_i32_2 = arith.constant 0 : i32
    return %c0_i32, %c0_i32_0, %c0_i32_1 : i32, i32, i32
  }
  func.func @transform_13(%arg0: i32) -> (i32, i32) {
    %c0_i32 = arith.constant 0 : i32
    %c0_i32_0 = arith.constant 0 : i32
    %c0_i32_1 = arith.constant 0 : i32
    return %c0_i32, %c0_i32_0 : i32, i32
  }
  func.func @transform_14(%arg0: i32) -> (i32, i32) {
    %c0_i32 = arith.constant 0 : i32
    %c0_i32_0 = arith.constant 0 : i32
    %c0_i32_1 = arith.constant 0 : i32
    return %c0_i32, %c0_i32_0 : i32, i32
  }
  func.func @transform_15(%arg0: i32) -> (i32, i32) {
    %c0_i32 = arith.constant 0 : i32
    %c0_i32_0 = arith.constant 0 : i32
    %c0_i32_1 = arith.constant 0 : i32
    return %c0_i32, %c0_i32_0 : i32, i32
  }
  func.func @transform_16(%arg0: i32) -> (i32, i32) {
    %c0_i32 = arith.constant 0 : i32
    %c0_i32_0 = arith.constant 0 : i32
    %c0_i32_1 = arith.constant 0 : i32
    return %c0_i32, %c0_i32_0 : i32, i32
  }
  func.func @transform_17(%arg0: i32) -> (i32, i32) {
    %c0_i32 = arith.constant 0 : i32
    %c0_i32_0 = arith.constant 0 : i32
    %c0_i32_1 = arith.constant 0 : i32
    return %c0_i32, %c0_i32_0 : i32, i32
  }
  func.func @transform_18(%arg0: i32) -> (i32, i32) {
    %c0_i32 = arith.constant 0 : i32
    %c0_i32_0 = arith.constant 0 : i32
    %c0_i32_1 = arith.constant 0 : i32
    return %c0_i32, %c0_i32_0 : i32, i32
  }
  func.func @transform_19(%arg0: i32) -> (i32, i32) {
    %c0_i32 = arith.constant 0 : i32
    %c0_i32_0 = arith.constant 0 : i32
    %c0_i32_1 = arith.constant 0 : i32
    return %c0_i32, %c0_i32_0 : i32, i32
  }
  func.func @transform_20(%arg0: i32) -> (i32, i32) {
    %c0_i32 = arith.constant 0 : i32
    %c0_i32_0 = arith.constant 0 : i32
    %c0_i32_1 = arith.constant 0 : i32
    return %c0_i32, %c0_i32_0 : i32, i32
  }
  func.func @transform_21(%arg0: i32) -> (i32, i32) {
    %c0_i32 = arith.constant 0 : i32
    %c0_i32_0 = arith.constant 0 : i32
    %c0_i32_1 = arith.constant 0 : i32
    return %c0_i32, %c0_i32_0 : i32, i32
  }
  func.func @transform_22(%arg0: i32) -> (i32, i32) {
    %c0_i32 = arith.constant 0 : i32
    %c0_i32_0 = arith.constant 0 : i32
    %c0_i32_1 = arith.constant 0 : i32
    return %c0_i32, %c0_i32_0 : i32, i32
  }
  func.func @transform_23(%arg0: i32) -> (i32, i32) {
    %c0_i32 = arith.constant 0 : i32
    %c0_i32_0 = arith.constant 0 : i32
    %c0_i32_1 = arith.constant 0 : i32
    return %c0_i32, %c0_i32_0 : i32, i32
  }
  func.func @transform_24(%arg0: i32) -> (i32, i32) {
    %c0_i32 = arith.constant 0 : i32
    %c0_i32_0 = arith.constant 0 : i32
    %c0_i32_1 = arith.constant 0 : i32
    return %c0_i32, %c0_i32_0 : i32, i32
  }
  func.func @transform_25(%arg0: i32) -> (i32, i32) {
    %c0_i32 = arith.constant 0 : i32
    %c0_i32_0 = arith.constant 0 : i32
    %c0_i32_1 = arith.constant 0 : i32
    return %c0_i32, %c0_i32_0 : i32, i32
  }
  func.func @transform_26(%arg0: i32) -> (i32, i32) {
    %c0_i32 = arith.constant 0 : i32
    %c0_i32_0 = arith.constant 0 : i32
    %c0_i32_1 = arith.constant 0 : i32
    return %c0_i32, %c0_i32_0 : i32, i32
  }
  func.func @transform_27(%arg0: i32) -> (i32, i32) {
    %c0_i32 = arith.constant 0 : i32
    %c0_i32_0 = arith.constant 0 : i32
    %c0_i32_1 = arith.constant 0 : i32
    return %c0_i32, %c0_i32_0 : i32, i32
  }
  func.func @transform_28(%arg0: i32) -> (i32, i32) {
    %c0_i32 = arith.constant 0 : i32
    %c0_i32_0 = arith.constant 0 : i32
    %c0_i32_1 = arith.constant 0 : i32
    return %c0_i32, %c0_i32_0 : i32, i32
  }
}

</mosaic_0001>

<bundles_post_ra>
// kernel: maniqa_forward.1
= control target key start
LH: loop header
LB: loop body
LE: loop exit
PB: predicated region body
PF: predicated region fallthrough
CT: control target
= control target key end

     0   :  { %s12994_s0 = inlined_call_operand.vmem [shape: f32[4,16,192], index: 0, kind: input, shape index: {}]   ;;  %s12995_s1 = inlined_call_operand.vmem [shape: f32[192,32], index: 1, kind: input, shape index: {}]   ;;  %s12996_s2 = inlined_call_operand.vmem [shape: f32[1,32], index: 2, kind: input, shape index: {}]   ;;  %s12997_s3 = inlined_call_operand.vmem [shape: f32[1,32], index: 3, kind: input, shape index: {}]   ;;  %s12998_s4 = inlined_call_operand.vmem [shape: f32[17,32], index: 4, kind: input, shape index: {}]   ;;  %s12999_s5 = inlined_call_operand.vmem [shape: f32[12,32,64], index: 5, kind: input, shape index: {}]   ;;  %s13000_s6 = inlined_call_operand.vmem [shape: f32[12,1,64], index: 6, kind: input, shape index: {}]   ;;  %s13001_s7 = inlined_call_operand.vmem [shape: f32[12,64,32], index: 7, kind: input, shape index: {}]   ;;  %s13002_s8 = inlined_call_operand.vmem [shape: f32[12,1,32], index: 8, kind: input, shape index: {}]   ;;  %s13003_s9 = inlined_call_operand.vmem [shape: f32[32,128], index: 9, kind: input, shape index: {}]   ;;  %s13004_s10 = inlined_call_operand.vmem [shape: f32[1,128], index: 10, kind: input, shape index: {}]   ;;  %s13005_s11 = inlined_call_operand.vmem [shape: f32[6,16,48], index: 11, kind: input, shape index: {}]   ;;  %s13006_s12 = inlined_call_operand.vmem [shape: f32[6,1,48], index: 12, kind: input, shape index: {}]   ;;  %s13007_s13 = inlined_call_operand.vmem [shape: f32[128,32], index: 13, kind: input, shape index: {}]   ;;  %s13008_s14 = inlined_call_operand.vmem [shape: f32[1,32], index: 14, kind: input, shape index: {}]   ;;  %s13009_s15 = inlined_call_operand.vmem [shape: f32[32,16], index: 15, kind: input, shape index: {}]   ;;  %s13010_s16 = inlined_call_operand.vmem [shape: f32[1,16], index: 16, kind: input, shape index: {}]   ;;  %s13011_s17 = inlined_call_operand.vmem [shape: f32[16,16], index: 17, kind: input, shape index: {}]   ;;  %s13012_s18 = inlined_call_operand.vmem [shape: f32[1,16], index: 18, kind: input, shape index: {}]   ;;  %s13013_s19 = inlined_call_operand.vmem [shape: f32[16,16], index: 19, kind: input, shape index: {}]   ;;  %s13014_s20 = inlined_call_operand.vmem [shape: f32[1,16], index: 20, kind: input, shape index: {}]   ;;  %s13015_s21 = inlined_call_operand.vmem [shape: f32[16,1], index: 21, kind: input, shape index: {}]   ;;  %s13016_s22 = inlined_call_operand.<no memory space> [shape: f32[1,1], index: 22, kind: input, shape index: {}]   ;;  %s13017_s23 = inlined_call_operand.vmem [shape: f32[16,16], index: 23, kind: input, shape index: {}]   ;;  %s13018_s24 = inlined_call_operand.vmem [shape: f32[1,16], index: 24, kind: input, shape index: {}]   ;;  %s13019_s25 = inlined_call_operand.vmem [shape: f32[16,1], index: 25, kind: input, shape index: {}]   ;;  %s13020_s27 = inlined_call_operand.vmem [shape: f32[2,1], index: 27, kind: output, shape index: {0}]   ;;  %s13021_s28 = inlined_call_operand.vmem [shape: f32[4,128], index: 28, kind: output, shape index: {1}]   ;;  %s13022_s26 = inlined_call_operand.<no memory space> [shape: f32[1,1], index: 26, kind: input, shape index: {}]  }
   0x1   :  { %13067 = sst [smem:[#allocation40_spill]] %s12994_s0  ;;  %v34_v0 = vstv %s13016_s22  ;;  %v36_v1 = vstv %s13022_s26 }
   0x2   :  { %13068 = sst [smem:[#allocation41_spill]] %s12995_s1  ;;  %35 = vst [vmem:[#allocation4] sm:$0x1] %v34_v0 }
   0x3   :  { %13069 = sst [smem:[#allocation42_spill]] %s12996_s2  ;;  %37 = vst [vmem:[#allocation5] sm:$0x1] %v36_v1 }
   0x4   :  { %13070 = sst [smem:[#allocation43_spill]] %s12997_s3  ;;  %s9948_s3 = smov 0  }
   0x5   :  { %13071 = sst [smem:[#allocation44_spill]] %s12998_s4 }
   0x6   :  { %13072 = sst [smem:[#allocation45_spill]] %s12999_s5 }
   0x7   :  { %13073 = sst [smem:[#allocation46_spill]] %s13000_s6 }
   0x8   :  { %13074 = sst [smem:[#allocation47_spill]] %s13001_s7 }
   0x9   :  { %13075 = sst [smem:[#allocation48_spill]] %s13002_s8 }
   0xa   :  { %13076 = sst [smem:[#allocation49_spill]] %s13003_s9 }
   0xb   :  { %13077 = sst [smem:[#allocation50_spill]] %s13004_s10 }
   0xc   :  { %13078 = sst [smem:[#allocation51_spill]] %s13005_s11 }
   0xd   :  { %13079 = sst [smem:[#allocation52_spill]] %s13006_s12 }
   0xe   :  { %13080 = sst [smem:[#allocation53_spill]] %s13014_s20 }
   0xf   :  { %13081 = sst [smem:[#allocation54_spill]] %s13020_s27 }
  0x10   :  { %13082 = sst [smem:[#allocation55_spill]] %s13021_s28 }
  0x11 LB: > { %13083 = sst [smem:[#allocation6_spill]] %s9790_s3  ;;  %s9954_s6 = sadd.s32 4294967295, %s9790_s3   ;;  %s9790_s3 = sphi %s9948_s3, %s43_s3  }
  0x12   : > { %p8535_p0 = scmp.ge.s32.totalorder %s9790_s3, 1  ;;  %p785_p1 = scmp.lt.s32.totalorder %s9790_s3, 13 }
  0x14   : > { %p786_p2 = pnand %p8535_p0, %p785_p1 }
  0x15   : > { %p865_p3 = scmp.lt.s32.totalorder (!%p786_p2), %s9954_s6, 11  ;;  %s13084_s11 = sld [smem:[#allocation46_spill]] (!%p786_p2) }
  0x16   : > { %789 = sbr.rel (%p786_p2) target bundleno = 11496 (0x2ce8), region = 128  ;;  %s13085_s12 = sld [smem:[#allocation45_spill]] (!%p786_p2) }
  0x17   : > { %s13086_s9 = sld [smem:[#allocation47_spill]] (!%p786_p2)  ;;  %p8540_p4 = scmp.ne.s32.totalorder (!%p786_p2), %s9954_s6, 0 }
  0x18   : > { %s13087_s28 = sld [smem:[#allocation48_spill]] (!%p786_p2) }
  0x1b   : > { %s9960_s22 = scalar_select %p865_p3, %s9954_s6, 11 }
  0x1c   : > { %884 = sbr.rel (%p8540_p4) target bundleno = 241 (0xf1), region = 132  ;;  %s13090_s3 = sld [smem:[#allocation42_spill]] (!%p8540_p4) }
  0x1d   : > { %s9046_s26 = sshll.u32 %s9960_s22, 5  ;;  %s872_s29 = scalar_lea.vmem %s13084_s11, %s9960_s22 }
  0x1e   : > { %s9970_s1 = scalar_lea.vmem %s13085_s12, %s9046_s26  ;;  %s9047_s4 = sshll.u32 %s9960_s22, 6 }
  0x1f   : > { %s9976_s30 = scalar_lea.vmem %s13086_s9, %s9047_s4  ;;  %s880_s20 = scalar_lea.vmem %s13087_s28, %s9960_s22 }
  0x20   : > { %s13088_s11 = sld [smem:[#allocation41_spill]] (!%p8540_p4) }
  0x21   : > { %s13089_s28 = sld [smem:[#allocation40_spill]]  ;;  %vm929_vm0 = vcmask 523264   ;;  %vm1054_vm1 = vcmask 261120   ;;  %vm1039_vm2 = vcmask 253952  }
  0x22   : > { %v9138_v44 = vld [vmem:[%s13090_s3] ss:$0 sm:$0xff]  ;;  %s13091_s9 = sld [smem:[#allocation44_spill]] }
  0x23   : > { %s13092_s7 = sld [smem:[#allocation43_spill]] }
  0x26   : > { %v916_v2 = vld [vmem:[%s13088_s11 + $0x78] sm:$0xff]  ;;  %v915_v4 = vld [vmem:[%s13088_s11 + $0x70] sm:$0xff]  ;;  %v914_v6 = vld [vmem:[%s13088_s11 + $0x68] sm:$0xff] }
  0x27   : > { %v924_v3 = vld [vmem:[%s13088_s11 + $0xb8] sm:$0xff]  ;;  %9048 = vmatpush.msra.mxu2 %v916_v2  ;;  %v923_v5 = vld [vmem:[%s13088_s11 + $0xb0] sm:$0xff]  ;;  %v922_v7 = vld [vmem:[%s13088_s11 + $0xa8] sm:$0xff]  ;;  %954 = vmatpush.msra.mxu0 %v916_v2 }
  0x28   : > { %1003 = vmatpush.msra.mxu1 %v924_v3  ;;  %9064 = vmatpush.msra.mxu3 %v924_v3  ;;  %v913_v8 = vld [vmem:[%s13088_s11 + $0x60] sm:$0xff]  ;;  %v912_v10 = vld [vmem:[%s13088_s11 + $0x58] sm:$0xff]  ;;  %v911_v12 = vld [vmem:[%s13088_s11 + $0x50] sm:$0xff] }
  0x29   : > { %9049 = vmatpush.msra.mxu2 %v915_v4  ;;  %v921_v9 = vld [vmem:[%s13088_s11 + $0xa0] sm:$0xff]  ;;  %955 = vmatpush.msra.mxu0 %v915_v4  ;;  %v920_v11 = vld [vmem:[%s13088_s11 + $0x98] sm:$0xff]  ;;  %v919_v13 = vld [vmem:[%s13088_s11 + $0x90] sm:$0xff] }
  0x2a   : > { %1004 = vmatpush.msra.mxu1 %v923_v5  ;;  %9065 = vmatpush.msra.mxu3 %v923_v5  ;;  %v910_v14 = vld [vmem:[%s13088_s11 + $0x48] sm:$0xff]  ;;  %v909_v16 = vld [vmem:[%s13088_s11 + $0x40] sm:$0xff]  ;;  %v908_v19 = vld [vmem:[%s13088_s11 + $0x38] sm:$0xff] }
  0x2b   : > { %9050 = vmatpush.msra.mxu2 %v914_v6  ;;  %956 = vmatpush.msra.mxu0 %v914_v6  ;;  %v918_v15 = vld [vmem:[%s13088_s11 + $0x88] sm:$0xff]  ;;  %v917_v17 = vld [vmem:[%s13088_s11 + $0x80] sm:$0xff]  ;;  %v907_v20 = vld [vmem:[%s13088_s11 + $0x30] sm:$0xff] }
  0x2c   : > { %1005 = vmatpush.msra.mxu1 %v922_v7  ;;  %9066 = vmatpush.msra.mxu3 %v922_v7  ;;  %v886_v18 = vld [vmem:[%s13089_s28 + $0x8] sm:$0xff]  ;;  %v896_v21 = vld [vmem:[%s13089_s28 + $0x58] sm:$0xff]  ;;  %v905_v23 = vld [vmem:[%s13088_s11 + $0x20] sm:$0xff] }
  0x2d   : > { %9051 = vmatpush.msra.mxu2 %v913_v8  ;;  %957 = vmatpush.msra.mxu0 %v913_v8  ;;  %v906_v22 = vld [vmem:[%s13088_s11 + $0x28] sm:$0xff]  ;;  %v888_v24 = vld [vmem:[%s13089_s28 + $0x18] sm:$0xff]  ;;  %v903_v26 = vld [vmem:[%s13088_s11 + $0x10] sm:$0xff] }
  0x2e   : > { %1006 = vmatpush.msra.mxu1 %v921_v9  ;;  %9067 = vmatpush.msra.mxu3 %v921_v9  ;;  %v904_v25 = vld [vmem:[%s13088_s11 + $0x18] sm:$0xff]  ;;  %v898_v27 = vld [vmem:[%s13089_s28 + $0x68] sm:$0xff]  ;;  %v901_v29 = vld [vmem:[%s13088_s11] sm:$0xff] }
  0x2f   : > { %9052 = vmatpush.msra.mxu2 %v912_v10  ;;  %958 = vmatpush.msra.mxu0 %v912_v10  ;;  %v902_v28 = vld [vmem:[%s13088_s11 + $0x8] sm:$0xff]  ;;  %v891_v30 = vld [vmem:[%s13089_s28 + $0x30] sm:$0xff]  ;;  %v885_v32 = vld [vmem:[%s13089_s28] sm:$0xff] }
  0x30   : > { %1007 = vmatpush.msra.mxu1 %v920_v11  ;;  %9068 = vmatpush.msra.mxu3 %v920_v11  ;;  %v890_v31 = vld [vmem:[%s13089_s28 + $0x28] sm:$0xff]  ;;  %v900_v33 = vld [vmem:[%s13089_s28 + $0x78] sm:$0xff]  ;;  %v893_v34 = vld [vmem:[%s13089_s28 + $0x40] sm:$0xff] }
  0x31   : > { %9053 = vmatpush.msra.mxu2 %v911_v12  ;;  %959 = vmatpush.msra.mxu0 %v911_v12  ;;  %v892_v35 = vld [vmem:[%s13089_s28 + $0x38] sm:$0xff]  ;;  %v887_v36 = vld [vmem:[%s13089_s28 + $0x10] sm:$0xff]  ;;  %v894_v38 = vld [vmem:[%s13089_s28 + $0x48] sm:$0xff] }
  0x32   : > { %1008 = vmatpush.msra.mxu1 %v919_v13  ;;  %9069 = vmatpush.msra.mxu3 %v919_v13  ;;  %v895_v37 = vld [vmem:[%s13089_s28 + $0x50] sm:$0xff]  ;;  %v889_v39 = vld [vmem:[%s13089_s28 + $0x20] sm:$0xff] }
  0x33   : > { %9054 = vmatpush.msra.mxu2 %v910_v14  ;;  %960 = vmatpush.msra.mxu0 %v910_v14  ;;  %v897_v40 = vld [vmem:[%s13089_s28 + $0x60] sm:$0xff]  ;;  %v899_v41 = vld [vmem:[%s13089_s28 + $0x70] sm:$0xff] }
  0x34   : > { %1009 = vmatpush.msra.mxu1 %v918_v15  ;;  %9070 = vmatpush.msra.mxu3 %v918_v15  ;;  %v1044_v48 = vld [vmem:[%s13091_s9 + $0x1] sm:$0xff]  ;;  %v1045_v54 = vld [vmem:[%s13091_s9 + $0x9] sm:$0xff]  ;;  %v1036_v57 = vld [vmem:[%s13092_s7] sm:$0x1] }
  0x35   : > { %9055 = vmatpush.msra.mxu2 %v909_v16  ;;  %961 = vmatpush.msra.mxu0 %v909_v16  ;;  %v1037_v58 = vld [vmem:[%s13091_s9] sm:$0x1] }
  0x36   : > { %1010 = vmatpush.msra.mxu1 %v917_v17  ;;  %9071 = vmatpush.msra.mxu3 %v917_v17  ;;  %v1038_v61 = vadd.f32 %v1037_v58, %v1036_v57 }
  0x37   : > { %8541 = vmatmul.msk.f32.vlgmr.msra.gmra.mxu1 %vm929_vm0, %v886_v18  ;;  %9056 = vmatpush.msra.mxu2 %v908_v19 }
  0x38   : > { %962 = vmatpush.msra.mxu0 %v908_v19  ;;  %8546 = vmatmul.msk.f32.vlgmr.msra.gmra.mxu3 %vm929_vm0, %v896_v21  ;;  %1040 = vst.msk [vmem:[#allocation2] sm:$0x1] %vm1039_vm2, %v1038_v61 }
  0x39   : > { %9057 = vmatpush.msra.mxu2 %v907_v20  ;;  %1041 = vst.msk [vmem:[#allocation2 + $0x18] sm:$0x1] %vm1039_vm2, %v1038_v61 }
  0x3a   : > { %963 = vmatpush.msra.mxu0 %v907_v20  ;;  %1042 = vst.msk [vmem:[#allocation2 + $0x30] sm:$0x1] %vm1039_vm2, %v1038_v61 }
  0x3b   : > { %9058 = vmatpush.msra.mxu2 %v906_v22  ;;  %1043 = vst.msk [vmem:[#allocation2 + $0x48] sm:$0x1] %vm1039_vm2, %v1038_v61 }
  0x3c   : > { %964 = vmatpush.msra.mxu0 %v906_v22 }
  0x3d   : > { %9059 = vmatpush.msra.mxu2 %v905_v23 }
  0x3e   : > { %965 = vmatpush.msra.mxu0 %v905_v23 }
  0x3f   : > { %8542 = vmatmul.msk.f32.gmra.mxu1 %vm929_vm0, %v888_v24  ;;  %9060 = vmatpush.msra.mxu2 %v904_v25 }
  0x40   : > { %966 = vmatpush.msra.mxu0 %v904_v25  ;;  %8547 = vmatmul.msk.f32.gmra.mxu3 %vm929_vm0, %v898_v27 }
  0x41   : > { %9061 = vmatpush.msra.mxu2 %v903_v26 }
  0x42   : > { %967 = vmatpush.msra.mxu0 %v903_v26 }
  0x43   : > { %9062 = vmatpush.msra.mxu2 %v902_v28 }
  0x44   : > { %968 = vmatpush.msra.mxu0 %v902_v28 }
  0x45   : > { %9063 = vmatpush.msra.mxu2 %v901_v29 }
  0x46   : > { %979 = vmatmul.f32.vlgmr.msra.gmra.mxu2 %v891_v30  ;;  %969 = vmatpush.msra.mxu0 %v901_v29 }
  0x47   : > { %8543 = vmatmul.msk.f32.gmra.mxu1 %vm929_vm0, %v890_v31  ;;  %970 = vmatmul.f32.vlgmr.msra.gmra.mxu0 %v885_v32 }
  0x48   : > { %8548 = vmatmul.msk.f32.gmra.mxu3 %vm929_vm0, %v900_v33 }
  0x4e   : > { %982 = vmatmul.f32.gmra.mxu2 %v893_v34 }
  0x4f   : > { %8544 = vmatmul.msk.f32.gmra.mxu1 %vm929_vm0, %v892_v35  ;;  %973 = vmatmul.f32.gmra.mxu0 %v887_v36 }
  0x56   : > { %985 = vmatmul.f32.gmra.mxu2 %v895_v37 }
  0x57   : > { %8545 = vmatmul.msk.f32.gmra.mxu1 %vm929_vm0, %v894_v38  ;;  %976 = vmatmul.f32.gmra.mxu0 %v889_v39 }
  0x5e   : > { %988 = vmatmul.f32.gmra.mxu2 %v897_v40 }
  0x66   : > { %991 = vmatmul.f32.gmra.mxu2 %v899_v41 }
  0xb4   : > { %v1012_v42 = vpop.f32.mrf.mxu1 }
  0xbb   : > { %v1027_v5 = vpop.f32.mrf.mxu3 }
  0xbc   : > { %v1015_v43 = vpop.f32.mrf.mxu1 }
  0xc3   : > { %v1030_v14 = vpop.f32.mrf.mxu3 }
  0xc4   : > { %v1018_v45 = vpop.f32.mrf.mxu1  ;;  %v971_v46 = vpop.f32.mrf.mxu0 }
  0xc5   : > { %v972_v47 = vadd.f32 %v9138_v44, %v971_v46 }
  0xc7   : > { %v1013_v49 = vadd.f32 %v1012_v42, %v972_v47 }
  0xc9   : > { %v980_v50 = vpop.f32.mrf.mxu2  ;;  %v1046_v51 = vadd.f32 %v1044_v48, %v1013_v49 }
  0xca   : > { %v981_v52 = vadd.f32 %v9138_v44, %v980_v50 }
  0xcb   : > { %1055 = vst.msk [vmem:[#allocation2 + $0x1] sm:$0xff] %vm1054_vm1, %v1046_v51  ;;  %v1033_v20 = vpop.f32.mrf.mxu3 }
  0xcc   : > { %v1021_v53 = vpop.f32.mrf.mxu1  ;;  %v974_v56 = vpop.f32.mrf.mxu0 }
  0xcd   : > { %v1022_v55 = vadd.f32 %v1021_v53, %v981_v52  ;;  %v975_v60 = vadd.f32 %v9138_v44, %v974_v56 }
  0xcf   : > { %v1049_v59 = vadd.f32 %v1045_v54, %v1022_v55  ;;  %v1016_v62 = vadd.f32 %v1015_v43, %v975_v60 }
  0xd1   : > { %1058 = vst.msk [vmem:[#allocation2 + $0x21] sm:$0xff] %vm1054_vm1, %v1049_v59  ;;  %v983_v63 = vpop.f32.mrf.mxu2  ;;  %v1047_v0 = vadd.f32 %v1045_v54, %v1016_v62 }
  0xd2   : > { %v984_v1 = vadd.f32 %v9138_v44, %v983_v63 }
  0xd3   : > { %1056 = vst.msk [vmem:[#allocation2 + $0x9] sm:$0xff] %vm1054_vm1, %v1047_v0 }
  0xd4   : > { %v1024_v2 = vpop.f32.mrf.mxu1  ;;  %v977_v4 = vpop.f32.mrf.mxu0 }
  0xd5   : > { %v1025_v3 = vadd.f32 %v1024_v2, %v984_v1  ;;  %v978_v7 = vadd.f32 %v9138_v44, %v977_v4 }
  0xd7   : > { %v1050_v6 = vadd.f32 %v1044_v48, %v1025_v3  ;;  %v1019_v8 = vadd.f32 %v1018_v45, %v978_v7 }
  0xd9   : > { %1059 = vst.msk [vmem:[#allocation2 + $0x31] sm:$0xff] %vm1054_vm1, %v1050_v6  ;;  %v986_v9 = vpop.f32.mrf.mxu2  ;;  %v1048_v10 = vadd.f32 %v1044_v48, %v1019_v8 }
  0xda   : > { %v987_v11 = vadd.f32 %v9138_v44, %v986_v9 }
  0xdb   : > { %1057 = vst.msk [vmem:[#allocation2 + $0x19] sm:$0xff] %vm1054_vm1, %v1048_v10 }
  0xdc   : > { %v1028_v12 = vadd.f32 %v1027_v5, %v987_v11 }
  0xde   : > { %v1051_v13 = vadd.f32 %v1045_v54, %v1028_v12 }
  0xe0   : > { %1060 = vst.msk [vmem:[#allocation2 + $0x39] sm:$0xff] %vm1054_vm1, %v1051_v13 }
  0xe1   : > { %v989_v15 = vpop.f32.mrf.mxu2 }
  0xe2   : > { %v990_v16 = vadd.f32 %v9138_v44, %v989_v15 }
  0xe4   : > { %v1031_v17 = vadd.f32 %v1030_v14, %v990_v16 }
  0xe6   : > { %v1052_v18 = vadd.f32 %v1044_v48, %v1031_v17 }
  0xe8   : > { %1061 = vst.msk [vmem:[#allocation2 + $0x49] sm:$0xff] %vm1054_vm1, %v1052_v18 }
  0xe9   : > { %v992_v19 = vpop.f32.mrf.mxu2 }
  0xea   : > { %v993_v21 = vadd.f32 %v9138_v44, %v992_v19 }
  0xec   : > { %v1034_v22 = vadd.f32 %v1033_v20, %v993_v21 }
  0xee   : > { %v1053_v23 = vadd.f32 %v1045_v54, %v1034_v22 }
  0xf0   : > { %1062 = vst.msk [vmem:[#allocation2 + $0x51] sm:$0xff] %vm1054_vm1, %v1053_v23 }
  0xf1 PF: > { %v1078_v24 = vld [vmem:[%s9970_s1 + $0x18] sm:$0xff]  ;;  %v1077_v25 = vld [vmem:[%s9970_s1 + $0x10] sm:$0xff]  ;;  %v10136_v26 = vld [vmem:[#allocation2] sm:$0xff]  ;;  %vm13031_vm3 = vcmask 261120   ;;  %vm1855_vm4 = vcmask 523264   ;;  %vm2099_vm5 = vcmask 253952  }
  0xf2   : > { %1365 = vmatpush.msra.mxu0 %v1078_v24  ;;  %9072 = vmatpush.msra.mxu3 %v1078_v24  ;;  %v1076_v27 = vld [vmem:[%s9970_s1 + $0x8] sm:$0xff]  ;;  %v1094_v28 = vrot.slane %v10136_v26, 1  ;;  %v1095_v29 = vrot.slane %v10136_v26, 2  ;;  %v1096_v30 = vrot.slane %v10136_v26, 3  ;;  %1157 = vst [vmem:[#allocation1] ss:$9 sm:$0xff] %v10136_v26 }
  0xf3   : > { %v1097_v31 = vrot.slane %v10136_v26, 4  ;;  %v1075_v32 = vld [vmem:[%s9970_s1] sm:$0xff]  ;;  %v1098_v33 = vrot.slane %v10136_v26, 5  ;;  %v1099_v34 = vrot.slane %v10136_v26, 6  ;;  %v1100_v35 = vrot.slane %v10136_v26, 7  ;;  %v10148_v36 = vld [vmem:[#allocation2 + $0x8] sm:$0xff] }
  0xf4   : > { %1366 = vmatpush.msra.mxu0 %v1077_v25  ;;  %9073 = vmatpush.msra.mxu3 %v1077_v25  ;;  %1159 = vst [vmem:[#allocation1 + $0x1] ss:$9 sm:$0xff] %v1094_v28  ;;  %v1101_v37 = vrot.slane %v10148_v36, 1  ;;  %v1102_v38 = vrot.slane %v10148_v36, 2  ;;  %v1103_v40 = vrot.slane %v10148_v36, 3  ;;  %v1104_v41 = vrot.slane %v10148_v36, 4 }
  0xf5   : > { %1161 = vst [vmem:[#allocation1 + $0x2] ss:$9 sm:$0xff] %v1095_v29  ;;  %v1105_v42 = vrot.slane %v10148_v36, 5  ;;  %v1106_v43 = vrot.slane %v10148_v36, 6  ;;  %v1107_v44 = vrot.slane %v10148_v36, 7  ;;  %v10159_v45 = vld [vmem:[#allocation2 + $0x18] sm:$0xff] }
  0xf6   : > { %1367 = vmatpush.msra.mxu0 %v1076_v27  ;;  %9074 = vmatpush.msra.mxu3 %v1076_v27  ;;  %1163 = vst [vmem:[#allocation1 + $0x3] ss:$9 sm:$0xff] %v1096_v30  ;;  %v10161_v46 = vld [vmem:[#allocation2 + $0x10] sm:$0x1]  ;;  %v1108_v47 = vrot.slane %v10159_v45, 1  ;;  %v1109_v49 = vrot.slane %v10159_v45, 2 }
  0xf7   : > { %1165 = vst [vmem:[#allocation1 + $0x4] ss:$9 sm:$0xff] %v1097_v31  ;;  %v1110_v50 = vrot.slane %v10159_v45, 3  ;;  %v1111_v51 = vrot.slane %v10159_v45, 4  ;;  %v1112_v52 = vrot.slane %v10159_v45, 5  ;;  %v1113_v53 = vrot.slane %v10159_v45, 6 }
  0xf8   : > { %1368 = vmatpush.msra.mxu0 %v1075_v32  ;;  %9075 = vmatpush.msra.mxu3 %v1075_v32  ;;  %1167 = vst [vmem:[#allocation1 + $0x5] ss:$9 sm:$0xff] %v1098_v33  ;;  %v10172_v54 = vld [vmem:[#allocation2 + $0x20] sm:$0xff]  ;;  %v1114_v55 = vrot.slane %v10159_v45, 7  ;;  %v10183_v63 = vld [vmem:[#allocation2 + $0x30] sm:$0xff]  ;;  %v10196_v8 = vld [vmem:[#allocation2 + $0x38] sm:$0xff] }
  0xf9   : > { %1169 = vst [vmem:[#allocation1 + $0x6] ss:$9 sm:$0xff] %v1099_v34  ;;  %v1115_v56 = vrot.slane %v10172_v54, 1  ;;  %v1116_v58 = vrot.slane %v10172_v54, 2  ;;  %v1117_v59 = vrot.slane %v10172_v54, 3  ;;  %v1118_v60 = vrot.slane %v10172_v54, 4 }
  0xfa   : > { %1171 = vst [vmem:[#allocation1 + $0x7] ss:$9 sm:$0xff] %v1100_v35  ;;  %v1119_v61 = vrot.slane %v10172_v54, 5  ;;  %v1120_v62 = vrot.slane %v10172_v54, 6  ;;  %v1121_v0 = vrot.slane %v10172_v54, 7  ;;  %v1122_v3 = vrot.slane %v10183_v63, 1 }
  0xfb   : > { %v10186_v1 = vld [vmem:[#allocation2 + $0x28] sm:$0x1]  ;;  %v1123_v4 = vrot.slane %v10183_v63, 2  ;;  %v1124_v5 = vrot.slane %v10183_v63, 3  ;;  %v1125_v6 = vrot.slane %v10183_v63, 4  ;;  %v1126_v7 = vrot.slane %v10183_v63, 5 }
  0xfc   : > { %v1127_v9 = vrot.slane %v10183_v63, 6  ;;  %v1128_v10 = vrot.slane %v10183_v63, 7  ;;  %v1129_v12 = vrot.slane %v10196_v8, 1  ;;  %v1130_v13 = vrot.slane %v10196_v8, 2  ;;  %v10208_v18 = vld [vmem:[#allocation2 + $0x48] sm:$0xff]  ;;  %v10221_v28 = vld [vmem:[#allocation2 + $0x50] sm:$0xff] }
  0xfd   : > { %v1131_v14 = vrot.slane %v10196_v8, 3  ;;  %v1132_v15 = vrot.slane %v10196_v8, 4  ;;  %v1133_v16 = vrot.slane %v10196_v8, 5  ;;  %v1134_v17 = vrot.slane %v10196_v8, 6  ;;  %v10211_v21 = vld [vmem:[#allocation2 + $0x40] sm:$0x1] }
  0xfe   : > { %v1135_v19 = vrot.slane %v10196_v8, 7  ;;  %v1136_v22 = vrot.slane %v10208_v18, 1  ;;  %v1137_v23 = vrot.slane %v10208_v18, 2  ;;  %v1138_v24 = vrot.slane %v10208_v18, 3  ;;  %p8567_p5 = scmp.ne.s32.totalorder %s9954_s6, 6 }
  0xff   : > { %v1139_v25 = vrot.slane %v10208_v18, 4  ;;  %v1140_v27 = vrot.slane %v10208_v18, 5  ;;  %v1141_v29 = vrot.slane %v10208_v18, 6  ;;  %v1142_v30 = vrot.slane %v10208_v18, 7 }
 0x100   : > { %v1143_v32 = vrot.slane %v10221_v28, 1  ;;  %v1144_v33 = vrot.slane %v10221_v28, 2  ;;  %v1145_v34 = vrot.slane %v10221_v28, 3  ;;  %v1146_v35 = vrot.slane %v10221_v28, 4 }
 0x101   : > { %v1172_v39 = vld [vmem:[#allocation1] sm:$0xff] }
 0x102   : > { %8549 = vmatmul.msk.f32.vlgmr.msra.gmra.mxu0 %vm13031_vm3, %v1172_v39  ;;  %1173 = vst [vmem:[#allocation1] ss:$9 sm:$0xff] %v10148_v36  ;;  %v1149_v39 = vrot.slane %v10221_v28, 7 }
 0x103   : > { %1174 = vst [vmem:[#allocation1 + $0x1] ss:$9 sm:$0xff] %v1101_v37  ;;  %v1147_v37 = vrot.slane %v10221_v28, 5 }
 0x104   : > { %1175 = vst [vmem:[#allocation1 + $0x2] ss:$9 sm:$0xff] %v1102_v38  ;;  %v1148_v38 = vrot.slane %v10221_v28, 6 }
 0x105   : > { %1176 = vst [vmem:[#allocation1 + $0x3] ss:$9 sm:$0xff] %v1103_v40 }
 0x106   : > { %1177 = vst [vmem:[#allocation1 + $0x4] ss:$9 sm:$0xff] %v1104_v41  ;;  %v10235_v41 = vld [vmem:[#allocation2 + $0x58] sm:$0x1] }
 0x107   : > { %1178 = vst [vmem:[#allocation1 + $0x5] ss:$9 sm:$0xff] %v1105_v42  ;;  %v10243_v42 = vld [vmem:[%s872_s29] ss:$0 sm:$0xff] }
 0x108   : > { %1179 = vst [vmem:[#allocation1 + $0x6] ss:$9 sm:$0xff] %v1106_v43  ;;  %v10246_v43 = vrot.slane %v10243_v42, 1 }
 0x109   : > { %1180 = vst [vmem:[#allocation1 + $0x7] ss:$9 sm:$0xff] %v1107_v44  ;;  %v10249_v44 = vrot.slane %v10243_v42, 2 }
 0x110   : > { %v1181_v48 = vld [vmem:[#allocation1] sm:$0xff] }
 0x111   : > { %8550 = vmatmul.msk.f32.gmra.mxu0 %vm13031_vm3, %v1181_v48  ;;  %1182 = vst [vmem:[#allocation1] ss:$9 sm:$0xff] %v10161_v46  ;;  %v10252_v48 = vrot.slane %v10243_v42, 3 }
 0x112   : > { %1183 = vst [vmem:[#allocation1 + $0x1] ss:$9 sm:$0xff] %v10159_v45 }
 0x113   : > { %1184 = vst [vmem:[#allocation1 + $0x2] ss:$9 sm:$0xff] %v1108_v47 }
 0x114   : > { %1185 = vst [vmem:[#allocation1 + $0x3] ss:$9 sm:$0xff] %v1109_v49  ;;  %v10256_v49 = vrot.slane %v10243_v42, 4 }
 0x115   : > { %1186 = vst [vmem:[#allocation1 + $0x4] ss:$9 sm:$0xff] %v1110_v50  ;;  %v10260_v50 = vrot.slane %v10243_v42, 5 }
 0x116   : > { %1187 = vst [vmem:[#allocation1 + $0x5] ss:$9 sm:$0xff] %v1111_v51  ;;  %v10264_v51 = vrot.slane %v10243_v42, 6 }
 0x117   : > { %1188 = vst [vmem:[#allocation1 + $0x6] ss:$9 sm:$0xff] %v1112_v52  ;;  %v10268_v52 = vrot.slane %v10243_v42, 7 }
 0x118   : > { %1189 = vst [vmem:[#allocation1 + $0x7] ss:$9 sm:$0xff] %v1113_v53 }
 0x11f   : > { %v1190_v57 = vld [vmem:[#allocation1] sm:$0xff] }
 0x120   : > { %8551 = vmatmul.msk.f32.gmra.mxu0 %vm13031_vm3, %v1190_v57  ;;  %1191 = vst [vmem:[#allocation1] ss:$9 sm:$0xff] %v1114_v55 }
 0x121   : > { %1192 = vst [vmem:[#allocation1 + $0x1] ss:$9 sm:$0xff] %v10172_v54 }
 0x122   : > { %1193 = vst [vmem:[#allocation1 + $0x2] ss:$9 sm:$0xff] %v1115_v56 }
 0x123   : > { %1194 = vst [vmem:[#allocation1 + $0x3] ss:$9 sm:$0xff] %v1116_v58 }
 0x124   : > { %1195 = vst [vmem:[#allocation1 + $0x4] ss:$9 sm:$0xff] %v1117_v59 }
 0x125   : > { %1196 = vst [vmem:[#allocation1 + $0x5] ss:$9 sm:$0xff] %v1118_v60  ;;  %v1599_v60 = vld [vmem:[%s9976_s30 + $0x38] sm:$0xff] }
 0x126   : > { %1197 = vst [vmem:[#allocation1 + $0x6] ss:$9 sm:$0xff] %v1119_v61  ;;  %1882 = vmatpush.msra.mxu1 %v1599_v60  ;;  %9076 = vmatpush.msra.mxu2 %v1599_v60  ;;  %v1598_v61 = vld [vmem:[%s9976_s30 + $0x30] sm:$0xff] }
 0x127   : > { %1198 = vst [vmem:[#allocation1 + $0x7] ss:$9 sm:$0xff] %v1120_v62  ;;  %9077 = vmatpush.msrb.mxu3 %v1599_v60  ;;  %v1597_v62 = vld [vmem:[%s9976_s30 + $0x28] sm:$0xff] }
 0x128   : > { %1883 = vmatpush.msra.mxu1 %v1598_v61  ;;  %9078 = vmatpush.msra.mxu2 %v1598_v61 }
 0x129   : > { %9079 = vmatpush.msrb.mxu3 %v1598_v61 }
 0x12a   : > { %1884 = vmatpush.msra.mxu1 %v1597_v62  ;;  %9080 = vmatpush.msra.mxu2 %v1597_v62 }
 0x12b   : > { %9081 = vmatpush.msrb.mxu3 %v1597_v62 }
 0x12e   : > { %v1199_v2 = vld [vmem:[#allocation1] sm:$0xff] }
 0x12f   : > { %8552 = vmatmul.msk.f32.gmra.mxu0 %vm13031_vm3, %v1199_v2  ;;  %1200 = vst [vmem:[#allocation1] ss:$9 sm:$0xff] %v1121_v0  ;;  %v1596_v2 = vld [vmem:[%s9976_s30 + $0x20] sm:$0xff] }
 0x130   : > { %1201 = vst [vmem:[#allocation1 + $0x1] ss:$9 sm:$0xff] %v10186_v1  ;;  %1885 = vmatpush.msra.mxu1 %v1596_v2  ;;  %9082 = vmatpush.msra.mxu2 %v1596_v2 }
 0x131   : > { %1202 = vst [vmem:[#allocation1 + $0x2] ss:$9 sm:$0xff] %v10183_v63  ;;  %9083 = vmatpush.msrb.mxu3 %v1596_v2 }
 0x132   : > { %1203 = vst [vmem:[#allocation1 + $0x3] ss:$9 sm:$0xff] %v1122_v3  ;;  %v1595_v3 = vld [vmem:[%s9976_s30 + $0x18] sm:$0xff] }
 0x133   : > { %1204 = vst [vmem:[#allocation1 + $0x4] ss:$9 sm:$0xff] %v1123_v4  ;;  %1886 = vmatpush.msra.mxu1 %v1595_v3  ;;  %9084 = vmatpush.msra.mxu2 %v1595_v3  ;;  %v1594_v4 = vld [vmem:[%s9976_s30 + $0x10] sm:$0xff] }
 0x134   : > { %1205 = vst [vmem:[#allocation1 + $0x5] ss:$9 sm:$0xff] %v1124_v5  ;;  %9085 = vmatpush.msrb.mxu3 %v1595_v3 }
 0x135   : > { %1206 = vst [vmem:[#allocation1 + $0x6] ss:$9 sm:$0xff] %v1125_v6  ;;  %1887 = vmatpush.msra.mxu1 %v1594_v4  ;;  %9086 = vmatpush.msra.mxu2 %v1594_v4  ;;  %v1593_v6 = vld [vmem:[%s9976_s30 + $0x8] sm:$0xff] }
 0x136   : > { %1207 = vst [vmem:[#allocation1 + $0x7] ss:$9 sm:$0xff] %v1126_v7  ;;  %9087 = vmatpush.msrb.mxu3 %v1594_v4 }
 0x137   : > { %1888 = vmatpush.msra.mxu1 %v1593_v6  ;;  %9088 = vmatpush.msra.mxu2 %v1593_v6 }
 0x138   : > { %9089 = vmatpush.msrb.mxu3 %v1593_v6 }
 0x13d   : > { %v1208_v11 = vld [vmem:[#allocation1] sm:$0xff] }
 0x13e   : > { %8553 = vmatmul.msk.f32.gmra.mxu0 %vm13031_vm3, %v1208_v11  ;;  %1209 = vst [vmem:[#allocation1] ss:$9 sm:$0xff] %v1127_v9  ;;  %v1592_v9 = vld [vmem:[%s9976_s30] sm:$0xff] }
 0x13f   : > { %1210 = vst [vmem:[#allocation1 + $0x1] ss:$9 sm:$0xff] %v1128_v10  ;;  %1889 = vmatpush.msra.mxu1 %v1592_v9  ;;  %9090 = vmatpush.msra.mxu2 %v1592_v9 }
 0x140   : > { %1211 = vst [vmem:[#allocation1 + $0x2] ss:$9 sm:$0xff] %v10196_v8  ;;  %9091 = vmatpush.msrb.mxu3 %v1592_v9 }
 0x141   : > { %1212 = vst [vmem:[#allocation1 + $0x3] ss:$9 sm:$0xff] %v1129_v12 }
 0x142   : > { %1213 = vst [vmem:[#allocation1 + $0x4] ss:$9 sm:$0xff] %v1130_v13 }
 0x143   : > { %1214 = vst [vmem:[#allocation1 + $0x5] ss:$9 sm:$0xff] %v1131_v14 }
 0x144   : > { %1215 = vst [vmem:[#allocation1 + $0x6] ss:$9 sm:$0xff] %v1132_v15 }
 0x145   : > { %1216 = vst [vmem:[#allocation1 + $0x7] ss:$9 sm:$0xff] %v1133_v16 }
 0x14c   : > { %v1217_v20 = vld [vmem:[#allocation1] sm:$0xff] }
 0x14d   : > { %8554 = vmatmul.msk.f32.vlgmr.msra.gmra.mxu3 %vm13031_vm3, %v1217_v20  ;;  %1218 = vst [vmem:[#allocation1] ss:$9 sm:$0xff] %v1134_v17 }
 0x14e   : > { %1219 = vst [vmem:[#allocation1 + $0x1] ss:$9 sm:$0xff] %v1135_v19 }
 0x14f   : > { %1220 = vst [vmem:[#allocation1 + $0x2] ss:$9 sm:$0xff] %v10211_v21 }
 0x150   : > { %1221 = vst [vmem:[#allocation1 + $0x3] ss:$9 sm:$0xff] %v10208_v18 }
 0x151   : > { %1222 = vst [vmem:[#allocation1 + $0x4] ss:$9 sm:$0xff] %v1136_v22 }
 0x152   : > { %1223 = vst [vmem:[#allocation1 + $0x5] ss:$9 sm:$0xff] %v1137_v23 }
 0x153   : > { %1224 = vst [vmem:[#allocation1 + $0x6] ss:$9 sm:$0xff] %v1138_v24 }
 0x154   : > { %1225 = vst [vmem:[#allocation1 + $0x7] ss:$9 sm:$0xff] %v1139_v25 }
 0x15b   : > { %v1226_v31 = vld [vmem:[#allocation1] sm:$0xff] }
 0x15c   : > { %8555 = vmatmul.msk.f32.gmra.mxu3 %vm13031_vm3, %v1226_v31  ;;  %1227 = vst [vmem:[#allocation1] ss:$9 sm:$0xff] %v1140_v27 }
 0x15d   : > { %1228 = vst [vmem:[#allocation1 + $0x1] ss:$9 sm:$0xff] %v1141_v29 }
 0x15e   : > { %1229 = vst [vmem:[#allocation1 + $0x2] ss:$9 sm:$0xff] %v1142_v30 }
 0x15f   : > { %1230 = vst [vmem:[#allocation1 + $0x3] ss:$9 sm:$0xff] %v10221_v28 }
 0x160   : > { %1231 = vst [vmem:[#allocation1 + $0x4] ss:$9 sm:$0xff] %v1143_v32 }
 0x161   : > { %1232 = vst [vmem:[#allocation1 + $0x5] ss:$9 sm:$0xff] %v1144_v33 }
 0x162   : > { %1233 = vst [vmem:[#allocation1 + $0x6] ss:$9 sm:$0xff] %v1145_v34 }
 0x163   : > { %1234 = vst [vmem:[#allocation1 + $0x7] ss:$9 sm:$0xff] %v1146_v35 }
 0x16a   : > { %v1235_v40 = vld [vmem:[#allocation1] sm:$0xff] }
 0x16b   : > { %8556 = vmatmul.msk.f32.gmra.mxu3 %vm13031_vm3, %v1235_v40  ;;  %1236 = vst [vmem:[#allocation1] ss:$9 sm:$0xff] %v1147_v37 }
 0x16c   : > { %1237 = vst [vmem:[#allocation1 + $0x1] ss:$9 sm:$0xff] %v1148_v38 }
 0x16d   : > { %1238 = vst [vmem:[#allocation1 + $0x2] ss:$9 sm:$0xff] %v1149_v39 }
 0x16e   : > { %1239 = vst [vmem:[#allocation1 + $0x3] ss:$9 sm:$0xff] %v10235_v41 }
 0x175   : > { %v1240_v47 = vld [vmem:[#allocation1] sm:$0xff] }
 0x176   : > { %8557 = vmatmul.msk.f32.gmra.mxu3 %vm13031_vm3, %v1240_v47  ;;  %1241 = vst [vmem:[#allocation1] ss:$9 sm:$0xff] %v10243_v42 }
 0x177   : > { %1243 = vst [vmem:[#allocation1 + $0x1] ss:$9 sm:$0xff] %v10246_v43 }
 0x178   : > { %1245 = vst [vmem:[#allocation1 + $0x2] ss:$9 sm:$0xff] %v10249_v44 }
 0x179   : > { %1247 = vst [vmem:[#allocation1 + $0x3] ss:$9 sm:$0xff] %v10252_v48 }
 0x17a   : > { %1249 = vst [vmem:[#allocation1 + $0x4] ss:$9 sm:$0xff] %v10256_v49 }
 0x17b   : > { %1251 = vst [vmem:[#allocation1 + $0x5] ss:$9 sm:$0xff] %v10260_v50 }
 0x17c   : > { %1253 = vst [vmem:[#allocation1 + $0x6] ss:$9 sm:$0xff] %v10264_v51 }
 0x17d   : > { %1255 = vst [vmem:[#allocation1 + $0x7] ss:$9 sm:$0xff] %v10268_v52 }
 0x17f   : > { %v1370_v5 = vpop.f32.mrf.mxu0 }
 0x184   : > { %v10275_v53 = vld [vmem:[#allocation1] sm:$0xff] }
 0x185   : > { %1257 = vst [vmem:[#allocation1] ss:$9 sm:$0xff] %v10243_v42  ;;  %v1371_v10 = vadd.f32 %v1370_v5, %v10275_v53 }
 0x186   : > { %1258 = vst [vmem:[#allocation1 + $0x1] ss:$9 sm:$0xff] %v10246_v43 }
 0x187   : > { %1259 = vst [vmem:[#allocation1 + $0x2] ss:$9 sm:$0xff] %v10249_v44  ;;  %v1406_v11 = vrot.slane %v1371_v10, 1  ;;  %v1407_v12 = vrot.slane %v1371_v10, 2  ;;  %v1408_v13 = vrot.slane %v1371_v10, 3  ;;  %v1409_v14 = vrot.slane %v1371_v10, 4 }
 0x188   : > { %1260 = vst [vmem:[#allocation1 + $0x3] ss:$9 sm:$0xff] %v10252_v48  ;;  %v1524_v15 = vmax.f32 %v1371_v10, 0.0  ;;  %v1410_v16 = vrot.slane %v1371_v10, 5  ;;  %v1411_v19 = vrot.slane %v1371_v10, 6  ;;  %v1412_v23 = vrot.slane %v1371_v10, 7 }
 0x189   : > { %1261 = vst [vmem:[#allocation1 + $0x4] ss:$9 sm:$0xff] %v10256_v49  ;;  %v1525_v17 = vmax.f32 %v1406_v11, 0.0  ;;  %v1526_v20 = vmax.f32 %v1407_v12, 0.0  ;;  %v1527_v24 = vmax.f32 %v1408_v13, 0.0  ;;  %v1528_v25 = vmax.f32 %v1409_v14, 0.0 }
 0x18a   : > { %1262 = vst [vmem:[#allocation1 + $0x5] ss:$9 sm:$0xff] %v10260_v50  ;;  %v1529_v27 = vmax.f32 %v1410_v16, 0.0  ;;  %v1530_v30 = vmax.f32 %v1411_v19, 0.0  ;;  %v1531_v31 = vmax.f32 %v1412_v23, 0.0 }
 0x18b   : > { %1263 = vst [vmem:[#allocation1 + $0x6] ss:$9 sm:$0xff] %v10264_v51 }
 0x18c   : > { %1264 = vst [vmem:[#allocation1 + $0x7] ss:$9 sm:$0xff] %v10268_v52 }
 0x18e   : > { %v1373_v29 = vpop.f32.mrf.mxu0 }
 0x193   : > { %v10285_v55 = vld [vmem:[#allocation1] sm:$0xff] }
 0x194   : > { %1266 = vst [vmem:[#allocation1] ss:$9 sm:$0xff] %v10243_v42  ;;  %v1374_v32 = vadd.f32 %v1373_v29, %v10285_v55 }
 0x195   : > { %1267 = vst [vmem:[#allocation1 + $0x1] ss:$9 sm:$0xff] %v10243_v42 }
 0x196   : > { %1268 = vst [vmem:[#allocation1 + $0x2] ss:$9 sm:$0xff] %v10246_v43  ;;  %v1413_v33 = vrot.slane %v1374_v32, 1  ;;  %v1414_v34 = vrot.slane %v1374_v32, 2  ;;  %v1415_v35 = vrot.slane %v1374_v32, 3  ;;  %v1416_v37 = vrot.slane %v1374_v32, 4 }
 0x197   : > { %1269 = vst [vmem:[#allocation1 + $0x3] ss:$9 sm:$0xff] %v10249_v44  ;;  %v1532_v38 = vmax.f32 %v1374_v32, 0.0  ;;  %v1417_v39 = vrot.slane %v1374_v32, 5  ;;  %v1419_v47 = vrot.slane %v1374_v32, 7 }
 0x198   : > { %1270 = vst [vmem:[#allocation1 + $0x4] ss:$9 sm:$0xff] %v10252_v48  ;;  %v1533_v40 = vmax.f32 %v1413_v33, 0.0 }
 0x199   : > { %1271 = vst [vmem:[#allocation1 + $0x5] ss:$9 sm:$0xff] %v10256_v49  ;;  %v1539_v53 = vmax.f32 %v1419_v47, 0.0 }
 0x19a   : > { %1272 = vst [vmem:[#allocation1 + $0x6] ss:$9 sm:$0xff] %v10260_v50 }
 0x19b   : > { %1273 = vst [vmem:[#allocation1 + $0x7] ss:$9 sm:$0xff] %v10264_v51 }
 0x1a2   : > { %v10295_v56 = vld [vmem:[#allocation1] sm:$0xff] }
 0x1a3   : > { %1275 = vst [vmem:[#allocation1] ss:$9 sm:$0xff] %v10268_v52 }
 0x1a4   : > { %1276 = vst [vmem:[#allocation1 + $0x1] ss:$9 sm:$0xff] %v10243_v42 }
 0x1a5   : > { %1277 = vst [vmem:[#allocation1 + $0x2] ss:$9 sm:$0xff] %v10246_v43 }
 0x1a6   : > { %1278 = vst [vmem:[#allocation1 + $0x3] ss:$9 sm:$0xff] %v10249_v44 }
 0x1a7   : > { %1279 = vst [vmem:[#allocation1 + $0x4] ss:$9 sm:$0xff] %v10252_v48 }
 0x1a8   : > { %1280 = vst [vmem:[#allocation1 + $0x5] ss:$9 sm:$0xff] %v10256_v49 }
 0x1a9   : > { %1281 = vst [vmem:[#allocation1 + $0x6] ss:$9 sm:$0xff] %v10260_v50 }
 0x1aa   : > { %1282 = vst [vmem:[#allocation1 + $0x7] ss:$9 sm:$0xff] %v10264_v51 }
 0x1b1   : > { %v10305_v57 = vld [vmem:[#allocation1] sm:$0xff] }
 0x1b2   : > { %1284 = vst [vmem:[#allocation1] ss:$9 sm:$0xff] %v10268_v52 }
 0x1b3   : > { %1285 = vst [vmem:[#allocation1 + $0x1] ss:$9 sm:$0xff] %v10243_v42 }
 0x1b4   : > { %1286 = vst [vmem:[#allocation1 + $0x2] ss:$9 sm:$0xff] %v10243_v42 }
 0x1b5   : > { %1287 = vst [vmem:[#allocation1 + $0x3] ss:$9 sm:$0xff] %v10246_v43 }
 0x1b6   : > { %1288 = vst [vmem:[#allocation1 + $0x4] ss:$9 sm:$0xff] %v10249_v44 }
 0x1b7   : > { %1289 = vst [vmem:[#allocation1 + $0x5] ss:$9 sm:$0xff] %v10252_v48 }
 0x1b8   : > { %1290 = vst [vmem:[#allocation1 + $0x6] ss:$9 sm:$0xff] %v10256_v49 }
 0x1b9   : > { %1291 = vst [vmem:[#allocation1 + $0x7] ss:$9 sm:$0xff] %v10260_v50 }
 0x1c0   : > { %v10315_v58 = vld [vmem:[#allocation1] sm:$0xff] }
 0x1c1   : > { %1293 = vst [vmem:[#allocation1] ss:$9 sm:$0xff] %v10264_v51 }
 0x1c2   : > { %1294 = vst [vmem:[#allocation1 + $0x1] ss:$9 sm:$0xff] %v10268_v52 }
 0x1c3   : > { %1295 = vst [vmem:[#allocation1 + $0x2] ss:$9 sm:$0xff] %v10243_v42 }
 0x1c4   : > { %1296 = vst [vmem:[#allocation1 + $0x3] ss:$9 sm:$0xff] %v10246_v43 }
 0x1c5   : > { %1297 = vst [vmem:[#allocation1 + $0x4] ss:$9 sm:$0xff] %v10249_v44 }
 0x1c6   : > { %1298 = vst [vmem:[#allocation1 + $0x5] ss:$9 sm:$0xff] %v10252_v48 }
 0x1c7   : > { %1299 = vst [vmem:[#allocation1 + $0x6] ss:$9 sm:$0xff] %v10256_v49 }
 0x1c8   : > { %1300 = vst [vmem:[#allocation1 + $0x7] ss:$9 sm:$0xff] %v10260_v50 }
 0x1cf   : > { %v10325_v59 = vld [vmem:[#allocation1] sm:$0xff] }
 0x1d0   : > { %1302 = vst [vmem:[#allocation1] ss:$9 sm:$0xff] %v10264_v51 }
 0x1d1   : > { %1303 = vst [vmem:[#allocation1 + $0x1] ss:$9 sm:$0xff] %v10268_v52 }
 0x1d2   : > { %1304 = vst [vmem:[#allocation1 + $0x2] ss:$9 sm:$0xff] %v10243_v42 }
 0x1d3   : > { %1305 = vst [vmem:[#allocation1 + $0x3] ss:$9 sm:$0xff] %v10243_v42 }
 0x1d4   : > { %1306 = vst [vmem:[#allocation1 + $0x4] ss:$9 sm:$0xff] %v10246_v43 }
 0x1d5   : > { %1307 = vst [vmem:[#allocation1 + $0x5] ss:$9 sm:$0xff] %v10249_v44 }
 0x1d6   : > { %1308 = vst [vmem:[#allocation1 + $0x6] ss:$9 sm:$0xff] %v10252_v48 }
 0x1d7   : > { %1309 = vst [vmem:[#allocation1 + $0x7] ss:$9 sm:$0xff] %v10256_v49 }
 0x1de   : > { %v10338_v0 = vld [vmem:[#allocation1] sm:$0xff] }
 0x1df   : > { %1311 = vst [vmem:[#allocation1] ss:$9 sm:$0xff] %v10260_v50 }
 0x1e0   : > { %1312 = vst [vmem:[#allocation1 + $0x1] ss:$9 sm:$0xff] %v10264_v51 }
 0x1e1   : > { %1313 = vst [vmem:[#allocation1 + $0x2] ss:$9 sm:$0xff] %v10268_v52 }
 0x1e2   : > { %1314 = vst [vmem:[#allocation1 + $0x3] ss:$9 sm:$0xff] %v10243_v42 }
 0x1e3   : > { %1315 = vst [vmem:[#allocation1 + $0x4] ss:$9 sm:$0xff] %v10246_v43  ;;  %v1534_v43 = vmax.f32 %v1414_v34, 0.0 }
 0x1e4   : > { %1316 = vst [vmem:[#allocation1 + $0x5] ss:$9 sm:$0xff] %v10249_v44 }
 0x1e5   : > { %1317 = vst [vmem:[#allocation1 + $0x6] ss:$9 sm:$0xff] %v10252_v48  ;;  %v1535_v48 = vmax.f32 %v1415_v35, 0.0 }
 0x1e6   : > { %1318 = vst [vmem:[#allocation1 + $0x7] ss:$9 sm:$0xff] %v10256_v49  ;;  %v1536_v49 = vmax.f32 %v1416_v37, 0.0 }
 0x1ed   : > { %v10352_v7 = vld [vmem:[#allocation1] sm:$0xff] }
 0x1ee   : > { %1320 = vst [vmem:[#allocation1] ss:$9 sm:$0xff] %v10260_v50  ;;  %v1537_v50 = vmax.f32 %v1417_v39, 0.0 }
 0x1ef   : > { %1321 = vst [vmem:[#allocation1 + $0x1] ss:$9 sm:$0xff] %v10264_v51  ;;  %v1376_v51 = vpop.f32.mrf.mxu0 }
 0x1f0   : > { %1322 = vst [vmem:[#allocation1 + $0x2] ss:$9 sm:$0xff] %v10268_v52  ;;  %v1377_v55 = vadd.f32 %v1376_v51, %v10295_v56 }
 0x1f1   : > { %1323 = vst [vmem:[#allocation1 + $0x3] ss:$9 sm:$0xff] %v10243_v42  ;;  %v1418_v42 = vrot.slane %v1374_v32, 6 }
 0x1f2   : > { %v1420_v60 = vrot.slane %v1377_v55, 1  ;;  %v1421_v61 = vrot.slane %v1377_v55, 2  ;;  %v1422_v62 = vrot.slane %v1377_v55, 3  ;;  %v1423_v2 = vrot.slane %v1377_v55, 4 }
 0x1f3   : > { %v1538_v52 = vmax.f32 %v1418_v42, 0.0  ;;  %v1540_v3 = vmax.f32 %v1377_v55, 0.0  ;;  %v1424_v4 = vrot.slane %v1377_v55, 5  ;;  %v1425_v6 = vrot.slane %v1377_v55, 6 }
 0x1f4   : > { %v1541_v5 = vmax.f32 %v1420_v60, 0.0  ;;  %v1542_v9 = vmax.f32 %v1421_v61, 0.0  ;;  %v1426_v11 = vrot.slane %v1377_v55, 7  ;;  %v1543_v12 = vmax.f32 %v1422_v62, 0.0  ;;  %v1385_v62 = vpop.f32.mrf.mxu3 }
 0x1f5   : > { %v1544_v13 = vmax.f32 %v1423_v2, 0.0  ;;  %v1545_v56 = vmax.f32 %v1424_v4, 0.0  ;;  %v1386_v4 = vadd.f32 %v1385_v62, %v10325_v59 }
 0x1f6   : > { %v1547_v16 = vmax.f32 %v1426_v11, 0.0 }
 0x1f7   : > { %v1379_v14 = vpop.f32.mrf.mxu0  ;;  %v1564_v11 = vmax.f32 %v1386_v4, 0.0 }
 0x1f8   : > { %v10360_v22 = vld [vmem:[#allocation1] sm:$0xff] }
 0x1f9   : > { %1678 = vst [vmem:[#allocation1] ss:$9 sm:$0xff] %v1524_v15  ;;  %v1546_v15 = vmax.f32 %v1425_v6, 0.0  ;;  %v1442_v6 = vrot.slane %v1386_v4, 2 }
 0x1fa   : > { %1680 = vst [vmem:[#allocation1 + $0x1] ss:$9 sm:$0xff] %v1525_v17  ;;  %v1380_v17 = vadd.f32 %v1379_v14, %v10305_v57 }
 0x1fb   : > { %1682 = vst [vmem:[#allocation1 + $0x2] ss:$9 sm:$0xff] %v1526_v20  ;;  %v1566_v14 = vmax.f32 %v1442_v6, 0.0 }
 0x1fc   : > { %1684 = vst [vmem:[#allocation1 + $0x3] ss:$9 sm:$0xff] %v1527_v24  ;;  %v1427_v19 = vrot.slane %v1380_v17, 1  ;;  %v1428_v20 = vrot.slane %v1380_v17, 2  ;;  %v1429_v23 = vrot.slane %v1380_v17, 3  ;;  %v1430_v24 = vrot.slane %v1380_v17, 4 }
 0x1fd   : > { %1686 = vst [vmem:[#allocation1 + $0x4] ss:$9 sm:$0xff] %v1528_v25  ;;  %v1548_v25 = vmax.f32 %v1380_v17, 0.0  ;;  %v1433_v33 = vrot.slane %v1380_v17, 7 }
 0x1fe   : > { %1688 = vst [vmem:[#allocation1 + $0x5] ss:$9 sm:$0xff] %v1529_v27  ;;  %v1431_v27 = vrot.slane %v1380_v17, 5  ;;  %v1549_v29 = vmax.f32 %v1427_v19, 0.0  ;;  %v1551_v34 = vmax.f32 %v1429_v23, 0.0  ;;  %v1552_v35 = vmax.f32 %v1430_v24, 0.0 }
 0x1ff   : > { %1690 = vst [vmem:[#allocation1 + $0x6] ss:$9 sm:$0xff] %v1530_v30  ;;  %v1432_v30 = vrot.slane %v1380_v17, 6  ;;  %v1382_v37 = vpop.f32.mrf.mxu0  ;;  %v1555_v39 = vmax.f32 %v1433_v33, 0.0 }
 0x200   : > { %1692 = vst [vmem:[#allocation1 + $0x7] ss:$9 sm:$0xff] %v1531_v31  ;;  %v1550_v31 = vmax.f32 %v1428_v20, 0.0  ;;  %v1553_v57 = vmax.f32 %v1431_v27, 0.0  ;;  %v1388_v20 = vpop.f32.mrf.mxu3 }
 0x207   : > { %v1693_v44 = vld [vmem:[#allocation1] sm:$0xff] }
 0x208   : > { %1694 = vst [vmem:[#allocation1] ss:$9 sm:$0xff] %v1532_v38  ;;  %8558 = vmatmul.msk.f32.vlgmr.msra.gmra.mxu1 %vm1855_vm4, %v1693_v44  ;;  %v1554_v38 = vmax.f32 %v1432_v30, 0.0 }
 0x209   : > { %1695 = vst [vmem:[#allocation1 + $0x1] ss:$9 sm:$0xff] %v1533_v40  ;;  %v1383_v40 = vadd.f32 %v1382_v37, %v10315_v58 }
 0x20a   : > { %1696 = vst [vmem:[#allocation1 + $0x2] ss:$9 sm:$0xff] %v1534_v43 }
 0x20b   : > { %1697 = vst [vmem:[#allocation1 + $0x3] ss:$9 sm:$0xff] %v1535_v48  ;;  %v1434_v42 = vrot.slane %v1383_v40, 1  ;;  %v1435_v43 = vrot.slane %v1383_v40, 2  ;;  %v1436_v44 = vrot.slane %v1383_v40, 3  ;;  %v1437_v47 = vrot.slane %v1383_v40, 4 }
 0x20c   : > { %1698 = vst [vmem:[#allocation1 + $0x4] ss:$9 sm:$0xff] %v1536_v49  ;;  %v1556_v48 = vmax.f32 %v1383_v40, 0.0  ;;  %v1438_v49 = vrot.slane %v1383_v40, 5  ;;  %v1439_v51 = vrot.slane %v1383_v40, 6  ;;  %v1440_v55 = vrot.slane %v1383_v40, 7 }
 0x20d   : > { %1699 = vst [vmem:[#allocation1 + $0x5] ss:$9 sm:$0xff] %v1537_v50  ;;  %v1557_v50 = vmax.f32 %v1434_v42, 0.0  ;;  %v1559_v60 = vmax.f32 %v1436_v44, 0.0  ;;  %v1560_v61 = vmax.f32 %v1437_v47, 0.0  ;;  %v1391_v42 = vpop.f32.mrf.mxu3 }
 0x20e   : > { %1700 = vst [vmem:[#allocation1 + $0x6] ss:$9 sm:$0xff] %v1538_v52  ;;  %v1558_v52 = vmax.f32 %v1435_v43, 0.0  ;;  %v1561_v58 = vmax.f32 %v1438_v49, 0.0  ;;  %v1562_v2 = vmax.f32 %v1439_v51, 0.0  ;;  %v1392_v47 = vadd.f32 %v1391_v42, %v10352_v7 }
 0x20f   : > { %1701 = vst [vmem:[#allocation1 + $0x7] ss:$9 sm:$0xff] %v1539_v53 }
 0x210   : > { %v1456_v49 = vrot.slane %v1392_v47, 2  ;;  %v1458_v51 = vrot.slane %v1392_v47, 4  ;;  %v1461_v62 = vrot.slane %v1392_v47, 7 }
 0x212   : > { %v1587_v6 = vmax.f32 %v1461_v62, 0.0 }
 0x216   : > { %v1702_v10 = vld [vmem:[#allocation1] sm:$0xff] }
 0x217   : > { %1703 = vst [vmem:[#allocation1] ss:$9 sm:$0xff] %v1540_v3  ;;  %8559 = vmatmul.msk.f32.gmra.mxu1 %vm1855_vm4, %v1702_v10  ;;  %v1563_v3 = vmax.f32 %v1440_v55, 0.0  ;;  %v1444_v10 = vrot.slane %v1386_v4, 4  ;;  %v1460_v55 = vrot.slane %v1392_v47, 6 }
 0x218   : > { %1704 = vst [vmem:[#allocation1 + $0x1] ss:$9 sm:$0xff] %v1541_v5  ;;  %v1441_v5 = vrot.slane %v1386_v4, 1 }
 0x219   : > { %1705 = vst [vmem:[#allocation1 + $0x2] ss:$9 sm:$0xff] %v1542_v9  ;;  %v1443_v9 = vrot.slane %v1386_v4, 3  ;;  %v1568_v19 = vmax.f32 %v1444_v10, 0.0 }
 0x21a   : > { %1706 = vst [vmem:[#allocation1 + $0x3] ss:$9 sm:$0xff] %v1543_v12  ;;  %v1445_v12 = vrot.slane %v1386_v4, 5 }
 0x21b   : > { %1707 = vst [vmem:[#allocation1 + $0x4] ss:$9 sm:$0xff] %v1544_v13  ;;  %v1565_v13 = vmax.f32 %v1441_v5, 0.0  ;;  %v1567_v17 = vmax.f32 %v1443_v9, 0.0  ;;  %v1586_v5 = vmax.f32 %v1460_v55, 0.0 }
 0x21c   : > { %1708 = vst [vmem:[#allocation1 + $0x5] ss:$9 sm:$0xff] %v1545_v56  ;;  %v1446_v56 = vrot.slane %v1386_v4, 6  ;;  %v1569_v59 = vmax.f32 %v1445_v12, 0.0 }
 0x21d   : > { %1709 = vst [vmem:[#allocation1 + $0x6] ss:$9 sm:$0xff] %v1546_v15 }
 0x21e   : > { %1710 = vst [vmem:[#allocation1 + $0x7] ss:$9 sm:$0xff] %v1547_v16  ;;  %v1447_v16 = vrot.slane %v1386_v4, 7  ;;  %v1570_v23 = vmax.f32 %v1446_v56, 0.0  ;;  %v1394_v4 = vpop.f32.mrf.mxu3 }
 0x21f   : > { %v1395_v9 = vadd.f32 %v1394_v4, %v10360_v22  ;;  %v10383_v22 = vld [vmem:[%s880_s20] ss:$0 sm:$0xff] }
 0x220   : > { %v1571_v24 = vmax.f32 %v1447_v16, 0.0 }
 0x221   : > { %v1462_v10 = vrot.slane %v1395_v9, 1  ;;  %v1464_v12 = vrot.slane %v1395_v9, 3  ;;  %v1588_v56 = vmax.f32 %v1395_v9, 0.0 }
 0x223   : > { %v1591_v16 = vmax.f32 %v1464_v12, 0.0 }
 0x225   : > { %v1711_v32 = vld [vmem:[#allocation1] sm:$0xff] }
 0x226   : > { %1712 = vst [vmem:[#allocation1] ss:$9 sm:$0xff] %v1548_v25  ;;  %8560 = vmatmul.msk.f32.gmra.mxu1 %vm1855_vm4, %v1711_v32  ;;  %v1389_v25 = vadd.f32 %v1388_v20, %v10338_v0 }
 0x227   : > { %1713 = vst [vmem:[#allocation1 + $0x1] ss:$9 sm:$0xff] %v1549_v29 }
 0x228   : > { %1714 = vst [vmem:[#allocation1 + $0x2] ss:$9 sm:$0xff] %v1550_v31  ;;  %v1448_v27 = vrot.slane %v1389_v25, 1  ;;  %v1449_v29 = vrot.slane %v1389_v25, 2  ;;  %v1450_v30 = vrot.slane %v1389_v25, 3  ;;  %v1451_v31 = vrot.slane %v1389_v25, 4 }
 0x229   : > { %1715 = vst [vmem:[#allocation1 + $0x3] ss:$9 sm:$0xff] %v1551_v34  ;;  %v1452_v32 = vrot.slane %v1389_v25, 5  ;;  %v1453_v34 = vrot.slane %v1389_v25, 6 }
 0x22a   : > { %1716 = vst [vmem:[#allocation1 + $0x4] ss:$9 sm:$0xff] %v1552_v35  ;;  %v1573_v33 = vmax.f32 %v1448_v27, 0.0  ;;  %v1572_v35 = vmax.f32 %v1389_v25, 0.0  ;;  %v1576_v40 = vmax.f32 %v1451_v31, 0.0  ;;  %v10408_v27 = vrot.slane %v10383_v22, 7 }
 0x22b   : > { %1717 = vst [vmem:[#allocation1 + $0x5] ss:$9 sm:$0xff] %v1553_v57  ;;  %v1574_v57 = vmax.f32 %v1449_v29, 0.0  ;;  %v1577_v0 = vmax.f32 %v1452_v32, 0.0  ;;  %v1578_v43 = vmax.f32 %v1453_v34, 0.0 }
 0x22c   : > { %1718 = vst [vmem:[#allocation1 + $0x6] ss:$9 sm:$0xff] %v1554_v38  ;;  %v1454_v38 = vrot.slane %v1389_v25, 7  ;;  %v10404_v25 = vrot.slane %v10383_v22, 6 }
 0x22d   : > { %1719 = vst [vmem:[#allocation1 + $0x7] ss:$9 sm:$0xff] %v1555_v39  ;;  %v1575_v39 = vmax.f32 %v1450_v30, 0.0 }
 0x22e   : > { %v1579_v44 = vmax.f32 %v1454_v38, 0.0 }
 0x234   : > { %v1720_v53 = vld [vmem:[#allocation1] sm:$0xff] }
 0x235   : > { %1721 = vst [vmem:[#allocation1] ss:$9 sm:$0xff] %v1556_v48  ;;  %8561 = vmatmul.msk.f32.gmra.mxu1 %vm1855_vm4, %v1720_v53  ;;  %v1455_v48 = vrot.slane %v1392_v47, 1 }
 0x236   : > { %1722 = vst [vmem:[#allocation1 + $0x1] ss:$9 sm:$0xff] %v1557_v50  ;;  %v1457_v50 = vrot.slane %v1392_v47, 3 }
 0x237   : > { %1723 = vst [vmem:[#allocation1 + $0x2] ss:$9 sm:$0xff] %v1558_v52  ;;  %v1459_v52 = vrot.slane %v1392_v47, 5  ;;  %v1581_v53 = vmax.f32 %v1455_v48, 0.0 }
 0x238   : > { %1724 = vst [vmem:[#allocation1 + $0x3] ss:$9 sm:$0xff] %v1559_v60  ;;  %v1580_v60 = vmax.f32 %v1392_v47, 0.0 }
 0x239   : > { %1725 = vst [vmem:[#allocation1 + $0x4] ss:$9 sm:$0xff] %v1560_v61  ;;  %v1582_v61 = vmax.f32 %v1456_v49, 0.0  ;;  %v1585_v7 = vmax.f32 %v1459_v52, 0.0 }
 0x23a   : > { %1726 = vst [vmem:[#allocation1 + $0x5] ss:$9 sm:$0xff] %v1561_v58 }
 0x23b   : > { %1727 = vst [vmem:[#allocation1 + $0x6] ss:$9 sm:$0xff] %v1562_v2  ;;  %v1583_v2 = vmax.f32 %v1457_v50, 0.0 }
 0x23c   : > { %1728 = vst [vmem:[#allocation1 + $0x7] ss:$9 sm:$0xff] %v1563_v3  ;;  %v1584_v3 = vmax.f32 %v1458_v51, 0.0 }
 0x243   : > { %v1729_v15 = vld [vmem:[#allocation1] sm:$0xff] }
 0x244   : > { %1730 = vst [vmem:[#allocation1] ss:$9 sm:$0xff] %v1564_v11  ;;  %8562 = vmatmul.msk.f32.vlgmr.msra.gmra.mxu2 %vm1855_vm4, %v1729_v15  ;;  %v1463_v11 = vrot.slane %v1395_v9, 2 }
 0x245   : > { %1731 = vst [vmem:[#allocation1 + $0x1] ss:$9 sm:$0xff] %v1565_v13  ;;  %v1589_v13 = vmax.f32 %v1462_v10, 0.0 }
 0x246   : > { %1732 = vst [vmem:[#allocation1 + $0x2] ss:$9 sm:$0xff] %v1566_v14  ;;  %v1590_v14 = vmax.f32 %v1463_v11, 0.0 }
 0x247   : > { %1733 = vst [vmem:[#allocation1 + $0x3] ss:$9 sm:$0xff] %v1567_v17  ;;  %v10386_v17 = vrot.slane %v10383_v22, 1 }
 0x248   : > { %1734 = vst [vmem:[#allocation1 + $0x4] ss:$9 sm:$0xff] %v1568_v19  ;;  %v10389_v19 = vrot.slane %v10383_v22, 2 }
 0x249   : > { %1735 = vst [vmem:[#allocation1 + $0x5] ss:$9 sm:$0xff] %v1569_v59  ;;  %v10392_v59 = vrot.slane %v10383_v22, 3 }
 0x24a   : > { %1736 = vst [vmem:[#allocation1 + $0x6] ss:$9 sm:$0xff] %v1570_v23  ;;  %v10395_v23 = vrot.slane %v10383_v22, 4 }
 0x24b   : > { %1737 = vst [vmem:[#allocation1 + $0x7] ss:$9 sm:$0xff] %v1571_v24  ;;  %v10400_v24 = vrot.slane %v10383_v22, 5 }
 0x252   : > { %v1738_v37 = vld [vmem:[#allocation1] sm:$0xff] }
 0x253   : > { %1739 = vst [vmem:[#allocation1] ss:$9 sm:$0xff] %v1572_v35  ;;  %8563 = vmatmul.msk.f32.gmra.mxu2 %vm1855_vm4, %v1738_v37 }
 0x254   : > { %1740 = vst [vmem:[#allocation1 + $0x1] ss:$9 sm:$0xff] %v1573_v33 }
 0x255   : > { %1741 = vst [vmem:[#allocation1 + $0x2] ss:$9 sm:$0xff] %v1574_v57 }
 0x256   : > { %1742 = vst [vmem:[#allocation1 + $0x3] ss:$9 sm:$0xff] %v1575_v39 }
 0x257   : > { %1743 = vst [vmem:[#allocation1 + $0x4] ss:$9 sm:$0xff] %v1576_v40 }
 0x258   : > { %1744 = vst [vmem:[#allocation1 + $0x5] ss:$9 sm:$0xff] %v1577_v0 }
 0x259   : > { %1745 = vst [vmem:[#allocation1 + $0x6] ss:$9 sm:$0xff] %v1578_v43 }
 0x25a   : > { %1746 = vst [vmem:[#allocation1 + $0x7] ss:$9 sm:$0xff] %v1579_v44 }
 0x261   : > { %v1747_v58 = vld [vmem:[#allocation1] sm:$0xff] }
 0x262   : > { %1748 = vst [vmem:[#allocation1] ss:$9 sm:$0xff] %v1580_v60  ;;  %8564 = vmatmul.msk.f32.gmra.mxu2 %vm1855_vm4, %v1747_v58 }
 0x263   : > { %1749 = vst [vmem:[#allocation1 + $0x1] ss:$9 sm:$0xff] %v1581_v53 }
 0x264   : > { %1750 = vst [vmem:[#allocation1 + $0x2] ss:$9 sm:$0xff] %v1582_v61 }
 0x265   : > { %1751 = vst [vmem:[#allocation1 + $0x3] ss:$9 sm:$0xff] %v1583_v2 }
 0x266   : > { %1752 = vst [vmem:[#allocation1 + $0x4] ss:$9 sm:$0xff] %v1584_v3 }
 0x267   : > { %1753 = vst [vmem:[#allocation1 + $0x5] ss:$9 sm:$0xff] %v1585_v7 }
 0x268   : > { %1754 = vst [vmem:[#allocation1 + $0x6] ss:$9 sm:$0xff] %v1586_v5 }
 0x269   : > { %1755 = vst [vmem:[#allocation1 + $0x7] ss:$9 sm:$0xff] %v1587_v6 }
 0x270   : > { %v1756_v15 = vld [vmem:[#allocation1] sm:$0xff] }
 0x271   : > { %1757 = vst [vmem:[#allocation1] ss:$9 sm:$0xff] %v1588_v56  ;;  %8565 = vmatmul.msk.f32.gmra.mxu2 %vm1855_vm4, %v1756_v15 }
 0x272   : > { %1758 = vst [vmem:[#allocation1 + $0x1] ss:$9 sm:$0xff] %v1589_v13 }
 0x273   : > { %1759 = vst [vmem:[#allocation1 + $0x2] ss:$9 sm:$0xff] %v1590_v14 }
 0x274   : > { %1760 = vst [vmem:[#allocation1 + $0x3] ss:$9 sm:$0xff] %v1591_v16 }
 0x27b   : > { %v1761_v20 = vld [vmem:[#allocation1] sm:$0xff] }
 0x27c   : > { %1762 = vst [vmem:[#allocation1] ss:$9 sm:$0xff] %v10383_v22  ;;  %8566 = vmatmul.msk.f32.vlgmr.msrb.gmra.mxu3 %vm1855_vm4, %v1761_v20 }
 0x27d   : > { %1764 = vst [vmem:[#allocation1 + $0x1] ss:$9 sm:$0xff] %v10386_v17 }
 0x27e   : > { %1766 = vst [vmem:[#allocation1 + $0x2] ss:$9 sm:$0xff] %v10389_v19 }
 0x27f   : > { %1768 = vst [vmem:[#allocation1 + $0x3] ss:$9 sm:$0xff] %v10392_v59 }
 0x280   : > { %1770 = vst [vmem:[#allocation1 + $0x4] ss:$9 sm:$0xff] %v10395_v23 }
 0x281   : > { %1772 = vst [vmem:[#allocation1 + $0x5] ss:$9 sm:$0xff] %v10400_v24 }
 0x282   : > { %1774 = vst [vmem:[#allocation1 + $0x6] ss:$9 sm:$0xff] %v10404_v25 }
 0x283   : > { %1776 = vst [vmem:[#allocation1 + $0x7] ss:$9 sm:$0xff] %v10408_v27 }
 0x285   : > { %v1891_v37 = vpop.f32.mrf.mxu1 }
 0x28a   : > { %v10415_v29 = vld [vmem:[#allocation1] sm:$0xff] }
 0x28b   : > { %1778 = vst [vmem:[#allocation1] ss:$9 sm:$0xff] %v10383_v22  ;;  %v1892_v38 = vadd.f32 %v1891_v37, %v10415_v29 }
 0x28c   : > { %1779 = vst [vmem:[#allocation1 + $0x1] ss:$9 sm:$0xff] %v10386_v17 }
 0x28d   : > { %1780 = vst [vmem:[#allocation1 + $0x2] ss:$9 sm:$0xff] %v10389_v19  ;;  %v1927_v40 = vrot.slane %v1892_v38, 1  ;;  %v1928_v0 = vrot.slane %v1892_v38, 2  ;;  %v1929_v42 = vrot.slane %v1892_v38, 3  ;;  %v1930_v43 = vrot.slane %v1892_v38, 4 }
 0x28e   : > { %1781 = vst [vmem:[#allocation1 + $0x3] ss:$9 sm:$0xff] %v10392_v59  ;;  %v1931_v44 = vrot.slane %v1892_v38, 5  ;;  %v1932_v47 = vrot.slane %v1892_v38, 6  ;;  %v1933_v48 = vrot.slane %v1892_v38, 7 }
 0x28f   : > { %1782 = vst [vmem:[#allocation1 + $0x4] ss:$9 sm:$0xff] %v10395_v23 }
 0x290   : > { %1783 = vst [vmem:[#allocation1 + $0x5] ss:$9 sm:$0xff] %v10400_v24 }
 0x291   : > { %1784 = vst [vmem:[#allocation1 + $0x6] ss:$9 sm:$0xff] %v10404_v25 }
 0x292   : > { %1785 = vst [vmem:[#allocation1 + $0x7] ss:$9 sm:$0xff] %v10408_v27 }
 0x294   : > { %v1894_v49 = vpop.f32.mrf.mxu1 }
 0x299   : > { %v10425_v30 = vld [vmem:[#allocation1] sm:$0xff] }
 0x29a   : > { %1787 = vst [vmem:[#allocation1] ss:$9 sm:$0xff] %v10383_v22  ;;  %v1895_v50 = vadd.f32 %v1894_v49, %v10425_v30 }
 0x29b   : > { %1788 = vst [vmem:[#allocation1 + $0x1] ss:$9 sm:$0xff] %v10383_v22 }
 0x29c   : > { %1789 = vst [vmem:[#allocation1 + $0x2] ss:$9 sm:$0xff] %v10386_v17  ;;  %v1934_v52 = vrot.slane %v1895_v50, 1  ;;  %v1935_v55 = vrot.slane %v1895_v50, 2  ;;  %v1936_v60 = vrot.slane %v1895_v50, 3  ;;  %v1937_v61 = vrot.slane %v1895_v50, 4 }
 0x29d   : > { %1790 = vst [vmem:[#allocation1 + $0x3] ss:$9 sm:$0xff] %v10389_v19  ;;  %v1938_v58 = vrot.slane %v1895_v50, 5  ;;  %v1939_v62 = vrot.slane %v1895_v50, 6  ;;  %v1940_v2 = vrot.slane %v1895_v50, 7 }
 0x29e   : > { %1791 = vst [vmem:[#allocation1 + $0x4] ss:$9 sm:$0xff] %v10392_v59 }
 0x29f   : > { %1792 = vst [vmem:[#allocation1 + $0x5] ss:$9 sm:$0xff] %v10395_v23 }
 0x2a0   : > { %1793 = vst [vmem:[#allocation1 + $0x6] ss:$9 sm:$0xff] %v10400_v24 }
 0x2a1   : > { %1794 = vst [vmem:[#allocation1 + $0x7] ss:$9 sm:$0xff] %v10404_v25 }
 0x2a3   : > { %v1897_v3 = vpop.f32.mrf.mxu1 }
 0x2a8   : > { %v10435_v31 = vld [vmem:[#allocation1] sm:$0xff] }
 0x2a9   : > { %1796 = vst [vmem:[#allocation1] ss:$9 sm:$0xff] %v10408_v27 }
 0x2aa   : > { %1797 = vst [vmem:[#allocation1 + $0x1] ss:$9 sm:$0xff] %v10383_v22 }
 0x2ab   : > { %1798 = vst [vmem:[#allocation1 + $0x2] ss:$9 sm:$0xff] %v10386_v17 }
 0x2ac   : > { %1799 = vst [vmem:[#allocation1 + $0x3] ss:$9 sm:$0xff] %v10389_v19 }
 0x2ad   : > { %1800 = vst [vmem:[#allocation1 + $0x4] ss:$9 sm:$0xff] %v10392_v59 }
 0x2ae   : > { %1801 = vst [vmem:[#allocation1 + $0x5] ss:$9 sm:$0xff] %v10395_v23 }
 0x2af   : > { %1802 = vst [vmem:[#allocation1 + $0x6] ss:$9 sm:$0xff] %v10400_v24 }
 0x2b0   : > { %1803 = vst [vmem:[#allocation1 + $0x7] ss:$9 sm:$0xff] %v10404_v25 }
 0x2b2   : > { %v1900_v13 = vpop.f32.mrf.mxu1 }
 0x2b7   : > { %v10445_v32 = vld [vmem:[#allocation1] sm:$0xff] }
 0x2b8   : > { %1805 = vst [vmem:[#allocation1] ss:$9 sm:$0xff] %v10408_v27  ;;  %v1901_v15 = vadd.f32 %v1900_v13, %v10445_v32 }
 0x2b9   : > { %1806 = vst [vmem:[#allocation1 + $0x1] ss:$9 sm:$0xff] %v10383_v22 }
 0x2ba   : > { %1807 = vst [vmem:[#allocation1 + $0x2] ss:$9 sm:$0xff] %v10383_v22  ;;  %v1948_v16 = vrot.slane %v1901_v15, 1  ;;  %v1952_v20 = vrot.slane %v1901_v15, 5 }
 0x2bb   : > { %1808 = vst [vmem:[#allocation1 + $0x3] ss:$9 sm:$0xff] %v10386_v17 }
 0x2bc   : > { %1809 = vst [vmem:[#allocation1 + $0x4] ss:$9 sm:$0xff] %v10389_v19 }
 0x2bd   : > { %1810 = vst [vmem:[#allocation1 + $0x5] ss:$9 sm:$0xff] %v10392_v59 }
 0x2be   : > { %1811 = vst [vmem:[#allocation1 + $0x6] ss:$9 sm:$0xff] %v10395_v23 }
 0x2bf   : > { %1812 = vst [vmem:[#allocation1 + $0x7] ss:$9 sm:$0xff] %v10400_v24 }
 0x2c6   : > { %v10455_v33 = vld [vmem:[#allocation1] sm:$0xff] }
 0x2c7   : > { %1814 = vst [vmem:[#allocation1] ss:$9 sm:$0xff] %v10404_v25 }
 0x2c8   : > { %1815 = vst [vmem:[#allocation1 + $0x1] ss:$9 sm:$0xff] %v10408_v27 }
 0x2c9   : > { %1816 = vst [vmem:[#allocation1 + $0x2] ss:$9 sm:$0xff] %v10383_v22 }
 0x2ca   : > { %1817 = vst [vmem:[#allocation1 + $0x3] ss:$9 sm:$0xff] %v10386_v17 }
 0x2cb   : > { %1818 = vst [vmem:[#allocation1 + $0x4] ss:$9 sm:$0xff] %v10389_v19 }
 0x2cc   : > { %1819 = vst [vmem:[#allocation1 + $0x5] ss:$9 sm:$0xff] %v10392_v59 }
 0x2cd   : > { %1820 = vst [vmem:[#allocation1 + $0x6] ss:$9 sm:$0xff] %v10395_v23 }
 0x2ce   : > { %1821 = vst [vmem:[#allocation1 + $0x7] ss:$9 sm:$0xff] %v10400_v24 }
 0x2d5   : > { %v10465_v34 = vld [vmem:[#allocation1] sm:$0xff] }
 0x2d6   : > { %1823 = vst [vmem:[#allocation1] ss:$9 sm:$0xff] %v10404_v25 }
 0x2d7   : > { %1824 = vst [vmem:[#allocation1 + $0x1] ss:$9 sm:$0xff] %v10408_v27 }
 0x2d8   : > { %1825 = vst [vmem:[#allocation1 + $0x2] ss:$9 sm:$0xff] %v10383_v22 }
 0x2d9   : > { %1826 = vst [vmem:[#allocation1 + $0x3] ss:$9 sm:$0xff] %v10383_v22 }
 0x2da   : > { %1827 = vst [vmem:[#allocation1 + $0x4] ss:$9 sm:$0xff] %v10386_v17 }
 0x2db   : > { %1828 = vst [vmem:[#allocation1 + $0x5] ss:$9 sm:$0xff] %v10389_v19 }
 0x2dc   : > { %1829 = vst [vmem:[#allocation1 + $0x6] ss:$9 sm:$0xff] %v10392_v59 }
 0x2dd   : > { %1830 = vst [vmem:[#allocation1 + $0x7] ss:$9 sm:$0xff] %v10395_v23 }
 0x2e4   : > { %v10475_v35 = vld [vmem:[#allocation1] sm:$0xff] }
 0x2e5   : > { %1832 = vst [vmem:[#allocation1] ss:$9 sm:$0xff] %v10400_v24 }
 0x2e6   : > { %1833 = vst [vmem:[#allocation1 + $0x1] ss:$9 sm:$0xff] %v10404_v25 }
 0x2e7   : > { %1834 = vst [vmem:[#allocation1 + $0x2] ss:$9 sm:$0xff] %v10408_v27 }
 0x2e8   : > { %1835 = vst [vmem:[#allocation1 + $0x3] ss:$9 sm:$0xff] %v10383_v22 }
 0x2e9   : > { %1836 = vst [vmem:[#allocation1 + $0x4] ss:$9 sm:$0xff] %v10386_v17 }
 0x2ea   : > { %1837 = vst [vmem:[#allocation1 + $0x5] ss:$9 sm:$0xff] %v10389_v19  ;;  %v1950_v19 = vrot.slane %v1901_v15, 3 }
 0x2eb   : > { %1838 = vst [vmem:[#allocation1 + $0x6] ss:$9 sm:$0xff] %v10392_v59  ;;  %v1951_v59 = vrot.slane %v1901_v15, 4 }
 0x2ec   : > { %1839 = vst [vmem:[#allocation1 + $0x7] ss:$9 sm:$0xff] %v10395_v23 }
 0x2f3   : > { %v10485_v57 = vld [vmem:[#allocation1] sm:$0xff] }
 0x2f4   : > { %1841 = vst [vmem:[#allocation1] ss:$9 sm:$0xff] %v10400_v24  ;;  %v1903_v24 = vpop.f32.mrf.mxu2 }
 0x2f5   : > { %1842 = vst [vmem:[#allocation1 + $0x1] ss:$9 sm:$0xff] %v10404_v25  ;;  %v1954_v25 = vrot.slane %v1901_v15, 7 }
 0x2f6   : > { %1843 = vst [vmem:[#allocation1 + $0x2] ss:$9 sm:$0xff] %v10408_v27  ;;  %v1904_v27 = vadd.f32 %v1903_v24, %v10455_v33 }
 0x2f7   : > { %1844 = vst [vmem:[#allocation1 + $0x3] ss:$9 sm:$0xff] %v10383_v22  ;;  %v1949_v22 = vrot.slane %v1901_v15, 2 }
 0x2f8   : > { %v1955_v29 = vrot.slane %v1904_v27, 1  ;;  %v1957_v37 = vrot.slane %v1904_v27, 3  ;;  %v1959_v33 = vrot.slane %v1904_v27, 5 }
 0x2fc   : > { %v1906_v32 = vpop.f32.mrf.mxu2 }
 0x2fe   : > { %v10492_v39 = vld [vmem:[#allocation1] sm:$0xff] }
 0x2ff   : > { %1986 = vst [vmem:[#allocation1] ss:$9 sm:$0xff] %v1892_v38  ;;  %v1915_v13 = vpop.f32.mrf.mxu3 }
 0x300   : > { %1988 = vst [vmem:[#allocation1 + $0x1] ss:$9 sm:$0xff] %v1927_v40  ;;  %v1958_v40 = vrot.slane %v1904_v27, 4 }
 0x301   : > { %1990 = vst [vmem:[#allocation1 + $0x2] ss:$9 sm:$0xff] %v1928_v0  ;;  %v1907_v0 = vadd.f32 %v1906_v32, %v10465_v34 }
 0x302   : > { %1992 = vst [vmem:[#allocation1 + $0x3] ss:$9 sm:$0xff] %v1929_v42  ;;  %v1960_v42 = vrot.slane %v1904_v27, 6 }
 0x303   : > { %1994 = vst [vmem:[#allocation1 + $0x4] ss:$9 sm:$0xff] %v1930_v43  ;;  %v1961_v43 = vrot.slane %v1904_v27, 7  ;;  %v1965_v34 = vrot.slane %v1907_v0, 4 }
 0x304   : > { %1996 = vst [vmem:[#allocation1 + $0x5] ss:$9 sm:$0xff] %v1931_v44  ;;  %v1962_v44 = vrot.slane %v1907_v0, 1 }
 0x305   : > { %1998 = vst [vmem:[#allocation1 + $0x6] ss:$9 sm:$0xff] %v1932_v47  ;;  %v1963_v47 = vrot.slane %v1907_v0, 2 }
 0x306   : > { %2000 = vst [vmem:[#allocation1 + $0x7] ss:$9 sm:$0xff] %v1933_v48  ;;  %v1964_v48 = vrot.slane %v1907_v0, 3 }
 0x30d   : > { %v2001_v51 = vld [vmem:[#allocation1] sm:$0xff] }
 0x30e   : > { %v10496_v53 = vadd.f32 %v2001_v51, %v10136_v26  ;;  %2002 = vst [vmem:[#allocation1] ss:$9 sm:$0xff] %v1895_v50  ;;  %v1898_v26 = vadd.f32 %v1897_v3, %v10435_v31  ;;  %v1909_v50 = vpop.f32.mrf.mxu2  ;;  %v1966_v51 = vrot.slane %v1907_v0, 5 }
 0x30f   : > { %2003 = vst [vmem:[#allocation1 + $0x1] ss:$9 sm:$0xff] %v1934_v52  ;;  %v1967_v52 = vrot.slane %v1907_v0, 6 }
 0x310   : > { %2097 = vst.msk [vmem:[#allocation2] sm:$0xff] %vm13031_vm3, %v10496_v53  ;;  %v1941_v5 = vrot.slane %v1898_v26, 1  ;;  %v1942_v6 = vrot.slane %v1898_v26, 2  ;;  %v1943_v10 = vrot.slane %v1898_v26, 3  ;;  %v1944_v11 = vrot.slane %v1898_v26, 4 }
 0x311   : > { %2004 = vst [vmem:[#allocation1 + $0x2] ss:$9 sm:$0xff] %v1935_v55  ;;  %v1945_v12 = vrot.slane %v1898_v26, 5  ;;  %v1946_v56 = vrot.slane %v1898_v26, 6  ;;  %v1947_v14 = vrot.slane %v1898_v26, 7  ;;  %v1910_v55 = vadd.f32 %v1909_v50, %v10475_v35 }
 0x312   : > { %2005 = vst [vmem:[#allocation1 + $0x3] ss:$9 sm:$0xff] %v1936_v60  ;;  %v1968_v60 = vrot.slane %v1907_v0, 7 }
 0x313   : > { %2006 = vst [vmem:[#allocation1 + $0x4] ss:$9 sm:$0xff] %v1937_v61  ;;  %v1969_v61 = vrot.slane %v1910_v55, 1  ;;  %v1972_v35 = vrot.slane %v1910_v55, 4 }
 0x314   : > { %2007 = vst [vmem:[#allocation1 + $0x5] ss:$9 sm:$0xff] %v1938_v58  ;;  %v1970_v58 = vrot.slane %v1910_v55, 2 }
 0x315   : > { %2008 = vst [vmem:[#allocation1 + $0x6] ss:$9 sm:$0xff] %v1939_v62 }
 0x316   : > { %2009 = vst [vmem:[#allocation1 + $0x7] ss:$9 sm:$0xff] %v1940_v2  ;;  %v1912_v3 = vpop.f32.mrf.mxu2 }
 0x31d   : > { %v2010_v7 = vld [vmem:[#allocation1] sm:$0xff] }
 0x31e   : > { %v10502_v4 = vadd.f32 %v2010_v7, %v10148_v36  ;;  %2011 = vst [vmem:[#allocation1] ss:$9 sm:$0xff] %v1898_v26  ;;  %v1973_v7 = vrot.slane %v1910_v55, 5 }
 0x320   : > { %2098 = vst.msk [vmem:[#allocation2 + $0x8] sm:$0xff] %vm13031_vm3, %v10502_v4 }
 0x325   : > { %v2012_v9 = vld [vmem:[#allocation1] sm:$0xff] }
 0x326   : > { %2013 = vst [vmem:[#allocation1] ss:$9 sm:$0xff] %v1941_v5  ;;  %v10507_v36 = vadd.f32 %v2012_v9, %v10161_v46  ;;  %v1953_v46 = vrot.slane %v1901_v15, 6  ;;  %v1974_v5 = vrot.slane %v1910_v55, 6  ;;  %v1913_v9 = vadd.f32 %v1912_v3, %v10485_v57 }
 0x327   : > { %2014 = vst [vmem:[#allocation1 + $0x1] ss:$9 sm:$0xff] %v1942_v6 }
 0x328   : > { %2015 = vst [vmem:[#allocation1 + $0x2] ss:$9 sm:$0xff] %v1943_v10  ;;  %v1975_v10 = vrot.slane %v1910_v55, 7 }
 0x329   : > { %2016 = vst [vmem:[#allocation1 + $0x3] ss:$9 sm:$0xff] %v1944_v11  ;;  %v1977_v11 = vrot.slane %v1913_v9, 2 }
 0x32a   : > { %2017 = vst [vmem:[#allocation1 + $0x4] ss:$9 sm:$0xff] %v1945_v12  ;;  %v1978_v12 = vrot.slane %v1913_v9, 3 }
 0x32b   : > { %2018 = vst [vmem:[#allocation1 + $0x5] ss:$9 sm:$0xff] %v1946_v56  ;;  %v1979_v56 = vrot.slane %v1913_v9, 4 }
 0x32c   : > { %2019 = vst [vmem:[#allocation1 + $0x6] ss:$9 sm:$0xff] %v1947_v14 }
 0x32d   : > { %2020 = vst [vmem:[#allocation1 + $0x7] ss:$9 sm:$0xff] %v1901_v15  ;;  %v1980_v15 = vrot.slane %v1913_v9, 5 }
 0x32e   : > { %2100 = vst.msk [vmem:[#allocation2 + $0x10] sm:$0x1] %vm2099_vm5, %v10507_v36 }
 0x334   : > { %v2021_v17 = vld [vmem:[#allocation1] sm:$0xff] }
 0x335   : > { %2022 = vst [vmem:[#allocation1] ss:$9 sm:$0xff] %v1948_v16  ;;  %v10513_v23 = vadd.f32 %v2021_v17, %v10159_v45  ;;  %v1956_v45 = vrot.slane %v1904_v27, 2  ;;  %v1916_v16 = vadd.f32 %v1915_v13, %v10492_v39 }
 0x336   : > { %2023 = vst [vmem:[#allocation1 + $0x1] ss:$9 sm:$0xff] %v1949_v22  ;;  %v1982_v22 = vrot.slane %v1913_v9, 7 }
 0x337   : > { %2024 = vst [vmem:[#allocation1 + $0x2] ss:$9 sm:$0xff] %v1950_v19  ;;  %v1983_v17 = vrot.slane %v1916_v16, 1  ;;  %v1984_v19 = vrot.slane %v1916_v16, 2 }
 0x338   : > { %2025 = vst [vmem:[#allocation1 + $0x3] ss:$9 sm:$0xff] %v1951_v59  ;;  %v1985_v59 = vrot.slane %v1916_v16, 3 }
 0x339   : > { %2026 = vst [vmem:[#allocation1 + $0x4] ss:$9 sm:$0xff] %v1952_v20 }
 0x33a   : > { %2027 = vst [vmem:[#allocation1 + $0x5] ss:$9 sm:$0xff] %v1953_v46 }
 0x33b   : > { %2028 = vst [vmem:[#allocation1 + $0x6] ss:$9 sm:$0xff] %v1954_v25 }
 0x33c   : > { %2101 = vst.msk [vmem:[#allocation2 + $0x18] sm:$0xff] %vm13031_vm3, %v10513_v23 }
 0x33d   : > { %2029 = vst [vmem:[#allocation1 + $0x7] ss:$9 sm:$0xff] %v1904_v27 }
 0x344   : > { %v2030_v30 = vld [vmem:[#allocation1] sm:$0xff] }
 0x345   : > { %2031 = vst [vmem:[#allocation1] ss:$9 sm:$0xff] %v1955_v29  ;;  %v10519_v31 = vadd.f32 %v2030_v30, %v10172_v54 }
 0x347   : > { %2102 = vst.msk [vmem:[#allocation2 + $0x20] sm:$0xff] %vm13031_vm3, %v10519_v31 }
 0x34c   : > { %v2032_v38 = vld [vmem:[#allocation1] sm:$0xff] }
 0x34d   : > { %2033 = vst [vmem:[#allocation1] ss:$9 sm:$0xff] %v1956_v45  ;;  %v10525_v54 = vadd.f32 %v2032_v38, %v10186_v1 }
 0x34e   : > { %2034 = vst [vmem:[#allocation1 + $0x1] ss:$9 sm:$0xff] %v1957_v37 }
 0x34f   : > { %2035 = vst [vmem:[#allocation1 + $0x2] ss:$9 sm:$0xff] %v1958_v40 }
 0x350   : > { %2036 = vst [vmem:[#allocation1 + $0x3] ss:$9 sm:$0xff] %v1959_v33 }
 0x351   : > { %2037 = vst [vmem:[#allocation1 + $0x4] ss:$9 sm:$0xff] %v1960_v42 }
 0x352   : > { %2038 = vst [vmem:[#allocation1 + $0x5] ss:$9 sm:$0xff] %v1961_v43 }
 0x353   : > { %2039 = vst [vmem:[#allocation1 + $0x6] ss:$9 sm:$0xff] %v1907_v0 }
 0x354   : > { %2040 = vst [vmem:[#allocation1 + $0x7] ss:$9 sm:$0xff] %v1962_v44 }
 0x355   : > { %2103 = vst.msk [vmem:[#allocation2 + $0x28] sm:$0x1] %vm2099_vm5, %v10525_v54 }
 0x35b   : > { %v2041_v49 = vld [vmem:[#allocation1] sm:$0xff] }
 0x35c   : > { %2042 = vst [vmem:[#allocation1] ss:$9 sm:$0xff] %v1963_v47  ;;  %v10530_v1 = vadd.f32 %v2041_v49, %v10183_v63  ;;  %v1971_v63 = vrot.slane %v1910_v55, 3 }
 0x35d   : > { %2043 = vst [vmem:[#allocation1 + $0x1] ss:$9 sm:$0xff] %v1964_v48 }
 0x35e   : > { %2044 = vst [vmem:[#allocation1 + $0x2] ss:$9 sm:$0xff] %v1965_v34 }
 0x35f   : > { %2045 = vst [vmem:[#allocation1 + $0x3] ss:$9 sm:$0xff] %v1966_v51 }
 0x360   : > { %2046 = vst [vmem:[#allocation1 + $0x4] ss:$9 sm:$0xff] %v1967_v52 }
 0x361   : > { %2047 = vst [vmem:[#allocation1 + $0x5] ss:$9 sm:$0xff] %v1968_v60 }
 0x362   : > { %2104 = vst.msk [vmem:[#allocation2 + $0x30] sm:$0xff] %vm13031_vm3, %v10530_v1 }
 0x363   : > { %2048 = vst [vmem:[#allocation1 + $0x6] ss:$9 sm:$0xff] %v1910_v55 }
 0x364   : > { %2049 = vst [vmem:[#allocation1 + $0x7] ss:$9 sm:$0xff] %v1969_v61 }
 0x36b   : > { %v2050_v62 = vld [vmem:[#allocation1] sm:$0xff] }
 0x36c   : > { %2051 = vst [vmem:[#allocation1] ss:$9 sm:$0xff] %v1970_v58  ;;  %v2092_v2 = vadd.f32 %v2050_v62, %v10196_v8  ;;  %v1976_v8 = vrot.slane %v1913_v9, 1 }
 0x36e   : > { %2105 = vst.msk [vmem:[#allocation2 + $0x38] sm:$0xff] %vm13031_vm3, %v2092_v2 }
 0x373   : > { %v2052_v26 = vld [vmem:[#allocation1] sm:$0xff] }
 0x374   : > { %2053 = vst [vmem:[#allocation1] ss:$9 sm:$0xff] %v1971_v63  ;;  %v2093_v6 = vadd.f32 %v2052_v26, %v10211_v21  ;;  %v1981_v21 = vrot.slane %v1913_v9, 6 }
 0x375   : > { %2054 = vst [vmem:[#allocation1 + $0x1] ss:$9 sm:$0xff] %v1972_v35 }
 0x376   : > { %2055 = vst [vmem:[#allocation1 + $0x2] ss:$9 sm:$0xff] %v1973_v7 }
 0x377   : > { %2056 = vst [vmem:[#allocation1 + $0x3] ss:$9 sm:$0xff] %v1974_v5 }
 0x378   : > { %2057 = vst [vmem:[#allocation1 + $0x4] ss:$9 sm:$0xff] %v1975_v10 }
 0x379   : > { %2106 = vst.msk [vmem:[#allocation2 + $0x40] sm:$0x1] %vm2099_vm5, %v2093_v6 }
 0x37a   : > { %2058 = vst [vmem:[#allocation1 + $0x5] ss:$9 sm:$0xff] %v1913_v9 }
 0x37b   : > { %2059 = vst [vmem:[#allocation1 + $0x6] ss:$9 sm:$0xff] %v1976_v8 }
 0x37c   : > { %2060 = vst [vmem:[#allocation1 + $0x7] ss:$9 sm:$0xff] %v1977_v11 }
 0x383   : > { %v2061_v14 = vld [vmem:[#allocation1] sm:$0xff] }
 0x384   : > { %2062 = vst [vmem:[#allocation1] ss:$9 sm:$0xff] %v1978_v12  ;;  %v10541_v57 = vadd.f32 %v2061_v14, %v10208_v18 }
 0x385   : > { %2063 = vst [vmem:[#allocation1 + $0x1] ss:$9 sm:$0xff] %v1979_v56 }
 0x386   : > { %2064 = vst [vmem:[#allocation1 + $0x2] ss:$9 sm:$0xff] %v1980_v15 }
 0x387   : > { %2065 = vst [vmem:[#allocation1 + $0x3] ss:$9 sm:$0xff] %v1981_v21 }
 0x388   : > { %2066 = vst [vmem:[#allocation1 + $0x4] ss:$9 sm:$0xff] %v1982_v22 }
 0x389   : > { %2107 = vst.msk [vmem:[#allocation2 + $0x48] sm:$0xff] %vm13031_vm3, %v10541_v57 }
 0x38a   : > { %2067 = vst [vmem:[#allocation1 + $0x5] ss:$9 sm:$0xff] %v1916_v16 }
 0x38b   : > { %2068 = vst [vmem:[#allocation1 + $0x6] ss:$9 sm:$0xff] %v1983_v17 }
 0x38c   : > { %2069 = vst [vmem:[#allocation1 + $0x7] ss:$9 sm:$0xff] %v1984_v19 }
 0x393   : > { %v2070_v20 = vld [vmem:[#allocation1] sm:$0xff] }
 0x394   : > { %2071 = vst [vmem:[#allocation1] ss:$9 sm:$0xff] %v1985_v59  ;;  %v2095_v18 = vadd.f32 %v2070_v20, %v10221_v28 }
 0x396   : > { %2108 = vst.msk [vmem:[#allocation2 + $0x50] sm:$0xff] %vm13031_vm3, %v2095_v18 }
 0x39a   : > { %2113 = sbr.rel (%p8567_p5) target bundleno = 1121 (0x461), region = 136 }
 0x39b   : > { %v2072_v39 = vld [vmem:[#allocation1] sm:$0xff] }
 0x39c   : > { %v2096_v46 = vadd.f32 %v2072_v39, %v10235_v41 }
 0x39e   : > { %2109 = vst.msk [vmem:[#allocation2 + $0x58] sm:$0x1] %vm2099_vm5, %v2096_v46 }
 0x39f   : > { %vm2120_vm6 = vcmask 1046528   ;;  %v2126_v24 = vrot.slane %v10513_v23, 1  ;;  %v2127_v25 = vrot.slane %v10519_v31, 1  ;;  %v2121_v27 = vrot.slane %v10496_v53, 1 }
 0x3a0   : > { %v2122_v29 = vrot.slane %v10502_v4, 1  ;;  %v2129_v41 = vrot.slane %v10525_v54, 1  ;;  %v2124_v45 = vrot.slane %v10507_v36, 1  ;;  %vm2199_vm7 = vcmask 130048  }
 0x3a1   : > { %v2128_v28 = vsel %vm2120_vm6, %v2126_v24, %v2127_v25 }
 0x3a2   : > { %2167 = vxpose.xlu1.b32.start [1/2] (short) (narrow) %v2128_v28, 32  ;;  %v2123_v30 = vsel %vm2120_vm6, %v2121_v27, %v2122_v29  ;;  %v2130_v32 = vsel %vm2120_vm6, %v2127_v25, %v2129_v41  ;;  %v2125_v37 = vsel %vm2120_vm6, %v2122_v29, %v2124_v45 }
 0x3a3   : > { %2135 = vxpose.xlu0.b32.start [1/2] (short) (narrow) %v2123_v30, 32 }
 0x3aa   : > { %2168 = vxpose.xlu1.b32.end [2/2] (short) (narrow) %v2130_v32, 32 }
 0x3ab   : > { %2136 = vxpose.xlu0.b32.end [2/2] (short) (narrow) %v2125_v37, 32 }
 0x446   : > { %v2183_v38 = vpop.trf.xlu1 }
 0x447   : > { %2204 = vst.msk [vmem:[#allocation3 + $0x80] sm:$0xff] %vm2199_vm7, %v2183_v38  ;;  %v2151_v40 = vpop.trf.xlu0 }
 0x448   : > { %2200 = vst.msk [vmem:[#allocation3] sm:$0xff] %vm2199_vm7, %v2151_v40 }
 0x44e   : > { %v2184_v33 = vpop.trf.xlu1 }
 0x44f   : > { %2205 = vst.msk [vmem:[#allocation3 + $0x88] sm:$0xff] %vm2199_vm7, %v2184_v33  ;;  %v2152_v0 = vpop.trf.xlu0 }
 0x450   : > { %2201 = vst.msk [vmem:[#allocation3 + $0x8] sm:$0xff] %vm2199_vm7, %v2152_v0 }
 0x456   : > { %v2185_v42 = vpop.trf.xlu1 }
 0x457   : > { %2206 = vst.msk [vmem:[#allocation3 + $0x90] sm:$0xff] %vm2199_vm7, %v2185_v42  ;;  %v2153_v43 = vpop.trf.xlu0 }
 0x458   : > { %2202 = vst.msk [vmem:[#allocation3 + $0x10] sm:$0xff] %vm2199_vm7, %v2153_v43 }
 0x45e   : > { %v2186_v44 = vpop.trf.xlu1 }
 0x45f   : > { %2207 = vst.msk [vmem:[#allocation3 + $0x98] sm:$0xff] %vm2199_vm7, %v2186_v44  ;;  %v2154_v47 = vpop.trf.xlu0 }
 0x460   : > { %2203 = vst.msk [vmem:[#allocation3 + $0x18] sm:$0xff] %vm2199_vm7, %v2154_v47 }
 0x461 PF: > { %p8568_p6 = scmp.ne.s32.totalorder %s9954_s6, 7 }
 0x463   : > { %2211 = sbr.rel (%p8568_p6) target bundleno = 1322 (0x52a), region = 140 }
 0x468   : > { %vm2218_vm8 = vcmask 1046528   ;;  %v2224_v48 = vrot.slane %v10513_v23, 1  ;;  %v2225_v49 = vrot.slane %v10519_v31, 1  ;;  %v2219_v50 = vrot.slane %v10496_v53, 1 }
 0x469   : > { %v2220_v34 = vrot.slane %v10502_v4, 1  ;;  %v2227_v55 = vrot.slane %v10525_v54, 1  ;;  %v2222_v60 = vrot.slane %v10507_v36, 1  ;;  %vm2297_vm9 = vcmask 130048  }
 0x46a   : > { %v2226_v51 = vsel %vm2218_vm8, %v2224_v48, %v2225_v49 }
 0x46b   : > { %2265 = vxpose.xlu1.b32.start [1/2] (short) (narrow) %v2226_v51, 32  ;;  %v2221_v52 = vsel %vm2218_vm8, %v2219_v50, %v2220_v34  ;;  %v2228_v61 = vsel %vm2218_vm8, %v2225_v49, %v2227_v55  ;;  %v2223_v58 = vsel %vm2218_vm8, %v2220_v34, %v2222_v60 }
 0x46c   : > { %2233 = vxpose.xlu0.b32.start [1/2] (short) (narrow) %v2221_v52, 32 }
 0x473   : > { %2266 = vxpose.xlu1.b32.end [2/2] (short) (narrow) %v2228_v61, 32 }
 0x474   : > { %2234 = vxpose.xlu0.b32.end [2/2] (short) (narrow) %v2223_v58, 32 }
 0x50f   : > { %v2281_v62 = vpop.trf.xlu1 }
 0x510   : > { %2302 = vst.msk [vmem:[#allocation3 + $0xa0] sm:$0xff] %vm2297_vm9, %v2281_v62  ;;  %v2249_v2 = vpop.trf.xlu0 }
 0x511   : > { %2298 = vst.msk [vmem:[#allocation3 + $0x20] sm:$0xff] %vm2297_vm9, %v2249_v2 }
 0x517   : > { %v2282_v63 = vpop.trf.xlu1 }
 0x518   : > { %2303 = vst.msk [vmem:[#allocation3 + $0xa8] sm:$0xff] %vm2297_vm9, %v2282_v63  ;;  %v2250_v3 = vpop.trf.xlu0 }
 0x519   : > { %2299 = vst.msk [vmem:[#allocation3 + $0x28] sm:$0xff] %vm2297_vm9, %v2250_v3 }
 0x51f   : > { %v2283_v35 = vpop.trf.xlu1 }
 0x520   : > { %2304 = vst.msk [vmem:[#allocation3 + $0xb0] sm:$0xff] %vm2297_vm9, %v2283_v35  ;;  %v2251_v26 = vpop.trf.xlu0 }
 0x521   : > { %2300 = vst.msk [vmem:[#allocation3 + $0x30] sm:$0xff] %vm2297_vm9, %v2251_v26 }
 0x527   : > { %v2284_v7 = vpop.trf.xlu1 }
 0x528   : > { %2305 = vst.msk [vmem:[#allocation3 + $0xb8] sm:$0xff] %vm2297_vm9, %v2284_v7  ;;  %v2252_v5 = vpop.trf.xlu0 }
 0x529   : > { %2301 = vst.msk [vmem:[#allocation3 + $0x38] sm:$0xff] %vm2297_vm9, %v2252_v5 }
 0x52a PF: > { %p8569_p7 = scmp.ne.s32.totalorder %s9954_s6, 8 }
 0x52c   : > { %2309 = sbr.rel (%p8569_p7) target bundleno = 1523 (0x5f3), region = 144 }
 0x531   : > { %vm2316_vm10 = vcmask 1046528   ;;  %v2322_v6 = vrot.slane %v10513_v23, 1  ;;  %v2323_v9 = vrot.slane %v10519_v31, 1  ;;  %v2317_v10 = vrot.slane %v10496_v53, 1 }
 0x532   : > { %v2318_v8 = vrot.slane %v10502_v4, 1  ;;  %v2325_v13 = vrot.slane %v10525_v54, 1  ;;  %v2320_v56 = vrot.slane %v10507_v36, 1  ;;  %vm2395_vm11 = vcmask 130048  }
 0x533   : > { %v2324_v11 = vsel %vm2316_vm10, %v2322_v6, %v2323_v9 }
 0x534   : > { %2363 = vxpose.xlu1.b32.start [1/2] (short) (narrow) %v2324_v11, 32  ;;  %v2319_v12 = vsel %vm2316_vm10, %v2317_v10, %v2318_v8  ;;  %v2326_v14 = vsel %vm2316_vm10, %v2323_v9, %v2325_v13  ;;  %v2321_v15 = vsel %vm2316_vm10, %v2318_v8, %v2320_v56 }
 0x535   : > { %2331 = vxpose.xlu0.b32.start [1/2] (short) (narrow) %v2319_v12, 32 }
 0x53c   : > { %2364 = vxpose.xlu1.b32.end [2/2] (short) (narrow) %v2326_v14, 32 }
 0x53d   : > { %2332 = vxpose.xlu0.b32.end [2/2] (short) (narrow) %v2321_v15, 32 }
 0x5d8   : > { %v2379_v21 = vpop.trf.xlu1 }
 0x5d9   : > { %2400 = vst.msk [vmem:[#allocation3 + $0xc0] sm:$0xff] %vm2395_vm11, %v2379_v21  ;;  %v2347_v16 = vpop.trf.xlu0 }
 0x5da   : > { %2396 = vst.msk [vmem:[#allocation3 + $0x40] sm:$0xff] %vm2395_vm11, %v2347_v16 }
 0x5e0   : > { %v2380_v22 = vpop.trf.xlu1 }
 0x5e1   : > { %2401 = vst.msk [vmem:[#allocation3 + $0xc8] sm:$0xff] %vm2395_vm11, %v2380_v22  ;;  %v2348_v17 = vpop.trf.xlu0 }
 0x5e2   : > { %2397 = vst.msk [vmem:[#allocation3 + $0x48] sm:$0xff] %vm2395_vm11, %v2348_v17 }
 0x5e8   : > { %v2381_v19 = vpop.trf.xlu1 }
 0x5e9   : > { %2402 = vst.msk [vmem:[#allocation3 + $0xd0] sm:$0xff] %vm2395_vm11, %v2381_v19  ;;  %v2349_v59 = vpop.trf.xlu0 }
 0x5ea   : > { %2398 = vst.msk [vmem:[#allocation3 + $0x50] sm:$0xff] %vm2395_vm11, %v2349_v59 }
 0x5f0   : > { %v2382_v20 = vpop.trf.xlu1 }
 0x5f1   : > { %2403 = vst.msk [vmem:[#allocation3 + $0xd8] sm:$0xff] %vm2395_vm11, %v2382_v20  ;;  %v2350_v18 = vpop.trf.xlu0 }
 0x5f2   : > { %2399 = vst.msk [vmem:[#allocation3 + $0x58] sm:$0xff] %vm2395_vm11, %v2350_v18 }
 0x5f3 PF: > { %p8570_p8 = scmp.ne.s32.totalorder %s9954_s6, 9 }
 0x5f5   : > { %2407 = sbr.rel (%p8570_p8) target bundleno = 1724 (0x6bc), region = 148 }
 0x5fa   : > { %vm2414_vm12 = vcmask 1046528   ;;  %v2420_v39 = vrot.slane %v10513_v23, 1  ;;  %v2421_v46 = vrot.slane %v10519_v31, 1  ;;  %v2415_v24 = vrot.slane %v10496_v53, 1 }
 0x5fb   : > { %v2416_v25 = vrot.slane %v10502_v4, 1  ;;  %v2423_v28 = vrot.slane %v10525_v54, 1  ;;  %v2418_v30 = vrot.slane %v10507_v36, 1  ;;  %vm2493_vm13 = vcmask 130048  }
 0x5fc   : > { %v2422_v27 = vsel %vm2414_vm12, %v2420_v39, %v2421_v46 }
 0x5fd   : > { %2461 = vxpose.xlu1.b32.start [1/2] (short) (narrow) %v2422_v27, 32  ;;  %v2417_v29 = vsel %vm2414_vm12, %v2415_v24, %v2416_v25  ;;  %v2424_v41 = vsel %vm2414_vm12, %v2421_v46, %v2423_v28  ;;  %v2419_v45 = vsel %vm2414_vm12, %v2416_v25, %v2418_v30 }
 0x5fe   : > { %2429 = vxpose.xlu0.b32.start [1/2] (short) (narrow) %v2417_v29, 32 }
 0x605   : > { %2462 = vxpose.xlu1.b32.end [2/2] (short) (narrow) %v2424_v41, 32 }
 0x606   : > { %2430 = vxpose.xlu0.b32.end [2/2] (short) (narrow) %v2419_v45, 32 }
 0x6a1   : > { %v2477_v32 = vpop.trf.xlu1 }
 0x6a2   : > { %2498 = vst.msk [vmem:[#allocation3 + $0xe0] sm:$0xff] %vm2493_vm13, %v2477_v32  ;;  %v2445_v31 = vpop.trf.xlu0 }
 0x6a3   : > { %2494 = vst.msk [vmem:[#allocation3 + $0x60] sm:$0xff] %vm2493_vm13, %v2445_v31 }
 0x6a9   : > { %v2478_v4 = vpop.trf.xlu1 }
 0x6aa   : > { %2499 = vst.msk [vmem:[#allocation3 + $0xe8] sm:$0xff] %vm2493_vm13, %v2478_v4  ;;  %v2446_v37 = vpop.trf.xlu0 }
 0x6ab   : > { %2495 = vst.msk [vmem:[#allocation3 + $0x68] sm:$0xff] %vm2493_vm13, %v2446_v37 }
 0x6b1   : > { %v2479_v54 = vpop.trf.xlu1 }
 0x6b2   : > { %2500 = vst.msk [vmem:[#allocation3 + $0xf0] sm:$0xff] %vm2493_vm13, %v2479_v54  ;;  %v2447_v36 = vpop.trf.xlu0 }
 0x6b3   : > { %2496 = vst.msk [vmem:[#allocation3 + $0x70] sm:$0xff] %vm2493_vm13, %v2447_v36 }
 0x6b9   : > { %v2480_v38 = vpop.trf.xlu1 }
 0x6ba   : > { %2501 = vst.msk [vmem:[#allocation3 + $0xf8] sm:$0xff] %vm2493_vm13, %v2480_v38  ;;  %v2448_v40 = vpop.trf.xlu0 }
 0x6bb   : > { %2497 = vst.msk [vmem:[#allocation3 + $0x78] sm:$0xff] %vm2493_vm13, %v2448_v40 }
 0x6bc PF: > { %p8571_p9 = scmp.ne.s32.totalorder %s9954_s6, 11 }
 0x6be   : > { %2505 = sbr.rel (%p8571_p9) target bundleno = 11496 (0x2ce8), region = 152 }
 0x6c3   : > { %s13095_s5 = sld [smem:[#allocation51_spill]]  ;;  %v2583_v42 = vld [vmem:[#allocation3] sm:$0xff]  ;;  %vm2621_vm14 = vcmask 130048   ;;  %v2584_v43 = vld [vmem:[#allocation3 + $0x8] sm:$0xff]  ;;  %v2585_v44 = vld [vmem:[#allocation3 + $0x10] sm:$0xff]  ;;  %s9792_s7 = smov 112  }
 0x6c4   : > { %v2586_v47 = vld [vmem:[#allocation3 + $0x18] sm:$0xff]  ;;  %v2587_v48 = vld [vmem:[#allocation3 + $0x20] sm:$0xff]  ;;  %v2588_v49 = vld [vmem:[#allocation3 + $0x28] sm:$0xff]  ;;  %s13096_s26 = sld [smem:[#allocation52_spill]]  ;;  %s9793_s12 = smov 96   ;;  %vm13030_vm15 = vcmask 1041409  }
 0x6c5   : > { %v2589_v50 = vld [vmem:[#allocation3 + $0x30] sm:$0xff]  ;;  %v2590_v34 = vld [vmem:[#allocation3 + $0x38] sm:$0xff]  ;;  %v2591_v51 = vld [vmem:[#allocation3 + $0x40] sm:$0xff]  ;;  %s13097_s27 = sld [smem:[#allocation49_spill]]  ;;  %vm2522_vm0 = vcmask 1042434   ;;  %vm2525_vm1 = vcmask 1043459  }
 0x6c6   : > { %v2592_v52 = vld [vmem:[#allocation3 + $0x48] sm:$0xff]  ;;  %v2593_v55 = vld [vmem:[#allocation3 + $0x50] sm:$0xff]  ;;  %v2594_v60 = vld [vmem:[#allocation3 + $0x58] sm:$0xff]  ;;  %s13218_s10 = sld [smem:[#allocation53_spill]] }
 0x6c7   : > { %v2595_v61 = vld [vmem:[#allocation3 + $0x60] sm:$0xff]  ;;  %v2596_v58 = vld [vmem:[#allocation3 + $0x68] sm:$0xff]  ;;  %v2597_v62 = vld [vmem:[#allocation3 + $0x70] sm:$0xff]  ;;  %s13223_s4 = sld [smem:[#allocation55_spill]] }
 0x6c8   : > { %v2598_v2 = vld [vmem:[#allocation3 + $0x78] sm:$0xff]  ;;  %v2599_v3 = vld [vmem:[#allocation3 + $0x80] sm:$0xff]  ;;  %v2600_v26 = vld [vmem:[#allocation3 + $0x88] sm:$0xff]  ;;  %s13224_s29 = sld [smem:[#allocation54_spill]] }
 0x6c9   : > { %v2616_v33 = vld [vmem:[%s13095_s5 + $0x8] sm:$0xff]  ;;  %v2615_v0 = vld [vmem:[%s13095_s5] sm:$0xff]  ;;  %v2601_v5 = vld [vmem:[#allocation3 + $0x90] sm:$0xff] }
 0x6ca   : > { %2732 = vmatpush.msra.mxu1 %v2616_v33  ;;  %v2602_v9 = vld [vmem:[#allocation3 + $0x98] sm:$0xff]  ;;  %v2603_v8 = vld [vmem:[#allocation3 + $0xa0] sm:$0xff]  ;;  %v2604_v12 = vld [vmem:[#allocation3 + $0xa8] sm:$0xff] }
 0x6cb   : > { %v2605_v56 = vld [vmem:[#allocation3 + $0xb0] sm:$0xff]  ;;  %v2606_v15 = vld [vmem:[#allocation3 + $0xb8] sm:$0xff]  ;;  %v2607_v16 = vld [vmem:[#allocation3 + $0xc0] sm:$0xff] }
 0x6cc   : > { %2733 = vmatpush.msra.mxu1 %v2615_v0  ;;  %v2608_v17 = vld [vmem:[#allocation3 + $0xc8] sm:$0xff]  ;;  %v2609_v59 = vld [vmem:[#allocation3 + $0xd0] sm:$0xff]  ;;  %v10653_v20 = vld [vmem:[%s13096_s26] ss:$0 sm:$0xff] }
 0x6cd   : > { %8573 = vmatmul.msk.f32.vlgmr.msra.gmra.mxu1 %vm2621_vm14, %v2583_v42  ;;  %v2610_v39 = vld [vmem:[#allocation3 + $0xd8] sm:$0xff]  ;;  %v2611_v25 = vld [vmem:[#allocation3 + $0xe0] sm:$0xff]  ;;  %v2612_v28 = vld [vmem:[#allocation3 + $0xe8] sm:$0xff] }
 0x6ce   : > { %v2613_v32 = vld [vmem:[#allocation3 + $0xf0] sm:$0xff]  ;;  %v2614_v54 = vld [vmem:[#allocation3 + $0xf8] sm:$0xff] }
 0x6d5   : > { %8574 = vmatmul.msk.f32.gmra.mxu1 %vm2621_vm14, %v2584_v43 }
 0x6dd   : > { %8575 = vmatmul.msk.f32.gmra.mxu1 %vm2621_vm14, %v2585_v44 }
 0x6e5   : > { %8576 = vmatmul.msk.f32.gmra.mxu1 %vm2621_vm14, %v2586_v47 }
 0x6ed   : > { %8577 = vmatmul.msk.f32.gmra.mxu1 %vm2621_vm14, %v2587_v48 }
 0x6f5   : > { %8578 = vmatmul.msk.f32.gmra.mxu1 %vm2621_vm14, %v2588_v49 }
 0x6fd   : > { %8579 = vmatmul.msk.f32.gmra.mxu1 %vm2621_vm14, %v2589_v50 }
 0x705   : > { %8580 = vmatmul.msk.f32.gmra.mxu1 %vm2621_vm14, %v2590_v34 }
 0x70d   : > { %8581 = vmatmul.msk.f32.gmra.mxu1 %vm2621_vm14, %v2591_v51 }
 0x715   : > { %8582 = vmatmul.msk.f32.gmra.mxu1 %vm2621_vm14, %v2592_v52 }
 0x71d   : > { %8583 = vmatmul.msk.f32.gmra.mxu1 %vm2621_vm14, %v2593_v55 }
 0x725   : > { %8584 = vmatmul.msk.f32.gmra.mxu1 %vm2621_vm14, %v2594_v60 }
 0x72d   : > { %8585 = vmatmul.msk.f32.gmra.mxu1 %vm2621_vm14, %v2595_v61 }
 0x735   : > { %8586 = vmatmul.msk.f32.gmra.mxu1 %vm2621_vm14, %v2596_v58 }
 0x73d   : > { %8587 = vmatmul.msk.f32.gmra.mxu1 %vm2621_vm14, %v2597_v62 }
 0x745   : > { %8588 = vmatmul.msk.f32.gmra.mxu1 %vm2621_vm14, %v2598_v2 }
 0x74a   : > { %v10633_v63 = vpop.f32.mrf.mxu1 }
 0x74b   : > { %v10743_v52 = vadd.f32 %v10653_v20, %v10633_v63 }
 0x74d   : > { %8589 = vmatmul.msk.f32.gmra.mxu1 %vm2621_vm14, %v2599_v3 }
 0x752   : > { %v2738_v35 = vpop.f32.mrf.mxu1 }
 0x753   : > { %v10693_v38 = vadd.f32 %v10653_v20, %v2738_v35 }
 0x755   : > { %8590 = vmatmul.msk.f32.gmra.mxu1 %vm2621_vm14, %v2600_v26 }
 0x75a   : > { %v10637_v7 = vpop.f32.mrf.mxu1 }
 0x75b   : > { %v10722_v47 = vadd.f32 %v10653_v20, %v10637_v7 }
 0x75d   : > { %8591 = vmatmul.msk.f32.gmra.mxu1 %vm2621_vm14, %v2601_v5 }
 0x762   : > { %v10640_v6 = vpop.f32.mrf.mxu1 }
 0x763   : > { %v10737_v34 = vadd.f32 %v10653_v20, %v10640_v6 }
 0x765   : > { %8592 = vmatmul.msk.f32.gmra.mxu1 %vm2621_vm14, %v2602_v9 }
 0x76a   : > { %v2747_v10 = vpop.f32.mrf.mxu1 }
 0x76b   : > { %v10682_v4 = vadd.f32 %v10653_v20, %v2747_v10 }
 0x76d   : > { %8593 = vmatmul.msk.f32.gmra.mxu1 %vm2621_vm14, %v2603_v8 }
 0x772   : > { %v2750_v11 = vpop.f32.mrf.mxu1 }
 0x773   : > { %v10711_v42 = vadd.f32 %v10653_v20, %v2750_v11 }
 0x775   : > { %8594 = vmatmul.msk.f32.gmra.mxu1 %vm2621_vm14, %v2604_v12 }
 0x77a   : > { %v2753_v13 = vpop.f32.mrf.mxu1 }
 0x77b   : > { %v10729_v49 = vadd.f32 %v10653_v20, %v2753_v13 }
 0x77d   : > { %8595 = vmatmul.msk.f32.gmra.mxu1 %vm2621_vm14, %v2605_v56 }
 0x782   : > { %v2756_v14 = vpop.f32.mrf.mxu1 }
 0x783   : > { %v10671_v41 = vadd.f32 %v10653_v20, %v2756_v14 }
 0x785   : > { %8596 = vmatmul.msk.f32.gmra.mxu1 %vm2621_vm14, %v2606_v15 }
 0x78a   : > { %v2759_v21 = vpop.f32.mrf.mxu1 }
 0x78b   : > { %v10696_v40 = vadd.f32 %v10653_v20, %v2759_v21 }
 0x78d   : > { %8597 = vmatmul.msk.f32.gmra.mxu1 %vm2621_vm14, %v2607_v16 }
 0x792   : > { %v2762_v22 = vpop.f32.mrf.mxu1 }
 0x793   : > { %v10718_v44 = vadd.f32 %v10653_v20, %v2762_v22 }
 0x795   : > { %8598 = vmatmul.msk.f32.gmra.mxu1 %vm2621_vm14, %v2608_v17 }
 0x79a   : > { %v2765_v19 = vpop.f32.mrf.mxu1 }
 0x79b   : > { %v10662_v27 = vadd.f32 %v10653_v20, %v2765_v19 }
 0x79d   : > { %8599 = vmatmul.msk.f32.gmra.mxu1 %vm2621_vm14, %v2609_v59 }
 0x7a2   : > { %v2768_v18 = vpop.f32.mrf.mxu1 }
 0x7a3   : > { %v10656_v46 = vadd.f32 %v10653_v20, %v2768_v18 }
 0x7a5   : > { %8600 = vmatmul.msk.f32.gmra.mxu1 %vm2621_vm14, %v2610_v39  ;;  %2869 = vrot.lane.b32.xlu2 %v10656_v46, %s9792_s7 }
 0x7aa   : > { %v2771_v24 = vpop.f32.mrf.mxu1 }
 0x7ab   : > { %v10679_v31 = vadd.f32 %v10653_v20, %v2771_v24 }
 0x7ad   : > { %8601 = vmatmul.msk.f32.gmra.mxu1 %vm2621_vm14, %v2611_v25  ;;  %2867 = vrot.lane.b32.xlu2 %v10662_v27, %s9792_s7 }
 0x7b2   : > { %v2774_v29 = vpop.f32.mrf.mxu1 }
 0x7b3   : > { %v10668_v30 = vadd.f32 %v10653_v20, %v2774_v29 }
 0x7b5   : > { %8602 = vmatmul.msk.f32.gmra.mxu1 %vm2621_vm14, %v2612_v28  ;;  %2873 = vrot.lane.b32.xlu1 %v10668_v30, %s9792_s7 }
 0x7b6   : > { %2861 = vrot.lane.b32.xlu2 %v10671_v41, %s9792_s7 }
 0x7ba   : > { %v2777_v45 = vpop.f32.mrf.mxu1 }
 0x7bb   : > { %v10708_v0 = vadd.f32 %v10653_v20, %v2777_v45  ;;  %v9151_v45 = vpack.i.bf16 %v10662_v27, %v10656_v46 }
 0x7bd   : > { %8603 = vmatmul.msk.f32.gmra.mxu1 %vm2621_vm14, %v2613_v32  ;;  %2871 = vrot.lane.b32.xlu1 %v10679_v31, %s9792_s7 }
 0x7be   : > { %2855 = vrot.lane.b32.xlu2 %v10682_v4, %s9792_s7 }
 0x7c2   : > { %v2780_v37 = vpop.f32.mrf.mxu1 }
 0x7c3   : > { %v10690_v36 = vadd.f32 %v10653_v20, %v2780_v37 }
 0x7c5   : > { %8604 = vmatmul.msk.f32.gmra.mxu1 %vm2621_vm14, %v2614_v54  ;;  %2877 = vrot.lane.b32.xlu0 %v10690_v36, %s9792_s7 }
 0x7c6   : > { %2863 = vrot.lane.b32.xlu1 %v10696_v40, %s9792_s7  ;;  %2849 = vrot.lane.b32.xlu2 %v10693_v38, %s9792_s7 }
 0x7ca   : > { %v10705_v33 = vpop.f32.mrf.mxu1 }
 0x7cd   : > { %2875 = vrot.lane.b32.xlu0 %v10708_v0, %s9792_s7 }
 0x7ce   : > { %2857 = vrot.lane.b32.xlu1 %v10711_v42, %s9792_s7 }
 0x7d2   : > { %v2786_v43 = vpop.f32.mrf.mxu1 }
 0x7d3   : > { %v10805_v39 = vadd.f32 %v10653_v20, %v2786_v43  ;;  %v9141_v43 = vpack.i.bf16 %v10708_v0, %v10690_v36 }
 0x7d5   : > { %2865 = vrot.lane.b32.xlu0 %v10718_v44, %s9792_s7 }
 0x7d6   : > { %2851 = vrot.lane.b32.xlu1 %v10722_v47, %s9792_s7 }
 0x7da   : > { %v2789_v48 = vpop.f32.mrf.mxu1 }
 0x7db   : > { %v10816_v25 = vadd.f32 %v10653_v20, %v2789_v48  ;;  %v9161_v48 = vpack.i.bf16 %v10729_v49, %v10671_v41 }
 0x7dd   : > { %2859 = vrot.lane.b32.xlu0 %v10729_v49, %s9792_s7 }
 0x7e2   : > { %v10733_v50 = vpop.f32.mrf.mxu1 }
 0x7e3   : > { %v10832_v37 = vadd.f32 %v10653_v20, %v10733_v50  ;;  %v10846_v50 = vadd.f32 %v10653_v20, %v10705_v33  ;;  %v9146_v33 = vpack.i.bf16 %v10679_v31, %v10668_v30 }
 0x7e5   : > { %2853 = vrot.lane.b32.xlu0 %v10737_v34, %s9792_s7 }
 0x7ea   : > { %v2795_v51 = vpop.f32.mrf.mxu1 }
 0x7eb   : > { %v10788_v22 = vadd.f32 %v10653_v20, %v2795_v51 }
 0x7ed   : > { %2847 = vrot.lane.b32.xlu0 %v10743_v52, %s9792_s7 }
 0x7f2   : > { %v2798_v55 = vpop.f32.mrf.mxu1 }
 0x7f3   : > { %v10799_v19 = vadd.f32 %v10653_v20, %v2798_v55 }
 0x7fa   : > { %v2801_v60 = vpop.f32.mrf.mxu1 }
 0x7fb   : > { %v10819_v29 = vadd.f32 %v10653_v20, %v2801_v60  ;;  %v9171_v60 = vpack.i.bf16 %v10722_v47, %v10737_v34 }
 0x7ff   : > { %v2870_v14 = vpop.permute.xlu2 %2869 }
 0x802   : > { %v2804_v61 = vpop.f32.mrf.mxu1 }
 0x803   : > { %v10771_v56 = vadd.f32 %v10653_v20, %v2804_v61  ;;  %v9166_v61 = vpack.i.bf16 %v10682_v4, %v10711_v42 }
 0x807   : > { %v2868_v17 = vpop.permute.xlu2 %2867 }
 0x80a   : > { %v2807_v58 = vpop.f32.mrf.mxu1 }
 0x80b   : > { %v10782_v21 = vadd.f32 %v10653_v20, %v2807_v58 }
 0x810   : > { %v2862_v28 = vpop.permute.xlu2 %2861 }
 0x812   : > { %v2810_v62 = vpop.f32.mrf.mxu1 }
 0x813   : > { %v10802_v59 = vadd.f32 %v10653_v20, %v2810_v62 }
 0x818   : > { %v2856_v51 = vpop.permute.xlu2 %2855 }
 0x81a   : > { %v2813_v2 = vpop.f32.mrf.mxu1 }
 0x81b   : > { %v10754_v6 = vadd.f32 %v10653_v20, %v2813_v2 }
 0x822   : > { %v2816_v3 = vpop.f32.mrf.mxu1 }
 0x823   : > { %v10765_v12 = vadd.f32 %v10653_v20, %v2816_v3  ;;  %v9156_v3 = vpack.i.bf16 %v10696_v40, %v10718_v44 }
 0x827   : > { %v2874_v10 = vpop.permute.xlu1 %2873 }
 0x82a   : > { %v2819_v35 = vpop.f32.mrf.mxu1 }
 0x82b   : > { %v10785_v16 = vadd.f32 %v10653_v20, %v2819_v35  ;;  %v9176_v35 = vpack.i.bf16 %v10743_v52, %v10693_v38 }
 0x82f   : > { %v2872_v15 = vpop.permute.xlu1 %2871 }
 0x832   : > { %v2822_v26 = vpop.f32.mrf.mxu1 }
 0x833   : > { %v10748_v7 = vadd.f32 %v10653_v20, %v2822_v26 }
 0x835   : > { %3050 = vrot.lane.b32.xlu0 %v10748_v7, %s9792_s7 }
 0x837   : > { %v2878_v63 = vpop.permute.xlu0 %2877 }
 0x838   : > { %8605 = vmatpush.xpose.msk.msra.mxu2 %vm2621_vm14, %v2878_v63  ;;  %v2864_v24 = vpop.permute.xlu1 %2863  ;;  %v2509_v63 = vld [vmem:[%s13097_s27 + $0x18] sm:$0xff] }
 0x839   : > { %2541 = vmatpush.msra.mxu0 %v2509_v63 }
 0x83a   : > { %v2825_v5 = vpop.f32.mrf.mxu1 }
 0x83b   : > { %v10757_v9 = vadd.f32 %v10653_v20, %v2825_v5 }
 0x83d   : > { %3052 = vrot.lane.b32.xlu2 %v10757_v9, %s9792_s7  ;;  %3044 = vrot.lane.b32.xlu0 %v10754_v6, %s9792_s7 }
 0x83f   : > { %v2876_v8 = vpop.permute.xlu0 %2875 }
 0x840   : > { %8606 = vmatpush.xpose.msk.msra.mxu2 %vm2621_vm14, %v2876_v8  ;;  %v2858_v54 = vpop.permute.xlu1 %2857 }
 0x842   : > { %v2828_v11 = vpop.f32.mrf.mxu1 }
 0x843   : > { %v10768_v13 = vadd.f32 %v10653_v20, %v2828_v11  ;;  %v2850_v20 = vpop.permute.xlu2 %2849 }
 0x844   : > { %8607 = vmatpush.xpose.msk.msra.mxu2 %vm2621_vm14, %v2874_v10 }
 0x845   : > { %3054 = vrot.lane.b32.xlu1 %v10768_v13, %s9792_s7  ;;  %3046 = vrot.lane.b32.xlu2 %v10765_v12, %s9792_s7  ;;  %v9181_v62 = vpack.i.bf16 %v10757_v9, %v10768_v13 }
 0x846   : > { %3038 = vrot.lane.b32.xlu0 %v10771_v56, %s9792_s7 }
 0x847   : > { %v2866_v18 = vpop.permute.xlu0 %2865 }
 0x848   : > { %8608 = vmatpush.xpose.msk.msra.mxu2 %vm2621_vm14, %v2872_v15  ;;  %v2852_v58 = vpop.permute.xlu1 %2851 }
 0x84c   : > { %8609 = vmatpush.xpose.msk.msra.mxu2 %vm2621_vm14, %v2870_v14 }
 0x84d   : > { %3048 = vrot.lane.b32.xlu1 %v10785_v16, %s9792_s7  ;;  %3040 = vrot.lane.b32.xlu2 %v10782_v21, %s9792_s7 }
 0x84e   : > { %3032 = vrot.lane.b32.xlu0 %v10788_v22, %s9792_s7 }
 0x84f   : > { %v2860_v32 = vpop.permute.xlu0 %2859 }
 0x850   : > { %8610 = vmatpush.xpose.msk.msra.mxu2 %vm2621_vm14, %v2868_v17 }
 0x854   : > { %8611 = vmatpush.xpose.msk.msra.mxu2 %vm2621_vm14, %v2866_v18 }
 0x855   : > { %3042 = vrot.lane.b32.xlu1 %v10802_v59, %s9792_s7  ;;  %3034 = vrot.lane.b32.xlu2 %v10799_v19, %s9792_s7 }
 0x856   : > { %3026 = vrot.lane.b32.xlu0 %v10805_v39, %s9792_s7 }
 0x857   : > { %v2854_v55 = vpop.permute.xlu0 %2853 }
 0x858   : > { %8612 = vmatpush.xpose.msk.msra.mxu2 %vm2621_vm14, %v2864_v24 }
 0x85c   : > { %8613 = vmatpush.xpose.msk.msra.mxu2 %vm2621_vm14, %v2862_v28 }
 0x85d   : > { %3036 = vrot.lane.b32.xlu1 %v10819_v29, %s9792_s7  ;;  %3028 = vrot.lane.b32.xlu2 %v10816_v25, %s9792_s7 }
 0x85e   : > { %9152 = vrot.lane.b32.xlu0 %v9151_v45, %s9793_s12 }
 0x85f   : > { %v2848_v2 = vpop.permute.xlu0 %2847 }
 0x860   : > { %8614 = vmatpush.xpose.msk.msra.mxu2 %vm2621_vm14, %v2860_v32  ;;  %v2518_v32 = vrot.slane %v10513_v23, 7 }
 0x864   : > { %8615 = vmatpush.xpose.msk.msra.mxu2 %vm2621_vm14, %v2858_v54  ;;  %v2520_v54 = vsel %vm13030_vm15, %v2518_v32, %v10496_v53 }
 0x865   : > { %3030 = vrot.lane.b32.xlu1 %v10832_v37, %s9792_s7  ;;  %9142 = vrot.lane.b32.xlu2 %v9141_v43, %s9793_s12 }
 0x866   : > { %9162 = vrot.lane.b32.xlu0 %v9161_v48, %s9793_s12 }
 0x868   : > { %8616 = vmatpush.xpose.msk.msra.mxu2 %vm2621_vm14, %v2856_v51 }
 0x86c   : > { %8617 = vmatpush.xpose.msk.msra.mxu2 %vm2621_vm14, %v2854_v55 }
 0x86d   : > { %3024 = vrot.lane.b32.xlu1 %v10846_v50, %s9792_s7  ;;  %9172 = vrot.lane.b32.xlu2 %v9171_v60, %s9793_s12 }
 0x86e   : > { %9167 = vrot.lane.b32.xlu0 %v9166_v61, %s9793_s12 }
 0x870   : > { %8618 = vmatpush.xpose.msk.msra.mxu2 %vm2621_vm14, %v2852_v58 }
 0x874   : > { %8619 = vmatpush.xpose.msk.msra.mxu2 %vm2621_vm14, %v2850_v20 }
 0x875   : > { %9147 = vrot.lane.b32.xlu1 %v9146_v33, %s9793_s12 }
 0x876   : > { %9182 = vrot.lane.b32.xlu0 %v9181_v62, %s9793_s12 }
 0x878   : > { %8620 = vmatpush.xpose.msk.msra.mxu2 %vm2621_vm14, %v2848_v2 }
 0x87b   : > { %8621 = vmatmul.msk.f32.vlgmr.msra.gmra.mxu2 %vm2621_vm14, %v10743_v52 }
 0x87d   : > { %9157 = vrot.lane.b32.xlu1 %v9156_v3, %s9793_s12 }
 0x883   : > { %8622 = vmatmul.msk.f32.gmra.mxu2 %vm2621_vm14, %v10693_v38  ;;  %v2508_v38 = vld [vmem:[%s13097_s27 + $0x10] sm:$0xff] }
 0x884   : > { %2542 = vmatpush.msra.mxu0 %v2508_v38 }
 0x885   : > { %9177 = vrot.lane.b32.xlu1 %v9176_v35, %s9793_s12 }
 0x88b   : > { %8623 = vmatmul.msk.f32.gmra.mxu2 %vm2621_vm14, %v10722_v47  ;;  %v2507_v47 = vld [vmem:[%s13097_s27 + $0x8] sm:$0xff] }
 0x88c   : > { %2543 = vmatpush.msra.mxu0 %v2507_v47 }
 0x893   : > { %8624 = vmatmul.msk.f32.gmra.mxu2 %vm2621_vm14, %v10737_v34  ;;  %v2506_v34 = vld [vmem:[%s13097_s27] sm:$0xff] }
 0x894   : > { %2544 = vmatpush.msra.mxu0 %v2506_v34 }
 0x897   : > { %v3053_v26 = vpop.permute.xlu2 %3052 }
 0x89b   : > { %8625 = vmatmul.msk.f32.gmra.mxu2 %vm2621_vm14, %v10682_v4 }
 0x89f   : > { %v3047_v52 = vpop.permute.xlu2 %3046 }
 0x8a3   : > { %8626 = vmatmul.msk.f32.gmra.mxu2 %vm2621_vm14, %v10711_v42 }
 0x8a7   : > { %v3041_v4 = vpop.permute.xlu2 %3040  ;;  %v3051_v5 = vpop.permute.xlu0 %3050 }
 0x8ab   : > { %8627 = vmatmul.msk.f32.gmra.mxu2 %vm2621_vm14, %v10729_v49 }
 0x8af   : > { %v3035_v10 = vpop.permute.xlu2 %3034  ;;  %v3045_v14 = vpop.permute.xlu0 %3044 }
 0x8b3   : > { %8628 = vmatmul.msk.f32.gmra.mxu2 %vm2621_vm14, %v10671_v41 }
 0x8b7   : > { %v3055_v8 = vpop.permute.xlu1 %3054  ;;  %v3029_v11 = vpop.permute.xlu2 %3028 }
 0x8b8   : > { %8637 = vmatpush.xpose.msk.msra.mxu3 %vm2621_vm14, %v3055_v8  ;;  %v3039_v18 = vpop.permute.xlu0 %3038 }
 0x8bb   : > { %8629 = vmatmul.msk.f32.gmra.mxu2 %vm2621_vm14, %v10696_v40 }
 0x8bc   : > { %8638 = vmatpush.xpose.msk.msra.mxu3 %vm2621_vm14, %v3053_v26 }
 0x8bf   : > { %v3049_v42 = vpop.permute.xlu1 %3048  ;;  %v9143_v15 = vpop.permute.xlu2 %9142 }
 0x8c0   : > { %8639 = vmatpush.xpose.msk.msra.mxu3 %vm2621_vm14, %v3051_v5  ;;  %v9144_v49 = vunpack.i.l.bf16 %v9143_v15  ;;  %v9145_v17 = vunpack.i.h.bf16 %v9143_v15  ;;  %v3033_v40 = vpop.permute.xlu0 %3032 }
 0x8c2   : > { %3553 = vmatpush.msrb.mxu0 %v9144_v49 }
 0x8c3   : > { %8630 = vmatmul.msk.f32.gmra.mxu2 %vm2621_vm14, %v10718_v44 }
 0x8c4   : > { %8640 = vmatpush.xpose.msk.msra.mxu3 %vm2621_vm14, %v3049_v42  ;;  %3554 = vmatpush.msrb.mxu0 %v9145_v17 }
 0x8c7   : > { %v3043_v41 = vpop.permute.xlu1 %3042  ;;  %v9173_v62 = vpop.permute.xlu2 %9172 }
 0x8c8   : > { %8641 = vmatpush.xpose.msk.msra.mxu3 %vm2621_vm14, %v3047_v52  ;;  %v3027_v44 = vpop.permute.xlu0 %3026  ;;  %v9174_v3 = vunpack.i.l.bf16 %v9173_v62 }
 0x8cb   : > { %8631 = vmatmul.msk.f32.gmra.mxu2 %vm2621_vm14, %v10662_v27 }
 0x8cc   : > { %8642 = vmatpush.xpose.msk.msra.mxu3 %vm2621_vm14, %v3045_v14 }
 0x8cf   : > { %v3037_v24 = vpop.permute.xlu1 %3036 }
 0x8d0   : > { %8643 = vmatpush.xpose.msk.msra.mxu3 %vm2621_vm14, %v3043_v41  ;;  %v9153_v45 = vpop.permute.xlu0 %9152 }
 0x8d1   : > { %v9154_v53 = vunpack.i.l.bf16 %v9153_v45 }
 0x8d3   : > { %8632 = vmatmul.msk.f32.gmra.mxu2 %vm2621_vm14, %v10656_v46  ;;  %v2521_v46 = vrot.slane %v10530_v1, 6 }
 0x8d4   : > { %8644 = vmatpush.xpose.msk.msra.mxu3 %vm2621_vm14, %v3041_v4 }
 0x8d5   : > { %v2523_v43 = vsel %vm2522_vm0, %v2521_v46, %v2520_v54 }
 0x8d7   : > { %v3031_v28 = vpop.permute.xlu1 %3030 }
 0x8d8   : > { %8645 = vmatpush.xpose.msk.msra.mxu3 %vm2621_vm14, %v3039_v18 }
 0x8db   : > { %8633 = vmatmul.msk.f32.gmra.mxu2 %vm2621_vm14, %v10679_v31  ;;  %v2524_v31 = vrot.slane %v10541_v57, 5  ;;  %v9155_v57 = vunpack.i.h.bf16 %v9153_v45 }
 0x8dc   : > { %8646 = vmatpush.xpose.msk.msra.mxu3 %vm2621_vm14, %v3037_v24 }
 0x8dd   : > { %v2526_v48 = vsel %vm2525_vm1, %v2524_v31, %v2523_v43 }
 0x8de   : > { %8572 = vmatmul.msk.f32.vlgmr.msra.gmra.mxu0 %vm13031_vm3, %v2526_v48 }
 0x8df   : > { %v3025_v27 = vpop.permute.xlu1 %3024 }
 0x8e0   : > { %8647 = vmatpush.xpose.msk.msra.mxu3 %vm2621_vm14, %v3035_v10 }
 0x8e3   : > { %8634 = vmatmul.msk.f32.gmra.mxu2 %vm2621_vm14, %v10668_v30  ;;  %v9163_v30 = vpop.permute.xlu0 %9162 }
 0x8e4   : > { %8648 = vmatpush.xpose.msk.msra.mxu3 %vm2621_vm14, %v3033_v40  ;;  %v9165_v20 = vunpack.i.h.bf16 %v9163_v30 }
 0x8e7   : > { %v9148_v23 = vpop.permute.xlu1 %9147 }
 0x8e8   : > { %8649 = vmatpush.xpose.msk.msra.mxu3 %vm2621_vm14, %v3031_v28  ;;  %v9149_v1 = vunpack.i.l.bf16 %v9148_v23  ;;  %v9150_v51 = vunpack.i.h.bf16 %v9148_v23 }
 0x8ea   : > { %3555 = vmatpush.msrb.mxu0 %v9149_v1 }
 0x8eb   : > { %8635 = vmatmul.msk.f32.gmra.mxu2 %vm2621_vm14, %v10708_v0  ;;  %v9164_v0 = vunpack.i.l.bf16 %v9163_v30  ;;  %v9168_v58 = vpop.permute.xlu0 %9167 }
 0x8ec   : > { %8650 = vmatpush.xpose.msk.msra.mxu3 %vm2621_vm14, %v3029_v11  ;;  %3556 = vmatpush.msrb.mxu0 %v9150_v51  ;;  %v9169_v33 = vunpack.i.l.bf16 %v9168_v58  ;;  %v9170_v2 = vunpack.i.h.bf16 %v9168_v58 }
 0x8ee   : > { %3557 = vmatpush.msrb.mxu0 %v9154_v53 }
 0x8ef   : > { %v9158_v55 = vpop.permute.xlu1 %9157 }
 0x8f0   : > { %8651 = vmatpush.xpose.msk.msra.mxu3 %vm2621_vm14, %v3027_v44  ;;  %3558 = vmatpush.msrb.mxu0 %v9155_v57  ;;  %v9159_v60 = vunpack.i.l.bf16 %v9158_v55  ;;  %v9160_v61 = vunpack.i.h.bf16 %v9158_v55 }
 0x8f2   : > { %3559 = vmatpush.msrb.mxu0 %v9159_v60 }
 0x8f3   : > { %8636 = vmatmul.msk.f32.gmra.mxu2 %vm2621_vm14, %v10690_v36  ;;  %v9175_v36 = vunpack.i.h.bf16 %v9173_v62  ;;  %v9183_v38 = vpop.permute.xlu0 %9182 }
 0x8f4   : > { %8652 = vmatpush.xpose.msk.msra.mxu3 %vm2621_vm14, %v3025_v27  ;;  %3560 = vmatpush.msrb.mxu0 %v9160_v61  ;;  %v9184_v34 = vunpack.i.l.bf16 %v9183_v38  ;;  %v9185_v4 = vunpack.i.h.bf16 %v9183_v38 }
 0x8f6   : > { %3561 = vmatpush.msrb.mxu0 %v9164_v0 }
 0x8f7   : > { %8653 = vmatmul.msk.f32.vlgmr.msra.gmra.mxu3 %vm2621_vm14, %v10846_v50  ;;  %v9178_v35 = vpop.permute.xlu1 %9177 }
 0x8f8   : > { %3562 = vmatpush.msrb.mxu0 %v9165_v20  ;;  %v9179_v52 = vunpack.i.l.bf16 %v9178_v35  ;;  %v9180_v47 = vunpack.i.h.bf16 %v9178_v35 }
 0x8fa   : > { %3563 = vmatpush.msrb.mxu0 %v9169_v33 }
 0x8fc   : > { %3564 = vmatpush.msrb.mxu0 %v9170_v2 }
 0x8fe   : > { %v2960_v26 = vpop.f32.mrf.mxu2  ;;  %3565 = vmatpush.msrb.mxu0 %v9174_v3 }
 0x8ff   : > { %8654 = vmatmul.msk.f32.gmra.mxu3 %vm2621_vm14, %v10805_v39  ;;  %v10942_v63 = vmul.f32 0.25, %v2960_v26 }
 0x900   : > { %3566 = vmatpush.msrb.mxu0 %v9175_v36 }
 0x901   : > { %3217 = vmax.xlane.f32.xlu2 %v10942_v63 }
 0x902   : > { %3567 = vmatpush.msrb.mxu0 %v9179_v52 }
 0x904   : > { %3568 = vmatpush.msrb.mxu0 %v9180_v47 }
 0x906   : > { %3666 = vmatpush.msra.mxu0 %v9184_v34  ;;  %v2963_v5 = vpop.f32.mrf.mxu2 }
 0x907   : > { %8655 = vmatmul.msk.f32.gmra.mxu3 %vm2621_vm14, %v10816_v25  ;;  %v10947_v10 = vmul.f32 0.25, %v2963_v5 }
 0x908   : > { %3667 = vmatpush.msra.mxu0 %v9185_v4 }
 0x909   : > { %3219 = vmax.xlane.f32.xlu0 %v10947_v10 }
 0x90e   : > { %v2966_v8 = vpop.f32.mrf.mxu2 }
 0x90f   : > { %8656 = vmatmul.msk.f32.gmra.mxu3 %vm2621_vm14, %v10832_v37  ;;  %v10952_v11 = vmul.f32 0.25, %v2966_v8  ;;  %v9191_v8 = vpack.i.bf16 %v10754_v6, %v10765_v12 }
 0x911   : > { %3221 = vmax.xlane.f32.xlu1 %v10952_v11 }
 0x916   : > { %v2969_v14 = vpop.f32.mrf.mxu2 }
 0x917   : > { %8657 = vmatmul.msk.f32.gmra.mxu3 %vm2621_vm14, %v10788_v22  ;;  %v10957_v42 = vmul.f32 0.25, %v2969_v14  ;;  %v9186_v14 = vpack.i.bf16 %v10785_v16, %v10748_v7 }
 0x919   : > { %3223 = vmax.xlane.f32.xlu2 %v10957_v42 }
 0x91e   : > { %v2972_v15 = vpop.f32.mrf.mxu2 }
 0x91f   : > { %8658 = vmatmul.msk.f32.gmra.mxu3 %vm2621_vm14, %v10799_v19  ;;  %v10962_v49 = vmul.f32 0.25, %v2972_v15 }
 0x921   : > { %3225 = vmax.xlane.f32.xlu0 %v10962_v49 }
 0x926   : > { %v2975_v17 = vpop.f32.mrf.mxu2 }
 0x927   : > { %8659 = vmatmul.msk.f32.gmra.mxu3 %vm2621_vm14, %v10819_v29  ;;  %v10967_v18 = vmul.f32 0.25, %v2975_v17 }
 0x929   : > { %3227 = vmax.xlane.f32.xlu2 %v10967_v18 }
 0x92e   : > { %v2978_v41 = vpop.f32.mrf.mxu2 }
 0x92f   : > { %8660 = vmatmul.msk.f32.gmra.mxu3 %vm2621_vm14, %v10771_v56  ;;  %v10972_v40 = vmul.f32 0.25, %v2978_v41 }
 0x931   : > { %3229 = vmax.xlane.f32.xlu1 %v10972_v40 }
 0x936   : > { %v2981_v24 = vpop.f32.mrf.mxu2 }
 0x937   : > { %8661 = vmatmul.msk.f32.gmra.mxu3 %vm2621_vm14, %v10782_v21  ;;  %v10977_v44 = vmul.f32 0.25, %v2981_v24 }
 0x939   : > { %3231 = vmax.xlane.f32.xlu1 %v10977_v44 }
 0x93e   : > { %v2984_v28 = vpop.f32.mrf.mxu2 }
 0x93f   : > { %8662 = vmatmul.msk.f32.gmra.mxu3 %vm2621_vm14, %v10802_v59  ;;  %v10982_v27 = vmul.f32 0.25, %v2984_v28 }
 0x941   : > { %3233 = vmax.xlane.f32.xlu2 %v10982_v27 }
 0x946   : > { %v2987_v45 = vpop.f32.mrf.mxu2 }
 0x947   : > { %8663 = vmatmul.msk.f32.gmra.mxu3 %vm2621_vm14, %v10754_v6  ;;  %v10987_v32 = vmul.f32 0.25, %v2987_v45 }
 0x949   : > { %3235 = vmax.xlane.f32.xlu0 %v10987_v32 }
 0x94e   : > { %v2990_v46 = vpop.f32.mrf.mxu2 }
 0x94f   : > { %8664 = vmatmul.msk.f32.gmra.mxu3 %vm2621_vm14, %v10765_v12  ;;  %v10992_v54 = vmul.f32 0.25, %v2990_v46 }
 0x951   : > { %3237 = vmax.xlane.f32.xlu0 %v10992_v54 }
 0x956   : > { %v2993_v31 = vpop.f32.mrf.mxu2 }
 0x957   : > { %8665 = vmatmul.msk.f32.gmra.mxu3 %vm2621_vm14, %v10785_v16  ;;  %v10997_v43 = vmul.f32 0.25, %v2993_v31 }
 0x959   : > { %3239 = vmax.xlane.f32.xlu0 %v10997_v43 }
 0x95e   : > { %v2996_v48 = vpop.f32.mrf.mxu2 }
 0x95f   : > { %8666 = vmatmul.msk.f32.gmra.mxu3 %vm2621_vm14, %v10748_v7  ;;  %v11002_v23 = vmul.f32 0.25, %v2996_v48 }
 0x961   : > { %3241 = vmax.xlane.f32.xlu0 %v11002_v23 }
 0x966   : > { %v2999_v1 = vpop.f32.mrf.mxu2 }
 0x967   : > { %8667 = vmatmul.msk.f32.gmra.mxu3 %vm2621_vm14, %v10757_v9  ;;  %v11007_v51 = vmul.f32 0.25, %v2999_v1 }
 0x969   : > { %3243 = vmax.xlane.f32.xlu0 %v11007_v51 }
 0x96e   : > { %v3002_v30 = vpop.f32.mrf.mxu2 }
 0x96f   : > { %8668 = vmatmul.msk.f32.gmra.mxu3 %vm2621_vm14, %v10768_v13  ;;  %v11012_v53 = vmul.f32 0.25, %v3002_v30 }
 0x971   : > { %3245 = vmax.xlane.f32.xlu0 %v11012_v53 }
 0x974   : > { %v3218_v57 = vpop.xlane.xlu2 %3217 }
 0x975   : > { %v3281_v55 = vsub.f32 %v10942_v63, %v3218_v57 }
 0x976   : > { %v3005_v60 = vpop.f32.mrf.mxu2 }
 0x977   : > { %v3313_v61 = vmul.f32 1.442695, %v3281_v55  ;;  %v11016_v0 = vmul.f32 0.25, %v3005_v60 }
 0x979   : > { %9378 = vpow2.f32 %v3313_v61  ;;  %3247 = vmax.xlane.f32.xlu2 %v11016_v0 }
 0x97a   : > { %v3137_v9 = vpop.f32.mrf.mxu3 }
 0x97b   : > { %v11019_v58 = vmul.f32 0.25, %v3137_v9 }
 0x97c   : > { %v3220_v20 = vpop.xlane.xlu0 %3219 }
 0x97d   : > { %v3282_v13 = vsub.f32 %v10947_v10, %v3220_v20  ;;  %3249 = vmax.xlane.f32.xlu1 %v11019_v58 }
 0x97f   : > { %v11023_v33 = vpop.eup %9378  ;;  %v3315_v62 = vmul.f32 1.442695, %v3282_v13 }
 0x980   : > { %3377 = vadd.xlane.f32.xlu0 %v11023_v33 }
 0x981   : > { %9380 = vpow2.f32 %v3315_v62 }
 0x982   : > { %v3140_v2 = vpop.f32.mrf.mxu3 }
 0x983   : > { %v11034_v34 = vmul.f32 0.25, %v3140_v2 }
 0x984   : > { %v3222_v3 = vpop.xlane.xlu1 %3221 }
 0x985   : > { %v3283_v26 = vsub.f32 %v10952_v11, %v3222_v3  ;;  %v9196_v11 = vpack.i.bf16 %v10782_v21, %v10802_v59 }
 0x987   : > { %v11026_v35 = vpop.eup %9380  ;;  %v3317_v38 = vmul.f32 1.442695, %v3283_v26 }
 0x988   : > { %3379 = vadd.xlane.f32.xlu0 %v11026_v35 }
 0x989   : > { %9382 = vpow2.f32 %v3317_v38 }
 0x98a   : > { %v3143_v36 = vpop.f32.mrf.mxu3 }
 0x98b   : > { %v11030_v63 = vmul.f32 0.25, %v3143_v36  ;;  %v9201_v36 = vpack.i.bf16 %v10819_v29, %v10771_v56 }
 0x98c   : > { %v3224_v52 = vpop.xlane.xlu2 %3223 }
 0x98d   : > { %v3284_v47 = vsub.f32 %v10957_v42, %v3224_v52  ;;  %3253 = vmax.xlane.f32.xlu2 %v11030_v63 }
 0x98f   : > { %v3319_v4 = vmul.f32 1.442695, %v3284_v47  ;;  %v11037_v5 = vpop.eup %9382 }
 0x990   : > { %3251 = vmax.xlane.f32.xlu0 %v11034_v34 }
 0x991   : > { %9384 = vpow2.f32 %v3319_v4 }
 0x992   : > { %v3146_v57 = vpop.f32.mrf.mxu3 }
 0x994   : > { %v3226_v42 = vpop.xlane.xlu0 %3225 }
 0x995   : > { %v3285_v28 = vsub.f32 %v10962_v49, %v3226_v42 }
 0x997   : > { %v11039_v10 = vpop.eup %9384  ;;  %v3321_v59 = vmul.f32 1.442695, %v3285_v28 }
 0x998   : > { %3383 = vadd.xlane.f32.xlu1 %v11039_v10  ;;  %3381 = vadd.xlane.f32.xlu0 %v11037_v5 }
 0x99c   : > { %v3228_v15 = vpop.xlane.xlu2 %3227 }
 0x99d   : > { %v3286_v41 = vsub.f32 %v10967_v18, %v3228_v15 }
 0x99f   : > { %v3323_v6 = vmul.f32 1.442695, %v3286_v41 }
 0x9a1   : > { %9386 = vpow2.f32 %v3323_v6 }
 0x9a2   : > { %9388 = vpow2.f32 %v3321_v59 }
 0x9a4   : > { %v3230_v24 = vpop.xlane.xlu1 %3229 }
 0x9a5   : > { %9192 = vrot.lane.b32.xlu2 %v9191_v8, %s9793_s12  ;;  %v3287_v21 = vsub.f32 %v10972_v40, %v3230_v24 }
 0x9a7   : > { %v3325_v45 = vmul.f32 1.442695, %v3287_v21  ;;  %v11057_v16 = vpop.eup %9386  ;;  %v9206_v21 = vpack.i.bf16 %v10788_v22, %v10799_v19 }
 0x9a8   : > { %v11061_v1 = vpop.eup %9388 }
 0x9a9   : > { %9390 = vpow2.f32 %v3325_v45 }
 0x9ac   : > { %9197 = vrot.lane.b32.xlu0 %v9196_v11, %s9793_s12  ;;  %v3232_v46 = vpop.xlane.xlu1 %3231 }
 0x9ad   : > { %v3288_v18 = vsub.f32 %v10977_v44, %v3232_v46  ;;  %v11071_v44 = vmul.f32 0.25, %v3146_v57 }
 0x9af   : > { %v3327_v48 = vmul.f32 1.442695, %v3288_v18  ;;  %v11066_v40 = vpop.eup %9390 }
 0x9b1   : > { %9187 = vrot.lane.b32.xlu1 %v9186_v14, %s9793_s12  ;;  %9392 = vpow2.f32 %v3327_v48 }
 0x9b4   : > { %v3234_v31 = vpop.xlane.xlu2 %3233 }
 0x9b5   : > { %v3289_v49 = vsub.f32 %v10982_v27, %v3234_v31 }
 0x9b7   : > { %v3329_v60 = vmul.f32 1.442695, %v3289_v49  ;;  %v11075_v20 = vpop.eup %9392 }
 0x9b9   : > { %9394 = vpow2.f32 %v3329_v60 }
 0x9bc   : > { %v11052_v17 = vpop.xlane.xlu0 %3235 }
 0x9bd   : > { %v3290_v24 = vsub.f32 %v10987_v32, %v11052_v17 }
 0x9bf   : > { %v11079_v2 = vpop.eup %9394  ;;  %v3331_v6 = vmul.f32 1.442695, %v3290_v24 }
 0x9c4   : > { %v3238_v12 = vpop.xlane.xlu0 %3237 }
 0x9c5   : > { %v3291_v55 = vsub.f32 %v10992_v54, %v3238_v12 }
 0x9c7   : > { %v3333_v61 = vmul.f32 1.442695, %v3291_v55  ;;  %v3149_v55 = vpop.f32.mrf.mxu3 }
 0x9c9   : > { %9396 = vpow2.f32 %v3333_v61 }
 0x9cc   : > { %v3240_v7 = vpop.xlane.xlu0 %3239 }
 0x9cd   : > { %v3292_v27 = vsub.f32 %v10997_v43, %v3240_v7 }
 0x9ce   : > { %3387 = vadd.xlane.f32.xlu2 %v11057_v16 }
 0x9cf   : > { %v3335_v62 = vmul.f32 1.442695, %v3292_v27  ;;  %v11082_v26 = vpop.eup %9396 }
 0x9d1   : > { %9398 = vpow2.f32 %v3335_v62  ;;  %v9216_v62 = vpack.i.bf16 %v10846_v50, %v10805_v39 }
 0x9d4   : > { %v11064_v30 = vpop.xlane.xlu0 %3241 }
 0x9d6   : > { %3389 = vadd.xlane.f32.xlu2 %v11066_v40  ;;  %3385 = vadd.xlane.f32.xlu0 %v11061_v1 }
 0x9d7   : > { %v11088_v38 = vpop.eup %9398 }
 0x9db   : > { %3255 = vmax.xlane.f32.xlu1 %v11071_v44 }
 0x9dc   : > { %v3244_v9 = vpop.xlane.xlu0 %3243 }
 0x9dd   : > { %v3294_v13 = vsub.f32 %v11007_v51, %v3244_v9  ;;  %v11127_v9 = vmul.f32 0.25, %v3149_v55 }
 0x9de   : > { %3391 = vadd.xlane.f32.xlu2 %v11075_v20 }
 0x9df   : > { %v3339_v54 = vmul.f32 1.442695, %v3294_v13  ;;  %v3152_v13 = vpop.f32.mrf.mxu3 }
 0x9e1   : > { %9400 = vpow2.f32 %v3339_v54 }
 0x9e3   : > { %3393 = vadd.xlane.f32.xlu1 %v11079_v2 }
 0x9e4   : > { %v3246_v3 = vpop.xlane.xlu0 %3245 }
 0x9e5   : > { %v3295_v43 = vsub.f32 %v11012_v53, %v3246_v3  ;;  %v11134_v3 = vmul.f32 0.25, %v3152_v13 }
 0x9e6   : > { %3397 = vadd.xlane.f32.xlu2 %v11082_v26 }
 0x9e7   : > { %v3341_v51 = vmul.f32 1.442695, %v3295_v43  ;;  %v11092_v47 = vpop.eup %9400 }
 0x9e9   : > { %9402 = vpow2.f32 %v3341_v51 }
 0x9ea   : > { %9202 = vrot.lane.b32.xlu0 %v9201_v36, %s9793_s12 }
 0x9eb   : > { %3399 = vadd.xlane.f32.xlu1 %v11088_v38 }
 0x9ec   : > { %v3248_v52 = vpop.xlane.xlu2 %3247 }
 0x9ed   : > { %v3296_v4 = vsub.f32 %v11016_v0, %v3248_v52  ;;  %v3155_v52 = vpop.f32.mrf.mxu3 }
 0x9ee   : > { %3403 = vadd.xlane.f32.xlu2 %v11092_v47 }
 0x9ef   : > { %v3343_v8 = vmul.f32 1.442695, %v3296_v4  ;;  %v11096_v56 = vpop.eup %9402 }
 0x9f0   : > { %v3250_v12 = vpop.xlane.xlu1 %3249 }
 0x9f1   : > { %9404 = vpow2.f32 %v3343_v8  ;;  %v3297_v19 = vsub.f32 %v11019_v58, %v3250_v12 }
 0x9f3   : > { %v3378_v53 = vpop.xlane.xlu0 %3377  ;;  %v3345_v46 = vmul.f32 1.442695, %v3297_v19 }
 0x9f4   : > { %9406 = vrcp.f32 %v3378_v53 }
 0x9f6   : > { %3405 = vadd.xlane.f32.xlu2 %v11096_v56 }
 0x9f7   : > { %v11099_v29 = vpop.eup %9404 }
 0x9f8   : > { %3407 = vadd.xlane.f32.xlu1 %v11099_v29 }
 0x9fa   : > { %v9407_v11 = vpop.eup %9406 }
 0x9fb   : > { %v3380_v14 = vpop.xlane.xlu0 %3379  ;;  %v3473_v42 = vmul.f32 %v9407_v11, %v11023_v33  ;;  %v3293_v33 = vsub.f32 %v11002_v23, %v11064_v30 }
 0x9fc   : > { %9408 = vrcp.f32 %v3380_v14 }
 0x9fd   : > { %3569 = vmatmul.f32.vlgmr.msrb.gmra.mxu0 %v3473_v42  ;;  %9410 = vpow2.f32 %v3331_v6  ;;  %v3337_v45 = vmul.f32 1.442695, %v3293_v33 }
 0xa02   : > { %v9409_v0 = vpop.eup %9408 }
 0xa03   : > { %v3252_v15 = vpop.xlane.xlu0 %3251  ;;  %v3474_v41 = vmul.f32 %v9409_v0, %v11026_v35  ;;  %v9211_v35 = vpack.i.bf16 %v10816_v25, %v10832_v37  ;;  %v11114_v32 = vpop.eup %9410 }
 0xa04   : > { %v3254_v25 = vpop.xlane.xlu2 %3253  ;;  %v3298_v61 = vsub.f32 %v11034_v34, %v3252_v15  ;;  %v3158_v15 = vpop.f32.mrf.mxu3 }
 0xa05   : > { %3572 = vmatmul.f32.gmra.mxu0 %v3474_v41  ;;  %v3299_v54 = vsub.f32 %v11030_v63, %v3254_v25 }
 0xa06   : > { %v3347_v27 = vmul.f32 1.442695, %v3298_v61  ;;  %v11217_v61 = vpop.f32.mrf.mxu0 }
 0xa07   : > { %v3349_v34 = vmul.f32 1.442695, %v3299_v54  ;;  %13100 = vst [vmem:[#allocation9_spill] sm:$0xff] %v11217_v61 }
 0xa0b   : > { %v3382_v28 = vpop.xlane.xlu0 %3381  ;;  %v3384_v59 = vpop.xlane.xlu1 %3383 }
 0xa0c   : > { %9412 = vrcp.f32 %v3382_v28 }
 0xa0d   : > { %9414 = vrcp.f32 %v3384_v59 }
 0xa0e   : > { %9207 = vrot.lane.b32.xlu2 %v9206_v21, %s9793_s12  ;;  %9416 = vpow2.f32 %v3337_v45  ;;  %v11153_v21 = vmul.f32 0.25, %v3158_v15  ;;  %v3731_v45 = vlaneseq }
 0xa0f   : > { %9418 = vpow2.f32 %v3345_v46 }
 0xa10   : > { %9420 = vpow2.f32 %v3347_v27  ;;  %v11162_v19 = vshrl.u32 %v3731_v45, 7 }
 0xa11   : > { %9212 = vrot.lane.b32.xlu1 %v9211_v35, %s9793_s12  ;;  %9422 = vpow2.f32 %v3349_v34  ;;  %v3161_v35 = vpop.f32.mrf.mxu3 }
 0xa12   : > { %v9413_v17 = vpop.eup %9412  ;;  %13098 = vst [vmem:[#allocation7_spill] sm:$0xff] %v11162_v19  ;;  %v11169_v25 = vadd.s32 8, %v11162_v19 }
 0xa13   : > { %v3475_v22 = vmul.f32 %v9413_v17, %v11037_v5  ;;  %v9415_v23 = vpop.eup %9414  ;;  %v9193_v5 = vpop.permute.xlu2 %9192 }
 0xa14   : > { %3395 = vadd.xlane.f32.xlu0 %v11114_v32  ;;  %v11119_v7 = vpop.eup %9416  ;;  %v3476_v37 = vmul.f32 %v9415_v23, %v11039_v10  ;;  %v9194_v49 = vunpack.i.l.bf16 %v9193_v5  ;;  %v9195_v57 = vunpack.i.h.bf16 %v9193_v5  ;;  %13099 = vst [vmem:[#allocation8_spill] sm:$0xff] %v11169_v25  ;;  %v11180_v5 = vmul.u32 8, %v11162_v19 }
 0xa15   : > { %3575 = vmatmul.f32.gmra.mxu0 %v3475_v22  ;;  %v11123_v18 = vpop.eup %9418  ;;  %v11160_v22 = vmul.f32 0.25, %v3161_v35 }
 0xa16   : > { %v11137_v43 = vpop.eup %9420 }
 0xa17   : > { %v11140_v51 = vpop.eup %9422 }
 0xa1c   : > { %3401 = vadd.xlane.f32.xlu0 %v11119_v7 }
 0xa1d   : > { %3578 = vmatmul.f32.gmra.mxu0 %v3476_v37  ;;  %v3164_v37 = vpop.f32.mrf.mxu3 }
 0xa1e   : > { %v9198_v30 = vpop.permute.xlu0 %9197 }
 0xa1f   : > { %v9199_v60 = vunpack.i.l.bf16 %v9198_v30  ;;  %v9200_v10 = vunpack.i.h.bf16 %v9198_v30 }
 0xa23   : > { %v9188_v31 = vpop.permute.xlu1 %9187 }
 0xa24   : > { %v9189_v48 = vunpack.i.l.bf16 %v9188_v31  ;;  %3409 = vadd.xlane.f32.xlu0 %v11123_v18  ;;  %v9190_v58 = vunpack.i.h.bf16 %v9188_v31  ;;  %v11174_v31 = vand.u32 127, %v3731_v45 }
 0xa26   : > { %3668 = vmatpush.msra.mxu0 %v9189_v48  ;;  %vm3738_vm10 = vcmp.eq.s32.totalorder %v11174_v31, %v11180_v5 }
 0xa28   : > { %3669 = vmatpush.msra.mxu0 %v9190_v58 }
 0xa2a   : > { %3670 = vmatpush.msra.mxu0 %v9194_v49  ;;  %v11182_v49 = vmul.f32 0.25, %v3164_v37 }
 0xa2c   : > { %3671 = vmatpush.msra.mxu0 %v9195_v57  ;;  %v13033_v57 = vmov 1.0  }
 0xa2e   : > { %3672 = vmatpush.msra.mxu0 %v9199_v60 }
 0xa30   : > { %3673 = vmatpush.msra.mxu0 %v9200_v10 }
 0xa37   : > { %3257 = vmax.xlane.f32.xlu2 %v11127_v9 }
 0xa38   : > { %9217 = vrot.lane.b32.xlu0 %v9216_v62, %s9793_s12 }
 0xa3b   : > { %3259 = vmax.xlane.f32.xlu1 %v11134_v3 }
 0xa3f   : > { %3411 = vadd.xlane.f32.xlu2 %v11137_v43 }
 0xa41   : > { %v3388_v36 = vpop.xlane.xlu2 %3387 }
 0xa47   : > { %3413 = vadd.xlane.f32.xlu2 %v11140_v51 }
 0xa49   : > { %v3390_v39 = vpop.xlane.xlu2 %3389  ;;  %v3386_v50 = vpop.xlane.xlu0 %3385 }
 0xa4a   : > { %9424 = vrcp.f32 %v3386_v50 }
 0xa4b   : > { %9426 = vrcp.f32 %v3388_v36 }
 0xa4e   : > { %v3256_v63 = vpop.xlane.xlu1 %3255 }
 0xa4f   : > { %v3300_v4 = vsub.f32 %v11071_v44, %v3256_v63 }
 0xa50   : > { %v9425_v8 = vpop.eup %9424 }
 0xa51   : > { %v3351_v53 = vmul.f32 1.442695, %v3300_v4  ;;  %v3392_v11 = vpop.xlane.xlu2 %3391  ;;  %v3477_v14 = vmul.f32 %v9425_v8, %v11061_v1  ;;  %v9427_v42 = vpop.eup %9426  ;;  %v11151_v1 = vmul.f32 0.25, %v3155_v52 }
 0xa52   : > { %v3478_v24 = vmul.f32 %v9427_v42, %v11057_v16 }
 0xa53   : > { %9428 = vpow2.f32 %v3351_v53  ;;  %3581 = vmatmul.f32.gmra.mxu0 %v3477_v14 }
 0xa54   : > { %9430 = vrcp.f32 %v3390_v39 }
 0xa55   : > { %9432 = vrcp.f32 %v3392_v11 }
 0xa56   : > { %v3394_v59 = vpop.xlane.xlu1 %3393 }
 0xa57   : > { %9434 = vrcp.f32 %v3394_v59 }
 0xa59   : > { %v11145_v0 = vpop.eup %9428  ;;  %v11147_v41 = vpop.xlane.xlu2 %3397 }
 0xa5a   : > { %3415 = vadd.xlane.f32.xlu2 %v11145_v0  ;;  %v9431_v12 = vpop.eup %9430 }
 0xa5b   : > { %3584 = vmatmul.f32.gmra.mxu0 %v3478_v24  ;;  %v3479_v16 = vmul.f32 %v9431_v12, %v11066_v40  ;;  %v9433_v17 = vpop.eup %9432  ;;  %v11172_v40 = vmul.u32 8, %v11169_v25 }
 0xa5c   : > { %v9203_v44 = vpop.permute.xlu0 %9202  ;;  %v3480_v46 = vmul.f32 %v9433_v17, %v11075_v20  ;;  %v11187_v20 = vadd.s32 1, %v11180_v5 }
 0xa5d   : > { %v9204_v6 = vunpack.i.l.bf16 %v9203_v44  ;;  %v9205_v28 = vunpack.i.h.bf16 %v9203_v44  ;;  %v11177_v48 = vadd.s32 1, %v11172_v40  ;;  %v9435_v58 = vpop.eup %9434  ;;  %vm3739_vm9 = vcmp.eq.s32.totalorder %v11174_v31, %v11172_v40 }
 0xa5e   : > { %v3481_v60 = vmul.f32 %v9435_v58, %v11079_v2  ;;  %vm3746_vm4 = vcmp.eq.s32.totalorder %v11174_v31, %v11187_v20  ;;  %v3400_v10 = vpop.xlane.xlu1 %3399 }
 0xa5f   : > { %3674 = vmatpush.msra.mxu0 %v9204_v6  ;;  %vm3747_vm2 = vcmp.eq.s32.totalorder %v11174_v31, %v11177_v48 }
 0xa60   : > { %8673 = vmatpush.msk.msra.mxu1 %vm3747_vm2, %v13033_v57  ;;  %9092 = vmatpush.msk.msrb.mxu2 %vm3747_vm2, %v13033_v57 }
 0xa61   : > { %v11155_v33 = vpop.xlane.xlu2 %3403  ;;  %3675 = vmatpush.msra.mxu0 %v9205_v28  ;;  %9093 = vmatpush.msk.msrb.mxu3 %vm3747_vm2, %v13033_v57  ;;  %v11233_v28 = vadd.s32 2, %v11172_v40 }
 0xa62   : > { %3261 = vmax.xlane.f32.xlu0 %v11151_v1  ;;  %3263 = vmax.xlane.f32.xlu2 %v11153_v21 }
 0xa63   : > { %3587 = vmatmul.f32.gmra.mxu0 %v3479_v16  ;;  %8674 = vmatpush.msk.msra.mxu1 %vm3746_vm4, %v13033_v57  ;;  %vm3837_vm5 = vcmp.eq.s32.totalorder %v11174_v31, %v11233_v28 }
 0xa64   : > { %9094 = vmatpush.msk.msrb.mxu2 %vm3746_vm4, %v13033_v57  ;;  %9095 = vmatpush.msk.msrb.mxu3 %vm3746_vm4, %v13033_v57 }
 0xa66   : > { %8687 = vmatpush.msk.msra.mxu2 %vm3837_vm5, %v13033_v57  ;;  %8679 = vmatpush.msk.msra.mxu3 %vm3739_vm9, %v13033_v57 }
 0xa68   : > { %8680 = vmatpush.msk.msra.mxu3 %vm3738_vm10, %v13033_v57 }
 0xa69   : > { %v11164_v23 = vpop.xlane.xlu2 %3405 }
 0xa6a   : > { %3265 = vmax.xlane.f32.xlu2 %v11160_v22 }
 0xa6b   : > { %3590 = vmatmul.f32.gmra.mxu0 %v3480_v46  ;;  %v3408_v27 = vpop.xlane.xlu1 %3407 }
 0xa71   : > { %v9208_v30 = vpop.permute.xlu2 %9207 }
 0xa72   : > { %v9209_v55 = vunpack.i.l.bf16 %v9208_v30  ;;  %3267 = vmax.xlane.f32.xlu2 %v11182_v49  ;;  %v9210_v2 = vunpack.i.h.bf16 %v9208_v30 }
 0xa73   : > { %3593 = vmatmul.f32.gmra.mxu0 %v3481_v60  ;;  %v3167_v60 = vpop.f32.mrf.mxu3 }
 0xa74   : > { %3676 = vmatpush.msra.mxu0 %v9209_v55 }
 0xa76   : > { %3677 = vmatpush.msra.mxu0 %v9210_v2 }
 0xa7a   : > { %v11219_v13 = vpop.f32.mrf.mxu0 }
 0xa82   : > { %v11221_v39 = vpop.f32.mrf.mxu0 }
 0xa83   : > { %v9213_v62 = vpop.permute.xlu1 %9212 }
 0xa84   : > { %v9214_v54 = vunpack.i.l.bf16 %v9213_v62  ;;  %v9215_v34 = vunpack.i.h.bf16 %v9213_v62 }
 0xa86   : > { %3678 = vmatpush.msra.mxu0 %v9214_v54  ;;  %v3170_v54 = vpop.f32.mrf.mxu3 }
 0xa87   : > { %v3396_v36 = vpop.xlane.xlu0 %3395 }
 0xa88   : > { %9436 = vrcp.f32 %v3396_v36  ;;  %3679 = vmatpush.msra.mxu0 %v9215_v34 }
 0xa89   : > { %9438 = vrcp.f32 %v11147_v41 }
 0xa8a   : > { %9440 = vrcp.f32 %v3400_v10 }
 0xa8e   : > { %v9437_v50 = vpop.eup %9436 }
 0xa8f   : > { %v3482_v63 = vmul.f32 %v9437_v50, %v11114_v32  ;;  %v9439_v4 = vpop.eup %9438  ;;  %v3402_v53 = vpop.xlane.xlu0 %3401 }
 0xa90   : > { %v3483_v8 = vmul.f32 %v9439_v4, %v11082_v26  ;;  %v9441_v14 = vpop.eup %9440  ;;  %9442 = vrcp.f32 %v3402_v53 }
 0xa91   : > { %3596 = vmatmul.f32.gmra.mxu0 %v3482_v63  ;;  %v3484_v42 = vmul.f32 %v9441_v14, %v11088_v38  ;;  %9444 = vrcp.f32 %v11155_v33 }
 0xa92   : > { %v3576_v52 = vpop.f32.mrf.mxu0  ;;  %9446 = vrcp.f32 %v11164_v23 }
 0xa93   : > { %8675 = vmatmul.msk.f32.vlgmr.msra.gmra.mxu1 %vm2621_vm14, %v3576_v52 }
 0xa96   : > { %v9443_v32 = vpop.eup %9442 }
 0xa97   : > { %v3410_v15 = vpop.xlane.xlu0 %3409  ;;  %v3485_v41 = vmul.f32 %v9443_v32, %v11119_v7  ;;  %v9445_v12 = vpop.eup %9444  ;;  %v11239_v7 = vadd.s32 2, %v11180_v5  ;;  %v11277_v32 = vmul.f32 0.25, %v3167_v60 }
 0xa98   : > { %v3486_v33 = vmul.f32 %v9445_v12, %v11092_v47 }
 0xa99   : > { %3599 = vmatmul.f32.gmra.mxu0 %v3483_v8  ;;  %vm3836_vm6 = vcmp.eq.s32.totalorder %v11174_v31, %v11239_v7 }
 0xa9a   : > { %v3579_v11 = vpop.f32.mrf.mxu0  ;;  %8688 = vmatpush.msk.msra.mxu2 %vm3836_vm6, %v13033_v57 }
 0xa9b   : > { %8676 = vmatmul.msk.f32.vlgmr.msrb.gmra.mxu2 %vm2621_vm14, %v3579_v11  ;;  %v3173_v11 = vpop.f32.mrf.mxu3 }
 0xaa1   : > { %3602 = vmatmul.f32.gmra.mxu0 %v3484_v42 }
 0xaa9   : > { %3605 = vmatmul.f32.gmra.mxu0 %v3485_v41 }
 0xaaa   : > { %v3258_v24 = vpop.xlane.xlu2 %3257  ;;  %v9218_v44 = vpop.permute.xlu0 %9217 }
 0xaab   : > { %v3301_v26 = vsub.f32 %v11127_v9, %v3258_v24  ;;  %v9219_v6 = vunpack.i.l.bf16 %v9218_v44  ;;  %v9220_v35 = vunpack.i.h.bf16 %v9218_v44  ;;  %v11285_v44 = vmul.f32 0.25, %v3170_v54 }
 0xaad   : > { %v3353_v16 = vmul.f32 1.442695, %v3301_v26  ;;  %3680 = vmatpush.msra.mxu0 %v9219_v6 }
 0xaae   : > { %v3260_v38 = vpop.xlane.xlu1 %3259 }
 0xaaf   : > { %9448 = vpow2.f32 %v3353_v16  ;;  %v3302_v9 = vsub.f32 %v11134_v3, %v3260_v38  ;;  %3681 = vmatpush.msra.mxu0 %v9220_v35  ;;  %v9447_v3 = vpop.eup %9446  ;;  %v11296_v16 = vmul.f32 0.25, %v3173_v11 }
 0xab0   : > { %v3487_v47 = vmul.f32 %v9447_v3, %v11096_v56 }
 0xab1   : > { %v3355_v59 = vmul.f32 1.442695, %v3302_v9  ;;  %3608 = vmatmul.f32.gmra.mxu0 %v3486_v33  ;;  %v11303_v9 = vadd.s32 6, %v11172_v40 }
 0xab2   : > { %v3412_v23 = vpop.xlane.xlu2 %3411 }
 0xab3   : > { %9450 = vpow2.f32 %v3355_v59  ;;  %vm4049_vm7 = vcmp.eq.s32.totalorder %v11174_v31, %v11303_v9  ;;  %v11315_v59 = vadd.s32 6, %v11180_v5 }
 0xab4   : > { %9452 = vrcp.f32 %v3408_v27  ;;  %8719 = vmatpush.msk.msra.mxu1 %vm4049_vm7, %v13033_v57 }
 0xab5   : > { %v11253_v45 = vpop.eup %9448  ;;  %9454 = vrcp.f32 %v3410_v15  ;;  %vm13032_vm8 = vcmp.eq.s32.totalorder %v11174_v31, %v11315_v59 }
 0xab6   : > { %3417 = vadd.xlane.f32.xlu2 %v11253_v45  ;;  %9456 = vrcp.f32 %v3412_v23  ;;  %8720 = vmatpush.msk.msra.mxu1 %vm13032_vm8, %v13033_v57 }
 0xab9   : > { %v11257_v17 = vpop.eup %9450  ;;  %3611 = vmatmul.f32.gmra.mxu0 %v3487_v47 }
 0xaba   : > { %3419 = vadd.xlane.f32.xlu1 %v11257_v17  ;;  %v9453_v46 = vpop.eup %9452  ;;  %v3414_v30 = vpop.xlane.xlu2 %3413 }
 0xabb   : > { %v3488_v37 = vmul.f32 %v9453_v46, %v11099_v29  ;;  %v9455_v58 = vpop.eup %9454  ;;  %9458 = vrcp.f32 %v3414_v30 }
 0xabc   : > { %v3489_v55 = vmul.f32 %v9455_v58, %v11123_v18  ;;  %v9457_v10 = vpop.eup %9456 }
 0xabd   : > { %v3490_v2 = vmul.f32 %v9457_v10, %v11137_v43 }
 0xac1   : > { %3614 = vmatmul.f32.gmra.mxu0 %v3488_v37  ;;  %v9459_v62 = vpop.eup %9458 }
 0xac2   : > { %v3491_v50 = vmul.f32 %v9459_v62, %v11140_v51 }
 0xac9   : > { %3682 = vmatmul.f32.vlgmr.msra.gmra.mxu0 %v3489_v55 }
 0xacd   : > { %v3416_v56 = vpop.xlane.xlu2 %3415 }
 0xace   : > { %9460 = vrcp.f32 %v3416_v56 }
 0xad0   : > { %v3582_v27 = vpop.f32.mrf.mxu0 }
 0xad1   : > { %3685 = vmatmul.f32.gmra.mxu0 %v3490_v2  ;;  %8689 = vmatmul.msk.f32.vlgmr.msra.gmra.mxu2 %vm2621_vm14, %v3582_v27 }
 0xad4   : > { %v9461_v43 = vpop.eup %9460 }
 0xad5   : > { %v3264_v29 = vpop.xlane.xlu2 %3263  ;;  %v3262_v34 = vpop.xlane.xlu0 %3261  ;;  %v3492_v14 = vmul.f32 %v9461_v43, %v11145_v0 }
 0xad6   : > { %v3304_v36 = vsub.f32 %v11153_v21, %v3264_v29  ;;  %v3303_v18 = vsub.f32 %v11151_v1, %v3262_v34  ;;  %v3176_v0 = vpop.f32.mrf.mxu3 }
 0xad7   : > { %v11283_v24 = vmul.f32 0.25, %v3176_v0 }
 0xad8   : > { %v3359_v63 = vmul.f32 1.442695, %v3304_v36  ;;  %v3357_v52 = vmul.f32 1.442695, %v3303_v18  ;;  %v3585_v4 = vpop.f32.mrf.mxu0 }
 0xad9   : > { %3688 = vmatmul.f32.gmra.mxu0 %v3491_v50  ;;  %8690 = vmatmul.msk.f32.gmra.mxu2 %vm2621_vm14, %v3585_v4 }
 0xada   : > { %9462 = vpow2.f32 %v3359_v63 }
 0xadb   : > { %9464 = vpow2.f32 %v3357_v52 }
 0xadd   : > { %v3266_v8 = vpop.xlane.xlu2 %3265 }
 0xade   : > { %v3305_v53 = vsub.f32 %v11160_v22, %v3266_v8  ;;  %v3179_v6 = vpop.f32.mrf.mxu3  ;;  %v11360_v8 = vadd.s32 3, %v11172_v40 }
 0xadf   : > { %v11294_v12 = vmul.f32 0.25, %v3179_v6 }
 0xae0   : > { %v11270_v21 = vpop.eup %9462  ;;  %v3361_v1 = vmul.f32 1.442695, %v3305_v53  ;;  %v11363_v53 = vadd.s32 3, %v11180_v5  ;;  %vm3890_vm11 = vcmp.eq.s32.totalorder %v11174_v31, %v11360_v8 }
 0xae1   : > { %v11272_v42 = vpop.eup %9464  ;;  %3423 = vadd.xlane.f32.xlu2 %v11270_v21  ;;  %3691 = vmatmul.f32.gmra.mxu0 %v3492_v14 }
 0xae2   : > { %9466 = vpow2.f32 %v3361_v1  ;;  %3421 = vadd.xlane.f32.xlu0 %v11272_v42  ;;  %vm3889_vm12 = vcmp.eq.s32.totalorder %v11174_v31, %v11363_v53 }
 0xae5   : > { %v3268_v51 = vpop.xlane.xlu2 %3267 }
 0xae6   : > { %v3306_v15 = vsub.f32 %v11182_v49, %v3268_v51  ;;  %v11291_v49 = vpop.f32.mrf.mxu0  ;;  %v3182_v38 = vpop.f32.mrf.mxu3 }
 0xae7   : > { %v11305_v33 = vmul.f32 0.25, %v3182_v38 }
 0xae8   : > { %v11279_v22 = vpop.eup %9466  ;;  %v3363_v41 = vmul.f32 1.442695, %v3306_v15 }
 0xae9   : > { %3269 = vmax.xlane.f32.xlu2 %v11277_v32  ;;  %3425 = vadd.xlane.f32.xlu1 %v11279_v22 }
 0xaea   : > { %9468 = vpow2.f32 %v3363_v41 }
 0xaee   : > { %v11300_v35 = vpop.f32.mrf.mxu0 }
 0xaf0   : > { %v11287_v26 = vpop.eup %9468 }
 0xaf1   : > { %3275 = vmax.xlane.f32.xlu2 %v11283_v24  ;;  %3271 = vmax.xlane.f32.xlu1 %v11285_v44 }
 0xaf2   : > { %3427 = vadd.xlane.f32.xlu0 %v11287_v26 }
 0xaf6   : > { %v11317_v3 = vpop.f32.mrf.mxu0 }
 0xaf9   : > { %3277 = vmax.xlane.f32.xlu1 %v11294_v12 }
 0xafa   : > { %3273 = vmax.xlane.f32.xlu0 %v11296_v16 }
 0xb02   : > { %3279 = vmax.xlane.f32.xlu0 %v11305_v33 }
 0xb0e   : > { %v11325_v47 = vpop.f32.mrf.mxu0 }
 0xb16   : > { %v11327_v23 = vpop.f32.mrf.mxu0 }
 0xb1e   : > { %v11329_v46 = vpop.f32.mrf.mxu0 }
 0xb26   : > { %v3606_v37 = vpop.f32.mrf.mxu0 }
 0xb27   : > { %8721 = vmatmul.msk.f32.vlgmr.msra.gmra.mxu1 %vm2621_vm14, %v3606_v37 }
 0xb29   : > { %v3418_v58 = vpop.xlane.xlu2 %3417 }
 0xb2a   : > { %9470 = vrcp.f32 %v3418_v58 }
 0xb2d   : > { %v3420_v30 = vpop.xlane.xlu1 %3419 }
 0xb2e   : > { %v3609_v55 = vpop.f32.mrf.mxu0  ;;  %9472 = vrcp.f32 %v3420_v30 }
 0xb2f   : > { %8722 = vmatmul.msk.f32.gmra.mxu1 %vm2621_vm14, %v3609_v55 }
 0xb30   : > { %v9471_v60 = vpop.eup %9470 }
 0xb31   : > { %v3493_v10 = vmul.f32 %v9471_v60, %v11253_v45 }
 0xb33   : > { %3694 = vmatmul.f32.gmra.mxu0 %v3493_v10 }
 0xb34   : > { %v9473_v56 = vpop.eup %9472 }
 0xb35   : > { %v3494_v27 = vmul.f32 %v9473_v56, %v11257_v17 }
 0xb36   : > { %v11334_v2 = vpop.f32.mrf.mxu0 }
 0xb3b   : > { %3697 = vmatmul.f32.gmra.mxu0 %v3494_v27 }
 0xb3e   : > { %v11337_v62 = vpop.f32.mrf.mxu0 }
 0xb46   : > { %v11345_v54 = vpop.f32.mrf.mxu0 }
 0xb4e   : > { %v11353_v45 = vpop.f32.mrf.mxu0 }
 0xb54   : > { %v3424_v17 = vpop.xlane.xlu2 %3423 }
 0xb55   : > { %v3422_v29 = vpop.xlane.xlu0 %3421 }
 0xb56   : > { %9474 = vrcp.f32 %v3422_v29  ;;  %v3689_v34 = vpop.f32.mrf.mxu0 }
 0xb57   : > { %8677 = vmatmul.msk.f32.vlgmr.msrb.gmra.mxu3 %vm2621_vm14, %v3689_v34  ;;  %9476 = vrcp.f32 %v3424_v17 }
 0xb58   : > { %8695 = vmatpush.msk.msrb.mxu3 %vm3890_vm11, %v13033_v57 }
 0xb5a   : > { %8696 = vmatpush.msk.msrb.mxu3 %vm3889_vm12, %v13033_v57 }
 0xb5c   : > { %v9475_v36 = vpop.eup %9474  ;;  %v3426_v18 = vpop.xlane.xlu1 %3425 }
 0xb5d   : > { %v3270_v50 = vpop.xlane.xlu2 %3269  ;;  %v3495_v52 = vmul.f32 %v9475_v36, %v11272_v42  ;;  %v9477_v11 = vpop.eup %9476 }
 0xb5e   : > { %v3307_v63 = vsub.f32 %v11277_v32, %v3270_v50  ;;  %v3692_v4 = vpop.f32.mrf.mxu0  ;;  %v3496_v32 = vmul.f32 %v9477_v11, %v11270_v21 }
 0xb5f   : > { %3700 = vmatmul.f32.gmra.mxu0 %v3495_v52  ;;  %8678 = vmatmul.msk.f32.gmra.mxu3 %vm2621_vm14, %v3692_v4 }
 0xb60   : > { %v3365_v43 = vmul.f32 1.442695, %v3307_v63 }
 0xb62   : > { %9478 = vpow2.f32 %v3365_v43 }
 0xb63   : > { %9480 = vrcp.f32 %v3426_v18 }
 0xb64   : > { %v3272_v14 = vpop.xlane.xlu1 %3271 }
 0xb65   : > { %v3276_v1 = vpop.xlane.xlu2 %3275  ;;  %v3308_v42 = vsub.f32 %v11285_v44, %v3272_v14  ;;  %v3428_v15 = vpop.xlane.xlu0 %3427 }
 0xb66   : > { %v3310_v51 = vsub.f32 %v11283_v24, %v3276_v1 }
 0xb67   : > { %v3367_v0 = vmul.f32 1.442695, %v3308_v42  ;;  %3703 = vmatmul.f32.gmra.mxu0 %v3496_v32  ;;  %8681 = vmatmul.msk.f32.vlgmr.msra.gmra.mxu3 %vm2621_vm14, %v11219_v13 }
 0xb68   : > { %v11380_v41 = vpop.eup %9478  ;;  %v3371_v6 = vmul.f32 1.442695, %v3310_v51 }
 0xb69   : > { %3429 = vadd.xlane.f32.xlu2 %v11380_v41  ;;  %9482 = vpow2.f32 %v3367_v0  ;;  %v9481_v24 = vpop.eup %9480 }
 0xb6a   : > { %9484 = vpow2.f32 %v3371_v6  ;;  %v3497_v37 = vmul.f32 %v9481_v24, %v11279_v22 }
 0xb6b   : > { %9486 = vrcp.f32 %v3428_v15 }
 0xb6c   : > { %v3278_v21 = vpop.xlane.xlu1 %3277 }
 0xb6d   : > { %v3311_v44 = vsub.f32 %v11294_v12, %v3278_v21  ;;  %v3274_v38 = vpop.xlane.xlu0 %3273 }
 0xb6e   : > { %v3309_v58 = vsub.f32 %v11296_v16, %v3274_v38 }
 0xb6f   : > { %v11388_v30 = vpop.eup %9482  ;;  %v3373_v55 = vmul.f32 1.442695, %v3311_v44  ;;  %3706 = vmatmul.f32.gmra.mxu0 %v3497_v37  ;;  %8682 = vmatmul.msk.f32.gmra.mxu3 %vm2621_vm14, %v11221_v39  ;;  %v3784_v37 = vpop.f32.mrf.mxu2 }
 0xb70   : > { %v11392_v13 = vpop.eup %9484  ;;  %v3369_v60 = vmul.f32 1.442695, %v3309_v58  ;;  %3431 = vadd.xlane.f32.xlu1 %v11388_v30 }
 0xb71   : > { %9488 = vpow2.f32 %v3373_v55  ;;  %3435 = vadd.xlane.f32.xlu2 %v11392_v13  ;;  %v9487_v12 = vpop.eup %9486 }
 0xb72   : > { %9490 = vpow2.f32 %v3369_v60  ;;  %v3498_v16 = vmul.f32 %v9487_v12, %v11287_v26  ;;  %v11413_v26 = vadd.s32 4, %v11172_v40 }
 0xb74   : > { %vm3943_vm13 = vcmp.eq.s32.totalorder %v11174_v31, %v11413_v26 }
 0xb75   : > { %v3280_v22 = vpop.xlane.xlu0 %3279  ;;  %8703 = vmatpush.msk.msrb.mxu2 %vm3943_vm13, %v13033_v57 }
 0xb76   : > { %v3312_v10 = vsub.f32 %v11305_v33, %v3280_v22  ;;  %v11416_v33 = vadd.s32 4, %v11180_v5 }
 0xb77   : > { %v11398_v56 = vpop.eup %9488  ;;  %3709 = vmatmul.f32.gmra.mxu0 %v3498_v16  ;;  %8683 = vmatmul.msk.f32.gmra.mxu3 %vm2621_vm14, %v11345_v54  ;;  %v11435_v54 = vadd.s32 5, %v11172_v40  ;;  %v3871_v58 = vpop.f32.mrf.mxu2 }
 0xb78   : > { %v9491_v39 = vpop.eup %9490  ;;  %v3375_v27 = vmul.f32 1.442695, %v3312_v10  ;;  %3437 = vadd.xlane.f32.xlu1 %v11398_v56  ;;  %vm3942_vm0 = vcmp.eq.s32.totalorder %v11174_v31, %v11416_v33 }
 0xb79   : > { %3433 = vadd.xlane.f32.xlu0 %v9491_v39  ;;  %8704 = vmatpush.msk.msrb.mxu2 %vm3942_vm0, %v13033_v57  ;;  %vm3996_vm1 = vcmp.eq.s32.totalorder %v11174_v31, %v11435_v54 }
 0xb7a   : > { %9492 = vpow2.f32 %v3375_v27  ;;  %8711 = vmatpush.msk.msra.mxu3 %vm3996_vm1, %v13033_v57 }
 0xb7f   : > { %8684 = vmatmul.msk.f32.gmra.mxu3 %vm2621_vm14, %v11353_v45  ;;  %v11446_v45 = vadd.s32 5, %v11180_v5  ;;  %v3874_v55 = vpop.f32.mrf.mxu2 }
 0xb80   : > { %v11405_v17 = vpop.eup %9492 }
 0xb81   : > { %3439 = vadd.xlane.f32.xlu0 %v11405_v17  ;;  %vm3995_vm15 = vcmp.eq.s32.totalorder %v11174_v31, %v11446_v45 }
 0xb82   : > { %8712 = vmatpush.msk.msra.mxu3 %vm3995_vm15, %v13033_v57 }
 0xb87   : > { %8697 = vmatmul.msk.f32.vlgmr.msrb.gmra.mxu3 %vm2621_vm14, %v11291_v49 }
 0xb8f   : > { %8698 = vmatmul.msk.f32.gmra.mxu3 %vm2621_vm14, %v11300_v35 }
 0xbb0   : > { %v3695_v49 = vpop.f32.mrf.mxu0 }
 0xbb1   : > { %8691 = vmatmul.msk.f32.gmra.mxu2 %vm2621_vm14, %v3695_v49  ;;  %v3781_v49 = vpop.f32.mrf.mxu1 }
 0xbb8   : > { %v3698_v35 = vpop.f32.mrf.mxu0 }
 0xbb9   : > { %8692 = vmatmul.msk.f32.gmra.mxu2 %vm2621_vm14, %v3698_v35 }
 0xbc1   : > { %8705 = vmatmul.msk.f32.vlgmr.msrb.gmra.mxu2 %vm2621_vm14, %v11317_v3  ;;  %v11455_v3 = vadd.s32 7, %v11172_v40 }
 0xbc3   : > { %vm4102_vm3 = vcmp.eq.s32.totalorder %v11174_v31, %v11455_v3 }
 0xbc4   : > { %8727 = vmatpush.msk.msra.mxu2 %vm4102_vm3, %v13033_v57 }
 0xbc9   : > { %8706 = vmatmul.msk.f32.gmra.mxu2 %vm2621_vm14, %v11325_v47  ;;  %v11464_v47 = vadd.s32 7, %v11180_v5 }
 0xbcb   : > { %vm4101_vm8 = vcmp.eq.s32.totalorder %v11174_v31, %v11464_v47 }
 0xbcc   : > { %8728 = vmatpush.msk.msra.mxu2 %vm4101_vm8, %v13033_v57 }
 0xbda   : > { %v3787_v21 = vpop.f32.mrf.mxu3 }
 0xbdc   : > { %v3430_v29 = vpop.xlane.xlu2 %3429  ;;  %v3701_v34 = vpop.f32.mrf.mxu0 }
 0xbdd   : > { %9494 = vrcp.f32 %v3430_v29  ;;  %8699 = vmatmul.msk.f32.gmra.mxu3 %vm2621_vm14, %v3701_v34 }
 0xbe2   : > { %v11489_v44 = vpop.f32.mrf.mxu3 }
 0xbe3   : > { %v9495_v36 = vpop.eup %9494  ;;  %v3432_v18 = vpop.xlane.xlu1 %3431 }
 0xbe4   : > { %v3499_v50 = vmul.f32 %v9495_v36, %v11380_v41  ;;  %9496 = vrcp.f32 %v3432_v18  ;;  %v3704_v63 = vpop.f32.mrf.mxu0  ;;  %v3436_v14 = vpop.xlane.xlu2 %3435 }
 0xbe5   : > { %8700 = vmatmul.msk.f32.gmra.mxu3 %vm2621_vm14, %v3704_v63 }
 0xbe6   : > { %3712 = vmatmul.f32.gmra.mxu0 %v3499_v50 }
 0xbea   : > { %v9497_v52 = vpop.eup %9496  ;;  %v3822_v38 = vpop.f32.mrf.mxu3 }
 0xbeb   : > { %v3500_v4 = vmul.f32 %v9497_v52, %v11388_v30  ;;  %v3438_v15 = vpop.xlane.xlu1 %3437  ;;  %v3823_v29 = vadd.f32 %v3822_v38, %v3781_v49 }
 0xbec   : > { %v3434_v43 = vpop.xlane.xlu0 %3433  ;;  %v3707_v11 = vpop.f32.mrf.mxu0 }
 0xbed   : > { %9498 = vrcp.f32 %v3434_v43  ;;  %8707 = vmatmul.msk.f32.gmra.mxu2 %vm2621_vm14, %v3707_v11  ;;  %8713 = vmatmul.msk.f32.vlgmr.msra.gmra.mxu3 %vm2621_vm14, %v11327_v23  ;;  %v3883_v36 = vadd.f32 %v3871_v58, %v3823_v29  ;;  %v8734_v58 = vld [vmem:[%s13095_s5 + $0x18] sm:$0xff] }
 0xbee   : > { %3715 = vmatmul.f32.gmra.mxu0 %v3500_v4  ;;  %9500 = vrcp.f32 %v3436_v14  ;;  %v4083_v14 = vpop.f32.mrf.mxu1  ;;  %4366 = vmatpush.msrb.mxu3 %v8734_v58 }
 0xbef   : > { %9502 = vrcp.f32 %v3438_v15 }
 0xbf3   : > { %v9499_v1 = vpop.eup %9498 }
 0xbf4   : > { %v3710_v42 = vpop.f32.mrf.mxu0  ;;  %v3501_v51 = vmul.f32 %v9499_v1, %v9491_v39  ;;  %v9501_v32 = vpop.eup %9500 }
 0xbf5   : > { %8708 = vmatmul.msk.f32.gmra.mxu2 %vm2621_vm14, %v3710_v42  ;;  %8714 = vmatmul.msk.f32.gmra.mxu3 %vm2621_vm14, %v11329_v46  ;;  %v3502_v41 = vmul.f32 %v9501_v32, %v11392_v13  ;;  %v3440_v23 = vpop.xlane.xlu0 %3439  ;;  %v9503_v0 = vpop.eup %9502 }
 0xbf6   : > { %3718 = vmatmul.f32.gmra.mxu0 %v3501_v51  ;;  %9504 = vrcp.f32 %v3440_v23  ;;  %v3503_v6 = vmul.f32 %v9503_v0, %v11398_v56 }
 0xbfc   : > { %v9505_v46 = vpop.eup %9504 }
 0xbfd   : > { %8729 = vmatmul.msk.f32.vlgmr.msra.gmra.mxu2 %vm2621_vm14, %v11334_v2  ;;  %v3504_v24 = vmul.f32 %v9505_v46, %v11405_v17  ;;  %v3825_v2 = vpop.f32.mrf.mxu3  ;;  %v4086_v46 = vpop.f32.mrf.mxu1 }
 0xbfe   : > { %3721 = vmatmul.f32.gmra.mxu0 %v3502_v41  ;;  %v3826_v52 = vadd.f32 %v3825_v2, %v3784_v37 }
 0xc00   : > { %v3884_v1 = vadd.f32 %v3874_v55, %v3826_v52 }
 0xc05   : > { %8730 = vmatmul.msk.f32.gmra.mxu2 %vm2621_vm14, %v11337_v62  ;;  %v3828_v30 = vpop.f32.mrf.mxu3 }
 0xc06   : > { %3724 = vmatmul.f32.gmra.mxu0 %v3503_v6  ;;  %v3829_v55 = vadd.f32 %v3828_v30, %v3787_v21 }
 0xc0d   : > { %v3831_v13 = vpop.f32.mrf.mxu3 }
 0xc0e   : > { %3727 = vmatmul.f32.gmra.mxu0 %v3504_v24  ;;  %v3832_v30 = vadd.f32 %v3831_v13, %v11489_v44  ;;  %v9753_v13 = vld [vmem:[#allocation3 + $0x8] sm:$0xff] }
 0xc15   : > { %v3924_v12 = vpop.f32.mrf.mxu3 }
 0xc16   : > { %v3936_v50 = vadd.f32 %v3924_v12, %v3883_v36  ;;  %v8733_v12 = vld [vmem:[%s13095_s5 + $0x10] sm:$0xff] }
 0xc17   : > { %4367 = vmatpush.msrb.mxu3 %v8733_v12  ;;  %v9760_v12 = vld [vmem:[#allocation3 + $0x40] sm:$0xff] }
 0xc19   : > { %8874 = vmatpush.msk.msra.mxu3 %vm4102_vm3, %v13033_v57  ;;  %vm13132_vm3 = vcmp.eq.s32.totalorder %v11174_v31, %v11315_v59 }
 0xc1b   : > { %8875 = vmatpush.msk.msra.mxu3 %vm4101_vm8, %v13033_v57 }
 0xc1d   : > { %v3927_v16 = vpop.f32.mrf.mxu3 }
 0xc1e   : > { %v3937_v42 = vadd.f32 %v3927_v16, %v3884_v1 }
 0xc34   : > { %v3877_v60 = vpop.f32.mrf.mxu2 }
 0xc35   : > { %v3885_v16 = vadd.f32 %v3877_v60, %v3829_v55 }
 0xc3c   : > { %v3880_v22 = vpop.f32.mrf.mxu2 }
 0xc3d   : > { %v3886_v49 = vadd.f32 %v3880_v22, %v3832_v30  ;;  %v9762_v30 = vld [vmem:[#allocation3 + $0x50] sm:$0xff] }
 0xc44   : > { %v3977_v62 = vpop.f32.mrf.mxu2 }
 0xc45   : > { %v3989_v4 = vadd.f32 %v3977_v62, %v3936_v50 }
 0xc4c   : > { %v3980_v39 = vpop.f32.mrf.mxu2 }
 0xc4d   : > { %v3990_v41 = vadd.f32 %v3980_v39, %v3937_v42  ;;  %v9755_v42 = vld [vmem:[#allocation3 + $0x18] sm:$0xff] }
 0xc60   : > { %v3930_v10 = vpop.f32.mrf.mxu3 }
 0xc63   : > { %v3713_v56 = vpop.f32.mrf.mxu0 }
 0xc64   : > { %8715 = vmatmul.msk.f32.gmra.mxu3 %vm2621_vm14, %v3713_v56  ;;  %v3938_v56 = vadd.f32 %v3930_v10, %v3885_v16 }
 0xc68   : > { %v3933_v17 = vpop.f32.mrf.mxu3 }
 0xc6b   : > { %v3716_v27 = vpop.f32.mrf.mxu0 }
 0xc6c   : > { %8716 = vmatmul.msk.f32.gmra.mxu3 %vm2621_vm14, %v3716_v27 }
 0xc70   : > { %v3983_v35 = vpop.f32.mrf.mxu2  ;;  %v4030_v18 = vpop.f32.mrf.mxu3 }
 0xc71   : > { %v4042_v43 = vadd.f32 %v4030_v18, %v3989_v4  ;;  %v3991_v21 = vadd.f32 %v3983_v35, %v3938_v56  ;;  %v9761_v56 = vld [vmem:[#allocation3 + $0x48] sm:$0xff] }
 0xc73   : > { %v3719_v34 = vpop.f32.mrf.mxu0  ;;  %v4095_v51 = vadd.f32 %v4083_v14, %v4042_v43 }
 0xc74   : > { %8723 = vmatmul.msk.f32.gmra.mxu1 %vm2621_vm14, %v3719_v34  ;;  %v3939_v34 = vadd.f32 %v3933_v17, %v3886_v49 }
 0xc78   : > { %v3986_v63 = vpop.f32.mrf.mxu2  ;;  %v4033_v15 = vpop.f32.mrf.mxu3 }
 0xc79   : > { %v4043_v0 = vadd.f32 %v4033_v15, %v3990_v41  ;;  %v3992_v50 = vadd.f32 %v3986_v63, %v3939_v34  ;;  %v9754_v63 = vld [vmem:[#allocation3 + $0x10] sm:$0xff] }
 0xc7b   : > { %v3722_v11 = vpop.f32.mrf.mxu0  ;;  %v4096_v24 = vadd.f32 %v4086_v46, %v4043_v0  ;;  %v9757_v0 = vld [vmem:[#allocation3 + $0x28] sm:$0xff] }
 0xc7c   : > { %8724 = vmatmul.msk.f32.gmra.mxu1 %vm2621_vm14, %v3722_v11  ;;  %v9752_v11 = vld [vmem:[#allocation3] sm:$0xff] }
 0xc80   : > { %v4136_v32 = vpop.f32.mrf.mxu2 }
 0xc81   : > { %v4148_v23 = vadd.f32 %v4136_v32, %v4095_v51  ;;  %v9756_v32 = vld [vmem:[#allocation3 + $0x20] sm:$0xff] }
 0xc83   : > { %4152 = vxpose.xlu2.b32.start [1/2] (short) %v4148_v23, 128  ;;  %v3725_v6 = vpop.f32.mrf.mxu0 }
 0xc84   : > { %8731 = vmatmul.msk.f32.gmra.mxu2 %vm2621_vm14, %v3725_v6 }
 0xc88   : > { %v4139_v38 = vpop.f32.mrf.mxu2 }
 0xc89   : > { %v4149_v37 = vadd.f32 %v4139_v38, %v4096_v24  ;;  %v9758_v24 = vld [vmem:[#allocation3 + $0x30] sm:$0xff] }
 0xc8b   : > { %4153 = vxpose.xlu2.b32.end [2/2] (short) %v4149_v37, 128  ;;  %v3728_v2 = vpop.f32.mrf.mxu0 }
 0xc8c   : > { %8732 = vmatmul.msk.f32.gmra.mxu2 %vm2621_vm14, %v3728_v2  ;;  %v9759_v2 = vld [vmem:[#allocation3 + $0x38] sm:$0xff] }
 0xce7   : > { %v4036_v62 = vpop.f32.mrf.mxu3 }
 0xce8   : > { %v4044_v27 = vadd.f32 %v4036_v62, %v3991_v21 }
 0xcef   : > { %v4039_v18 = vpop.f32.mrf.mxu3 }
 0xcf0   : > { %v4045_v10 = vadd.f32 %v4039_v18, %v3992_v50 }
 0xcf1   : > { %v4089_v39 = vpop.f32.mrf.mxu1 }
 0xcf2   : > { %v4097_v60 = vadd.f32 %v4089_v39, %v4044_v27 }
 0xcf9   : > { %v4092_v3 = vpop.f32.mrf.mxu1 }
 0xcfa   : > { %v4098_v52 = vadd.f32 %v4092_v3, %v4045_v10  ;;  %v9765_v3 = vld [vmem:[#allocation3 + $0x68] sm:$0xff] }
 0xd07   : > { %v4142_v29 = vpop.f32.mrf.mxu2 }
 0xd08   : > { %v4150_v36 = vadd.f32 %v4142_v29, %v4097_v60  ;;  %v9763_v60 = vld [vmem:[#allocation3 + $0x58] sm:$0xff] }
 0xd0a   : > { %4184 = vxpose.xlu1.b32.start [1/2] (short) %v4150_v36, 128  ;;  %v9764_v36 = vld [vmem:[#allocation3 + $0x60] sm:$0xff] }
 0xd0f   : > { %v4145_v4 = vpop.f32.mrf.mxu2 }
 0xd10   : > { %v4151_v43 = vadd.f32 %v4145_v4, %v4098_v52  ;;  %v9766_v4 = vld [vmem:[#allocation3 + $0x70] sm:$0xff] }
 0xd12   : > { %4185 = vxpose.xlu1.b32.end [2/2] (short) %v4151_v43, 128 }
 0xd1c   : > { %v4168_v47 = vpop.trf.xlu2 }
 0xd1d   : > { %v11512_v35 = vadd.f32 %v9752_v11, %v4168_v47  ;;  %v9767_v11 = vld [vmem:[#allocation3 + $0x78] sm:$0xff] }
 0xd1f   : > { %13101 = vst [vmem:[#allocation10_spill] sm:$0xff] %v11512_v35  ;;  %8736 = vmatmul.msk.f32.vlgmr.msrb.gmra.mxu3 %vm2621_vm14, %v11512_v35 }
 0xd24   : > { %v4169_v44 = vpop.trf.xlu2 }
 0xd25   : > { %v11516_v22 = vadd.f32 %v9753_v13, %v4169_v44 }
 0xd27   : > { %13102 = vst [vmem:[#allocation11_spill] sm:$0xff] %v11516_v22  ;;  %8737 = vmatmul.msk.f32.gmra.mxu3 %vm2621_vm14, %v11516_v22 }
 0xd2c   : > { %v4170_v17 = vpop.trf.xlu2 }
 0xd2d   : > { %v11520_v14 = vadd.f32 %v9754_v63, %v4170_v17 }
 0xd2f   : > { %13103 = vst [vmem:[#allocation12_spill] sm:$0xff] %v11520_v14  ;;  %8738 = vmatmul.msk.f32.gmra.mxu3 %vm2621_vm14, %v11520_v14 }
 0xd34   : > { %v4171_v1 = vpop.trf.xlu2 }
 0xd35   : > { %v11524_v51 = vadd.f32 %v9755_v42, %v4171_v1  ;;  %v9768_v1 = vld [vmem:[#allocation3 + $0x80] sm:$0xff] }
 0xd37   : > { %13104 = vst [vmem:[#allocation13_spill] sm:$0xff] %v11524_v51  ;;  %8739 = vmatmul.msk.f32.gmra.mxu3 %vm2621_vm14, %v11524_v51 }
 0xd3c   : > { %v4172_v15 = vpop.trf.xlu2 }
 0xd3d   : > { %v11528_v41 = vadd.f32 %v9756_v32, %v4172_v15 }
 0xd3f   : > { %13105 = vst [vmem:[#allocation14_spill] sm:$0xff] %v11528_v41  ;;  %8740 = vmatmul.msk.f32.gmra.mxu3 %vm2621_vm14, %v11528_v41 }
 0xd44   : > { %v4173_v23 = vpop.trf.xlu2 }
 0xd45   : > { %v11532_v6 = vadd.f32 %v9757_v0, %v4173_v23  ;;  %v9769_v23 = vld [vmem:[#allocation3 + $0x88] sm:$0xff] }
 0xd47   : > { %13106 = vst [vmem:[#allocation15_spill] sm:$0xff] %v11532_v6  ;;  %8741 = vmatmul.msk.f32.gmra.mxu3 %vm2621_vm14, %v11532_v6 }
 0xd4c   : > { %v4174_v46 = vpop.trf.xlu2 }
 0xd4d   : > { %v11536_v38 = vadd.f32 %v9758_v24, %v4174_v46 }
 0xd4f   : > { %13107 = vst [vmem:[#allocation16_spill] sm:$0xff] %v11536_v38  ;;  %8742 = vmatmul.msk.f32.gmra.mxu3 %vm2621_vm14, %v11536_v38 }
 0xd54   : > { %v4175_v37 = vpop.trf.xlu2 }
 0xd55   : > { %v11540_v58 = vadd.f32 %v9759_v2, %v4175_v37  ;;  %v9770_v37 = vld [vmem:[#allocation3 + $0x90] sm:$0xff] }
 0xd57   : > { %13108 = vst [vmem:[#allocation17_spill] sm:$0xff] %v11540_v58  ;;  %8743 = vmatmul.msk.f32.gmra.mxu3 %vm2621_vm14, %v11540_v58 }
 0xd5c   : > { %v4176_v55 = vpop.trf.xlu2 }
 0xd5d   : > { %v11544_v16 = vadd.f32 %v9760_v12, %v4176_v55 }
 0xd5f   : > { %13109 = vst [vmem:[#allocation18_spill] sm:$0xff] %v11544_v16  ;;  %8744 = vmatmul.msk.f32.gmra.mxu3 %vm2621_vm14, %v11544_v16 }
 0xd64   : > { %v4177_v62 = vpop.trf.xlu2 }
 0xd65   : > { %v11548_v39 = vadd.f32 %v9761_v56, %v4177_v62  ;;  %v9771_v62 = vld [vmem:[#allocation3 + $0x98] sm:$0xff] }
 0xd67   : > { %13110 = vst [vmem:[#allocation19_spill] sm:$0xff] %v11548_v39  ;;  %8745 = vmatmul.msk.f32.gmra.mxu3 %vm2621_vm14, %v11548_v39 }
 0xd6c   : > { %v4178_v21 = vpop.trf.xlu2 }
 0xd6d   : > { %v11552_v27 = vadd.f32 %v9762_v30, %v4178_v21 }
 0xd6f   : > { %13111 = vst [vmem:[#allocation20_spill] sm:$0xff] %v11552_v27  ;;  %8746 = vmatmul.msk.f32.gmra.mxu3 %vm2621_vm14, %v11552_v27 }
 0xd74   : > { %v4179_v49 = vpop.trf.xlu2 }
 0xd75   : > { %v11556_v29 = vadd.f32 %v9763_v60, %v4179_v49  ;;  %v9772_v49 = vld [vmem:[#allocation3 + $0xa0] sm:$0xff] }
 0xd77   : > { %13112 = vst [vmem:[#allocation21_spill] sm:$0xff] %v11556_v29  ;;  %8747 = vmatmul.msk.f32.gmra.mxu3 %vm2621_vm14, %v11556_v29 }
 0xd7c   : > { %v4180_v34 = vpop.trf.xlu2 }
 0xd7d   : > { %v11560_v18 = vadd.f32 %v9764_v36, %v4180_v34 }
 0xd7f   : > { %13113 = vst [vmem:[#allocation22_spill] sm:$0xff] %v11560_v18  ;;  %8748 = vmatmul.msk.f32.gmra.mxu3 %vm2621_vm14, %v11560_v18 }
 0xd84   : > { %v4181_v50 = vpop.trf.xlu2 }
 0xd85   : > { %v11564_v10 = vadd.f32 %v9765_v3, %v4181_v50  ;;  %v9773_v50 = vld [vmem:[#allocation3 + $0xa8] sm:$0xff] }
 0xd87   : > { %13114 = vst [vmem:[#allocation23_spill] sm:$0xff] %v11564_v10  ;;  %8749 = vmatmul.msk.f32.gmra.mxu3 %vm2621_vm14, %v11564_v10 }
 0xd8c   : > { %v4182_v52 = vpop.trf.xlu2 }
 0xd8d   : > { %v11568_v43 = vadd.f32 %v9766_v4, %v4182_v52 }
 0xd8f   : > { %8750 = vmatmul.msk.f32.gmra.mxu3 %vm2621_vm14, %v11568_v43 }
 0xd94   : > { %v4183_v47 = vpop.trf.xlu2 }
 0xd95   : > { %v11572_v44 = vadd.f32 %v9767_v11, %v4183_v47  ;;  %v9774_v47 = vld [vmem:[#allocation3 + $0xb0] sm:$0xff] }
 0xd97   : > { %8751 = vmatmul.msk.f32.gmra.mxu3 %vm2621_vm14, %v11572_v44 }
 0xda2   : > { %v11576_v13 = vpop.f32.mrf.mxu3 }
 0xdaa   : > { %v11578_v17 = vpop.f32.mrf.mxu3 }
 0xdae   : > { %v4200_v63 = vpop.trf.xlu1 }
 0xdaf   : > { %v11580_v42 = vadd.f32 %v9768_v1, %v4200_v63 }
 0xdb1   : > { %13115 = vst [vmem:[#allocation24_spill] sm:$0xff] %v11580_v42  ;;  %8752 = vmatmul.msk.f32.gmra.mxu3 %vm2621_vm14, %v11580_v42 }
 0xdb2   : > { %v11584_v15 = vpop.f32.mrf.mxu3 }
 0xdb6   : > { %v4201_v32 = vpop.trf.xlu1 }
 0xdb7   : > { %v11586_v0 = vadd.f32 %v9769_v23, %v4201_v32  ;;  %v9775_v32 = vld [vmem:[#allocation3 + $0xb8] sm:$0xff] }
 0xdb9   : > { %13116 = vst [vmem:[#allocation25_spill] sm:$0xff] %v11586_v0  ;;  %8753 = vmatmul.msk.f32.gmra.mxu3 %vm2621_vm14, %v11586_v0 }
 0xdba   : > { %v11590_v46 = vpop.f32.mrf.mxu3 }
 0xdbe   : > { %v4202_v24 = vpop.trf.xlu1 }
 0xdbf   : > { %v11592_v2 = vadd.f32 %v9770_v37, %v4202_v24 }
 0xdc1   : > { %13117 = vst [vmem:[#allocation26_spill] sm:$0xff] %v11592_v2  ;;  %8754 = vmatmul.msk.f32.gmra.mxu3 %vm2621_vm14, %v11592_v2 }
 0xdc2   : > { %v11596_v55 = vpop.f32.mrf.mxu3 }
 0xdc6   : > { %v4203_v12 = vpop.trf.xlu1 }
 0xdc7   : > { %v11598_v56 = vadd.f32 %v9771_v62, %v4203_v12  ;;  %v9776_v12 = vld [vmem:[#allocation3 + $0xc0] sm:$0xff] }
 0xdc9   : > { %13118 = vst [vmem:[#allocation27_spill] sm:$0xff] %v11598_v56  ;;  %8755 = vmatmul.msk.f32.gmra.mxu3 %vm2621_vm14, %v11598_v56 }
 0xdca   : > { %v11602_v21 = vpop.f32.mrf.mxu3 }
 0xdce   : > { %v4204_v30 = vpop.trf.xlu1 }
 0xdcf   : > { %v11604_v60 = vadd.f32 %v9772_v49, %v4204_v30  ;;  %v11625_v30 = vld [vmem:[%s13096_s26 + $0x1] ss:$0 sm:$0xff] }
 0xdd0   : > { %v11729_v41 = vadd.f32 %v11625_v30, %v11578_v17 }
 0xdd1   : > { %13119 = vst [vmem:[#allocation28_spill] sm:$0xff] %v11604_v60  ;;  %8756 = vmatmul.msk.f32.gmra.mxu3 %vm2621_vm14, %v11604_v60 }
 0xdd2   : > { %v4387_v34 = vpop.f32.mrf.mxu3 }
 0xdd3   : > { %v11661_v61 = vadd.f32 %v11625_v30, %v4387_v34 }
 0xdd6   : > { %v4205_v36 = vpop.trf.xlu1 }
 0xdd7   : > { %v11608_v3 = vadd.f32 %v9773_v50, %v4205_v36 }
 0xdd9   : > { %13120 = vst [vmem:[#allocation29_spill] sm:$0xff] %v11608_v3  ;;  %8757 = vmatmul.msk.f32.gmra.mxu3 %vm2621_vm14, %v11608_v3 }
 0xdda   : > { %v4390_v52 = vpop.f32.mrf.mxu3 }
 0xdde   : > { %v4206_v4 = vpop.trf.xlu1 }
 0xddf   : > { %v11612_v11 = vadd.f32 %v9774_v47, %v4206_v4  ;;  %v9777_v4 = vld [vmem:[#allocation3 + $0xc8] sm:$0xff] }
 0xde1   : > { %13121 = vst [vmem:[#allocation30_spill] sm:$0xff] %v11612_v11  ;;  %8758 = vmatmul.msk.f32.gmra.mxu3 %vm2621_vm14, %v11612_v11 }
 0xde2   : > { %v4393_v63 = vpop.f32.mrf.mxu3 }
 0xde6   : > { %v4207_v1 = vpop.trf.xlu1 }
 0xde7   : > { %v11616_v23 = vadd.f32 %v9775_v32, %v4207_v1 }
 0xde9   : > { %13122 = vst [vmem:[#allocation31_spill] sm:$0xff] %v11616_v23  ;;  %8759 = vmatmul.msk.f32.gmra.mxu3 %vm2621_vm14, %v11616_v23 }
 0xdea   : > { %v4396_v24 = vpop.f32.mrf.mxu3 }
 0xdeb   : > { %v11639_v32 = vadd.f32 %v11625_v30, %v4396_v24 }
 0xdee   : > { %v4208_v37 = vpop.trf.xlu1 }
 0xdef   : > { %v11620_v62 = vadd.f32 %v9776_v12, %v4208_v37 }
 0xdf1   : > { %13123 = vst [vmem:[#allocation32_spill] sm:$0xff] %v11620_v62  ;;  %8760 = vmatmul.msk.f32.gmra.mxu3 %vm2621_vm14, %v11620_v62 }
 0xdf2   : > { %v4399_v49 = vpop.f32.mrf.mxu3 }
 0xdf3   : > { %v11630_v36 = vadd.f32 %v11625_v30, %v4399_v49  ;;  %v9778_v49 = vld [vmem:[#allocation3 + $0xd0] sm:$0xff] }
 0xdf5   : > { %4501 = vrot.lane.b32.xlu0 %v11630_v36, %s9792_s7 }
 0xdf6   : > { %v4209_v50 = vpop.trf.xlu1 }
 0xdf7   : > { %v11634_v47 = vadd.f32 %v9777_v4, %v4209_v50 }
 0xdf9   : > { %13124 = vst [vmem:[#allocation33_spill] sm:$0xff] %v11634_v47  ;;  %8761 = vmatmul.msk.f32.gmra.mxu3 %vm2621_vm14, %v11634_v47 }
 0xdfa   : > { %v4402_v1 = vpop.f32.mrf.mxu3 }
 0xdfb   : > { %v11642_v37 = vadd.f32 %v11625_v30, %v4402_v1 }
 0xdfd   : > { %4503 = vrot.lane.b32.xlu2 %v11642_v37, %s9792_s7  ;;  %4499 = vrot.lane.b32.xlu0 %v11639_v32, %s9792_s7  ;;  %v9231_v4 = vpack.i.bf16 %v11630_v36, %v11642_v37 }
 0xdfe   : > { %v4210_v12 = vpop.trf.xlu1 }
 0xdff   : > { %v11648_v50 = vadd.f32 %v9778_v49, %v4210_v12  ;;  %v11664_v12 = vadd.f32 %v11625_v30, %v4390_v52  ;;  %v9779_v49 = vld [vmem:[#allocation3 + $0xd8] sm:$0xff]  ;;  %v9780_v52 = vld [vmem:[#allocation3 + $0xe0] sm:$0xff] }
 0xe01   : > { %13125 = vst [vmem:[#allocation34_spill] sm:$0xff] %v11648_v50  ;;  %8762 = vmatmul.msk.f32.gmra.mxu3 %vm2621_vm14, %v11648_v50 }
 0xe02   : > { %v4405_v24 = vpop.f32.mrf.mxu3 }
 0xe03   : > { %v11655_v1 = vadd.f32 %v11625_v30, %v4405_v24 }
 0xe05   : > { %9232 = vrot.lane.b32.xlu2 %v9231_v4, %s9793_s12  ;;  %4505 = vrot.lane.b32.xlu0 %v11655_v1, %s9792_s7  ;;  %v9241_v4 = vpack.i.bf16 %v11661_v61, %v11664_v12 }
 0xe06   : > { %v4211_v57 = vpop.trf.xlu1 }
 0xe07   : > { %v11666_v19 = vadd.f32 %v9779_v49, %v4211_v57 }
 0xe09   : > { %13126 = vst [vmem:[#allocation35_spill] sm:$0xff] %v11666_v19  ;;  %8763 = vmatmul.msk.f32.gmra.mxu3 %vm2621_vm14, %v11666_v19  ;;  %v9781_v19 = vld [vmem:[#allocation3 + $0xe8] sm:$0xff] }
 0xe0a   : > { %v4408_v24 = vpop.f32.mrf.mxu3 }
 0xe0b   : > { %v11673_v25 = vadd.f32 %v11625_v30, %v4408_v24 }
 0xe0d   : > { %4507 = vrot.lane.b32.xlu0 %v11673_v25, %s9792_s7  ;;  %9242 = vrot.lane.b32.xlu2 %v9241_v4, %s9793_s12  ;;  %v9226_v39 = vpack.i.bf16 %v11655_v1, %v11673_v25 }
 0xe0e   : > { %v4212_v34 = vpop.trf.xlu1 }
 0xe0f   : > { %v11678_v50 = vadd.f32 %v9780_v52, %v4212_v34 }
 0xe11   : > { %13127 = vst [vmem:[#allocation36_spill] sm:$0xff] %v11678_v50  ;;  %8764 = vmatmul.msk.f32.gmra.mxu3 %vm2621_vm14, %v11678_v50 }
 0xe12   : > { %v4411_v57 = vpop.f32.mrf.mxu3 }
 0xe13   : > { %v11683_v49 = vadd.f32 %v11625_v30, %v4411_v57  ;;  %v9782_v57 = vld [vmem:[#allocation3 + $0xf0] sm:$0xff] }
 0xe15   : > { %4509 = vrot.lane.b32.xlu0 %v11683_v49, %s9792_s7 }
 0xe16   : > { %v4213_v24 = vpop.trf.xlu1 }
 0xe17   : > { %v11687_v47 = vadd.f32 %v9781_v19, %v4213_v24  ;;  %v11701_v19 = vadd.f32 %v11625_v30, %v4393_v63 }
 0xe19   : > { %13128 = vst [vmem:[#allocation37_spill] sm:$0xff] %v11687_v47  ;;  %8765 = vmatmul.msk.f32.gmra.mxu3 %vm2621_vm14, %v11687_v47  ;;  %v9783_v47 = vld [vmem:[#allocation3 + $0xf8] sm:$0xff]  ;;  %v9236_v27 = vpack.i.bf16 %v11701_v19, %v11639_v32 }
 0xe1a   : > { %v4414_v4 = vpop.f32.mrf.mxu3 }
 0xe1b   : > { %v11692_v34 = vadd.f32 %v11625_v30, %v4414_v4 }
 0xe1d   : > { %4511 = vrot.lane.b32.xlu0 %v11692_v34, %s9792_s7 }
 0xe1e   : > { %v4214_v52 = vpop.trf.xlu1 }
 0xe1f   : > { %v11696_v50 = vadd.f32 %v9782_v57, %v4214_v52 }
 0xe21   : > { %13129 = vst [vmem:[#allocation38_spill] sm:$0xff] %v11696_v50  ;;  %8766 = vmatmul.msk.f32.gmra.mxu3 %vm2621_vm14, %v11696_v50 }
 0xe25   : > { %4497 = vrot.lane.b32.xlu0 %v11701_v19, %s9792_s7 }
 0xe26   : > { %v4215_v24 = vpop.trf.xlu1 }
 0xe27   : > { %v11705_v4 = vadd.f32 %v9783_v47, %v4215_v24 }
 0xe29   : > { %13130 = vst [vmem:[#allocation39_spill] sm:$0xff] %v11705_v4  ;;  %8767 = vmatmul.msk.f32.gmra.mxu3 %vm2621_vm14, %v11705_v4 }
 0xe34   : > { %v11709_v62 = vpop.f32.mrf.mxu3 }
 0xe3c   : > { %v11711_v52 = vpop.f32.mrf.mxu3 }
 0xe44   : > { %v11713_v57 = vpop.f32.mrf.mxu3 }
 0xe4c   : > { %v11715_v50 = vpop.f32.mrf.mxu3 }
 0xe54   : > { %v11717_v63 = vpop.f32.mrf.mxu3 }
 0xe57   : > { %v4504_v38 = vpop.permute.xlu2 %4503 }
 0xe5c   : > { %v11719_v23 = vpop.f32.mrf.mxu3 }
 0xe64   : > { %v11721_v11 = vpop.f32.mrf.mxu3 }
 0xe67   : > { %v4502_v3 = vpop.permute.xlu0 %4501 }
 0xe6c   : > { %v4438_v47 = vpop.f32.mrf.mxu3 }
 0xe6f   : > { %v4500_v24 = vpop.permute.xlu0 %4499 }
 0xe74   : > { %v4441_v60 = vpop.f32.mrf.mxu3 }
 0xe77   : > { %v4506_v56 = vpop.permute.xlu0 %4505 }
 0xe7c   : > { %v4444_v4 = vpop.f32.mrf.mxu3 }
 0xe7f   : > { %v4508_v2 = vpop.permute.xlu0 %4507 }
 0xe84   : > { %v4447_v0 = vpop.f32.mrf.mxu3 }
 0xe87   : > { %v4510_v35 = vpop.permute.xlu0 %4509 }
 0xe8c   : > { %v4450_v42 = vpop.f32.mrf.mxu3 }
 0xe8f   : > { %v4512_v22 = vpop.permute.xlu0 %4511 }
 0xe90   : > { %8768 = vmatpush.xpose.msk.msrb.mxu0 %vm2621_vm14, %v4512_v22 }
 0xe94   : > { %v4453_v14 = vpop.f32.mrf.mxu3  ;;  %8769 = vmatpush.xpose.msk.msrb.mxu0 %vm2621_vm14, %v4510_v35  ;;  %v11741_v35 = vadd.f32 %v11625_v30, %v4450_v42  ;;  %v9221_v42 = vpack.i.bf16 %v11683_v49, %v11692_v34 }
 0xe98   : > { %8770 = vmatpush.xpose.msk.msrb.mxu0 %vm2621_vm14, %v4508_v2 }
 0xe9c   : > { %v4456_v51 = vpop.f32.mrf.mxu3  ;;  %8771 = vmatpush.xpose.msk.msrb.mxu0 %vm2621_vm14, %v4506_v56  ;;  %v11768_v56 = vadd.f32 %v11625_v30, %v4453_v14 }
 0xe9d   : > { %v11732_v6 = vadd.f32 %v11625_v30, %v4456_v51  ;;  %v11745_v51 = vadd.f32 %v11625_v30, %v4447_v0  ;;  %v11765_v0 = vadd.f32 %v11625_v30, %v4441_v60  ;;  %v11791_v60 = vadd.f32 %v11625_v30, %v11584_v15 }
 0xe9e   : > { %v11808_v15 = vadd.f32 %v11625_v30, %v11590_v46  ;;  %v11825_v46 = vadd.f32 %v11625_v30, %v11721_v11 }
 0xe9f   : > { %v9256_v58 = vpack.i.bf16 %v11729_v41, %v11732_v6  ;;  %4684 = vrot.lane.b32.xlu0 %v11732_v6, %s9792_s7  ;;  %v9266_v2 = vpack.i.bf16 %v11745_v51, %v11741_v35 }
 0xea0   : > { %8772 = vmatpush.xpose.msk.msrb.mxu0 %vm2621_vm14, %v4504_v38  ;;  %v11759_v38 = vadd.f32 %v11625_v30, %v4444_v4  ;;  %v11777_v4 = vadd.f32 %v11625_v30, %v11596_v55 }
 0xea1   : > { %9257 = vrot.lane.b32.xlu2 %v9256_v58, %s9793_s12  ;;  %v4498_v58 = vpop.permute.xlu0 %4497 }
 0xea4   : > { %v4459_v22 = vpop.f32.mrf.mxu3  ;;  %8773 = vmatpush.xpose.msk.msrb.mxu0 %vm2621_vm14, %v4502_v3  ;;  %v9271_v3 = vpack.i.bf16 %v11765_v0, %v11759_v38 }
 0xea5   : > { %v11748_v17 = vadd.f32 %v11625_v30, %v4459_v22 }
 0xea7   : > { %4495 = vrot.lane.b32.xlu0 %v11664_v12, %s9792_s7  ;;  %4686 = vrot.lane.b32.xlu1 %v11748_v17, %s9792_s7  ;;  %v9251_v55 = vpack.i.bf16 %v11791_v60, %v11748_v17 }
 0xea8   : > { %8774 = vmatpush.xpose.msk.msrb.mxu0 %vm2621_vm14, %v4500_v24  ;;  %v11781_v24 = vadd.f32 %v11625_v30, %v11602_v21  ;;  %v11817_v21 = vadd.f32 %v11625_v30, %v4438_v47 }
 0xea9   : > { %9267 = vrot.lane.b32.xlu2 %v9266_v2, %s9793_s12  ;;  %v4370_v2 = vadd.f32 %v11625_v30, %v11576_v13  ;;  %v11843_v13 = vadd.f32 %v11625_v30, %v11717_v63 }
 0xeaa   : > { %v9246_v14 = vpack.i.bf16 %v11777_v4, %v11781_v24 }
 0xeac   : > { %8775 = vmatpush.xpose.msk.msrb.mxu0 %vm2621_vm14, %v4498_v58 }
 0xeaf   : > { %4682 = vrot.lane.b32.xlu0 %v11768_v56, %s9792_s7  ;;  %9222 = vrot.lane.b32.xlu1 %v9221_v42, %s9793_s12  ;;  %v11837_v42 = vadd.f32 %v11625_v30, %v11719_v23  ;;  %v11850_v23 = vadd.f32 %v11625_v30, %v11715_v50 }
 0xeb1   : > { %9272 = vrot.lane.b32.xlu2 %v9271_v3, %s9793_s12 }
 0xeb7   : > { %4493 = vrot.lane.b32.xlu0 %v11661_v61, %s9792_s7  ;;  %9247 = vrot.lane.b32.xlu1 %v9246_v14, %s9793_s12 }
 0xebf   : > { %4680 = vrot.lane.b32.xlu0 %v11741_v35, %s9792_s7  ;;  %9252 = vrot.lane.b32.xlu1 %v9251_v55, %s9793_s12 }
 0xec7   : > { %4491 = vrot.lane.b32.xlu0 %v11781_v24, %s9792_s7 }
 0xecf   : > { %4678 = vrot.lane.b32.xlu0 %v11745_v51, %s9792_s7 }
 0xed7   : > { %4489 = vrot.lane.b32.xlu0 %v11777_v4, %s9792_s7 }
 0xedf   : > { %4676 = vrot.lane.b32.xlu0 %v11759_v38, %s9792_s7 }
 0xee7   : > { %4487 = vrot.lane.b32.xlu0 %v11808_v15, %s9792_s7 }
 0xeef   : > { %4674 = vrot.lane.b32.xlu0 %v11765_v0, %s9792_s7 }
 0xef7   : > { %4485 = vrot.lane.b32.xlu0 %v11791_v60, %s9792_s7 }
 0xeff   : > { %4672 = vrot.lane.b32.xlu0 %v11817_v21, %s9792_s7 }
 0xf07   : > { %4483 = vrot.lane.b32.xlu0 %v11729_v41, %s9792_s7 }
 0xf0f   : > { %4670 = vrot.lane.b32.xlu0 %v11825_v46, %s9792_s7 }
 0xf11   : > { %v11829_v22 = vpop.permute.xlu0 %4684 }
 0xf17   : > { %4481 = vrot.lane.b32.xlu0 %v4370_v2, %s9792_s7 }
 0xf19   : > { %v4496_v47 = vpop.permute.xlu0 %4495  ;;  %v4687_v58 = vpop.permute.xlu1 %4686 }
 0xf1a   : > { %8776 = vmatpush.xpose.msk.msrb.mxu0 %vm2621_vm14, %v4496_v47 }
 0xf1f   : > { %4668 = vrot.lane.b32.xlu0 %v11837_v42, %s9792_s7 }
 0xf21   : > { %v4683_v11 = vpop.permute.xlu0 %4682  ;;  %v9223_v3 = vpop.permute.xlu1 %9222 }
 0xf22   : > { %v9224_v14 = vunpack.i.l.bf16 %v9223_v3  ;;  %v9225_v55 = vunpack.i.h.bf16 %v9223_v3 }
 0xf24   : > { %5187 = vmatpush.msrb.mxu2 %v9224_v14  ;;  %v4462_v14 = vpop.f32.mrf.mxu3 }
 0xf25   : > { %v11855_v16 = vadd.f32 %v11625_v30, %v4462_v14 }
 0xf26   : > { %5188 = vmatpush.msrb.mxu2 %v9225_v55  ;;  %v11862_v55 = vadd.f32 %v11625_v30, %v11713_v57 }
 0xf27   : > { %4666 = vrot.lane.b32.xlu0 %v11843_v13, %s9792_s7  ;;  %v9276_v29 = vpack.i.bf16 %v11808_v15, %v11855_v16 }
 0xf29   : > { %v4494_v47 = vpop.permute.xlu0 %4493 }
 0xf2a   : > { %8777 = vmatpush.xpose.msk.msrb.mxu0 %vm2621_vm14, %v4494_v47  ;;  %v11868_v47 = vadd.f32 %v11625_v30, %v11711_v52 }
 0xf2f   : > { %4664 = vrot.lane.b32.xlu0 %v11850_v23, %s9792_s7 }
 0xf31   : > { %v4681_v3 = vpop.permute.xlu0 %4680 }
 0xf37   : > { %4688 = vrot.lane.b32.xlu0 %v11855_v16, %s9792_s7 }
 0xf39   : > { %v4492_v63 = vpop.permute.xlu0 %4491 }
 0xf3a   : > { %8778 = vmatpush.xpose.msk.msrb.mxu0 %vm2621_vm14, %v4492_v63  ;;  %v11875_v63 = vadd.f32 %v11625_v30, %v11709_v62  ;;  %v9261_v62 = vpack.i.bf16 %v4370_v2, %v11768_v56 }
 0xf3f   : > { %4662 = vrot.lane.b32.xlu0 %v11862_v55, %s9792_s7 }
 0xf41   : > { %v4679_v50 = vpop.permute.xlu0 %4678 }
 0xf47   : > { %4660 = vrot.lane.b32.xlu0 %v11868_v47, %s9792_s7 }
 0xf49   : > { %v4490_v14 = vpop.permute.xlu0 %4489 }
 0xf4a   : > { %8779 = vmatpush.xpose.msk.msrb.mxu0 %vm2621_vm14, %v4490_v14 }
 0xf4f   : > { %4658 = vrot.lane.b32.xlu0 %v11875_v63, %s9792_s7 }
 0xf51   : > { %v4677_v57 = vpop.permute.xlu0 %4676 }
 0xf57   : > { %9227 = vrot.lane.b32.xlu0 %v9226_v39, %s9793_s12 }
 0xf59   : > { %v4488_v52 = vpop.permute.xlu0 %4487 }
 0xf5a   : > { %8780 = vmatpush.xpose.msk.msrb.mxu0 %vm2621_vm14, %v4488_v52 }
 0xf5f   : > { %9237 = vrot.lane.b32.xlu0 %v9236_v27, %s9793_s12 }
 0xf61   : > { %v4675_v14 = vpop.permute.xlu0 %4674 }
 0xf67   : > { %9262 = vrot.lane.b32.xlu0 %v9261_v62, %s9793_s12 }
 0xf69   : > { %v4486_v30 = vpop.permute.xlu0 %4485 }
 0xf6a   : > { %8781 = vmatpush.xpose.msk.msrb.mxu0 %vm2621_vm14, %v4486_v30 }
 0xf6f   : > { %9277 = vrot.lane.b32.xlu0 %v9276_v29, %s9793_s12 }
 0xf71   : > { %v4673_v39 = vpop.permute.xlu0 %4672 }
 0xf79   : > { %v4484_v52 = vpop.permute.xlu0 %4483 }
 0xf7a   : > { %8782 = vmatpush.xpose.msk.msrb.mxu0 %vm2621_vm14, %v4484_v52 }
 0xf81   : > { %v4671_v18 = vpop.permute.xlu0 %4670 }
 0xf89   : > { %v4482_v10 = vpop.permute.xlu0 %4481 }
 0xf8a   : > { %8783 = vmatpush.xpose.msk.msrb.mxu0 %vm2621_vm14, %v4482_v10 }
 0xf8d   : > { %8784 = vmatmul.msk.f32.vlgmr.msrb.gmra.mxu0 %vm2621_vm14, %v4370_v2 }
 0xf91   : > { %v4669_v27 = vpop.permute.xlu0 %4668 }
 0xf95   : > { %8785 = vmatmul.msk.f32.gmra.mxu0 %vm2621_vm14, %v11729_v41 }
 0xf99   : > { %v4667_v62 = vpop.permute.xlu0 %4666 }
 0xf9d   : > { %8786 = vmatmul.msk.f32.gmra.mxu0 %vm2621_vm14, %v11791_v60  ;;  %v9233_v60 = vpop.permute.xlu2 %9232 }
 0xf9e   : > { %v9235_v2 = vunpack.i.h.bf16 %v9233_v60 }
 0xfa1   : > { %v4665_v30 = vpop.permute.xlu0 %4664 }
 0xfa5   : > { %8787 = vmatmul.msk.f32.gmra.mxu0 %vm2621_vm14, %v11808_v15 }
 0xfa9   : > { %v4689_v29 = vpop.permute.xlu0 %4688 }
 0xfaa   : > { %8800 = vmatpush.xpose.msk.msra.mxu1 %vm2621_vm14, %v4689_v29 }
 0xfad   : > { %8788 = vmatmul.msk.f32.gmra.mxu0 %vm2621_vm14, %v11777_v4 }
 0xfae   : > { %8801 = vmatpush.xpose.msk.msra.mxu1 %vm2621_vm14, %v4687_v58  ;;  %v9243_v58 = vpop.permute.xlu2 %9242 }
 0xfb1   : > { %v4663_v10 = vpop.permute.xlu0 %4662 }
 0xfb2   : > { %8802 = vmatpush.xpose.msk.msra.mxu1 %vm2621_vm14, %v11829_v22 }
 0xfb5   : > { %8789 = vmatmul.msk.f32.gmra.mxu0 %vm2621_vm14, %v11781_v24 }
 0xfb6   : > { %8803 = vmatpush.xpose.msk.msra.mxu1 %vm2621_vm14, %v4683_v11 }
 0xfb9   : > { %v4661_v41 = vpop.permute.xlu0 %4660 }
 0xfba   : > { %8804 = vmatpush.xpose.msk.msra.mxu1 %vm2621_vm14, %v4681_v3 }
 0xfbd   : > { %8790 = vmatmul.msk.f32.gmra.mxu0 %vm2621_vm14, %v11661_v61  ;;  %v9234_v61 = vunpack.i.l.bf16 %v9233_v60 }
 0xfbe   : > { %8805 = vmatpush.xpose.msk.msra.mxu1 %vm2621_vm14, %v4679_v50  ;;  %v9244_v50 = vunpack.i.l.bf16 %v9243_v58 }
 0xfc1   : > { %v4659_v4 = vpop.permute.xlu0 %4658 }
 0xfc2   : > { %8806 = vmatpush.xpose.msk.msra.mxu1 %vm2621_vm14, %v4677_v57  ;;  %v9258_v57 = vpop.permute.xlu2 %9257 }
 0xfc5   : > { %8791 = vmatmul.msk.f32.gmra.mxu0 %vm2621_vm14, %v11664_v12 }
 0xfc6   : > { %8807 = vmatpush.xpose.msk.msra.mxu1 %vm2621_vm14, %v4675_v14 }
 0xfc9   : > { %v9228_v24 = vpop.permute.xlu0 %9227 }
 0xfca   : > { %v9229_v15 = vunpack.i.l.bf16 %v9228_v24  ;;  %8808 = vmatpush.xpose.msk.msra.mxu1 %vm2621_vm14, %v4673_v39  ;;  %v9230_v22 = vunpack.i.h.bf16 %v9228_v24 }
 0xfcc   : > { %5189 = vmatpush.msrb.mxu2 %v9229_v15  ;;  %v9260_v15 = vunpack.i.h.bf16 %v9258_v57 }
 0xfcd   : > { %8792 = vmatmul.msk.f32.gmra.mxu0 %vm2621_vm14, %v11701_v19  ;;  %v9248_v19 = vpop.permute.xlu1 %9247 }
 0xfce   : > { %8809 = vmatpush.xpose.msk.msra.mxu1 %vm2621_vm14, %v4671_v18  ;;  %5190 = vmatpush.msrb.mxu2 %v9230_v22  ;;  %v9245_v18 = vunpack.i.h.bf16 %v9243_v58  ;;  %v9249_v39 = vunpack.i.l.bf16 %v9248_v19  ;;  %v9250_v52 = vunpack.i.h.bf16 %v9248_v19 }
 0xfd0   : > { %5191 = vmatpush.msrb.mxu2 %v9234_v61 }
 0xfd1   : > { %v9238_v12 = vpop.permute.xlu0 %9237 }
 0xfd2   : > { %v9239_v11 = vunpack.i.l.bf16 %v9238_v12  ;;  %8810 = vmatpush.xpose.msk.msra.mxu1 %vm2621_vm14, %v4669_v27  ;;  %5192 = vmatpush.msrb.mxu2 %v9235_v2  ;;  %v9240_v3 = vunpack.i.h.bf16 %v9238_v12 }
 0xfd4   : > { %5193 = vmatpush.msrb.mxu2 %v9239_v11 }
 0xfd5   : > { %8793 = vmatmul.msk.f32.gmra.mxu0 %vm2621_vm14, %v11639_v32  ;;  %v9253_v32 = vpop.permute.xlu1 %9252 }
 0xfd6   : > { %8811 = vmatpush.xpose.msk.msra.mxu1 %vm2621_vm14, %v4667_v62  ;;  %5194 = vmatpush.msrb.mxu2 %v9240_v3  ;;  %v9268_v62 = vpop.permute.xlu2 %9267  ;;  %v9255_v24 = vunpack.i.h.bf16 %v9253_v32 }
 0xfd7   : > { %v9270_v61 = vunpack.i.h.bf16 %v9268_v62 }
 0xfd8   : > { %5195 = vmatpush.msrb.mxu2 %v9244_v50 }
 0xfd9   : > { %v9263_v14 = vpop.permute.xlu0 %9262 }
 0xfda   : > { %8812 = vmatpush.xpose.msk.msra.mxu1 %vm2621_vm14, %v4665_v30  ;;  %5196 = vmatpush.msrb.mxu2 %v9245_v18  ;;  %v9254_v30 = vunpack.i.l.bf16 %v9253_v32  ;;  %v9264_v22 = vunpack.i.l.bf16 %v9263_v14 }
 0xfdc   : > { %5197 = vmatpush.msrb.mxu2 %v9249_v39 }
 0xfdd   : > { %8794 = vmatmul.msk.f32.gmra.mxu0 %vm2621_vm14, %v11630_v36  ;;  %v9259_v36 = vunpack.i.l.bf16 %v9258_v57  ;;  %v9281_v57 = vpack.i.bf16 %v11825_v46, %v11817_v21 }
 0xfde   : > { %8813 = vmatpush.xpose.msk.msra.mxu1 %vm2621_vm14, %v4663_v10  ;;  %5198 = vmatpush.msrb.mxu2 %v9250_v52  ;;  %v9265_v10 = vunpack.i.h.bf16 %v9263_v14 }
 0xfe1   : > { %v9278_v27 = vpop.permute.xlu0 %9277 }
 0xfe2   : > { %v9280_v29 = vunpack.i.h.bf16 %v9278_v27  ;;  %v9279_v60 = vunpack.i.l.bf16 %v9278_v27  ;;  %8814 = vmatpush.xpose.msk.msra.mxu1 %vm2621_vm14, %v4661_v41  ;;  %v13131_v41 = vmov 1.0  }
 0xfe4   : > { %5199 = vmatpush.msrb.mxu2 %v9280_v29  ;;  %5300 = vmatpush.msra.mxu0 %v9279_v60 }
 0xfe5   : > { %8795 = vmatmul.msk.f32.gmra.mxu0 %vm2621_vm14, %v11642_v37  ;;  %v9269_v37 = vunpack.i.l.bf16 %v9268_v62 }
 0xfe6   : > { %8815 = vmatpush.xpose.msk.msra.mxu1 %vm2621_vm14, %v4659_v4  ;;  %5200 = vmatpush.msrb.mxu2 %v9255_v24  ;;  %v9273_v4 = vpop.permute.xlu2 %9272 }
 0xfe7   : > { %5301 = vmatpush.msra.mxu0 %v9254_v30  ;;  %v9274_v40 = vunpack.i.l.bf16 %v9273_v4  ;;  %v9275_v48 = vunpack.i.h.bf16 %v9273_v4 }
 0xfe8   : > { %5201 = vmatpush.msrb.mxu2 %v9260_v15 }
 0xfe9   : > { %5302 = vmatpush.msra.mxu0 %v9259_v36  ;;  %8816 = vmatmul.msk.f32.vlgmr.msra.gmra.mxu1 %vm2621_vm14, %v11875_v63 }
 0xfea   : > { %5202 = vmatpush.msrb.mxu2 %v9265_v10  ;;  %8838 = vmatpush.msk.msra.mxu1 %vm3739_vm9, %v13131_v41 }
 0xfeb   : > { %5303 = vmatpush.msra.mxu0 %v9264_v22 }
 0xfec   : > { %8832 = vmatpush.msk.msra.mxu2 %vm3747_vm2, %v13131_v41  ;;  %8839 = vmatpush.msk.msra.mxu1 %vm3738_vm10, %v13131_v41 }
 0xfed   : > { %5304 = vmatpush.msra.mxu0 %v9269_v37 }
 0xfee   : > { %8833 = vmatpush.msk.msra.mxu2 %vm3746_vm4, %v13131_v41  ;;  %8796 = vmatmul.msk.f32.gmra.mxu0 %vm2621_vm14, %v11655_v1 }
 0xfef   : > { %5305 = vmatpush.msra.mxu0 %v9270_v61 }
 0xff1   : > { %5306 = vmatpush.msra.mxu0 %v9274_v40  ;;  %8817 = vmatmul.msk.f32.gmra.mxu1 %vm2621_vm14, %v11868_v47 }
 0xff3   : > { %5307 = vmatpush.msra.mxu0 %v9275_v48 }
 0xff6   : > { %8797 = vmatmul.msk.f32.gmra.mxu0 %vm2621_vm14, %v11673_v25 }
 0xff9   : > { %8818 = vmatmul.msk.f32.gmra.mxu1 %vm2621_vm14, %v11862_v55 }
 0xffe   : > { %8798 = vmatmul.msk.f32.gmra.mxu0 %vm2621_vm14, %v11683_v49 }
0x1001   : > { %8819 = vmatmul.msk.f32.gmra.mxu1 %vm2621_vm14, %v11850_v23 }
0x1006   : > { %8799 = vmatmul.msk.f32.gmra.mxu0 %vm2621_vm14, %v11692_v34  ;;  %v9286_v34 = vpack.i.bf16 %v11843_v13, %v11837_v42 }
0x1009   : > { %8820 = vmatmul.msk.f32.gmra.mxu1 %vm2621_vm14, %v11843_v13 }
0x100a   : > { %v4594_v5 = vpop.f32.mrf.mxu0 }
0x100b   : > { %v4819_v20 = vmul.f32 0.25, %v4594_v5 }
0x100d   : > { %4851 = vmax.xlane.f32.xlu0 %v4819_v20 }
0x1011   : > { %8821 = vmatmul.msk.f32.gmra.mxu1 %vm2621_vm14, %v11837_v42 }
0x1012   : > { %v4597_v25 = vpop.f32.mrf.mxu0 }
0x1013   : > { %v4820_v1 = vmul.f32 0.25, %v4597_v25 }
0x1015   : > { %4853 = vmax.xlane.f32.xlu2 %v4820_v1 }
0x1019   : > { %8822 = vmatmul.msk.f32.gmra.mxu1 %vm2621_vm14, %v11825_v46 }
0x101a   : > { %v4600_v49 = vpop.f32.mrf.mxu0 }
0x101b   : > { %v4821_v2 = vmul.f32 0.25, %v4600_v49 }
0x101d   : > { %4855 = vmax.xlane.f32.xlu1 %v4821_v2 }
0x1021   : > { %9287 = vrot.lane.b32.xlu0 %v9286_v34, %s9793_s12  ;;  %8823 = vmatmul.msk.f32.gmra.mxu1 %vm2621_vm14, %v11817_v21 }
0x1022   : > { %v4603_v58 = vpop.f32.mrf.mxu0 }
0x1023   : > { %v4822_v12 = vmul.f32 0.25, %v4603_v58 }
0x1025   : > { %4857 = vmax.xlane.f32.xlu2 %v4822_v12 }
0x1029   : > { %8824 = vmatmul.msk.f32.gmra.mxu1 %vm2621_vm14, %v11765_v0 }
0x102a   : > { %v4606_v11 = vpop.f32.mrf.mxu0 }
0x102b   : > { %v4823_v3 = vmul.f32 0.25, %v4606_v11 }
0x102d   : > { %4859 = vmax.xlane.f32.xlu2 %v4823_v3 }
0x1031   : > { %8825 = vmatmul.msk.f32.gmra.mxu1 %vm2621_vm14, %v11759_v38 }
0x1032   : > { %v4609_v50 = vpop.f32.mrf.mxu0 }
0x1033   : > { %v11981_v19 = vmul.f32 0.25, %v4609_v50 }
0x1035   : > { %4861 = vmax.xlane.f32.xlu1 %v11981_v19 }
0x1039   : > { %8826 = vmatmul.msk.f32.gmra.mxu1 %vm2621_vm14, %v11745_v51 }
0x103a   : > { %v4612_v42 = vpop.f32.mrf.mxu0 }
0x103b   : > { %v11986_v13 = vmul.f32 0.25, %v4612_v42 }
0x103d   : > { %4863 = vmax.xlane.f32.xlu2 %v11986_v13 }
0x1041   : > { %8827 = vmatmul.msk.f32.gmra.mxu1 %vm2621_vm14, %v11741_v35 }
0x1042   : > { %v4615_v0 = vpop.f32.mrf.mxu0 }
0x1049   : > { %8828 = vmatmul.msk.f32.gmra.mxu1 %vm2621_vm14, %v11768_v56  ;;  %v12005_v56 = vmul.f32 0.25, %v4615_v0 }
0x104a   : > { %v4618_v38 = vpop.f32.mrf.mxu0 }
0x104b   : > { %v11993_v18 = vmul.f32 0.25, %v4618_v38 }
0x104d   : > { %4867 = vmax.xlane.f32.xlu2 %v11993_v18 }
0x104e   : > { %9282 = vrot.lane.b32.xlu1 %v9281_v57, %s9793_s12 }
0x1051   : > { %8829 = vmatmul.msk.f32.gmra.mxu1 %vm2621_vm14, %v11732_v6 }
0x1052   : > { %v4621_v37 = vpop.f32.mrf.mxu0 }
0x1053   : > { %v12027_v5 = vmul.f32 0.25, %v4621_v37 }
0x1059   : > { %8830 = vmatmul.msk.f32.gmra.mxu1 %vm2621_vm14, %v11748_v17 }
0x105a   : > { %v4624_v7 = vpop.f32.mrf.mxu0 }
0x1061   : > { %8831 = vmatmul.msk.f32.gmra.mxu1 %vm2621_vm14, %v11855_v16 }
0x1066   : > { %v4771_v35 = vpop.f32.mrf.mxu1 }
0x1067   : > { %v12014_v29 = vmul.f32 0.25, %v4771_v35 }
0x106e   : > { %v4774_v51 = vpop.f32.mrf.mxu1 }
0x106f   : > { %v12023_v40 = vmul.f32 0.25, %v4774_v51 }
0x1076   : > { %v4777_v14 = vpop.f32.mrf.mxu1 }
0x1077   : > { %v12007_v39 = vmul.f32 0.25, %v4777_v14 }
0x1078   : > { %4865 = vmax.xlane.f32.xlu1 %v12005_v56 }
0x1079   : > { %4887 = vmax.xlane.f32.xlu2 %v12007_v39 }
0x107e   : > { %v4780_v30 = vpop.f32.mrf.mxu1 }
0x1080   : > { %v4852_v21 = vpop.xlane.xlu0 %4851 }
0x1081   : > { %v4915_v46 = vsub.f32 %v4819_v20, %v4852_v21  ;;  %v12048_v21 = vmul.f32 0.25, %v4780_v30 }
0x1083   : > { %v4947_v6 = vmul.f32 1.442695, %v4915_v46 }
0x1085   : > { %9506 = vpow2.f32 %v4947_v6 }
0x1086   : > { %v4783_v20 = vpop.f32.mrf.mxu1 }
0x1088   : > { %v4854_v52 = vpop.xlane.xlu2 %4853 }
0x1089   : > { %v4916_v32 = vsub.f32 %v4820_v1, %v4854_v52 }
0x108b   : > { %v12011_v17 = vpop.eup %9506  ;;  %v4949_v16 = vmul.f32 1.442695, %v4916_v32 }
0x108c   : > { %5011 = vadd.xlane.f32.xlu0 %v12011_v17 }
0x108d   : > { %9508 = vpow2.f32 %v4949_v16  ;;  %v9296_v16 = vpack.i.bf16 %v11875_v63, %v11868_v47 }
0x108e   : > { %v4786_v58 = vpop.f32.mrf.mxu1 }
0x1090   : > { %v4856_v27 = vpop.xlane.xlu1 %4855 }
0x1091   : > { %v4917_v62 = vsub.f32 %v4821_v2, %v4856_v27 }
0x1093   : > { %v4951_v60 = vmul.f32 1.442695, %v4917_v62  ;;  %v12017_v36 = vpop.eup %9508  ;;  %v9288_v38 = vpop.permute.xlu0 %9287 }
0x1094   : > { %4883 = vmax.xlane.f32.xlu0 %v12014_v29  ;;  %v9289_v35 = vunpack.i.l.bf16 %v9288_v38  ;;  %v9290_v51 = vunpack.i.h.bf16 %v9288_v38 }
0x1095   : > { %9510 = vpow2.f32 %v4951_v60 }
0x1096   : > { %v4789_v50 = vpop.f32.mrf.mxu1 }
0x1098   : > { %v4858_v24 = vpop.xlane.xlu2 %4857 }
0x1099   : > { %v4918_v15 = vsub.f32 %v4822_v12, %v4858_v24  ;;  %v12036_v12 = vmul.f32 0.25, %v4786_v58 }
0x109b   : > { %v12019_v10 = vpop.eup %9510  ;;  %v4953_v22 = vmul.f32 1.442695, %v4918_v15 }
0x109c   : > { %5013 = vadd.xlane.f32.xlu0 %v12017_v36  ;;  %5015 = vadd.xlane.f32.xlu1 %v12019_v10 }
0x109d   : > { %9512 = vpow2.f32 %v4953_v22 }
0x10a0   : > { %v4860_v4 = vpop.xlane.xlu2 %4859 }
0x10a1   : > { %v4919_v61 = vsub.f32 %v4823_v3, %v4860_v4  ;;  %v9291_v3 = vpack.i.bf16 %v11862_v55, %v11850_v23  ;;  %v12053_v55 = vmul.f32 0.25, %v4783_v20 }
0x10a3   : > { %v12025_v48 = vpop.eup %9512  ;;  %v4955_v25 = vmul.f32 1.442695, %v4919_v61 }
0x10a4   : > { %4885 = vmax.xlane.f32.xlu0 %v12023_v40  ;;  %5017 = vadd.xlane.f32.xlu2 %v12025_v48 }
0x10a5   : > { %9514 = vpow2.f32 %v4955_v25  ;;  %4869 = vmax.xlane.f32.xlu1 %v12027_v5 }
0x10a8   : > { %v4862_v1 = vpop.xlane.xlu1 %4861 }
0x10a9   : > { %v4920_v49 = vsub.f32 %v11981_v19, %v4862_v1  ;;  %v12045_v19 = vmul.f32 0.25, %v4789_v50  ;;  %v4627_v50 = vpop.f32.mrf.mxu0 }
0x10ab   : > { %v12033_v2 = vpop.eup %9514  ;;  %v4957_v34 = vmul.f32 1.442695, %v4920_v49 }
0x10ac   : > { %5019 = vadd.xlane.f32.xlu2 %v12033_v2 }
0x10ad   : > { %9516 = vpow2.f32 %v4957_v34 }
0x10b0   : > { %v4864_v14 = vpop.xlane.xlu2 %4863 }
0x10b1   : > { %v4921_v1 = vsub.f32 %v11986_v13, %v4864_v14 }
0x10b3   : > { %v12038_v11 = vpop.eup %9516 }
0x10b4   : > { %4893 = vmax.xlane.f32.xlu2 %v12036_v12  ;;  %5021 = vadd.xlane.f32.xlu1 %v12038_v11 }
0x10b8   : > { %9292 = vrot.lane.b32.xlu0 %v9291_v3, %s9793_s12  ;;  %v12083_v3 = vmul.f32 0.25, %v4624_v7 }
0x10bc   : > { %4895 = vmax.xlane.f32.xlu2 %v12045_v19 }
0x10c0   : > { %v9283_v42 = vpop.permute.xlu1 %9282  ;;  %v12051_v23 = vpop.xlane.xlu2 %4867 }
0x10c1   : > { %v9284_v0 = vunpack.i.l.bf16 %v9283_v42  ;;  %v9285_v57 = vunpack.i.h.bf16 %v9283_v42 }
0x10c3   : > { %5308 = vmatpush.msra.mxu0 %v9284_v0 }
0x10c5   : > { %5309 = vmatpush.msra.mxu0 %v9285_v57 }
0x10c7   : > { %5310 = vmatpush.msra.mxu0 %v9289_v35 }
0x10c9   : > { %5311 = vmatpush.msra.mxu0 %v9290_v51 }
0x10e2   : > { %4889 = vmax.xlane.f32.xlu0 %v12048_v21 }
0x10ea   : > { %4891 = vmax.xlane.f32.xlu0 %v12053_v55 }
0x10eb   : > { %v4866_v15 = vpop.xlane.xlu1 %4865 }
0x10ec   : > { %v4888_v46 = vpop.xlane.xlu2 %4887  ;;  %v4922_v13 = vsub.f32 %v12005_v56, %v4866_v15 }
0x10ed   : > { %v4933_v6 = vsub.f32 %v12007_v39, %v4888_v46  ;;  %v4792_v46 = vpop.f32.mrf.mxu1 }
0x10ee   : > { %v4961_v51 = vmul.f32 1.442695, %v4922_v13  ;;  %v12095_v56 = vmul.f32 0.25, %v4792_v46 }
0x10ef   : > { %v4983_v52 = vmul.f32 1.442695, %v4933_v6 }
0x10f1   : > { %9518 = vpow2.f32 %v4983_v52  ;;  %v4630_v52 = vpop.f32.mrf.mxu0 }
0x10f7   : > { %v12057_v32 = vpop.eup %9518 }
0x10f8   : > { %5047 = vadd.xlane.f32.xlu1 %v12057_v32 }
0x10fe   : > { %9297 = vrot.lane.b32.xlu0 %v9296_v16, %s9793_s12  ;;  %v4923_v16 = vsub.f32 %v11993_v18, %v12051_v23  ;;  %v4633_v18 = vpop.f32.mrf.mxu0 }
0x10ff   : > { %v5012_v27 = vpop.xlane.xlu0 %5011 }
0x1100   : > { %9520 = vrcp.f32 %v5012_v27 }
0x1106   : > { %v9521_v62 = vpop.eup %9520 }
0x1107   : > { %v5107_v60 = vmul.f32 %v9521_v62, %v12011_v17  ;;  %v4884_v24 = vpop.xlane.xlu0 %4883 }
0x1108   : > { %v4931_v30 = vsub.f32 %v12014_v29, %v4884_v24 }
0x1109   : > { %5203 = vmatmul.f32.vlgmr.msrb.gmra.mxu2 %v5107_v60  ;;  %v4963_v60 = vmul.f32 1.442695, %v4923_v16 }
0x110a   : > { %v4979_v39 = vmul.f32 1.442695, %v4931_v30  ;;  %8844 = vmatpush.msk.msrb.mxu2 %vm3837_vm5, %v13131_v41 }
0x110c   : > { %9522 = vpow2.f32 %v4979_v39  ;;  %8845 = vmatpush.msk.msrb.mxu2 %vm3836_vm6, %v13131_v41 }
0x110f   : > { %v5014_v47 = vpop.xlane.xlu0 %5013  ;;  %v5016_v17 = vpop.xlane.xlu1 %5015 }
0x1110   : > { %9524 = vrcp.f32 %v5014_v47 }
0x1111   : > { %9526 = vrcp.f32 %v5016_v17  ;;  %v12111_v17 = vmul.f32 0.25, %v4633_v18 }
0x1112   : > { %v12073_v63 = vpop.eup %9522 }
0x1113   : > { %5043 = vadd.xlane.f32.xlu2 %v12073_v63 }
0x1116   : > { %v9525_v29 = vpop.eup %9524 }
0x1117   : > { %v4886_v22 = vpop.xlane.xlu0 %4885  ;;  %v5108_v28 = vmul.f32 %v9525_v29, %v12017_v36  ;;  %v5018_v4 = vpop.xlane.xlu2 %5017 }
0x1118   : > { %v4932_v37 = vsub.f32 %v12023_v40, %v4886_v22  ;;  %v9527_v20 = vpop.eup %9526  ;;  %v4870_v34 = vpop.xlane.xlu1 %4869  ;;  %v4959_v40 = vmul.f32 1.442695, %v4921_v1 }
0x1119   : > { %5206 = vmatmul.f32.gmra.mxu2 %v5108_v28  ;;  %v5109_v25 = vmul.f32 %v9527_v20, %v12019_v10  ;;  %v12087_v10 = vmul.f32 0.25, %v4627_v50  ;;  %v4924_v39 = vsub.f32 %v12027_v5, %v4870_v34  ;;  %v4636_v29 = vpop.f32.mrf.mxu0  ;;  %v4795_v1 = vpop.f32.mrf.mxu1 }
0x111a   : > { %v4981_v61 = vmul.f32 1.442695, %v4932_v37  ;;  %v12118_v28 = vmul.f32 0.25, %v4636_v29  ;;  %v12131_v34 = vmul.f32 0.25, %v4795_v1 }
0x111b   : > { %v4965_v23 = vmul.f32 1.442695, %v4924_v39 }
0x111c   : > { %9528 = vpow2.f32 %v4981_v61 }
0x111d   : > { %9530 = vrcp.f32 %v5018_v4 }
0x111f   : > { %v5020_v58 = vpop.xlane.xlu2 %5019 }
0x1120   : > { %9532 = vrcp.f32 %v5020_v58 }
0x1121   : > { %5209 = vmatmul.f32.gmra.mxu2 %v5109_v25  ;;  %9534 = vpow2.f32 %v4959_v40  ;;  %v4639_v37 = vpop.f32.mrf.mxu0  ;;  %v4798_v40 = vpop.f32.mrf.mxu1 }
0x1122   : > { %v12080_v49 = vpop.eup %9528  ;;  %v12124_v61 = vmul.f32 0.25, %v4639_v37 }
0x1123   : > { %5045 = vadd.xlane.f32.xlu2 %v12080_v49  ;;  %v9531_v36 = vpop.eup %9530 }
0x1124   : > { %v5110_v42 = vmul.f32 %v9531_v36, %v12025_v48 }
0x1126   : > { %v9533_v35 = vpop.eup %9532 }
0x1127   : > { %v5022_v38 = vpop.xlane.xlu1 %5021  ;;  %v12091_v48 = vpop.eup %9534  ;;  %v5111_v6 = vmul.f32 %v9533_v35, %v12033_v2  ;;  %v12104_v2 = vmul.f32 0.25, %v4630_v52 }
0x1128   : > { %4871 = vmax.xlane.f32.xlu0 %v12083_v3  ;;  %9536 = vrcp.f32 %v5022_v38  ;;  %v4894_v62 = vpop.xlane.xlu2 %4893 }
0x1129   : > { %5212 = vmatmul.f32.gmra.mxu2 %v5110_v42  ;;  %9538 = vpow2.f32 %v4961_v51  ;;  %v12135_v42 = vmul.f32 0.25, %v4798_v40 }
0x112a   : > { %v9293_v0 = vpop.permute.xlu0 %9292  ;;  %9540 = vpow2.f32 %v4963_v60 }
0x112b   : > { %v9294_v57 = vunpack.i.l.bf16 %v9293_v0  ;;  %4873 = vmax.xlane.f32.xlu2 %v12087_v10  ;;  %v9295_v14 = vunpack.i.h.bf16 %v9293_v0  ;;  %9542 = vpow2.f32 %v4965_v23  ;;  %v4936_v0 = vsub.f32 %v12036_v12, %v4894_v62  ;;  %v4801_v23 = vpop.f32.mrf.mxu1 }
0x112d   : > { %5312 = vmatpush.msra.mxu0 %v9294_v57  ;;  %v4989_v57 = vmul.f32 1.442695, %v4936_v0 }
0x112e   : > { %v9537_v27 = vpop.eup %9536 }
0x112f   : > { %5313 = vmatpush.msra.mxu0 %v9295_v14  ;;  %v12100_v24 = vpop.eup %9538  ;;  %v5112_v30 = vmul.f32 %v9537_v27, %v12038_v11 }
0x1130   : > { %5023 = vadd.xlane.f32.xlu0 %v12091_v48  ;;  %v4896_v15 = vpop.xlane.xlu2 %4895  ;;  %v12108_v47 = vpop.eup %9540 }
0x1131   : > { %5215 = vmatmul.f32.gmra.mxu2 %v5111_v6  ;;  %v4937_v11 = vsub.f32 %v12045_v19, %v4896_v15  ;;  %v12115_v5 = vpop.eup %9542 }
0x1133   : > { %4897 = vmax.xlane.f32.xlu2 %v12095_v56  ;;  %v4991_v22 = vmul.f32 1.442695, %v4937_v11 }
0x1135   : > { %9544 = vpow2.f32 %v4991_v22 }
0x1138   : > { %5025 = vadd.xlane.f32.xlu0 %v12100_v24 }
0x1139   : > { %5218 = vmatmul.f32.gmra.mxu2 %v5112_v30 }
0x113b   : > { %4875 = vmax.xlane.f32.xlu2 %v12104_v2  ;;  %v12121_v4 = vpop.eup %9544 }
0x1140   : > { %5027 = vadd.xlane.f32.xlu0 %v12108_v47 }
0x1143   : > { %4877 = vmax.xlane.f32.xlu2 %v12111_v17 }
0x1148   : > { %5029 = vadd.xlane.f32.xlu0 %v12115_v5 }
0x114b   : > { %4879 = vmax.xlane.f32.xlu2 %v12118_v28 }
0x1150   : > { %5055 = vadd.xlane.f32.xlu0 %v12121_v4 }
0x1153   : > { %4881 = vmax.xlane.f32.xlu2 %v12124_v61 }
0x1155   : > { %v4890_v19 = vpop.xlane.xlu0 %4889 }
0x1156   : > { %v4934_v20 = vsub.f32 %v12048_v21, %v4890_v19 }
0x1158   : > { %v4985_v7 = vmul.f32 1.442695, %v4934_v20 }
0x115a   : > { %9546 = vpow2.f32 %v4985_v7  ;;  %v12168_v7 = vpop.f32.mrf.mxu1 }
0x115d   : > { %v4892_v58 = vpop.xlane.xlu0 %4891 }
0x115e   : > { %v4935_v36 = vsub.f32 %v12053_v55, %v4892_v58 }
0x1160   : > { %v12128_v25 = vpop.eup %9546  ;;  %v4987_v50 = vmul.f32 1.442695, %v4935_v36 }
0x1161   : > { %5049 = vadd.xlane.f32.xlu1 %v12128_v25 }
0x1162   : > { %9548 = vpow2.f32 %v4987_v50 }
0x1163   : > { %9550 = vpow2.f32 %v4989_v57 }
0x1168   : > { %v12139_v35 = vpop.eup %9548 }
0x1169   : > { %4899 = vmax.xlane.f32.xlu1 %v12131_v34  ;;  %v12142_v55 = vpop.eup %9550 }
0x116b   : > { %v5048_v52 = vpop.xlane.xlu1 %5047 }
0x1170   : > { %v9298_v13 = vpop.permute.xlu0 %9297 }
0x1171   : > { %v9299_v21 = vunpack.i.l.bf16 %v9298_v13  ;;  %4901 = vmax.xlane.f32.xlu1 %v12135_v42  ;;  %v9300_v38 = vunpack.i.h.bf16 %v9298_v13  ;;  %v4807_v13 = vpop.f32.mrf.mxu1 }
0x1173   : > { %5314 = vmatpush.msra.mxu0 %v9299_v21 }
0x1175   : > { %5315 = vmatpush.msra.mxu0 %v9300_v38 }
0x1179   : > { %5051 = vadd.xlane.f32.xlu1 %v12139_v35 }
0x1181   : > { %5053 = vadd.xlane.f32.xlu1 %v12142_v55 }
0x1186   : > { %v5044_v51 = vpop.xlane.xlu2 %5043 }
0x1187   : > { %9552 = vrcp.f32 %v5044_v51 }
0x118c   : > { %v5204_v14 = vpop.f32.mrf.mxu2 }
0x118d   : > { %v9553_v46 = vpop.eup %9552  ;;  %8840 = vmatmul.msk.f32.vlgmr.msra.gmra.mxu1 %vm2621_vm14, %v5204_v14 }
0x118e   : > { %v5123_v12 = vmul.f32 %v9553_v46, %v12073_v63  ;;  %8850 = vmatpush.msk.msra.mxu1 %vm3890_vm11, %v13131_v41 }
0x1190   : > { %5316 = vmatmul.f32.vlgmr.msra.gmra.mxu0 %v5123_v12  ;;  %8851 = vmatpush.msk.msra.mxu1 %vm3889_vm12, %v13131_v41  ;;  %v12184_v12 = vmul.f32 0.25, %v4801_v23 }
0x1196   : > { %v5046_v6 = vpop.xlane.xlu2 %5045 }
0x1197   : > { %9554 = vrcp.f32 %v5046_v6 }
0x1198   : > { %9556 = vrcp.f32 %v5048_v52  ;;  %v12187_v52 = vmul.f32 0.25, %v4807_v13 }
0x119b   : > { %v4872_v16 = vpop.xlane.xlu0 %4871 }
0x119c   : > { %v4925_v27 = vsub.f32 %v12083_v3, %v4872_v16  ;;  %v5207_v62 = vpop.f32.mrf.mxu2 }
0x119d   : > { %v9555_v60 = vpop.eup %9554  ;;  %8841 = vmatmul.msk.f32.gmra.mxu1 %vm2621_vm14, %v5207_v62 }
0x119e   : > { %v4967_v63 = vmul.f32 1.442695, %v4925_v27  ;;  %v4874_v8 = vpop.xlane.xlu2 %4873  ;;  %v5124_v30 = vmul.f32 %v9555_v60, %v12080_v49  ;;  %v9557_v18 = vpop.eup %9556 }
0x119f   : > { %v4926_v39 = vsub.f32 %v12087_v10, %v4874_v8  ;;  %v5125_v29 = vmul.f32 %v9557_v18, %v12057_v32 }
0x11a0   : > { %9558 = vpow2.f32 %v4967_v63  ;;  %5319 = vmatmul.f32.gmra.mxu0 %v5124_v30 }
0x11a1   : > { %v4969_v53 = vmul.f32 1.442695, %v4926_v39 }
0x11a3   : > { %9560 = vpow2.f32 %v4969_v53  ;;  %v5024_v15 = vpop.xlane.xlu0 %5023 }
0x11a4   : > { %9562 = vrcp.f32 %v5024_v15 }
0x11a6   : > { %v12159_v3 = vpop.eup %9558  ;;  %v4898_v11 = vpop.xlane.xlu2 %4897 }
0x11a7   : > { %v4938_v22 = vsub.f32 %v12095_v56, %v4898_v11  ;;  %5031 = vadd.xlane.f32.xlu2 %v12159_v3 }
0x11a8   : > { %5322 = vmatmul.f32.gmra.mxu0 %v5125_v29 }
0x11a9   : > { %v12164_v49 = vpop.eup %9560  ;;  %v4993_v10 = vmul.f32 1.442695, %v4938_v22 }
0x11aa   : > { %v9563_v37 = vpop.eup %9562  ;;  %5033 = vadd.xlane.f32.xlu1 %v12164_v49 }
0x11ab   : > { %9564 = vpow2.f32 %v4993_v10  ;;  %v5026_v19 = vpop.xlane.xlu0 %5025  ;;  %v5113_v20 = vmul.f32 %v9563_v37, %v12091_v48 }
0x11ac   : > { %9566 = vrcp.f32 %v5026_v19 }
0x11ad   : > { %5221 = vmatmul.f32.gmra.mxu2 %v5113_v20 }
0x11ae   : > { %v4876_v32 = vpop.xlane.xlu2 %4875 }
0x11af   : > { %v4927_v56 = vsub.f32 %v12104_v2, %v4876_v32 }
0x11b1   : > { %v12171_v1 = vpop.eup %9564  ;;  %v4971_v58 = vmul.f32 1.442695, %v4927_v56 }
0x11b2   : > { %v9567_v36 = vpop.eup %9566  ;;  %5057 = vadd.xlane.f32.xlu2 %v12171_v1 }
0x11b3   : > { %9568 = vpow2.f32 %v4971_v58  ;;  %v5028_v40 = vpop.xlane.xlu0 %5027  ;;  %v5114_v50 = vmul.f32 %v9567_v36, %v12100_v24  ;;  %v4810_v24 = vpop.f32.mrf.mxu1 }
0x11b4   : > { %9570 = vrcp.f32 %v5028_v40  ;;  %v12216_v36 = vmul.f32 0.25, %v4810_v24 }
0x11b5   : > { %5224 = vmatmul.f32.gmra.mxu2 %v5114_v50  ;;  %v12223_v50 = vpop.f32.mrf.mxu2 }
0x11b6   : > { %v4878_v48 = vpop.xlane.xlu2 %4877 }
0x11b7   : > { %v4928_v21 = vsub.f32 %v12111_v17, %v4878_v48 }
0x11b9   : > { %v12176_v0 = vpop.eup %9568  ;;  %v4973_v38 = vmul.f32 1.442695, %v4928_v21 }
0x11ba   : > { %v9571_v2 = vpop.eup %9570  ;;  %5035 = vadd.xlane.f32.xlu0 %v12176_v0 }
0x11bb   : > { %9572 = vpow2.f32 %v4973_v38  ;;  %v5030_v57 = vpop.xlane.xlu0 %5029  ;;  %v5115_v51 = vmul.f32 %v9571_v2, %v12108_v47  ;;  %v4813_v6 = vpop.f32.mrf.mxu1 }
0x11bc   : > { %9574 = vrcp.f32 %v5030_v57  ;;  %v12218_v40 = vmul.f32 0.25, %v4813_v6 }
0x11bd   : > { %5227 = vmatmul.f32.gmra.mxu2 %v5115_v51  ;;  %v12226_v13 = vpop.f32.mrf.mxu2 }
0x11be   : > { %v4880_v60 = vpop.xlane.xlu2 %4879 }
0x11bf   : > { %v4929_v39 = vsub.f32 %v12118_v28, %v4880_v60 }
0x11c1   : > { %v12180_v14 = vpop.eup %9572  ;;  %v4975_v53 = vmul.f32 1.442695, %v4929_v39 }
0x11c2   : > { %v9575_v46 = vpop.eup %9574  ;;  %5037 = vadd.xlane.f32.xlu2 %v12180_v14 }
0x11c3   : > { %v5116_v17 = vmul.f32 %v9575_v46, %v12115_v5  ;;  %v4816_v16 = vpop.f32.mrf.mxu1  ;;  %v5056_v32 = vpop.xlane.xlu0 %5055 }
0x11c4   : > { %v12190_v27 = vmul.f32 0.25, %v4816_v16 }
0x11c5   : > { %5230 = vmatmul.f32.gmra.mxu2 %v5116_v17  ;;  %v12228_v38 = vpop.f32.mrf.mxu2 }
0x11c6   : > { %v4882_v15 = vpop.xlane.xlu2 %4881 }
0x11ca   : > { %4903 = vmax.xlane.f32.xlu2 %v12184_v12 }
0x11cd   : > { %v12232_v46 = vpop.f32.mrf.mxu2 }
0x11d2   : > { %4907 = vmax.xlane.f32.xlu2 %v12187_v52 }
0x11d4   : > { %v5050_v47 = vpop.xlane.xlu1 %5049 }
0x11d5   : > { %9576 = vrcp.f32 %v5050_v47 }
0x11da   : > { %4913 = vmax.xlane.f32.xlu2 %v12190_v27 }
0x11db   : > { %v9577_v62 = vpop.eup %9576 }
0x11dc   : > { %v4900_v5 = vpop.xlane.xlu1 %4899  ;;  %v5126_v63 = vmul.f32 %v9577_v62, %v12128_v25  ;;  %v4930_v25 = vsub.f32 %v12124_v61, %v4882_v15  ;;  %v12209_v61 = vmul.f32 0.25, %v12168_v7 }
0x11dd   : > { %v4939_v8 = vsub.f32 %v12131_v34, %v4900_v5 }
0x11de   : > { %5325 = vmatmul.f32.gmra.mxu0 %v5126_v63  ;;  %v4977_v22 = vmul.f32 1.442695, %v4930_v25 }
0x11df   : > { %v4995_v30 = vmul.f32 1.442695, %v4939_v8 }
0x11e1   : > { %9578 = vpow2.f32 %v4995_v30 }
0x11e2   : > { %9580 = vpow2.f32 %v4975_v53 }
0x11e4   : > { %v4902_v18 = vpop.xlane.xlu1 %4901 }
0x11e5   : > { %v4940_v23 = vsub.f32 %v12135_v42, %v4902_v18 }
0x11e7   : > { %v12197_v11 = vpop.eup %9578  ;;  %v4997_v29 = vmul.f32 1.442695, %v4940_v23 }
0x11e8   : > { %5059 = vadd.xlane.f32.xlu1 %v12197_v11  ;;  %v12201_v10 = vpop.eup %9580 }
0x11e9   : > { %9582 = vpow2.f32 %v4997_v29 }
0x11ec   : > { %v5052_v34 = vpop.xlane.xlu1 %5051 }
0x11ed   : > { %9584 = vrcp.f32 %v5052_v34 }
0x11ee   : > { %9586 = vpow2.f32 %v4977_v22 }
0x11ef   : > { %v12203_v28 = vpop.eup %9582 }
0x11f0   : > { %5039 = vadd.xlane.f32.xlu1 %v12201_v10  ;;  %5061 = vadd.xlane.f32.xlu0 %v12203_v28 }
0x11f3   : > { %v9585_v42 = vpop.eup %9584 }
0x11f4   : > { %v5054_v37 = vpop.xlane.xlu1 %5053  ;;  %v5127_v19 = vmul.f32 %v9585_v42, %v12139_v35  ;;  %v12211_v20 = vpop.eup %9586 }
0x11f5   : > { %9588 = vrcp.f32 %v5054_v37 }
0x11f6   : > { %5328 = vmatmul.f32.gmra.mxu0 %v5127_v19  ;;  %9590 = vrcp.f32 %v5056_v32 }
0x11f8   : > { %4905 = vmax.xlane.f32.xlu1 %v12209_v61  ;;  %5041 = vadd.xlane.f32.xlu0 %v12211_v20 }
0x11fb   : > { %v9589_v56 = vpop.eup %9588 }
0x11fc   : > { %v5128_v58 = vmul.f32 %v9589_v56, %v12142_v55  ;;  %v9591_v35 = vpop.eup %9590 }
0x11fd   : > { %v5129_v7 = vmul.f32 %v9591_v35, %v12121_v4 }
0x11fe   : > { %5331 = vmatmul.f32.gmra.mxu0 %v5128_v58 }
0x1200   : > { %4911 = vmax.xlane.f32.xlu1 %v12218_v40  ;;  %4909 = vmax.xlane.f32.xlu0 %v12216_v36 }
0x1206   : > { %5334 = vmatmul.f32.gmra.mxu0 %v5129_v7 }
0x120d   : > { %v5317_v48 = vpop.f32.mrf.mxu0 }
0x120e   : > { %8842 = vmatmul.msk.f32.gmra.mxu1 %vm2621_vm14, %v5317_v48 }
0x121a   : > { %v5032_v55 = vpop.xlane.xlu2 %5031 }
0x121b   : > { %9592 = vrcp.f32 %v5032_v55 }
0x121d   : > { %v5320_v21 = vpop.f32.mrf.mxu0  ;;  %v5034_v2 = vpop.xlane.xlu1 %5033 }
0x121e   : > { %8843 = vmatmul.msk.f32.gmra.mxu1 %vm2621_vm14, %v5320_v21  ;;  %9594 = vrcp.f32 %v5034_v2 }
0x1221   : > { %v9593_v57 = vpop.eup %9592 }
0x1222   : > { %v5117_v4 = vmul.f32 %v9593_v57, %v12159_v3 }
0x1224   : > { %5233 = vmatmul.f32.gmra.mxu2 %v5117_v4  ;;  %v9595_v24 = vpop.eup %9594 }
0x1225   : > { %v5058_v51 = vpop.xlane.xlu2 %5057  ;;  %v5118_v17 = vmul.f32 %v9595_v24, %v12164_v49  ;;  %v5323_v42 = vpop.f32.mrf.mxu0 }
0x1226   : > { %9596 = vrcp.f32 %v5058_v51 }
0x122c   : > { %v9597_v6 = vpop.eup %9596  ;;  %5236 = vmatmul.f32.gmra.mxu2 %v5118_v17 }
0x122d   : > { %v5036_v47 = vpop.xlane.xlu0 %5035  ;;  %v5130_v16 = vmul.f32 %v9597_v6, %v12171_v1 }
0x122e   : > { %9598 = vrcp.f32 %v5036_v47 }
0x122f   : > { %5337 = vmatmul.f32.gmra.mxu0 %v5130_v16 }
0x1230   : > { %v5222_v62 = vpop.f32.mrf.mxu2 }
0x1231   : > { %8852 = vmatmul.msk.f32.vlgmr.msra.gmra.mxu1 %vm2621_vm14, %v5222_v62 }
0x1232   : > { %8862 = vmatpush.msk.msra.mxu1 %vm3996_vm1, %v13131_v41 }
0x1234   : > { %v9599_v3 = vpop.eup %9598  ;;  %8863 = vmatpush.msk.msra.mxu1 %vm3995_vm15, %v13131_v41  ;;  %vm13163_vm15 = vcmask 261120  }
0x1235   : > { %v5038_v49 = vpop.xlane.xlu2 %5037  ;;  %v5119_v60 = vmul.f32 %v9599_v3, %v12176_v0  ;;  %vm13164_vm2 = vmmov %vm13163_vm15 }
0x1236   : > { %9600 = vrcp.f32 %v5038_v49  ;;  %vm13165_vm4 = vmmov %vm13164_vm2 }
0x1237   : > { %5239 = vmatmul.f32.gmra.mxu2 %v5119_v60  ;;  %vm13166_vm5 = vmmov %vm13164_vm2 }
0x1238   : > { %v5225_v1 = vpop.f32.mrf.mxu2  ;;  %vm13167_vm6 = vmmov %vm13164_vm2 }
0x1239   : > { %8853 = vmatmul.msk.f32.gmra.mxu1 %vm2621_vm14, %v5225_v1  ;;  %vm13169_vm8 = vmmov %vm13164_vm2 }
0x123a   : > { %vm13170_vm9 = vmmov %vm13164_vm2 }
0x123b   : > { %vm13171_vm10 = vmmov %vm13164_vm2 }
0x123c   : > { %v9601_v5 = vpop.eup %9600  ;;  %vm13172_vm11 = vmmov %vm13164_vm2 }
0x123d   : > { %v4904_v63 = vpop.xlane.xlu2 %4903  ;;  %v5120_v8 = vmul.f32 %v9601_v5, %v12180_v14  ;;  %vm13173_vm12 = vmmov %vm13164_vm2 }
0x123e   : > { %v4941_v54 = vsub.f32 %v12184_v12, %v4904_v63 }
0x123f   : > { %5242 = vmatmul.f32.gmra.mxu2 %v5120_v8 }
0x1240   : > { %v4999_v30 = vmul.f32 1.442695, %v4941_v54  ;;  %v5228_v26 = vpop.f32.mrf.mxu2 }
0x1242   : > { %9602 = vpow2.f32 %v4999_v30 }
0x1245   : > { %v4908_v39 = vpop.xlane.xlu2 %4907 }
0x1246   : > { %v4943_v45 = vsub.f32 %v12187_v52, %v4908_v39 }
0x1248   : > { %v12250_v53 = vpop.eup %9602  ;;  %v5003_v0 = vmul.f32 1.442695, %v4943_v45  ;;  %v5231_v33 = vpop.f32.mrf.mxu2 }
0x1249   : > { %5063 = vadd.xlane.f32.xlu0 %v12250_v53 }
0x124a   : > { %9604 = vpow2.f32 %v5003_v0 }
0x124d   : > { %v4914_v18 = vpop.xlane.xlu2 %4913 }
0x124e   : > { %v4946_v23 = vsub.f32 %v12190_v27, %v4914_v18 }
0x1250   : > { %v12254_v15 = vpop.eup %9604  ;;  %v5009_v14 = vmul.f32 1.442695, %v4946_v23 }
0x1251   : > { %5067 = vadd.xlane.f32.xlu2 %v12254_v15 }
0x1252   : > { %9606 = vpow2.f32 %v5009_v14 }
0x1258   : > { %v12257_v12 = vpop.eup %9606 }
0x1259   : > { %5073 = vadd.xlane.f32.xlu2 %v12257_v12 }
0x125b   : > { %v5060_v52 = vpop.xlane.xlu1 %5059  ;;  %v5326_v58 = vpop.f32.mrf.mxu0 }
0x125c   : > { %9608 = vrcp.f32 %v5060_v52 }
0x1262   : > { %v9609_v29 = vpop.eup %9608 }
0x1263   : > { %v5062_v25 = vpop.xlane.xlu0 %5061  ;;  %v5040_v34 = vpop.xlane.xlu1 %5039  ;;  %v5131_v22 = vmul.f32 %v9609_v29, %v12197_v11 }
0x1264   : > { %9610 = vrcp.f32 %v5062_v25 }
0x1265   : > { %9612 = vrcp.f32 %v5040_v34  ;;  %5340 = vmatmul.f32.gmra.mxu0 %v5131_v22  ;;  %v5435_v22 = vpop.f32.mrf.mxu1 }
0x126a   : > { %v9611_v27 = vpop.eup %9610 }
0x126b   : > { %v9613_v37 = vpop.eup %9612  ;;  %v5042_v19 = vpop.xlane.xlu0 %5041  ;;  %v5132_v56 = vmul.f32 %v9611_v27, %v12203_v28 }
0x126c   : > { %v4906_v32 = vpop.xlane.xlu1 %4905  ;;  %9614 = vrcp.f32 %v5042_v19  ;;  %v5121_v7 = vmul.f32 %v9613_v37, %v12201_v10 }
0x126d   : > { %v4942_v35 = vsub.f32 %v12209_v61, %v4906_v32  ;;  %5343 = vmatmul.f32.gmra.mxu0 %v5132_v56 }
0x126e   : > { %5245 = vmatmul.f32.gmra.mxu2 %v5121_v7 }
0x126f   : > { %v5001_v48 = vmul.f32 1.442695, %v4942_v35 }
0x1271   : > { %9616 = vpow2.f32 %v5001_v48 }
0x1272   : > { %v9615_v11 = vpop.eup %9614 }
0x1273   : > { %v4910_v55 = vpop.xlane.xlu0 %4909  ;;  %v5122_v2 = vmul.f32 %v9615_v11, %v12211_v20  ;;  %v5329_v28 = vpop.f32.mrf.mxu0 }
0x1274   : > { %v4912_v21 = vpop.xlane.xlu1 %4911  ;;  %v4944_v57 = vsub.f32 %v12216_v36, %v4910_v55 }
0x1275   : > { %v4945_v4 = vsub.f32 %v12218_v40, %v4912_v21 }
0x1276   : > { %v5005_v24 = vmul.f32 1.442695, %v4944_v57  ;;  %5248 = vmatmul.f32.gmra.mxu2 %v5122_v2 }
0x1277   : > { %v9617_v51 = vpop.eup %9616  ;;  %v5007_v17 = vmul.f32 1.442695, %v4945_v4 }
0x1278   : > { %5065 = vadd.xlane.f32.xlu1 %v9617_v51  ;;  %9618 = vpow2.f32 %v5005_v24 }
0x1279   : > { %9620 = vpow2.f32 %v5007_v17 }
0x127b   : > { %v5332_v10 = vpop.f32.mrf.mxu0 }
0x127e   : > { %v9619_v61 = vpop.eup %9618  ;;  %8834 = vmatmul.msk.f32.vlgmr.msra.gmra.mxu2 %vm2621_vm14, %v12223_v50 }
0x127f   : > { %v12269_v6 = vpop.eup %9620  ;;  %5069 = vadd.xlane.f32.xlu0 %v9619_v61  ;;  %8856 = vmatpush.msk.msra.mxu2 %vm3943_vm13, %v13131_v41  ;;  %vm13174_vm13 = vmmov %vm13164_vm2 }
0x1280   : > { %5071 = vadd.xlane.f32.xlu1 %v12269_v6 }
0x1281   : > { %8857 = vmatpush.msk.msra.mxu2 %vm3942_vm0, %v13131_v41  ;;  %vm13175_vm0 = vmmov %vm13164_vm2 }
0x1282   : > { %vm13176_vm1 = vmmov %vm13175_vm0 }
0x1283   : > { %v5335_v20 = vpop.f32.mrf.mxu0 }
0x1284   : > { %8854 = vmatmul.msk.f32.gmra.mxu1 %vm2621_vm14, %v5335_v20 }
0x1286   : > { %8835 = vmatmul.msk.f32.gmra.mxu2 %vm2621_vm14, %v12226_v13 }
0x128e   : > { %8836 = vmatmul.msk.f32.gmra.mxu2 %vm2621_vm14, %v5323_v42  ;;  %v5438_v42 = vpop.f32.mrf.mxu1 }
0x1296   : > { %8837 = vmatmul.msk.f32.gmra.mxu2 %vm2621_vm14, %v5326_v58  ;;  %v5441_v37 = vpop.f32.mrf.mxu1 }
0x129e   : > { %8846 = vmatmul.msk.f32.vlgmr.msrb.gmra.mxu2 %vm2621_vm14, %v12228_v38  ;;  %v5444_v56 = vpop.f32.mrf.mxu1 }
0x129f   : > { %8868 = vmatpush.msk.msrb.mxu2 %vm4049_vm7, %v13131_v41  ;;  %vm13168_vm7 = vmmov %vm13164_vm2 }
0x12a1   : > { %8869 = vmatpush.msk.msrb.mxu2 %vm13132_vm3, %v13131_v41  ;;  %vm13177_vm3 = vmmov %vm13175_vm0 }
0x12a6   : > { %8847 = vmatmul.msk.f32.gmra.mxu2 %vm2621_vm14, %v12232_v46 }
0x12a7   : > { %v5234_v40 = vpop.f32.mrf.mxu2 }
0x12ac   : > { %v5338_v36 = vpop.f32.mrf.mxu0 }
0x12ad   : > { %8855 = vmatmul.msk.f32.gmra.mxu1 %vm2621_vm14, %v5338_v36 }
0x12ae   : > { %8848 = vmatmul.msk.f32.gmra.mxu2 %vm2621_vm14, %v5329_v28  ;;  %v5521_v35 = vpop.f32.mrf.mxu1 }
0x12af   : > { %v5237_v9 = vpop.f32.mrf.mxu2 }
0x12b5   : > { %8864 = vmatmul.msk.f32.vlgmr.msra.gmra.mxu1 %vm2621_vm14, %v5234_v40 }
0x12b6   : > { %8849 = vmatmul.msk.f32.gmra.mxu2 %vm2621_vm14, %v5332_v10  ;;  %v5524_v48 = vpop.f32.mrf.mxu1 }
0x12ba   : > { %v5240_v38 = vpop.f32.mrf.mxu2 }
0x12bc   : > { %v5064_v50 = vpop.xlane.xlu0 %5063 }
0x12bd   : > { %9622 = vrcp.f32 %v5064_v50  ;;  %8865 = vmatmul.msk.f32.gmra.mxu1 %vm2621_vm14, %v5237_v9 }
0x12be   : > { %8858 = vmatmul.msk.f32.vlgmr.msra.gmra.mxu2 %vm2621_vm14, %v5228_v26 }
0x12c2   : > { %v5243_v47 = vpop.f32.mrf.mxu2 }
0x12c3   : > { %v9623_v59 = vpop.eup %9622 }
0x12c4   : > { %v5133_v13 = vmul.f32 %v9623_v59, %v12250_v53  ;;  %v5068_v3 = vpop.xlane.xlu2 %5067 }
0x12c6   : > { %8859 = vmatmul.msk.f32.gmra.mxu2 %vm2621_vm14, %v5231_v33  ;;  %5346 = vmatmul.f32.gmra.mxu0 %v5133_v13 }
0x12cc   : > { %v5074_v0 = vpop.xlane.xlu2 %5073 }
0x12e2   : > { %v5341_v46 = vpop.f32.mrf.mxu0 }
0x12e3   : > { %8860 = vmatmul.msk.f32.gmra.mxu2 %vm2621_vm14, %v5341_v46 }
0x12ea   : > { %v5344_v62 = vpop.f32.mrf.mxu0 }
0x12eb   : > { %v5066_v16 = vpop.xlane.xlu1 %5065  ;;  %8861 = vmatmul.msk.f32.gmra.mxu2 %vm2621_vm14, %v5344_v62 }
0x12ec   : > { %9624 = vrcp.f32 %v5066_v16 }
0x12ed   : > { %9626 = vrcp.f32 %v5068_v3 }
0x12f1   : > { %v5246_v60 = vpop.f32.mrf.mxu2 }
0x12f2   : > { %v9625_v49 = vpop.eup %9624  ;;  %8876 = vmatmul.msk.f32.vlgmr.msra.gmra.mxu3 %vm2621_vm14, %v5246_v60  ;;  %v5070_v5 = vpop.xlane.xlu0 %5069 }
0x12f3   : > { %v5134_v1 = vmul.f32 %v9625_v49, %v9617_v51  ;;  %8870 = vmatmul.msk.f32.vlgmr.msrb.gmra.mxu2 %vm2621_vm14, %v5240_v38  ;;  %v9627_v63 = vpop.eup %9626  ;;  %9628 = vrcp.f32 %v5070_v5  ;;  %v5072_v30 = vpop.xlane.xlu1 %5071 }
0x12f4   : > { %v5135_v54 = vmul.f32 %v9627_v63, %v12254_v15  ;;  %9630 = vrcp.f32 %v5072_v30 }
0x12f5   : > { %5349 = vmatmul.f32.gmra.mxu0 %v5134_v1  ;;  %9632 = vrcp.f32 %v5074_v0 }
0x12f9   : > { %v5249_v8 = vpop.f32.mrf.mxu2  ;;  %v9629_v39 = vpop.eup %9628 }
0x12fa   : > { %8877 = vmatmul.msk.f32.gmra.mxu3 %vm2621_vm14, %v5249_v8  ;;  %v5136_v45 = vmul.f32 %v9629_v39, %v9619_v61  ;;  %v9631_v18 = vpop.eup %9630 }
0x12fb   : > { %8871 = vmatmul.msk.f32.gmra.mxu2 %vm2621_vm14, %v5243_v47  ;;  %v5137_v23 = vmul.f32 %v9631_v18, %v12269_v6  ;;  %v9633_v52 = vpop.eup %9632 }
0x12fc   : > { %v5138_v29 = vmul.f32 %v9633_v52, %v12257_v12 }
0x12fd   : > { %5352 = vmatmul.f32.gmra.mxu0 %v5135_v54 }
0x1301   : > { %v5394_v53 = vpop.f32.mrf.mxu2  ;;  %v5527_v55 = vpop.f32.mrf.mxu1 }
0x1302   : > { %v5436_v2 = vadd.f32 %v5435_v22, %v5394_v53 }
0x1305   : > { %5355 = vmatmul.f32.gmra.mxu0 %v5136_v45 }
0x1309   : > { %v5397_v14 = vpop.f32.mrf.mxu2 }
0x130a   : > { %v5439_v51 = vadd.f32 %v5438_v42, %v5397_v14 }
0x130d   : > { %5358 = vmatmul.f32.gmra.mxu0 %v5137_v23 }
0x1311   : > { %v5400_v15 = vpop.f32.mrf.mxu2 }
0x1312   : > { %v5442_v60 = vadd.f32 %v5441_v37, %v5400_v15 }
0x1315   : > { %5361 = vmatmul.f32.gmra.mxu0 %v5138_v29 }
0x1319   : > { %v5403_v25 = vpop.f32.mrf.mxu2 }
0x131a   : > { %v5445_v54 = vadd.f32 %v5444_v56, %v5403_v25 }
0x1321   : > { %v5476_v34 = vpop.f32.mrf.mxu2 }
0x1322   : > { %v5488_v57 = vadd.f32 %v5476_v34, %v5436_v2 }
0x1324   : > { %v5533_v28 = vadd.f32 %v5521_v35, %v5488_v57 }
0x1329   : > { %v5479_v27 = vpop.f32.mrf.mxu2 }
0x132a   : > { %v5530_v21 = vpop.f32.mrf.mxu1  ;;  %v5489_v61 = vadd.f32 %v5479_v27, %v5439_v51 }
0x132c   : > { %v5534_v33 = vadd.f32 %v5524_v48, %v5489_v61  ;;  %v13134_v61 = vld [vmem:[#allocation22_spill] sm:$0xff] }
0x1331   : > { %v5482_v19 = vpop.f32.mrf.mxu2 }
0x1332   : > { %v5611_v10 = vpop.f32.mrf.mxu1  ;;  %v5490_v1 = vadd.f32 %v5482_v19, %v5442_v60  ;;  %v5820_v60 = vld [vmem:[%s13007_s13 + $0x38] sm:$0xff] }
0x1334   : > { %v5535_v5 = vadd.f32 %v5527_v55, %v5490_v1  ;;  %v13141_v1 = vld [vmem:[#allocation15_spill] sm:$0xff] }
0x1339   : > { %v5485_v58 = vpop.f32.mrf.mxu2 }
0x133a   : > { %v5614_v59 = vpop.f32.mrf.mxu1  ;;  %v5491_v39 = vadd.f32 %v5485_v58, %v5445_v54 }
0x133c   : > { %v5536_v18 = vadd.f32 %v5530_v21, %v5491_v39  ;;  %v13143_v39 = vld [vmem:[#allocation13_spill] sm:$0xff] }
0x1341   : > { %v5566_v7 = vpop.f32.mrf.mxu2 }
0x1342   : > { %v5578_v24 = vadd.f32 %v5566_v7, %v5533_v28  ;;  %v5828_v28 = vld [vmem:[%s13007_s13 + $0x78] sm:$0xff] }
0x1343   : > { %v5347_v32 = vpop.f32.mrf.mxu0 }
0x1344   : > { %8866 = vmatmul.msk.f32.gmra.mxu1 %vm2621_vm14, %v5347_v32  ;;  %v5623_v6 = vadd.f32 %v5611_v10, %v5578_v24  ;;  %v13133_v24 = vld [vmem:[#allocation23_spill] sm:$0xff] }
0x1345   : > { %v5827_v10 = vld [vmem:[%s13007_s13 + $0x70] sm:$0xff] }
0x1349   : > { %v5569_v11 = vpop.f32.mrf.mxu2 }
0x134a   : > { %v5579_v40 = vadd.f32 %v5569_v11, %v5534_v33  ;;  %v13136_v33 = vld [vmem:[#allocation20_spill] sm:$0xff] }
0x134c   : > { %v5624_v13 = vadd.f32 %v5614_v59, %v5579_v40  ;;  %v5824_v40 = vld [vmem:[%s13007_s13 + $0x58] sm:$0xff]  ;;  %v5823_v59 = vld [vmem:[%s13007_s13 + $0x50] sm:$0xff] }
0x1366   : > { %v5572_v12 = vpop.f32.mrf.mxu2 }
0x1367   : > { %v5580_v30 = vadd.f32 %v5572_v12, %v5535_v5 }
0x136e   : > { %v5575_v4 = vpop.f32.mrf.mxu2 }
0x136f   : > { %v5581_v52 = vadd.f32 %v5575_v4, %v5536_v18 }
0x1372   : > { %v5350_v17 = vpop.f32.mrf.mxu0 }
0x1373   : > { %8867 = vmatmul.msk.f32.gmra.mxu1 %vm2621_vm14, %v5350_v17 }
0x1375   : > { %v5701_v20 = vpop.f32.mrf.mxu3 }
0x1376   : > { %v5656_v26 = vpop.f32.mrf.mxu2 }
0x1377   : > { %v5668_v36 = vadd.f32 %v5656_v26, %v5623_v6 }
0x1379   : > { %v5713_v9 = vadd.f32 %v5701_v20, %v5668_v36  ;;  %v13135_v20 = vld [vmem:[#allocation21_spill] sm:$0xff] }
0x137a   : > { %v5353_v50 = vpop.f32.mrf.mxu0 }
0x137b   : > { %8872 = vmatmul.msk.f32.gmra.mxu2 %vm2621_vm14, %v5353_v50  ;;  %5717 = vxpose.xlu0.b32.start [1/2] (short) %v5713_v9, 128  ;;  %v13137_v9 = vld [vmem:[#allocation19_spill] sm:$0xff] }
0x137d   : > { %v5704_v47 = vpop.f32.mrf.mxu3 }
0x137e   : > { %v5659_v38 = vpop.f32.mrf.mxu2 }
0x137f   : > { %v5669_v46 = vadd.f32 %v5659_v38, %v5624_v13  ;;  %v13138_v13 = vld [vmem:[#allocation18_spill] sm:$0xff] }
0x1381   : > { %v5714_v16 = vadd.f32 %v5704_v47, %v5669_v46  ;;  %v5822_v46 = vld [vmem:[%s13007_s13 + $0x48] sm:$0xff]  ;;  %v13139_v47 = vld [vmem:[#allocation17_spill] sm:$0xff] }
0x1382   : > { %v5356_v62 = vpop.f32.mrf.mxu0 }
0x1383   : > { %8873 = vmatmul.msk.f32.gmra.mxu2 %vm2621_vm14, %v5356_v62  ;;  %5718 = vxpose.xlu0.b32.end [2/2] (short) %v5714_v16, 128  ;;  %v5821_v62 = vld [vmem:[%s13007_s13 + $0x40] sm:$0xff] }
0x138a   : > { %v5359_v3 = vpop.f32.mrf.mxu0 }
0x138b   : > { %8878 = vmatmul.msk.f32.gmra.mxu3 %vm2621_vm14, %v5359_v3  ;;  %v13140_v3 = vld [vmem:[#allocation16_spill] sm:$0xff] }
0x1392   : > { %v5362_v49 = vpop.f32.mrf.mxu0 }
0x1393   : > { %8879 = vmatmul.msk.f32.gmra.mxu3 %vm2621_vm14, %v5362_v49 }
0x13c1   : > { %v5617_v63 = vpop.f32.mrf.mxu1 }
0x13c2   : > { %v5625_v45 = vadd.f32 %v5617_v63, %v5580_v30  ;;  %v5819_v63 = vld [vmem:[%s13007_s13 + $0x30] sm:$0xff]  ;;  %v5818_v30 = vld [vmem:[%s13007_s13 + $0x28] sm:$0xff] }
0x13f0   : > { %v5620_v14 = vpop.f32.mrf.mxu1 }
0x13f1   : > { %v5626_v34 = vadd.f32 %v5620_v14, %v5581_v52  ;;  %v13145_v52 = vld [vmem:[#allocation11_spill] sm:$0xff] }
0x13fe   : > { %v5662_v8 = vpop.f32.mrf.mxu2 }
0x13ff   : > { %v5670_v53 = vadd.f32 %v5662_v8, %v5625_v45  ;;  %v13142_v8 = vld [vmem:[#allocation14_spill] sm:$0xff] }
0x1406   : > { %v5665_v29 = vpop.f32.mrf.mxu2 }
0x1407   : > { %v5671_v22 = vadd.f32 %v5665_v29, %v5626_v34  ;;  %v13146_v34 = vld [vmem:[#allocation24_spill] sm:$0xff] }
0x140e   : > { %v5707_v0 = vpop.f32.mrf.mxu3 }
0x140f   : > { %v5715_v23 = vadd.f32 %v5707_v0, %v5670_v53  ;;  %v5817_v53 = vld [vmem:[%s13007_s13 + $0x20] sm:$0xff]  ;;  %v13144_v0 = vld [vmem:[#allocation12_spill] sm:$0xff] }
0x1411   : > { %5749 = vxpose.xlu1.b32.start [1/2] (short) %v5715_v23, 128  ;;  %v5816_v23 = vld [vmem:[%s13007_s13 + $0x18] sm:$0xff] }
0x1416   : > { %v5710_v42 = vpop.f32.mrf.mxu3 }
0x1417   : > { %v5716_v15 = vadd.f32 %v5710_v42, %v5671_v22  ;;  %v5815_v42 = vld [vmem:[%s13007_s13 + $0x10] sm:$0xff] }
0x1419   : > { %5750 = vxpose.xlu1.b32.end [2/2] (short) %v5716_v15, 128  ;;  %v13147_v15 = vld [vmem:[#allocation10_spill] sm:$0xff] }
0x141f   : > { %v12320_v27 = vpop.trf.xlu0 }
0x1427   : > { %v12322_v37 = vpop.trf.xlu0 }
0x1428   : > { %v5782_v29 = vadd.f32 %v12322_v37, %v13145_v52  ;;  %v5813_v37 = vld [vmem:[%s13007_s13] sm:$0xff] }
0x1429   : > { %v8880_v52 = vld [vmem:[%s13095_s5 + $0x20] sm:$0xff] }
0x142f   : > { %v5735_v25 = vpop.trf.xlu0 }
0x1430   : > { %v5783_v18 = vadd.f32 %v5735_v25, %v13144_v0  ;;  %v5781_v25 = vadd.f32 %v12320_v27, %v13147_v15 }
0x1437   : > { %v5736_v19 = vpop.trf.xlu0 }
0x1438   : > { %v5784_v45 = vadd.f32 %v5736_v19, %v13143_v39  ;;  %v5814_v19 = vld [vmem:[%s13007_s13 + $0x8] sm:$0xff]  ;;  %v9367_v39 = vld [vmem:[%s13008_s14] ss:$0 sm:$0xff] }
0x143f   : > { %v5737_v32 = vpop.trf.xlu0 }
0x1440   : > { %v5785_v54 = vadd.f32 %v5737_v32, %v13142_v8  ;;  %v13162_v8 = vld [vmem:[#allocation39_spill] sm:$0xff] }
0x1447   : > { %v5738_v56 = vpop.trf.xlu0 }
0x1448   : > { %v5786_v5 = vadd.f32 %v5738_v56, %v13141_v1  ;;  %v13148_v56 = vld [vmem:[#allocation25_spill] sm:$0xff]  ;;  %v13161_v1 = vld [vmem:[#allocation38_spill] sm:$0xff] }
0x144f   : > { %v5739_v58 = vpop.trf.xlu0 }
0x1450   : > { %v5787_v49 = vadd.f32 %v5739_v58, %v13140_v3  ;;  %v13160_v3 = vld [vmem:[#allocation37_spill] sm:$0xff] }
0x1457   : > { %v5740_v35 = vpop.trf.xlu0 }
0x1458   : > { %v5788_v16 = vadd.f32 %v5740_v35, %v13139_v47  ;;  %v13149_v35 = vld [vmem:[#allocation26_spill] sm:$0xff]  ;;  %v13159_v47 = vld [vmem:[#allocation36_spill] sm:$0xff] }
0x145f   : > { %v5741_v7 = vpop.trf.xlu0 }
0x1460   : > { %v5789_v38 = vadd.f32 %v5741_v7, %v13138_v13  ;;  %v13158_v13 = vld [vmem:[#allocation35_spill] sm:$0xff] }
0x1467   : > { %v5742_v48 = vpop.trf.xlu0 }
0x1468   : > { %v5790_v50 = vadd.f32 %v5742_v48, %v13137_v9  ;;  %v13157_v9 = vld [vmem:[#allocation34_spill] sm:$0xff] }
0x146f   : > { %v5743_v11 = vpop.trf.xlu0 }
0x1470   : > { %v5791_v36 = vadd.f32 %v5743_v11, %v13136_v33  ;;  %v13150_v11 = vld [vmem:[#allocation27_spill] sm:$0xff]  ;;  %v13156_v33 = vld [vmem:[#allocation33_spill] sm:$0xff] }
0x1477   : > { %v5744_v55 = vpop.trf.xlu0 }
0x1478   : > { %v5792_v26 = vadd.f32 %v5744_v55, %v13135_v20  ;;  %v13155_v20 = vld [vmem:[#allocation32_spill] sm:$0xff] }
0x147f   : > { %v5745_v12 = vpop.trf.xlu0 }
0x1480   : > { %v5793_v6 = vadd.f32 %v5745_v12, %v13134_v61  ;;  %v13154_v61 = vld [vmem:[#allocation31_spill] sm:$0xff] }
0x1487   : > { %v5746_v21 = vpop.trf.xlu0 }
0x1488   : > { %v5794_v17 = vadd.f32 %v5746_v21, %v13133_v24  ;;  %v13151_v21 = vld [vmem:[#allocation28_spill] sm:$0xff]  ;;  %v13153_v24 = vld [vmem:[#allocation30_spill] sm:$0xff] }
0x148f   : > { %v5747_v2 = vpop.trf.xlu0 }
0x1490   : > { %v5795_v51 = vadd.f32 %v5747_v2, %v11568_v43  ;;  %v5825_v43 = vld [vmem:[%s13007_s13 + $0x60] sm:$0xff] }
0x1497   : > { %v5748_v57 = vpop.trf.xlu0 }
0x1498   : > { %v5796_v4 = vadd.f32 %v5748_v57, %v11572_v44  ;;  %v5826_v44 = vld [vmem:[%s13007_s13 + $0x68] sm:$0xff] }
0x149a   : > { %9102 = vmatpush.lsf.msrb.mxu1 %v5796_v4  ;;  %v13152_v4 = vld [vmem:[#allocation29_spill] sm:$0xff] }
0x149c   : > { %5897 = vmatpush.msra.mxu1 %v5828_v28 }
0x149e   : > { %9103 = vmatpush.lsf.msrb.mxu1 %v5795_v51 }
0x14a0   : > { %9104 = vmatpush.lsf.msrb.mxu1 %v5794_v17 }
0x14a2   : > { %5898 = vmatpush.msra.mxu1 %v5827_v10 }
0x14a4   : > { %9105 = vmatpush.lsf.msrb.mxu1 %v5793_v6 }
0x14a6   : > { %5899 = vmatpush.msra.mxu1 %v5826_v44 }
0x14a8   : > { %9106 = vmatpush.lsf.msrb.mxu1 %v5792_v26 }
0x14aa   : > { %5900 = vmatpush.msra.mxu1 %v5825_v43 }
0x14ac   : > { %9107 = vmatpush.lsf.msrb.mxu1 %v5791_v36 }
0x14ae   : > { %5901 = vmatpush.msra.mxu1 %v5824_v40 }
0x14b0   : > { %9108 = vmatpush.lsf.msrb.mxu1 %v5790_v50 }
0x14b2   : > { %5902 = vmatpush.msra.mxu1 %v5823_v59 }
0x14b4   : > { %9109 = vmatpush.lsf.msrb.mxu1 %v5789_v38 }
0x14b5   : > { %v5765_v14 = vpop.trf.xlu1 }
0x14b6   : > { %5903 = vmatpush.msra.mxu1 %v5822_v46  ;;  %v5797_v22 = vadd.f32 %v5765_v14, %v13146_v34  ;;  %v8881_v14 = vld [vmem:[%s13095_s5 + $0x28] sm:$0xff] }
0x14b7   : > { %6036 = vmatpush.msrb.mxu0 %v8881_v14 }
0x14b8   : > { %9110 = vmatpush.lsf.msrb.mxu1 %v5788_v16  ;;  %5865 = vxpose.xlu2.b32.start [1/16] (narrow) %v5797_v22, 16 }
0x14b9   : > { %6037 = vmatpush.msrb.mxu0 %v8880_v52 }
0x14ba   : > { %5904 = vmatpush.msra.mxu1 %v5821_v62 }
0x14bc   : > { %9111 = vmatpush.lsf.msrb.mxu1 %v5787_v49 }
0x14bd   : > { %v5766_v32 = vpop.trf.xlu1 }
0x14be   : > { %5905 = vmatpush.msra.mxu1 %v5820_v60  ;;  %v5798_v58 = vadd.f32 %v5766_v32, %v13148_v56 }
0x14c0   : > { %9112 = vmatpush.lsf.msrb.mxu1 %v5786_v5  ;;  %5866 = vxpose.xlu2.b32.cont [2/16] (narrow) %v5798_v58, 16 }
0x14c2   : > { %5906 = vmatpush.msra.mxu1 %v5819_v63 }
0x14c4   : > { %9113 = vmatpush.lsf.msrb.mxu1 %v5785_v54 }
0x14c5   : > { %v5767_v27 = vpop.trf.xlu1 }
0x14c6   : > { %5907 = vmatpush.msra.mxu1 %v5818_v30  ;;  %v5799_v7 = vadd.f32 %v5767_v27, %v13149_v35  ;;  %v9368_v27 = vld [vmem:[%s13096_s26 + $0x2] ss:$0 sm:$0xff] }
0x14c8   : > { %9114 = vmatpush.lsf.msrb.mxu1 %v5784_v45  ;;  %5867 = vxpose.xlu2.b32.cont [3/16] (narrow) %v5799_v7, 16 }
0x14ca   : > { %5908 = vmatpush.msra.mxu1 %v5817_v53 }
0x14cc   : > { %9115 = vmatpush.lsf.msrb.mxu1 %v5783_v18 }
0x14cd   : > { %v5768_v48 = vpop.trf.xlu1 }
0x14ce   : > { %5909 = vmatpush.msra.mxu1 %v5816_v23  ;;  %v5800_v55 = vadd.f32 %v5768_v48, %v13150_v11 }
0x14d0   : > { %9116 = vmatpush.lsf.msrb.mxu1 %v5782_v29  ;;  %5868 = vxpose.xlu2.b32.cont [4/16] (narrow) %v5800_v55, 16 }
0x14d2   : > { %5910 = vmatpush.msra.mxu1 %v5815_v42 }
0x14d4   : > { %9117 = vmatpush.lsf.msrb.mxu1 %v5781_v25 }
0x14d5   : > { %9118 = vllmr.2.mxu1  ;;  %v5769_v12 = vpop.trf.xlu1 }
0x14d6   : > { %5911 = vmatpush.msra.mxu1 %v5814_v19  ;;  %v5801_v2 = vadd.f32 %v5769_v12, %v13151_v21 }
0x14d8   : > { %5912 = vmatpush.msra.mxu1 %v5813_v37  ;;  %5869 = vxpose.xlu2.b32.cont [5/16] (narrow) %v5801_v2, 16 }
0x14dd   : > { %v5770_v57 = vpop.trf.xlu1 }
0x14de   : > { %v5802_v28 = vadd.f32 %v5770_v57, %v13152_v4 }
0x14e0   : > { %5870 = vxpose.xlu2.b32.cont [6/16] (narrow) %v5802_v28, 16 }
0x14e5   : > { %v5771_v51 = vpop.trf.xlu1 }
0x14e6   : > { %v5803_v17 = vadd.f32 %v5771_v51, %v13153_v24 }
0x14e8   : > { %5871 = vxpose.xlu2.b32.cont [7/16] (narrow) %v5803_v17, 16 }
0x14ed   : > { %v5772_v10 = vpop.trf.xlu1 }
0x14ee   : > { %v5804_v6 = vadd.f32 %v5772_v10, %v13154_v61 }
0x14f0   : > { %5872 = vxpose.xlu2.b32.cont [8/16] (narrow) %v5804_v6, 16 }
0x14f5   : > { %v5773_v44 = vpop.trf.xlu1 }
0x14f6   : > { %9119 = vmatmul.lmr.bf16.vlgmr.msra.gmra.2.mxu1  ;;  %v5805_v26 = vadd.f32 %v5773_v44, %v13155_v20 }
0x14f8   : > { %5873 = vxpose.xlu2.b32.cont [9/16] (narrow) %v5805_v26, 16 }
0x14fd   : > { %v5774_v43 = vpop.trf.xlu1 }
0x14fe   : > { %9120 = vmatmul.lmr.bf16.gmra.2.mxu1  ;;  %v5806_v36 = vadd.f32 %v5774_v43, %v13156_v33 }
0x1500   : > { %5874 = vxpose.xlu2.b32.cont [10/16] (narrow) %v5806_v36, 16 }
0x1505   : > { %v5775_v40 = vpop.trf.xlu1 }
0x1506   : > { %v5807_v50 = vadd.f32 %v5775_v40, %v13157_v9 }
0x1508   : > { %5875 = vxpose.xlu2.b32.cont [11/16] (narrow) %v5807_v50, 16 }
0x150d   : > { %v5776_v59 = vpop.trf.xlu1 }
0x150e   : > { %v5808_v38 = vadd.f32 %v5776_v59, %v13158_v13 }
0x1510   : > { %5876 = vxpose.xlu2.b32.cont [12/16] (narrow) %v5808_v38, 16 }
0x1515   : > { %v5777_v46 = vpop.trf.xlu1 }
0x1516   : > { %v5809_v16 = vadd.f32 %v5777_v46, %v13159_v47 }
0x1518   : > { %5877 = vxpose.xlu2.b32.cont [13/16] (narrow) %v5809_v16, 16 }
0x151d   : > { %v5778_v62 = vpop.trf.xlu1 }
0x151e   : > { %v5810_v49 = vadd.f32 %v5778_v62, %v13160_v3 }
0x1520   : > { %5878 = vxpose.xlu2.b32.cont [14/16] (narrow) %v5810_v49, 16 }
0x1525   : > { %v5779_v60 = vpop.trf.xlu1 }
0x1526   : > { %v5811_v5 = vadd.f32 %v5779_v60, %v13161_v1 }
0x1528   : > { %5879 = vxpose.xlu2.b32.cont [15/16] (narrow) %v5811_v5, 16 }
0x152d   : > { %v5780_v63 = vpop.trf.xlu1 }
0x152e   : > { %v5812_v54 = vadd.f32 %v5780_v63, %v13162_v8 }
0x1530   : > { %5880 = vxpose.xlu2.b32.end [16/16] (narrow) %v5812_v54, 16 }
0x1551   : > { %v5881_v30 = vpop.trf.xlu2 }
0x1552   : > { %5919 = vmatmul.f32.gmra.mxu1 %v5881_v30 }
0x1559   : > { %v5882_v0 = vpop.trf.xlu2 }
0x155a   : > { %5922 = vmatmul.f32.gmra.mxu1 %v5882_v0 }
0x1573   : > { %v5914_v45 = vpop.f32.mrf.mxu1 }
0x1574   : > { %v5915_v53 = vadd.f32 %v9367_v39, %v5914_v45 }
0x1576   : > { %5926 = vxpose.xlu0.b32.start [1/2] (short) (narrow) %v5915_v53, 32 }
0x157b   : > { %v5917_v18 = vpop.f32.mrf.mxu1 }
0x157c   : > { %v5918_v23 = vadd.f32 %v9367_v39, %v5917_v18 }
0x157e   : > { %5927 = vxpose.xlu0.b32.end [2/2] (short) (narrow) %v5918_v23, 32 }
0x15cf   : > { %v5920_v29 = vpop.f32.mrf.mxu1 }
0x15d0   : > { %v5921_v34 = vadd.f32 %v9367_v39, %v5920_v29 }
0x15d2   : > { %5958 = vxpose.xlu1.b32.start [1/2] (short) (narrow) %v5921_v34, 32 }
0x15d7   : > { %v5923_v22 = vpop.f32.mrf.mxu1 }
0x15d8   : > { %v5924_v42 = vadd.f32 %v9367_v39, %v5923_v22 }
0x15da   : > { %5959 = vxpose.xlu1.b32.end [2/2] (short) (narrow) %v5924_v42, 32 }
0x161a   : > { %v12415_v15 = vpop.trf.xlu0 }
0x161b   : > { %8883 = vmatmul.msk.f32.vlgmr.msrb.gmra.mxu0 %vm2621_vm14, %v12415_v15 }
0x1622   : > { %v12419_v25 = vpop.trf.xlu0 }
0x1623   : > { %8884 = vmatmul.msk.f32.gmra.mxu0 %vm2621_vm14, %v12419_v25 }
0x162a   : > { %v12423_v19 = vpop.trf.xlu0 }
0x162b   : > { %8885 = vmatmul.msk.f32.gmra.mxu0 %vm2621_vm14, %v12423_v19 }
0x1632   : > { %v12427_v37 = vpop.trf.xlu0 }
0x1633   : > { %8886 = vmatmul.msk.f32.gmra.mxu0 %vm2621_vm14, %v12427_v37 }
0x1676   : > { %v12431_v32 = vpop.trf.xlu1 }
0x1677   : > { %8887 = vmatmul.msk.f32.gmra.mxu0 %vm2621_vm14, %v12431_v32 }
0x167e   : > { %v12435_v58 = vpop.trf.xlu1 }
0x167f   : > { %8888 = vmatmul.msk.f32.gmra.mxu0 %vm2621_vm14, %v12435_v58 }
0x1686   : > { %v12444_v48 = vpop.trf.xlu1 }
0x1687   : > { %8889 = vmatmul.msk.f32.gmra.mxu0 %vm2621_vm14, %v12444_v48 }
0x168e   : > { %v12450_v12 = vpop.trf.xlu1 }
0x168f   : > { %8890 = vmatmul.msk.f32.gmra.mxu0 %vm2621_vm14, %v12450_v12 }
0x1698   : > { %v6039_v56 = vpop.f32.mrf.mxu0 }
0x1699   : > { %v12456_v57 = vadd.f32 %v9368_v27, %v6039_v56 }
0x16a0   : > { %v6042_v35 = vpop.f32.mrf.mxu0 }
0x16a1   : > { %v12442_v7 = vadd.f32 %v9368_v27, %v6042_v35 }
0x16a3   : > { %6069 = vrot.lane.b32.xlu1 %v12442_v7, %s9792_s7 }
0x16a8   : > { %v6045_v11 = vpop.f32.mrf.mxu0 }
0x16a9   : > { %v6046_v55 = vadd.f32 %v9368_v27, %v6045_v11 }
0x16ab   : > { %6071 = vrot.lane.b32.xlu0 %v6046_v55, %s9792_s7 }
0x16b0   : > { %v6048_v21 = vpop.f32.mrf.mxu0 }
0x16b1   : > { %v6049_v2 = vadd.f32 %v9368_v27, %v6048_v21 }
0x16b3   : > { %6073 = vrot.lane.b32.xlu2 %v6049_v2, %s9792_s7  ;;  %v9301_v33 = vpack.i.bf16 %v6046_v55, %v6049_v2 }
0x16bb   : > { %6067 = vrot.lane.b32.xlu2 %v12456_v57, %s9792_s7 }
0x16f4   : > { %v6051_v28 = vpop.f32.mrf.mxu0 }
0x16f5   : > { %v12461_v51 = vadd.f32 %v9368_v27, %v6051_v28 }
0x16f7   : > { %6124 = vrot.lane.b32.xlu1 %v12461_v51, %s9792_s7 }
0x16fc   : > { %v6054_v24 = vpop.f32.mrf.mxu0 }
0x16fd   : > { %v12478_v43 = vadd.f32 %v9368_v27, %v6054_v24 }
0x1704   : > { %v6057_v10 = vpop.f32.mrf.mxu0 }
0x1705   : > { %v12466_v6 = vadd.f32 %v9368_v27, %v6057_v10 }
0x1707   : > { %6128 = vrot.lane.b32.xlu2 %v12466_v6, %s9792_s7 }
0x170c   : > { %v6060_v20 = vpop.f32.mrf.mxu0 }
0x170d   : > { %v6074_v4 = vpop.permute.xlu2 %6073  ;;  %v12472_v26 = vadd.f32 %v9368_v27, %v6060_v20 }
0x170e   : > { %8891 = vmatpush.xpose.msk.msra.mxu2 %vm2621_vm14, %v6074_v4 }
0x170f   : > { %6130 = vrot.lane.b32.xlu2 %v12472_v26, %s9792_s7  ;;  %v9311_v20 = vpack.i.bf16 %v12466_v6, %v12472_v26 }
0x1715   : > { %v6070_v61 = vpop.permute.xlu1 %6069  ;;  %v6068_v44 = vpop.permute.xlu2 %6067 }
0x1717   : > { %6126 = vrot.lane.b32.xlu2 %v12478_v43, %s9792_s7 }
0x171d   : > { %v6072_v17 = vpop.permute.xlu0 %6071 }
0x171e   : > { %8892 = vmatpush.xpose.msk.msra.mxu2 %vm2621_vm14, %v6072_v17 }
0x171f   : > { %9302 = vrot.lane.b32.xlu2 %v9301_v33, %s9793_s12  ;;  %v9306_v33 = vpack.i.bf16 %v12456_v57, %v12442_v7 }
0x1722   : > { %8893 = vmatpush.xpose.msk.msra.mxu2 %vm2621_vm14, %v6070_v61 }
0x1726   : > { %8894 = vmatpush.xpose.msk.msra.mxu2 %vm2621_vm14, %v6068_v44 }
0x1729   : > { %8895 = vmatmul.msk.f32.vlgmr.msra.gmra.mxu2 %vm2621_vm14, %v12456_v57 }
0x1731   : > { %8896 = vmatmul.msk.f32.gmra.mxu2 %vm2621_vm14, %v12442_v7 }
0x1739   : > { %8897 = vmatmul.msk.f32.gmra.mxu2 %vm2621_vm14, %v6046_v55 }
0x1741   : > { %8898 = vmatmul.msk.f32.gmra.mxu2 %vm2621_vm14, %v6049_v2 }
0x1761   : > { %v6129_v36 = vpop.permute.xlu2 %6128 }
0x1769   : > { %v6131_v40 = vpop.permute.xlu2 %6130  ;;  %v6125_v50 = vpop.permute.xlu1 %6124 }
0x176a   : > { %8899 = vmatpush.xpose.msk.msrb.mxu3 %vm2621_vm14, %v6131_v40 }
0x176e   : > { %8900 = vmatpush.xpose.msk.msrb.mxu3 %vm2621_vm14, %v6129_v36 }
0x1771   : > { %v6127_v9 = vpop.permute.xlu2 %6126 }
0x1772   : > { %8901 = vmatpush.xpose.msk.msrb.mxu3 %vm2621_vm14, %v6127_v9 }
0x1776   : > { %8902 = vmatpush.xpose.msk.msrb.mxu3 %vm2621_vm14, %v6125_v50 }
0x1779   : > { %8903 = vmatmul.msk.f32.vlgmr.msrb.gmra.mxu3 %vm2621_vm14, %v12461_v51  ;;  %v9303_v59 = vpop.permute.xlu2 %9302 }
0x177a   : > { %v9304_v13 = vunpack.i.l.bf16 %v9303_v59  ;;  %v9305_v38 = vunpack.i.h.bf16 %v9303_v59 }
0x177c   : > { %6309 = vmatpush.msra.mxu1 %v9304_v13 }
0x177e   : > { %6310 = vmatpush.msra.mxu1 %v9305_v38 }
0x1781   : > { %8904 = vmatmul.msk.f32.gmra.mxu3 %vm2621_vm14, %v12478_v43 }
0x1789   : > { %8905 = vmatmul.msk.f32.gmra.mxu3 %vm2621_vm14, %v12466_v6 }
0x1791   : > { %8906 = vmatmul.msk.f32.gmra.mxu3 %vm2621_vm14, %v12472_v26 }
0x17ac   : > { %v6108_v46 = vpop.f32.mrf.mxu2 }
0x17ad   : > { %v6177_v47 = vmul.f32 0.25, %v6108_v46 }
0x17af   : > { %v6185_v16 = vsel %vm13163_vm15, %v6177_v47, -inf  ;;  %vm13178_vm15 = vmmov %vm13175_vm0 }
0x17b0   : > { %6186 = vmax.xlane.f32.xlu0 %v6185_v16 }
0x17b4   : > { %v6111_v62 = vpop.f32.mrf.mxu2 }
0x17b5   : > { %v6178_v3 = vmul.f32 0.25, %v6111_v62 }
0x17b7   : > { %v6188_v49 = vsel %vm13164_vm2, %v6178_v3, -inf  ;;  %vm13179_vm2 = vmmov %vm13175_vm0 }
0x17b8   : > { %6189 = vmax.xlane.f32.xlu2 %v6188_v49 }
0x17bc   : > { %v6114_v60 = vpop.f32.mrf.mxu2 }
0x17bd   : > { %v6179_v1 = vmul.f32 0.25, %v6114_v60 }
0x17bf   : > { %v6191_v5 = vsel %vm13165_vm4, %v6179_v1, -inf  ;;  %vm13180_vm4 = vmmov %vm13175_vm0 }
0x17c0   : > { %6192 = vmax.xlane.f32.xlu1 %v6191_v5 }
0x17c4   : > { %v6117_v63 = vpop.f32.mrf.mxu2 }
0x17c5   : > { %v6180_v8 = vmul.f32 0.25, %v6117_v63 }
0x17c7   : > { %v6194_v54 = vsel %vm13166_vm5, %v6180_v8, -inf  ;;  %vm13181_vm5 = vmmov %vm13175_vm0 }
0x17c8   : > { %6195 = vmax.xlane.f32.xlu2 %v6194_v54 }
0x17fc   : > { %v6165_v30 = vpop.f32.mrf.mxu3 }
0x17fd   : > { %v6181_v39 = vmul.f32 0.25, %v6165_v30 }
0x17ff   : > { %v6197_v45 = vsel %vm13167_vm6, %v6181_v39, -inf  ;;  %vm13182_vm6 = vmmov %vm13175_vm0 }
0x1800   : > { %6198 = vmax.xlane.f32.xlu0 %v6197_v45 }
0x1804   : > { %v6168_v53 = vpop.f32.mrf.mxu3 }
0x1805   : > { %v6182_v0 = vmul.f32 0.25, %v6168_v53 }
0x1807   : > { %v6200_v18 = vsel %vm13168_vm7, %v6182_v0, -inf }
0x1808   : > { %6201 = vmax.xlane.f32.xlu1 %v6200_v18 }
0x180c   : > { %v6171_v29 = vpop.f32.mrf.mxu3 }
0x180d   : > { %v12505_v34 = vmul.f32 0.25, %v6171_v29 }
0x180f   : > { %v6203_v22 = vsel %vm13169_vm8, %v12505_v34, -inf }
0x1810   : > { %6204 = vmax.xlane.f32.xlu2 %v6203_v22 }
0x1814   : > { %v6174_v11 = vpop.f32.mrf.mxu3 }
0x1815   : > { %v6184_v21 = vmul.f32 0.25, %v6174_v11 }
0x1817   : > { %v6206_v2 = vsel %vm13171_vm10, %v6184_v21, -inf  ;;  %vm13189_vm10 = vmmov %vm13175_vm0 }
0x1818   : > { %6207 = vmax.xlane.f32.xlu0 %v6206_v2 }
0x1823   : > { %v6187_v23 = vpop.xlane.xlu0 %6186 }
0x1824   : > { %v6209_v14 = vsub.f32 %v6177_v47, %v6187_v23 }
0x1826   : > { %v6217_v52 = vmul.f32 1.442695, %v6209_v14 }
0x1828   : > { %9634 = vpow2.f32 %v6217_v52  ;;  %9312 = vrot.lane.b32.xlu2 %v9311_v20, %s9793_s12 }
0x182b   : > { %v6190_v42 = vpop.xlane.xlu2 %6189 }
0x182c   : > { %v6210_v56 = vsub.f32 %v6178_v3, %v6190_v42  ;;  %9307 = vrot.lane.b32.xlu0 %v9306_v33, %s9793_s12 }
0x182e   : > { %v12509_v27 = vpop.eup %9634  ;;  %v6219_v35 = vmul.f32 1.442695, %v6210_v56 }
0x182f   : > { %v6233_v55 = vsel %vm13170_vm9, %v12509_v27, 0.0 }
0x1830   : > { %9636 = vpow2.f32 %v6219_v35  ;;  %6234 = vadd.xlane.f32.xlu1 %v6233_v55 }
0x1833   : > { %v6193_v4 = vpop.xlane.xlu1 %6192 }
0x1834   : > { %v6211_v28 = vsub.f32 %v6179_v1, %v6193_v4  ;;  %v13183_v4 = vld [vmem:[#allocation8_spill] sm:$0xff] }
0x1836   : > { %v12514_v24 = vpop.eup %9636  ;;  %v6221_v17 = vmul.f32 1.442695, %v6211_v28  ;;  %v6380_v28 = vmul.u32 2, %v13183_v4 }
0x1837   : > { %v6236_v10 = vsel %vm13172_vm11, %v12514_v24, 0.0 }
0x1838   : > { %9638 = vpow2.f32 %v6221_v17  ;;  %6237 = vadd.xlane.f32.xlu1 %v6236_v10  ;;  %vm12551_vm7 = vcmp.eq.s32.totalorder %v11174_v31, %v6380_v28 }
0x183b   : > { %v6196_v36 = vpop.xlane.xlu2 %6195 }
0x183c   : > { %v6212_v40 = vsub.f32 %v6180_v8, %v6196_v36 }
0x183e   : > { %v9639_v61 = vpop.eup %9638  ;;  %v6223_v9 = vmul.f32 1.442695, %v6212_v40 }
0x183f   : > { %v6239_v44 = vsel %vm13173_vm12, %v9639_v61, 0.0  ;;  %vm13190_vm12 = vmmov %vm13175_vm0 }
0x1840   : > { %6240 = vadd.xlane.f32.xlu1 %v6239_v44  ;;  %9640 = vpow2.f32 %v6223_v9  ;;  %v12567_v44 = vadd.s32 1, %v6380_v28 }
0x1842   : > { %vm6390_vm9 = vcmp.eq.s32.totalorder %v11174_v31, %v12567_v44 }
0x1843   : > { %8919 = vmatpush.msk.msra.mxu3 %vm6390_vm9, %v13131_v41 }
0x1846   : > { %v9641_v50 = vpop.eup %9640 }
0x1847   : > { %v6242_v59 = vsel %vm13174_vm13, %v9641_v50, 0.0  ;;  %vm13191_vm13 = vmmov %vm13175_vm0 }
0x1856   : > { %6243 = vadd.xlane.f32.xlu0 %v6242_v59 }
0x1873   : > { %v6199_v13 = vpop.xlane.xlu0 %6198 }
0x1874   : > { %v6213_v38 = vsub.f32 %v6181_v39, %v6199_v13  ;;  %v9316_v39 = vpack.i.bf16 %v12461_v51, %v12478_v43 }
0x1876   : > { %v6225_v46 = vmul.f32 1.442695, %v6213_v38 }
0x1878   : > { %9642 = vpow2.f32 %v6225_v46 }
0x187b   : > { %v6202_v6 = vpop.xlane.xlu1 %6201 }
0x187c   : > { %v6214_v26 = vsub.f32 %v6182_v0, %v6202_v6 }
0x187e   : > { %v12526_v47 = vpop.eup %9642  ;;  %v6227_v16 = vmul.f32 1.442695, %v6214_v26 }
0x187f   : > { %v6245_v7 = vsel %vm13175_vm0, %v12526_v47, 0.0 }
0x1880   : > { %9644 = vpow2.f32 %v6227_v16  ;;  %6246 = vadd.xlane.f32.xlu1 %v6245_v7 }
0x1883   : > { %v6205_v57 = vpop.xlane.xlu2 %6204 }
0x1884   : > { %v6215_v42 = vsub.f32 %v12505_v34, %v6205_v57 }
0x1886   : > { %v12530_v62 = vpop.eup %9644  ;;  %v6229_v35 = vmul.f32 1.442695, %v6215_v42 }
0x1887   : > { %v6248_v3 = vsel %vm13176_vm1, %v12530_v62, 0.0  ;;  %vm13192_vm1 = vmmov %vm13175_vm0 }
0x1888   : > { %6249 = vadd.xlane.f32.xlu2 %v6248_v3 }
0x188b   : > { %v6208_v49 = vpop.xlane.xlu0 %6207  ;;  %v9313_v60 = vpop.permute.xlu2 %9312 }
0x188c   : > { %v6216_v1 = vsub.f32 %v6184_v21, %v6208_v49  ;;  %v9314_v5 = vunpack.i.l.bf16 %v9313_v60  ;;  %v9315_v8 = vunpack.i.h.bf16 %v9313_v60 }
0x188e   : > { %v6231_v63 = vmul.f32 1.442695, %v6216_v1  ;;  %6362 = vmatpush.msrb.mxu2 %v9314_v5 }
0x1890   : > { %9646 = vpow2.f32 %v6231_v63  ;;  %6363 = vmatpush.msrb.mxu2 %v9315_v8 }
0x1896   : > { %v12534_v30 = vpop.eup %9646 }
0x1897   : > { %v6254_v45 = vsel %vm13177_vm3, %v12534_v30, 0.0  ;;  %vm13193_vm3 = vmmov %vm13175_vm0 }
0x1898   : > { %6255 = vadd.xlane.f32.xlu0 %v6254_v45 }
0x1899   : > { %9317 = vrot.lane.b32.xlu1 %v9316_v39, %s9793_s12 }
0x189e   : > { %v9308_v0 = vpop.permute.xlu0 %9307 }
0x189f   : > { %v9309_v23 = vunpack.i.l.bf16 %v9308_v0  ;;  %v9310_v14 = vunpack.i.h.bf16 %v9308_v0  ;;  %v8932_v0 = vld [vmem:[%s13095_s5 + $0x38] sm:$0xff] }
0x18a0   : > { %6595 = vmatpush.msra.mxu0 %v8932_v0 }
0x18a1   : > { %6311 = vmatpush.msra.mxu1 %v9309_v23 }
0x18a3   : > { %v6235_v54 = vpop.xlane.xlu1 %6234  ;;  %6312 = vmatpush.msra.mxu1 %v9310_v14 }
0x18a4   : > { %9648 = vrcp.f32 %v6235_v54 }
0x18aa   : > { %v9649_v18 = vpop.eup %9648 }
0x18ab   : > { %v6238_v53 = vpop.xlane.xlu1 %6237  ;;  %v6265_v52 = vmul.f32 %v9649_v18, %v12509_v27 }
0x18ac   : > { %9650 = vrcp.f32 %v6238_v53 }
0x18ad   : > { %8907 = vmatmul.msk.f32.vlgmr.msra.gmra.mxu1 %vm13178_vm15, %v6265_v52  ;;  %vm13194_vm15 = vmmov %vm13175_vm0 }
0x18ae   : > { %8925 = vmatpush.msk.msra.mxu1 %vm12551_vm7, %v13131_v41 }
0x18b2   : > { %v9651_v43 = vpop.eup %9650 }
0x18b3   : > { %v6241_v51 = vpop.xlane.xlu1 %6240  ;;  %v6266_v29 = vmul.f32 %v9651_v43, %v12514_v24  ;;  %v13186_v24 = vld [vmem:[#allocation7_spill] sm:$0xff] }
0x18b4   : > { %9652 = vrcp.f32 %v6241_v51  ;;  %v6379_v17 = vmul.u32 2, %v13186_v24 }
0x18b5   : > { %8908 = vmatmul.msk.f32.gmra.mxu1 %vm13179_vm2, %v6266_v29  ;;  %9654 = vpow2.f32 %v6229_v35  ;;  %v8931_v29 = vld [vmem:[%s13095_s5 + $0x30] sm:$0xff]  ;;  %vm13195_vm2 = vmmov %vm13175_vm0 }
0x18b6   : > { %vm12560_vm8 = vcmp.eq.s32.totalorder %v11174_v31, %v6379_v17  ;;  %v12576_v59 = vadd.s32 1, %v6379_v17  ;;  %6596 = vmatpush.msra.mxu0 %v8931_v29 }
0x18b7   : > { %8926 = vmatpush.msk.msra.mxu1 %vm12560_vm8, %v13131_v41 }
0x18b8   : > { %vm6389_vm11 = vcmp.eq.s32.totalorder %v11174_v31, %v12576_v59 }
0x18b9   : > { %8920 = vmatpush.msk.msra.mxu3 %vm6389_vm11, %v13131_v41 }
0x18ba   : > { %v9653_v22 = vpop.eup %9652 }
0x18bb   : > { %v6267_v56 = vmul.f32 %v9653_v22, %v9639_v61  ;;  %v9655_v11 = vpop.eup %9654 }
0x18bc   : > { %v6251_v27 = vsel %vm13181_vm5, %v9655_v11, 0.0  ;;  %vm13197_vm5 = vmmov %vm13175_vm0 }
0x18bd   : > { %8909 = vmatmul.msk.f32.gmra.mxu1 %vm13180_vm4, %v6267_v56  ;;  %vm13196_vm4 = vmmov %vm13175_vm0 }
0x18c3   : > { %6252 = vadd.xlane.f32.xlu1 %v6251_v27 }
0x18c9   : > { %v6244_v55 = vpop.xlane.xlu0 %6243 }
0x18ca   : > { %9656 = vrcp.f32 %v6244_v55 }
0x18d0   : > { %v9657_v21 = vpop.eup %9656 }
0x18d1   : > { %v6268_v2 = vmul.f32 %v9657_v21, %v9641_v50 }
0x18d3   : > { %8910 = vmatmul.msk.f32.gmra.mxu1 %vm13182_vm6, %v6268_v2  ;;  %vm13198_vm6 = vmmov %vm13175_vm0 }
0x18f3   : > { %v6247_v61 = vpop.xlane.xlu1 %6246 }
0x18f4   : > { %9658 = vrcp.f32 %v6247_v61 }
0x18fa   : > { %v9659_v36 = vpop.eup %9658 }
0x18fb   : > { %v6250_v20 = vpop.xlane.xlu2 %6249  ;;  %v6269_v50 = vmul.f32 %v9659_v36, %v12526_v47 }
0x18fc   : > { %9660 = vrcp.f32 %v6250_v20 }
0x1902   : > { %v9661_v13 = vpop.eup %9660 }
0x1903   : > { %v6270_v38 = vmul.f32 %v9661_v13, %v12530_v62 }
0x190b   : > { %v9318_v33 = vpop.permute.xlu1 %9317  ;;  %v6256_v16 = vpop.xlane.xlu0 %6255 }
0x190c   : > { %v9319_v40 = vunpack.i.l.bf16 %v9318_v33  ;;  %v9320_v9 = vunpack.i.h.bf16 %v9318_v33 }
0x190e   : > { %6364 = vmatpush.msrb.mxu2 %v9319_v40 }
0x1910   : > { %6365 = vmatpush.msrb.mxu2 %v9320_v9 }
0x1911   : > { %8911 = vmatmul.msk.f32.vlgmr.msrb.gmra.mxu2 %vm13189_vm10, %v6269_v50  ;;  %vm13200_vm10 = vmmov %vm13175_vm0 }
0x1919   : > { %8912 = vmatmul.msk.f32.gmra.mxu2 %vm13190_vm12, %v6270_v38  ;;  %vm13202_vm12 = vmmov %vm13175_vm0 }
0x192a   : > { %v6314_v46 = vpop.f32.mrf.mxu1 }
0x192b   : > { %8927 = vmatmul.msk.f32.vlgmr.msra.gmra.mxu1 %vm2621_vm14, %v6314_v46 }
0x1932   : > { %v6317_v6 = vpop.f32.mrf.mxu1 }
0x1933   : > { %8928 = vmatmul.msk.f32.gmra.mxu1 %vm2621_vm14, %v6317_v6 }
0x1936   : > { %v6253_v47 = vpop.xlane.xlu1 %6252 }
0x1937   : > { %9662 = vrcp.f32 %v6253_v47 }
0x1938   : > { %9664 = vrcp.f32 %v6256_v16 }
0x193a   : > { %v6320_v26 = vpop.f32.mrf.mxu1 }
0x193b   : > { %8921 = vmatmul.msk.f32.vlgmr.msra.gmra.mxu3 %vm2621_vm14, %v6320_v26 }
0x193d   : > { %v9663_v7 = vpop.eup %9662 }
0x193e   : > { %v6271_v57 = vmul.f32 %v9663_v7, %v9655_v11  ;;  %v9665_v62 = vpop.eup %9664 }
0x193f   : > { %v6272_v3 = vmul.f32 %v9665_v62, %v12534_v30 }
0x1940   : > { %8913 = vmatmul.msk.f32.gmra.mxu2 %vm13191_vm13, %v6271_v57  ;;  %vm13203_vm13 = vmmov %vm13175_vm0 }
0x1948   : > { %8914 = vmatmul.msk.f32.gmra.mxu2 %vm13175_vm0, %v6272_v3 }
0x1950   : > { %v6323_v49 = vpop.f32.mrf.mxu1 }
0x1951   : > { %8922 = vmatmul.msk.f32.gmra.mxu3 %vm2621_vm14, %v6323_v49 }
0x1994   : > { %v6367_v60 = vpop.f32.mrf.mxu2 }
0x1995   : > { %8929 = vmatmul.msk.f32.gmra.mxu1 %vm2621_vm14, %v6367_v60 }
0x199c   : > { %v6370_v1 = vpop.f32.mrf.mxu2 }
0x199d   : > { %8930 = vmatmul.msk.f32.gmra.mxu1 %vm2621_vm14, %v6370_v1 }
0x19a8   : > { %v6465_v5 = vpop.f32.mrf.mxu1 }
0x19b0   : > { %v6468_v30 = vpop.f32.mrf.mxu1 }
0x19be   : > { %v6424_v63 = vpop.f32.mrf.mxu3 }
0x19bf   : > { %v6466_v8 = vadd.f32 %v6465_v5, %v6424_v63 }
0x19c1   : > { %6477 = vxpose.xlu0.b32.start [1/2] (short) (narrow) %v6466_v8, 32 }
0x19c3   : > { %v6373_v54 = vpop.f32.mrf.mxu2 }
0x19c4   : > { %8923 = vmatmul.msk.f32.gmra.mxu3 %vm2621_vm14, %v6373_v54 }
0x19cb   : > { %v6376_v39 = vpop.f32.mrf.mxu2 }
0x19cc   : > { %8924 = vmatmul.msk.f32.gmra.mxu3 %vm2621_vm14, %v6376_v39 }
0x19d4   : > { %v6427_v45 = vpop.f32.mrf.mxu3 }
0x19d5   : > { %v6469_v53 = vadd.f32 %v6468_v30, %v6427_v45 }
0x19d7   : > { %6478 = vxpose.xlu0.b32.end [2/2] (short) (narrow) %v6469_v53, 32 }
0x1a12   : > { %v6471_v18 = vpop.f32.mrf.mxu1 }
0x1a1a   : > { %v6474_v52 = vpop.f32.mrf.mxu1 }
0x1a47   : > { %v6430_v23 = vpop.f32.mrf.mxu3 }
0x1a48   : > { %v6472_v14 = vadd.f32 %v6471_v18, %v6430_v23 }
0x1a4a   : > { %6509 = vxpose.xlu2.b32.start [1/2] (short) (narrow) %v6472_v14, 32 }
0x1a4f   : > { %v6433_v51 = vpop.f32.mrf.mxu3 }
0x1a50   : > { %v6475_v43 = vadd.f32 %v6474_v52, %v6433_v51 }
0x1a52   : > { %6510 = vxpose.xlu2.b32.end [2/2] (short) (narrow) %v6475_v43, 32 }
0x1a73   : > { %v6493_v22 = vpop.trf.xlu0 }
0x1a74   : > { %v12605_v42 = vadd.f32 %v6493_v22, %v12415_v15 }
0x1a76   : > { %8934 = vmatmul.msk.f32.vlgmr.msra.gmra.mxu0 %vm2621_vm14, %v12605_v42 }
0x1a7b   : > { %v6494_v56 = vpop.trf.xlu0 }
0x1a7c   : > { %v12610_v35 = vadd.f32 %v6494_v56, %v12419_v25 }
0x1a7e   : > { %8935 = vmatmul.msk.f32.gmra.mxu0 %vm2621_vm14, %v12610_v35 }
0x1a83   : > { %v6495_v11 = vpop.trf.xlu0 }
0x1a84   : > { %v12615_v27 = vadd.f32 %v6495_v11, %v12423_v19 }
0x1a86   : > { %8936 = vmatmul.msk.f32.gmra.mxu0 %vm2621_vm14, %v12615_v27 }
0x1a8b   : > { %v6496_v55 = vpop.trf.xlu0 }
0x1a8c   : > { %v12620_v15 = vadd.f32 %v6496_v55, %v12427_v37  ;;  %v9369_v37 = vld [vmem:[%s13096_s26 + $0x3] ss:$0 sm:$0xff] }
0x1a8e   : > { %8937 = vmatmul.msk.f32.gmra.mxu0 %vm2621_vm14, %v12620_v15 }
0x1ae3   : > { %v6525_v21 = vpop.trf.xlu2 }
0x1ae4   : > { %v12625_v25 = vadd.f32 %v6525_v21, %v12431_v32 }
0x1ae6   : > { %8938 = vmatmul.msk.f32.gmra.mxu0 %vm2621_vm14, %v12625_v25 }
0x1aeb   : > { %v6526_v2 = vpop.trf.xlu2 }
0x1aec   : > { %v12630_v19 = vadd.f32 %v6526_v2, %v12435_v58 }
0x1aee   : > { %8939 = vmatmul.msk.f32.gmra.mxu0 %vm2621_vm14, %v12630_v19 }
0x1af3   : > { %v6598_v4 = vpop.f32.mrf.mxu0  ;;  %v6527_v28 = vpop.trf.xlu2 }
0x1af4   : > { %v12637_v24 = vadd.f32 %v9369_v37, %v6598_v4  ;;  %v12640_v32 = vadd.f32 %v6527_v28, %v12444_v48 }
0x1af6   : > { %6626 = vrot.lane.b32.xlu1 %v12637_v24, %s9792_s7  ;;  %8940 = vmatmul.msk.f32.gmra.mxu0 %vm2621_vm14, %v12640_v32 }
0x1afb   : > { %v6601_v58 = vpop.f32.mrf.mxu0  ;;  %v6528_v17 = vpop.trf.xlu2 }
0x1afc   : > { %v12646_v61 = vadd.f32 %v9369_v37, %v6601_v58  ;;  %v12649_v20 = vadd.f32 %v6528_v17, %v12450_v12 }
0x1afe   : > { %6628 = vrot.lane.b32.xlu2 %v12646_v61, %s9792_s7  ;;  %8941 = vmatmul.msk.f32.gmra.mxu0 %vm2621_vm14, %v12649_v20 }
0x1b03   : > { %v6604_v48 = vpop.f32.mrf.mxu0 }
0x1b04   : > { %v6605_v33 = vadd.f32 %v9369_v37, %v6604_v48 }
0x1b06   : > { %6630 = vrot.lane.b32.xlu0 %v6605_v33, %s9792_s7 }
0x1b0b   : > { %v6607_v36 = vpop.f32.mrf.mxu0 }
0x1b0c   : > { %v6608_v40 = vadd.f32 %v9369_v37, %v6607_v36 }
0x1b0e   : > { %6632 = vrot.lane.b32.xlu1 %v6608_v40, %s9792_s7  ;;  %v9321_v62 = vpack.i.bf16 %v6605_v33, %v6608_v40 }
0x1b58   : > { %v6629_v7 = vpop.permute.xlu2 %6628 }
0x1b63   : > { %v6610_v9 = vpop.f32.mrf.mxu0 }
0x1b64   : > { %v12672_v57 = vadd.f32 %v9369_v37, %v6610_v9 }
0x1b68   : > { %v6627_v12 = vpop.permute.xlu1 %6626 }
0x1b6b   : > { %v6613_v50 = vpop.f32.mrf.mxu0 }
0x1b6c   : > { %v12666_v47 = vadd.f32 %v9369_v37, %v6613_v50 }
0x1b73   : > { %v6616_v13 = vpop.f32.mrf.mxu0 }
0x1b74   : > { %v12657_v38 = vadd.f32 %v9369_v37, %v6616_v13 }
0x1b76   : > { %6687 = vrot.lane.b32.xlu1 %v12657_v38, %s9792_s7 }
0x1b78   : > { %v6631_v16 = vpop.permute.xlu0 %6630 }
0x1b7b   : > { %v6619_v46 = vpop.f32.mrf.mxu0 }
0x1b7c   : > { %v12661_v6 = vadd.f32 %v9369_v37, %v6619_v46 }
0x1b7e   : > { %6689 = vrot.lane.b32.xlu1 %v12661_v6, %s9792_s7 }
0x1b80   : > { %v6633_v26 = vpop.permute.xlu1 %6632 }
0x1b81   : > { %8942 = vmatpush.xpose.msk.msra.mxu2 %vm2621_vm14, %v6633_v26 }
0x1b85   : > { %8943 = vmatpush.xpose.msk.msra.mxu2 %vm2621_vm14, %v6631_v16 }
0x1b86   : > { %6685 = vrot.lane.b32.xlu1 %v12666_v47, %s9792_s7 }
0x1b89   : > { %8944 = vmatpush.xpose.msk.msra.mxu2 %vm2621_vm14, %v6629_v7 }
0x1b8d   : > { %8945 = vmatpush.xpose.msk.msra.mxu2 %vm2621_vm14, %v6627_v12 }
0x1b8e   : > { %6683 = vrot.lane.b32.xlu1 %v12672_v57, %s9792_s7 }
0x1b90   : > { %8946 = vmatmul.msk.f32.vlgmr.msra.gmra.mxu2 %vm2621_vm14, %v12637_v24 }
0x1b96   : > { %9322 = vrot.lane.b32.xlu1 %v9321_v62, %s9793_s12  ;;  %v9331_v62 = vpack.i.bf16 %v12657_v38, %v12661_v6 }
0x1b98   : > { %8947 = vmatmul.msk.f32.gmra.mxu2 %vm2621_vm14, %v12646_v61 }
0x1ba0   : > { %8948 = vmatmul.msk.f32.gmra.mxu2 %vm2621_vm14, %v6605_v33 }
0x1ba8   : > { %8949 = vmatmul.msk.f32.gmra.mxu2 %vm2621_vm14, %v6608_v40 }
0x1be8   : > { %v6688_v3 = vpop.permute.xlu1 %6687 }
0x1bf0   : > { %v6690_v49 = vpop.permute.xlu1 %6689 }
0x1bf1   : > { %8950 = vmatpush.xpose.msk.msrb.mxu3 %vm2621_vm14, %v6690_v49  ;;  %v9326_v49 = vpack.i.bf16 %v12637_v24, %v12646_v61 }
0x1bf5   : > { %8951 = vmatpush.xpose.msk.msrb.mxu3 %vm2621_vm14, %v6688_v3 }
0x1bf8   : > { %v6686_v60 = vpop.permute.xlu1 %6685 }
0x1bf9   : > { %8952 = vmatpush.xpose.msk.msrb.mxu3 %vm2621_vm14, %v6686_v60  ;;  %v9336_v60 = vpack.i.bf16 %v12672_v57, %v12666_v47 }
0x1c00   : > { %v6684_v1 = vpop.permute.xlu1 %6683 }
0x1c01   : > { %8953 = vmatpush.xpose.msk.msrb.mxu3 %vm2621_vm14, %v6684_v1 }
0x1c04   : > { %8954 = vmatmul.msk.f32.vlgmr.msrb.gmra.mxu3 %vm2621_vm14, %v12672_v57 }
0x1c05   : > { %8966 = vmatpush.msk.msra.mxu3 %vm6390_vm9, %v13131_v41  ;;  %vm13199_vm9 = vmmov %vm13175_vm0 }
0x1c07   : > { %8967 = vmatpush.msk.msra.mxu3 %vm6389_vm11, %v13131_v41  ;;  %vm13201_vm11 = vmmov %vm13175_vm0 }
0x1c08   : > { %v9323_v5 = vpop.permute.xlu1 %9322 }
0x1c09   : > { %v9324_v63 = vunpack.i.l.bf16 %v9323_v5  ;;  %v9325_v8 = vunpack.i.h.bf16 %v9323_v5 }
0x1c0b   : > { %6868 = vmatpush.msra.mxu1 %v9324_v63 }
0x1c0c   : > { %8955 = vmatmul.msk.f32.gmra.mxu3 %vm2621_vm14, %v12666_v47 }
0x1c0d   : > { %6869 = vmatpush.msra.mxu1 %v9325_v8 }
0x1c13   : > { %v6667_v54 = vpop.f32.mrf.mxu2 }
0x1c14   : > { %v6736_v39 = vmul.f32 0.25, %v6667_v54  ;;  %8956 = vmatmul.msk.f32.gmra.mxu3 %vm2621_vm14, %v12657_v38 }
0x1c16   : > { %v6744_v44 = vsel %vm13192_vm1, %v6736_v39, -inf  ;;  %vm13204_vm1 = vmmov %vm13175_vm0 }
0x1c17   : > { %6745 = vmax.xlane.f32.xlu1 %v6744_v44 }
0x1c1b   : > { %v6670_v30 = vpop.f32.mrf.mxu2 }
0x1c1c   : > { %v6737_v45 = vmul.f32 0.25, %v6670_v30  ;;  %8957 = vmatmul.msk.f32.gmra.mxu3 %vm2621_vm14, %v12661_v6 }
0x1c1e   : > { %v6747_v59 = vsel %vm13193_vm3, %v6737_v45, -inf  ;;  %vm13205_vm3 = vmmov %vm13175_vm0 }
0x1c1f   : > { %6748 = vmax.xlane.f32.xlu1 %v6747_v59 }
0x1c23   : > { %v6673_v53 = vpop.f32.mrf.mxu2 }
0x1c24   : > { %v6738_v0 = vmul.f32 0.25, %v6673_v53 }
0x1c26   : > { %v6750_v18 = vsel %vm13194_vm15, %v6738_v0, -inf  ;;  %vm13206_vm15 = vmmov %vm13175_vm0 }
0x1c27   : > { %6751 = vmax.xlane.f32.xlu1 %v6750_v18 }
0x1c2b   : > { %v6676_v23 = vpop.f32.mrf.mxu2 }
0x1c2c   : > { %v6739_v14 = vmul.f32 0.25, %v6676_v23 }
0x1c2e   : > { %v6753_v52 = vsel %vm13195_vm2, %v6739_v14, -inf  ;;  %vm13207_vm2 = vmmov %vm13175_vm0 }
0x1c2f   : > { %6754 = vmax.xlane.f32.xlu1 %v6753_v52 }
0x1c87   : > { %v6724_v51 = vpop.f32.mrf.mxu3 }
0x1c88   : > { %v6740_v43 = vmul.f32 0.25, %v6724_v51 }
0x1c8a   : > { %v6746_v29 = vpop.xlane.xlu1 %6745  ;;  %v6756_v22 = vsel %vm13196_vm4, %v6740_v43, -inf  ;;  %vm13208_vm4 = vmmov %vm13175_vm0 }
0x1c8b   : > { %v6768_v56 = vsub.f32 %v6736_v39, %v6746_v29  ;;  %6757 = vmax.xlane.f32.xlu1 %v6756_v22 }
0x1c8d   : > { %v6776_v11 = vmul.f32 1.442695, %v6768_v56 }
0x1c8f   : > { %9666 = vpow2.f32 %v6776_v11  ;;  %v6727_v55 = vpop.f32.mrf.mxu3 }
0x1c90   : > { %v6741_v21 = vmul.f32 0.25, %v6727_v55 }
0x1c92   : > { %v6749_v2 = vpop.xlane.xlu1 %6748  ;;  %v6759_v37 = vsel %vm13197_vm5, %v6741_v21, -inf  ;;  %vm13209_vm5 = vmmov %vm13175_vm0 }
0x1c93   : > { %v6769_v4 = vsub.f32 %v6737_v45, %v6749_v2  ;;  %6760 = vmax.xlane.f32.xlu1 %v6759_v37 }
0x1c95   : > { %v12710_v28 = vpop.eup %9666  ;;  %v6778_v58 = vmul.f32 1.442695, %v6769_v4 }
0x1c96   : > { %v6792_v17 = vsel %vm13198_vm6, %v12710_v28, 0.0  ;;  %vm13212_vm6 = vmmov %vm13175_vm0 }
0x1c97   : > { %v6730_v48 = vpop.f32.mrf.mxu3  ;;  %6793 = vadd.xlane.f32.xlu0 %v6792_v17  ;;  %9668 = vpow2.f32 %v6778_v58 }
0x1c98   : > { %v6742_v33 = vmul.f32 0.25, %v6730_v48 }
0x1c9a   : > { %v6752_v36 = vpop.xlane.xlu1 %6751  ;;  %v6762_v40 = vsel %vm13199_vm9, %v6742_v33, -inf  ;;  %vm13213_vm9 = vmmov %vm13175_vm0 }
0x1c9b   : > { %v6770_v9 = vsub.f32 %v6738_v0, %v6752_v36  ;;  %6763 = vmax.xlane.f32.xlu2 %v6762_v40 }
0x1c9d   : > { %v6780_v50 = vmul.f32 1.442695, %v6770_v9  ;;  %v12715_v13 = vpop.eup %9668 }
0x1c9e   : > { %v6795_v26 = vsel %vm13200_vm10, %v12715_v13, 0.0  ;;  %vm13214_vm10 = vmmov %vm13175_vm0 }
0x1c9f   : > { %v6733_v12 = vpop.f32.mrf.mxu3  ;;  %9670 = vpow2.f32 %v6780_v50 }
0x1ca0   : > { %v6743_v46 = vmul.f32 0.25, %v6733_v12 }
0x1ca2   : > { %v6765_v16 = vsel %vm13201_vm11, %v6743_v46, -inf  ;;  %v6755_v1 = vpop.xlane.xlu1 %6754  ;;  %vm13215_vm11 = vmmov %vm13175_vm0 }
0x1ca3   : > { %6796 = vadd.xlane.f32.xlu2 %v6795_v26  ;;  %6766 = vmax.xlane.f32.xlu1 %v6765_v16  ;;  %v6771_v5 = vsub.f32 %v6739_v14, %v6755_v1 }
0x1ca5   : > { %v12720_v7 = vpop.eup %9670  ;;  %v6782_v63 = vmul.f32 1.442695, %v6771_v5 }
0x1ca6   : > { %v6798_v3 = vsel %vm13202_vm12, %v12720_v7, 0.0  ;;  %vm13216_vm12 = vmmov %vm13175_vm0 }
0x1ca7   : > { %9672 = vpow2.f32 %v6782_v63 }
0x1cab   : > { %9332 = vrot.lane.b32.xlu0 %v9331_v62, %s9793_s12  ;;  %6799 = vadd.xlane.f32.xlu2 %v6798_v3 }
0x1cad   : > { %v12733_v38 = vpop.eup %9672 }
0x1cae   : > { %v6801_v6 = vsel %vm13203_vm13, %v12733_v38, 0.0  ;;  %vm13217_vm13 = vmmov %vm13175_vm0 }
0x1cbc   : > { %9327 = vrot.lane.b32.xlu1 %v9326_v49, %s9793_s12 }
0x1cc3   : > { %9337 = vrot.lane.b32.xlu2 %v9336_v60, %s9793_s12 }
0x1cec   : > { %6802 = vadd.xlane.f32.xlu2 %v6801_v6 }
0x1cfe   : > { %v6758_v8 = vpop.xlane.xlu1 %6757 }
0x1cff   : > { %v6772_v54 = vsub.f32 %v6740_v43, %v6758_v8 }
0x1d01   : > { %v6784_v24 = vmul.f32 1.442695, %v6772_v54 }
0x1d03   : > { %9674 = vpow2.f32 %v6784_v24 }
0x1d06   : > { %v6761_v61 = vpop.xlane.xlu1 %6760 }
0x1d07   : > { %v6773_v39 = vsub.f32 %v6741_v21, %v6761_v61 }
0x1d09   : > { %v9675_v44 = vpop.eup %9674  ;;  %v6786_v47 = vmul.f32 1.442695, %v6773_v39 }
0x1d0a   : > { %v6804_v57 = vsel %vm13175_vm0, %v9675_v44, 0.0  ;;  %v6794_v18 = vpop.xlane.xlu0 %6793 }
0x1d0b   : > { %9676 = vpow2.f32 %v6786_v47  ;;  %6805 = vadd.xlane.f32.xlu1 %v6804_v57 }
0x1d0e   : > { %v6764_v30 = vpop.xlane.xlu2 %6763 }
0x1d0f   : > { %v6774_v45 = vsub.f32 %v6742_v33, %v6764_v30 }
0x1d11   : > { %v9677_v59 = vpop.eup %9676  ;;  %v6788_v53 = vmul.f32 1.442695, %v6774_v45 }
0x1d12   : > { %v6807_v0 = vsel %vm13204_vm1, %v9677_v59, 0.0 }
0x1d13   : > { %9678 = vpow2.f32 %v6788_v53  ;;  %6808 = vadd.xlane.f32.xlu0 %v6807_v0 }
0x1d16   : > { %v6767_v23 = vpop.xlane.xlu1 %6766  ;;  %v6797_v14 = vpop.xlane.xlu2 %6796 }
0x1d17   : > { %v6775_v52 = vsub.f32 %v6743_v46, %v6767_v23 }
0x1d19   : > { %v9679_v51 = vpop.eup %9678  ;;  %v6790_v43 = vmul.f32 1.442695, %v6775_v52 }
0x1d1a   : > { %v6810_v29 = vsel %vm13205_vm3, %v9679_v51, 0.0 }
0x1d1b   : > { %9680 = vpow2.f32 %v6790_v43  ;;  %6811 = vadd.xlane.f32.xlu1 %v6810_v29 }
0x1d1c   : > { %9682 = vrcp.f32 %v6794_v18 }
0x1d1d   : > { %v9333_v22 = vpop.permute.xlu0 %9332  ;;  %9684 = vrcp.f32 %v6797_v14 }
0x1d1e   : > { %v9334_v56 = vunpack.i.l.bf16 %v9333_v22  ;;  %v6800_v11 = vpop.xlane.xlu2 %6799  ;;  %v9335_v55 = vunpack.i.h.bf16 %v9333_v22 }
0x1d1f   : > { %9686 = vrcp.f32 %v6800_v11 }
0x1d20   : > { %6921 = vmatpush.msrb.mxu2 %v9334_v56 }
0x1d21   : > { %v9681_v21 = vpop.eup %9680 }
0x1d22   : > { %6922 = vmatpush.msrb.mxu2 %v9335_v55  ;;  %v6813_v2 = vsel %vm13206_vm15, %v9681_v21, 0.0  ;;  %v9683_v48 = vpop.eup %9682 }
0x1d23   : > { %6814 = vadd.xlane.f32.xlu1 %v6813_v2  ;;  %v6824_v40 = vmul.f32 %v9683_v48, %v12710_v28  ;;  %v9685_v9 = vpop.eup %9684 }
0x1d24   : > { %v6825_v50 = vmul.f32 %v9685_v9, %v12715_v13 }
0x1d25   : > { %v9687_v12 = vpop.eup %9686 }
0x1d26   : > { %v9338_v37 = vpop.permute.xlu2 %9337  ;;  %v6826_v28 = vmul.f32 %v9687_v12, %v12720_v7 }
0x1d27   : > { %v9339_v4 = vunpack.i.l.bf16 %v9338_v37  ;;  %v9340_v58 = vunpack.i.h.bf16 %v9338_v37  ;;  %v7095_v37 = vld [vmem:[%s13009_s15 + $0x18] sm:$0xff] }
0x1d28   : > { %7188 = vmatpush.msrb.mxu0 %v7095_v37 }
0x1d29   : > { %6923 = vmatpush.msrb.mxu2 %v9339_v4 }
0x1d2b   : > { %6924 = vmatpush.msrb.mxu2 %v9340_v58 }
0x1d2e   : > { %v9328_v17 = vpop.permute.xlu1 %9327 }
0x1d2f   : > { %v9329_v33 = vunpack.i.l.bf16 %v9328_v17  ;;  %v9330_v36 = vunpack.i.h.bf16 %v9328_v17 }
0x1d31   : > { %6870 = vmatpush.msra.mxu1 %v9329_v33 }
0x1d33   : > { %6871 = vmatpush.msra.mxu1 %v9330_v36 }
0x1d34   : > { %8958 = vmatmul.msk.f32.vlgmr.msra.gmra.mxu1 %vm13207_vm2, %v6824_v40 }
0x1d35   : > { %8972 = vmatpush.msk.msra.mxu1 %vm12551_vm7, %v13131_v41  ;;  %vm13210_vm7 = vmmov %vm13175_vm0 }
0x1d37   : > { %8973 = vmatpush.msk.msra.mxu1 %vm12560_vm8, %v13131_v41  ;;  %vm13211_vm8 = vmmov %vm13175_vm0 }
0x1d3c   : > { %8959 = vmatmul.msk.f32.gmra.mxu1 %vm13208_vm4, %v6825_v50 }
0x1d44   : > { %8960 = vmatmul.msk.f32.gmra.mxu1 %vm13209_vm5, %v6826_v28 }
0x1d5f   : > { %v6803_v46 = vpop.xlane.xlu2 %6802 }
0x1d60   : > { %9688 = vrcp.f32 %v6803_v46 }
0x1d66   : > { %v9689_v26 = vpop.eup %9688 }
0x1d67   : > { %v6827_v34 = vmul.f32 %v9689_v26, %v12733_v38  ;;  %v8983_v26 = vld [vmem:[%s13095_s5 + $0x48] sm:$0xff] }
0x1d68   : > { %7303 = vmatpush.msra.mxu2 %v8983_v26 }
0x1d69   : > { %8961 = vmatmul.msk.f32.gmra.mxu1 %vm13210_vm7, %v6827_v34 }
0x1d7e   : > { %v6806_v16 = vpop.xlane.xlu1 %6805 }
0x1d7f   : > { %9690 = vrcp.f32 %v6806_v16 }
0x1d85   : > { %v9691_v41 = vpop.eup %9690 }
0x1d86   : > { %v6828_v10 = vmul.f32 %v9691_v41, %v9675_v44  ;;  %v6809_v62 = vpop.xlane.xlu0 %6808 }
0x1d87   : > { %9692 = vrcp.f32 %v6809_v62  ;;  %v8982_v62 = vld [vmem:[%s13095_s5 + $0x40] sm:$0xff] }
0x1d88   : > { %8962 = vmatmul.msk.f32.vlgmr.msrb.gmra.mxu2 %vm13211_vm8, %v6828_v10 }
0x1d89   : > { %7304 = vmatpush.msra.mxu2 %v8982_v62 }
0x1d8d   : > { %v9693_v13 = vpop.eup %9692 }
0x1d8e   : > { %v6812_v3 = vpop.xlane.xlu1 %6811  ;;  %v6829_v7 = vmul.f32 %v9693_v13, %v9677_v59 }
0x1d8f   : > { %9694 = vrcp.f32 %v6812_v3 }
0x1d90   : > { %8963 = vmatmul.msk.f32.gmra.mxu2 %vm13212_vm6, %v6829_v7 }
0x1d95   : > { %v9695_v49 = vpop.eup %9694 }
0x1d96   : > { %v6815_v60 = vpop.xlane.xlu1 %6814  ;;  %v6830_v1 = vmul.f32 %v9695_v49, %v9679_v51 }
0x1d97   : > { %9696 = vrcp.f32 %v6815_v60  ;;  %v9371_v60 = vld [vmem:[%s13096_s26 + $0x4] ss:$0 sm:$0xff] }
0x1d98   : > { %8964 = vmatmul.msk.f32.gmra.mxu2 %vm13213_vm9, %v6830_v1 }
0x1d9d   : > { %v9697_v5 = vpop.eup %9696 }
0x1d9e   : > { %v6831_v63 = vmul.f32 %v9697_v5, %v9681_v21 }
0x1da0   : > { %8965 = vmatmul.msk.f32.gmra.mxu2 %vm13214_vm10, %v6831_v63 }
0x1db1   : > { %v6873_v38 = vpop.f32.mrf.mxu1 }
0x1db2   : > { %8974 = vmatmul.msk.f32.vlgmr.msra.gmra.mxu1 %vm2621_vm14, %v6873_v38 }
0x1db9   : > { %v6876_v6 = vpop.f32.mrf.mxu1 }
0x1dba   : > { %8975 = vmatmul.msk.f32.gmra.mxu1 %vm2621_vm14, %v6876_v6 }
0x1dc1   : > { %v6879_v8 = vpop.f32.mrf.mxu1 }
0x1dc2   : > { %8968 = vmatmul.msk.f32.vlgmr.msra.gmra.mxu3 %vm2621_vm14, %v6879_v8 }
0x1de6   : > { %v6882_v54 = vpop.f32.mrf.mxu1 }
0x1de7   : > { %8969 = vmatmul.msk.f32.gmra.mxu3 %vm2621_vm14, %v6882_v54 }
0x1e0b   : > { %v6926_v24 = vpop.f32.mrf.mxu2 }
0x1e0c   : > { %8976 = vmatmul.msk.f32.gmra.mxu1 %vm2621_vm14, %v6926_v24 }
0x1e13   : > { %v6929_v61 = vpop.f32.mrf.mxu2 }
0x1e14   : > { %8977 = vmatmul.msk.f32.gmra.mxu1 %vm2621_vm14, %v6929_v61 }
0x1e1b   : > { %v6932_v39 = vpop.f32.mrf.mxu2 }
0x1e1c   : > { %8970 = vmatmul.msk.f32.gmra.mxu3 %vm2621_vm14, %v6932_v39 }
0x1e23   : > { %v6935_v44 = vpop.f32.mrf.mxu2 }
0x1e24   : > { %8971 = vmatmul.msk.f32.gmra.mxu3 %vm2621_vm14, %v6935_v44 }
0x1e2f   : > { %v7008_v47 = vpop.f32.mrf.mxu1 }
0x1e37   : > { %v7011_v45 = vpop.f32.mrf.mxu1 }
0x1e45   : > { %v6967_v57 = vpop.f32.mrf.mxu3 }
0x1e46   : > { %v7009_v30 = vadd.f32 %v7008_v47, %v6967_v57 }
0x1e48   : > { %7020 = vxpose.xlu1.b32.start [1/2] (short) (narrow) %v7009_v30, 32 }
0x1e6a   : > { %v6970_v59 = vpop.f32.mrf.mxu3 }
0x1e6b   : > { %v7012_v53 = vadd.f32 %v7011_v45, %v6970_v59 }
0x1e6d   : > { %7021 = vxpose.xlu1.b32.end [2/2] (short) (narrow) %v7012_v53, 32 }
0x1e89   : > { %v7014_v0 = vpop.f32.mrf.mxu1 }
0x1e91   : > { %v7017_v14 = vpop.f32.mrf.mxu1 }
0x1e9f   : > { %v6973_v18 = vpop.f32.mrf.mxu3 }
0x1ea0   : > { %v7015_v23 = vadd.f32 %v7014_v0, %v6973_v18 }
0x1ea2   : > { %7052 = vxpose.xlu0.b32.start [1/2] (short) (narrow) %v7015_v23, 32 }
0x1ea7   : > { %v6976_v52 = vpop.f32.mrf.mxu3 }
0x1ea8   : > { %v7018_v51 = vadd.f32 %v7017_v14, %v6976_v52 }
0x1eaa   : > { %7053 = vxpose.xlu0.b32.end [2/2] (short) (narrow) %v7018_v51, 32 }
0x1f09   : > { %v7036_v43 = vpop.trf.xlu1 }
0x1f0a   : > { %v7084_v29 = vadd.f32 %v7036_v43, %v12605_v42  ;;  %v7094_v42 = vld [vmem:[%s13009_s15 + $0x10] sm:$0xff] }
0x1f0b   : > { %7189 = vmatpush.msrb.mxu0 %v7094_v42 }
0x1f0c   : > { %7100 = vxpose.xlu2.b32.start [1/4] (short) (narrow) %v7084_v29, 16 }
0x1f11   : > { %v7037_v22 = vpop.trf.xlu1 }
0x1f12   : > { %v7085_v56 = vadd.f32 %v7037_v22, %v12610_v35  ;;  %v7093_v35 = vld [vmem:[%s13009_s15 + $0x8] sm:$0xff] }
0x1f13   : > { %7190 = vmatpush.msrb.mxu0 %v7093_v35 }
0x1f14   : > { %7101 = vxpose.xlu2.b32.cont [2/4] (short) (narrow) %v7085_v56, 16 }
0x1f19   : > { %v7038_v11 = vpop.trf.xlu1 }
0x1f1a   : > { %v7086_v55 = vadd.f32 %v7038_v11, %v12615_v27  ;;  %v7092_v27 = vld [vmem:[%s13009_s15] sm:$0xff] }
0x1f1b   : > { %7191 = vmatpush.msrb.mxu0 %v7092_v27 }
0x1f1c   : > { %7102 = vxpose.xlu2.b32.cont [3/4] (short) (narrow) %v7086_v55, 16 }
0x1f21   : > { %v7039_v21 = vpop.trf.xlu1 }
0x1f22   : > { %v7087_v2 = vadd.f32 %v7039_v21, %v12620_v15 }
0x1f24   : > { %7103 = vxpose.xlu2.b32.end [4/4] (short) (narrow) %v7087_v2, 16 }
0x1f46   : > { %v7068_v15 = vpop.trf.xlu0 }
0x1f47   : > { %v7088_v4 = vadd.f32 %v7068_v15, %v12625_v25 }
0x1f49   : > { %7132 = vxpose.xlu0.b32.start [1/4] (short) (narrow) %v7088_v4, 16 }
0x1f4e   : > { %v7069_v58 = vpop.trf.xlu0 }
0x1f4f   : > { %v7089_v17 = vadd.f32 %v7069_v58, %v12630_v19  ;;  %v9370_v19 = vld [vmem:[%s13010_s16] ss:$0 sm:$0xff] }
0x1f51   : > { %7133 = vxpose.xlu0.b32.cont [2/4] (short) (narrow) %v7089_v17, 16 }
0x1f56   : > { %v7070_v48 = vpop.trf.xlu0 }
0x1f57   : > { %v7090_v33 = vadd.f32 %v7070_v48, %v12640_v32 }
0x1f59   : > { %7134 = vxpose.xlu0.b32.cont [3/4] (short) (narrow) %v7090_v33, 16 }
0x1f5e   : > { %v7071_v36 = vpop.trf.xlu0 }
0x1f5f   : > { %v7091_v40 = vadd.f32 %v7071_v36, %v12649_v20 }
0x1f61   : > { %7135 = vxpose.xlu0.b32.end [4/4] (short) (narrow) %v7091_v40, 16 }
0x1fa5   : > { %v7116_v9 = vpop.trf.xlu2 }
0x1fa6   : > { %8978 = vmatmul.msk.f32.vlgmr.msrb.gmra.mxu0 %vm13215_vm11, %v7116_v9 }
0x1fad   : > { %v7117_v50 = vpop.trf.xlu2 }
0x1fae   : > { %8979 = vmatmul.msk.f32.gmra.mxu0 %vm13216_vm12, %v7117_v50 }
0x1fed   : > { %v7148_v25 = vpop.trf.xlu0 }
0x1fee   : > { %8980 = vmatmul.msk.f32.gmra.mxu0 %vm13217_vm13, %v7148_v25 }
0x1ff5   : > { %v7149_v12 = vpop.trf.xlu0 }
0x1ff6   : > { %8981 = vmatmul.msk.f32.gmra.mxu0 %vm13175_vm0, %v7149_v12 }
0x2023   : > { %v7193_v32 = vpop.f32.mrf.mxu0 }
0x2024   : > { %v7194_v28 = vadd.f32 %v9370_v19, %v7193_v32 }
0x2026   : > { %7205 = vxpose.xlu1.b32.start [1/2] (short) (narrow) %v7194_v28, 16 }
0x202b   : > { %v7196_v20 = vpop.f32.mrf.mxu0 }
0x202c   : > { %v7197_v46 = vadd.f32 %v9370_v19, %v7196_v20 }
0x202e   : > { %7206 = vxpose.xlu1.b32.end [2/2] (short) (narrow) %v7197_v46, 16 }
0x206b   : > { %v7199_v34 = vpop.f32.mrf.mxu0 }
0x206c   : > { %v7200_v16 = vadd.f32 %v9370_v19, %v7199_v34 }
0x206e   : > { %7237 = vxpose.xlu2.b32.start [1/2] (short) (narrow) %v7200_v16, 16 }
0x2073   : > { %v7202_v41 = vpop.f32.mrf.mxu0 }
0x2074   : > { %v7203_v10 = vadd.f32 %v9370_v19, %v7202_v41 }
0x2076   : > { %7238 = vxpose.xlu2.b32.end [2/2] (short) (narrow) %v7203_v10, 16 }
0x20ca   : > { %v12800_v13 = vpop.trf.xlu1 }
0x20cb   : > { %8985 = vmatmul.msk.f32.vlgmr.msra.gmra.mxu2 %vm2621_vm14, %v12800_v13 }
0x20d2   : > { %v12804_v3 = vpop.trf.xlu1 }
0x20d3   : > { %8986 = vmatmul.msk.f32.gmra.mxu2 %vm2621_vm14, %v12804_v3 }
0x2107   : > { %v12808_v7 = vpop.trf.xlu2 }
0x2108   : > { %8987 = vmatmul.msk.f32.gmra.mxu2 %vm2621_vm14, %v12808_v7 }
0x210f   : > { %v12812_v49 = vpop.trf.xlu2 }
0x2110   : > { %8988 = vmatmul.msk.f32.gmra.mxu2 %vm2621_vm14, %v12812_v49 }
0x214e   : > { %v7306_v1 = vpop.f32.mrf.mxu2 }
0x214f   : > { %v7307_v5 = vadd.f32 %v9371_v60, %v7306_v1 }
0x2151   : > { %7320 = vrot.lane.b32.xlu2 %v7307_v5, %s9792_s7 }
0x2156   : > { %v7309_v63 = vpop.f32.mrf.mxu2 }
0x2157   : > { %v7310_v38 = vadd.f32 %v9371_v60, %v7309_v63 }
0x2159   : > { %7322 = vrot.lane.b32.xlu1 %v7310_v38, %s9792_s7  ;;  %v9341_v18 = vpack.i.bf16 %v7307_v5, %v7310_v38 }
0x218b   : > { %v7312_v6 = vpop.f32.mrf.mxu2 }
0x218c   : > { %v7313_v8 = vadd.f32 %v9371_v60, %v7312_v6 }
0x218e   : > { %7357 = vrot.lane.b32.xlu1 %v7313_v8, %s9792_s7 }
0x2193   : > { %v7315_v54 = vpop.f32.mrf.mxu2 }
0x2194   : > { %v7316_v24 = vadd.f32 %v9371_v60, %v7315_v54 }
0x2196   : > { %7359 = vrot.lane.b32.xlu0 %v7316_v24, %s9792_s7  ;;  %v9346_v17 = vpack.i.bf16 %v7313_v8, %v7316_v24 }
0x21ab   : > { %v7321_v39 = vpop.permute.xlu2 %7320 }
0x21cb   : > { %v7323_v61 = vpop.permute.xlu1 %7322 }
0x21cc   : > { %8989 = vmatpush.xpose.msk.msrb.mxu3 %vm2621_vm14, %v7323_v61 }
0x21d0   : > { %8990 = vmatpush.xpose.msk.msrb.mxu3 %vm2621_vm14, %v7321_v39 }
0x21d3   : > { %8991 = vmatmul.msk.f32.vlgmr.msrb.gmra.mxu3 %vm2621_vm14, %v7307_v5 }
0x21db   : > { %8992 = vmatmul.msk.f32.gmra.mxu3 %vm2621_vm14, %v7310_v38 }
0x2200   : > { %v7358_v47 = vpop.permute.xlu1 %7357 }
0x2208   : > { %v7360_v44 = vpop.permute.xlu0 %7359 }
0x2209   : > { %8993 = vmatpush.xpose.msk.msra.mxu1 %vm2621_vm14, %v7360_v44  ;;  %v9001_v44 = vld [vmem:[%s13095_s5 + $0x50] sm:$0xff] }
0x220d   : > { %8994 = vmatpush.xpose.msk.msra.mxu1 %vm2621_vm14, %v7358_v47 }
0x2210   : > { %8995 = vmatmul.msk.f32.vlgmr.msra.gmra.mxu1 %vm2621_vm14, %v7313_v8 }
0x2218   : > { %8996 = vmatmul.msk.f32.gmra.mxu1 %vm2621_vm14, %v7316_v24  ;;  %v9002_v24 = vld [vmem:[%s13095_s5 + $0x58] sm:$0xff] }
0x2219   : > { %7612 = vmatpush.msra.mxu1 %v9002_v24 }
0x221b   : > { %7613 = vmatpush.msra.mxu1 %v9001_v44 }
0x2256   : > { %v7349_v57 = vpop.f32.mrf.mxu3 }
0x2257   : > { %v7392_v30 = vmul.f32 0.25, %v7349_v57 }
0x2259   : > { %v7396_v45 = vsel %vm2621_vm14, %v7392_v30, -inf }
0x225a   : > { %7397 = vmax.xlane.f32.xlu1 %v7396_v45 }
0x225e   : > { %v7352_v59 = vpop.f32.mrf.mxu3 }
0x225f   : > { %v7393_v53 = vmul.f32 0.25, %v7352_v59 }
0x2261   : > { %v7399_v0 = vsel %vm2621_vm14, %v7393_v53, -inf }
0x2262   : > { %7400 = vmax.xlane.f32.xlu2 %v7399_v0 }
0x227a   : > { %9342 = vrot.lane.b32.xlu2 %v9341_v18, %s9793_s12 }
0x228d   : > { %v7386_v23 = vpop.f32.mrf.mxu1 }
0x228e   : > { %v7394_v14 = vmul.f32 0.25, %v7386_v23 }
0x2290   : > { %v7402_v52 = vsel %vm2621_vm14, %v7394_v14, -inf }
0x2291   : > { %7403 = vmax.xlane.f32.xlu0 %v7402_v52 }
0x2295   : > { %v7389_v51 = vpop.f32.mrf.mxu1 }
0x2296   : > { %v7395_v43 = vmul.f32 0.25, %v7389_v51 }
0x2298   : > { %v7405_v29 = vsel %vm2621_vm14, %v7395_v43, -inf }
0x2299   : > { %7406 = vmax.xlane.f32.xlu1 %v7405_v29 }
0x22cd   : > { %v7398_v22 = vpop.xlane.xlu1 %7397 }
0x22ce   : > { %v7408_v56 = vsub.f32 %v7392_v30, %v7398_v22 }
0x22d0   : > { %v7412_v11 = vmul.f32 1.442695, %v7408_v56 }
0x22d2   : > { %9698 = vpow2.f32 %v7412_v11 }
0x22d5   : > { %v7401_v55 = vpop.xlane.xlu2 %7400 }
0x22d6   : > { %v7409_v21 = vsub.f32 %v7393_v53, %v7401_v55 }
0x22d8   : > { %v9699_v2 = vpop.eup %9698  ;;  %v7414_v37 = vmul.f32 1.442695, %v7409_v21 }
0x22d9   : > { %v7420_v42 = vsel %vm2621_vm14, %v9699_v2, 0.0 }
0x22da   : > { %9700 = vpow2.f32 %v7414_v37  ;;  %7421 = vadd.xlane.f32.xlu1 %v7420_v42 }
0x22dd   : > { %v9343_v35 = vpop.permute.xlu2 %9342 }
0x22de   : > { %v9344_v27 = vunpack.i.l.bf16 %v9343_v35  ;;  %v9345_v4 = vunpack.i.h.bf16 %v9343_v35 }
0x22e0   : > { %v9701_v15 = vpop.eup %9700  ;;  %7466 = vmatpush.msra.mxu0 %v9344_v27 }
0x22e1   : > { %v7423_v58 = vsel %vm2621_vm14, %v9701_v15, 0.0 }
0x22e2   : > { %7424 = vadd.xlane.f32.xlu1 %v7423_v58  ;;  %7467 = vmatpush.msra.mxu0 %v9345_v4 }
0x22fb   : > { %9347 = vrot.lane.b32.xlu1 %v9346_v17, %s9793_s12 }
0x2304   : > { %v7404_v48 = vpop.xlane.xlu0 %7403 }
0x2305   : > { %v7410_v33 = vsub.f32 %v7394_v14, %v7404_v48 }
0x2307   : > { %v7416_v36 = vmul.f32 1.442695, %v7410_v33 }
0x2309   : > { %9702 = vpow2.f32 %v7416_v36 }
0x230c   : > { %v7407_v40 = vpop.xlane.xlu1 %7406 }
0x230d   : > { %v7411_v9 = vsub.f32 %v7395_v43, %v7407_v40 }
0x230f   : > { %v9703_v50 = vpop.eup %9702  ;;  %v7418_v25 = vmul.f32 1.442695, %v7411_v9 }
0x2310   : > { %v7426_v12 = vsel %vm2621_vm14, %v9703_v50, 0.0 }
0x2311   : > { %9704 = vpow2.f32 %v7418_v25  ;;  %7427 = vadd.xlane.f32.xlu0 %v7426_v12 }
0x2317   : > { %v9705_v19 = vpop.eup %9704 }
0x2318   : > { %v7429_v32 = vsel %vm2621_vm14, %v9705_v19, 0.0 }
0x2319   : > { %7430 = vadd.xlane.f32.xlu0 %v7429_v32 }
0x234d   : > { %v7422_v28 = vpop.xlane.xlu1 %7421 }
0x234e   : > { %9706 = vrcp.f32 %v7422_v28 }
0x2354   : > { %v9707_v20 = vpop.eup %9706 }
0x2355   : > { %v7436_v46 = vmul.f32 %v9707_v20, %v9699_v2  ;;  %v7425_v26 = vpop.xlane.xlu1 %7424 }
0x2356   : > { %9708 = vrcp.f32 %v7425_v26 }
0x2357   : > { %8997 = vmatmul.msk.f32.vlgmr.msra.gmra.mxu0 %vm2621_vm14, %v7436_v46 }
0x235c   : > { %v9709_v34 = vpop.eup %9708 }
0x235d   : > { %v7437_v16 = vmul.f32 %v9709_v34, %v9701_v15 }
0x235f   : > { %8998 = vmatmul.msk.f32.gmra.mxu0 %vm2621_vm14, %v7437_v16 }
0x236d   : > { %v9348_v41 = vpop.permute.xlu1 %9347 }
0x236e   : > { %v9349_v10 = vunpack.i.l.bf16 %v9348_v41  ;;  %v9350_v62 = vunpack.i.h.bf16 %v9348_v41 }
0x2370   : > { %7501 = vmatpush.msra.mxu3 %v9349_v10 }
0x2372   : > { %7502 = vmatpush.msra.mxu3 %v9350_v62 }
0x2384   : > { %v7428_v60 = vpop.xlane.xlu0 %7427 }
0x2385   : > { %9710 = vrcp.f32 %v7428_v60 }
0x238b   : > { %v9711_v1 = vpop.eup %9710 }
0x238c   : > { %v7438_v5 = vmul.f32 %v9711_v1, %v9703_v50  ;;  %v7431_v63 = vpop.xlane.xlu0 %7430 }
0x238d   : > { %9712 = vrcp.f32 %v7431_v63 }
0x238e   : > { %8999 = vmatmul.msk.f32.vlgmr.msra.gmra.mxu3 %vm2621_vm14, %v7438_v5 }
0x2393   : > { %v9713_v38 = vpop.eup %9712 }
0x2394   : > { %v7439_v6 = vmul.f32 %v9713_v38, %v9705_v19 }
0x2396   : > { %9000 = vmatmul.msk.f32.gmra.mxu3 %vm2621_vm14, %v7439_v6 }
0x23d4   : > { %v7469_v8 = vpop.f32.mrf.mxu0 }
0x23d5   : > { %7510 = vxpose.xlu0.b32.start [1/2] (short) (narrow) %v7469_v8, 16 }
0x23dc   : > { %v7472_v54 = vpop.f32.mrf.mxu0 }
0x23dd   : > { %7511 = vxpose.xlu0.b32.end [2/2] (short) (narrow) %v7472_v54, 16 }
0x2411   : > { %v7504_v61 = vpop.f32.mrf.mxu3 }
0x2412   : > { %7542 = vxpose.xlu2.b32.start [1/2] (short) (narrow) %v7504_v61, 16 }
0x2419   : > { %v7507_v39 = vpop.f32.mrf.mxu3 }
0x241a   : > { %7543 = vxpose.xlu2.b32.end [2/2] (short) (narrow) %v7507_v39, 16 }
0x2479   : > { %v7526_v47 = vpop.trf.xlu0 }
0x247a   : > { %v12852_v57 = vadd.f32 %v7526_v47, %v12800_v13 }
0x247c   : > { %9004 = vmatmul.msk.f32.vlgmr.msra.gmra.mxu1 %vm2621_vm14, %v12852_v57 }
0x2481   : > { %v7527_v30 = vpop.trf.xlu0 }
0x2482   : > { %v12857_v45 = vadd.f32 %v7527_v30, %v12804_v3  ;;  %v9372_v3 = vld [vmem:[%s13096_s26 + $0x5] ss:$0 sm:$0xff] }
0x2484   : > { %9005 = vmatmul.msk.f32.gmra.mxu1 %vm2621_vm14, %v12857_v45 }
0x24ab   : > { %v7558_v59 = vpop.trf.xlu2 }
0x24ac   : > { %v12862_v53 = vadd.f32 %v7558_v59, %v12808_v7 }
0x24ae   : > { %9006 = vmatmul.msk.f32.gmra.mxu1 %vm2621_vm14, %v12862_v53 }
0x24b3   : > { %v7559_v0 = vpop.trf.xlu2 }
0x24b4   : > { %v12867_v13 = vadd.f32 %v7559_v0, %v12812_v49 }
0x24b6   : > { %9007 = vmatmul.msk.f32.gmra.mxu1 %vm2621_vm14, %v12867_v13 }
0x24f9   : > { %v7615_v18 = vpop.f32.mrf.mxu1 }
0x24fa   : > { %v7616_v7 = vadd.f32 %v9372_v3, %v7615_v18 }
0x2501   : > { %v7618_v23 = vpop.f32.mrf.mxu1 }
0x2502   : > { %v7619_v14 = vadd.f32 %v9372_v3, %v7618_v23 }
0x2504   : > { %7631 = vrot.lane.b32.xlu1 %v7619_v14, %s9792_s7  ;;  %v9351_v36 = vpack.i.bf16 %v7616_v7, %v7619_v14 }
0x250c   : > { %7629 = vrot.lane.b32.xlu1 %v7616_v7, %s9792_s7 }
0x252b   : > { %v7621_v52 = vpop.f32.mrf.mxu1 }
0x252c   : > { %v7622_v49 = vadd.f32 %v9372_v3, %v7621_v52 }
0x2533   : > { %v7624_v51 = vpop.f32.mrf.mxu1 }
0x2534   : > { %v7625_v43 = vadd.f32 %v9372_v3, %v7624_v51 }
0x2536   : > { %7668 = vrot.lane.b32.xlu1 %v7625_v43, %s9792_s7  ;;  %v9356_v33 = vpack.i.bf16 %v7622_v49, %v7625_v43 }
0x253e   : > { %7666 = vrot.lane.b32.xlu1 %v7622_v49, %s9792_s7 }
0x2576   : > { %v7632_v29 = vpop.permute.xlu1 %7631 }
0x2577   : > { %9008 = vmatpush.xpose.msk.msrb.mxu0 %vm2621_vm14, %v7632_v29 }
0x257e   : > { %v7630_v22 = vpop.permute.xlu1 %7629 }
0x257f   : > { %9009 = vmatpush.xpose.msk.msrb.mxu0 %vm2621_vm14, %v7630_v22 }
0x2582   : > { %9010 = vmatmul.msk.f32.vlgmr.msrb.gmra.mxu0 %vm2621_vm14, %v7616_v7 }
0x258a   : > { %9011 = vmatmul.msk.f32.gmra.mxu0 %vm2621_vm14, %v7619_v14 }
0x25a8   : > { %v7669_v56 = vpop.permute.xlu1 %7668 }
0x25a9   : > { %9012 = vmatpush.xpose.msk.msrb.mxu2 %vm2621_vm14, %v7669_v56 }
0x25b0   : > { %v7667_v11 = vpop.permute.xlu1 %7666 }
0x25b1   : > { %9013 = vmatpush.xpose.msk.msrb.mxu2 %vm2621_vm14, %v7667_v11 }
0x25b4   : > { %9014 = vmatmul.msk.f32.vlgmr.msrb.gmra.mxu2 %vm2621_vm14, %v7622_v49 }
0x25bc   : > { %9015 = vmatmul.msk.f32.gmra.mxu2 %vm2621_vm14, %v7625_v43 }
0x25ff   : > { %v7658_v55 = vpop.f32.mrf.mxu0 }
0x2600   : > { %v7701_v21 = vmul.f32 0.25, %v7658_v55 }
0x2602   : > { %v7705_v2 = vsel %vm2621_vm14, %v7701_v21, -inf }
0x2603   : > { %7706 = vmax.xlane.f32.xlu2 %v7705_v2  ;;  %v7887_v2 = vld [vmem:[%s13011_s17] sm:$0xff] }
0x2607   : > { %v7661_v37 = vpop.f32.mrf.mxu0 }
0x2608   : > { %v7702_v42 = vmul.f32 0.25, %v7661_v37 }
0x260a   : > { %v7708_v35 = vsel %vm2621_vm14, %v7702_v42, -inf }
0x260b   : > { %7709 = vmax.xlane.f32.xlu1 %v7708_v35 }
0x2637   : > { %v7695_v27 = vpop.f32.mrf.mxu2 }
0x2638   : > { %v7703_v15 = vmul.f32 0.25, %v7695_v27 }
0x263a   : > { %v7711_v4 = vsel %vm2621_vm14, %v7703_v15, -inf }
0x263b   : > { %7712 = vmax.xlane.f32.xlu0 %v7711_v4 }
0x263f   : > { %v7698_v58 = vpop.f32.mrf.mxu2 }
0x2640   : > { %v7704_v17 = vmul.f32 0.25, %v7698_v58 }
0x2642   : > { %v7714_v48 = vsel %vm2621_vm14, %v7704_v17, -inf }
0x2643   : > { %7715 = vmax.xlane.f32.xlu1 %v7714_v48 }
0x264f   : > { %9357 = vrot.lane.b32.xlu0 %v9356_v33, %s9793_s12 }
0x265c   : > { %9352 = vrot.lane.b32.xlu1 %v9351_v36, %s9793_s12  ;;  %s13219_s12 = sld [smem:[#allocation50_spill]] }
0x2676   : > { %v7707_v40 = vpop.xlane.xlu2 %7706 }
0x2677   : > { %v7717_v9 = vsub.f32 %v7701_v21, %v7707_v40  ;;  %v7888_v21 = vld [vmem:[%s13011_s17 + $0x8] sm:$0xff] }
0x2678   : > { %7983 = vmatpush.msra.mxu2 %v7888_v21 }
0x2679   : > { %v7721_v50 = vmul.f32 1.442695, %v7717_v9 }
0x267a   : > { %7984 = vmatpush.msra.mxu2 %v7887_v2 }
0x267b   : > { %9714 = vpow2.f32 %v7721_v50 }
0x267e   : > { %v7710_v25 = vpop.xlane.xlu1 %7709 }
0x267f   : > { %v7718_v12 = vsub.f32 %v7702_v42, %v7710_v25 }
0x2681   : > { %v7723_v19 = vmul.f32 1.442695, %v7718_v12  ;;  %v9715_v32 = vpop.eup %9714  ;;  %v8229_v12 = vld [vmem:[%s13017_s23 + $0x8] sm:$0xff] }
0x2682   : > { %v7729_v28 = vsel %vm2621_vm14, %v9715_v32, 0.0 }
0x2683   : > { %9716 = vpow2.f32 %v7723_v19  ;;  %v8228_v19 = vld [vmem:[%s13017_s23] sm:$0xff] }
0x2686   : > { %7730 = vadd.xlane.f32.xlu1 %v7729_v28 }
0x2689   : > { %v9717_v20 = vpop.eup %9716 }
0x268a   : > { %v7732_v46 = vsel %vm2621_vm14, %v9717_v20, 0.0 }
0x268e   : > { %7733 = vadd.xlane.f32.xlu1 %v7732_v46  ;;  %v8126_v46 = vld [vmem:[%s13013_s19] sm:$0xff] }
0x26ae   : > { %v7713_v26 = vpop.xlane.xlu0 %7712 }
0x26af   : > { %v7719_v34 = vsub.f32 %v7703_v15, %v7713_v26 }
0x26b1   : > { %v7725_v16 = vmul.f32 1.442695, %v7719_v34 }
0x26b3   : > { %9718 = vpow2.f32 %v7725_v16 }
0x26b6   : > { %v7716_v41 = vpop.xlane.xlu1 %7715 }
0x26b7   : > { %v7720_v10 = vsub.f32 %v7704_v17, %v7716_v41 }
0x26b9   : > { %v9719_v62 = vpop.eup %9718  ;;  %v7727_v60 = vmul.f32 1.442695, %v7720_v10  ;;  %v8268_v10 = vld [vmem:[%s13019_s25 + $0x8] sm:$0xff] }
0x26ba   : > { %v7735_v1 = vsel %vm2621_vm14, %v9719_v62, 0.0  ;;  %8299 = vmatpush.msrb.mxu2 %v8268_v10 }
0x26bb   : > { %9720 = vpow2.f32 %v7727_v60  ;;  %7736 = vadd.xlane.f32.xlu2 %v7735_v1  ;;  %v8178_v60 = vld [vmem:[%s13015_s21 + $0x8] sm:$0xff]  ;;  %v9374_v1 = vld [vmem:[%s13018_s24] ss:$0 sm:$0xff] }
0x26bc   : > { %8209 = vmatpush.msra.mxu1 %v8178_v60 }
0x26c1   : > { %v9721_v5 = vpop.eup %9720  ;;  %v9358_v63 = vpop.permute.xlu0 %9357 }
0x26c2   : > { %v9359_v38 = vunpack.i.l.bf16 %v9358_v63  ;;  %v7738_v6 = vsel %vm2621_vm14, %v9721_v5, 0.0  ;;  %v9360_v8 = vunpack.i.h.bf16 %v9358_v63 }
0x26c3   : > { %7739 = vadd.xlane.f32.xlu2 %v7738_v6 }
0x26c4   : > { %7810 = vmatpush.msra.mxu0 %v9359_v38 }
0x26c6   : > { %7811 = vmatpush.msra.mxu0 %v9360_v8  ;;  %v9375_v8 = vld [vmem:[%s13218_s10] ss:$0 sm:$0xff] }
0x26c8   : > { %8248 = vmatpush.msrb.mxu0 %v8229_v12 }
0x26ca   : > { %8249 = vmatpush.msrb.mxu0 %v8228_v19 }
0x26ce   : > { %v9353_v54 = vpop.permute.xlu1 %9352 }
0x26cf   : > { %v9354_v24 = vunpack.i.l.bf16 %v9353_v54  ;;  %v9355_v61 = vunpack.i.h.bf16 %v9353_v54 }
0x26d1   : > { %7775 = vmatpush.msrb.mxu3 %v9354_v24 }
0x26d3   : > { %7776 = vmatpush.msrb.mxu3 %v9355_v61 }
0x26f9   : > { %v7731_v39 = vpop.xlane.xlu1 %7730 }
0x26fa   : > { %9722 = vrcp.f32 %v7731_v39 }
0x2700   : > { %v9723_v44 = vpop.eup %9722 }
0x2701   : > { %v7745_v47 = vmul.f32 %v9723_v44, %v9715_v32  ;;  %v7734_v30 = vpop.xlane.xlu1 %7733 }
0x2702   : > { %9724 = vrcp.f32 %v7734_v30 }
0x2703   : > { %9016 = vmatmul.msk.f32.vlgmr.msrb.gmra.mxu3 %vm2621_vm14, %v7745_v47 }
0x2708   : > { %v9725_v59 = vpop.eup %9724 }
0x2709   : > { %v7746_v0 = vmul.f32 %v9725_v59, %v9717_v20  ;;  %v8127_v20 = vld [vmem:[%s13013_s19 + $0x8] sm:$0xff] }
0x270a   : > { %8158 = vmatpush.msra.mxu3 %v8127_v20 }
0x270b   : > { %9017 = vmatmul.msk.f32.gmra.mxu3 %vm2621_vm14, %v7746_v0 }
0x270c   : > { %8159 = vmatpush.msra.mxu3 %v8126_v46 }
0x272e   : > { %v7737_v18 = vpop.xlane.xlu2 %7736 }
0x272f   : > { %9726 = vrcp.f32 %v7737_v18 }
0x2735   : > { %v9727_v3 = vpop.eup %9726 }
0x2736   : > { %v7747_v23 = vmul.f32 %v9727_v3, %v9719_v62  ;;  %v7740_v14 = vpop.xlane.xlu2 %7739  ;;  %v8267_v62 = vld [vmem:[%s13019_s25] sm:$0xff] }
0x2737   : > { %9728 = vrcp.f32 %v7740_v14  ;;  %8300 = vmatpush.msrb.mxu2 %v8267_v62 }
0x2738   : > { %9018 = vmatmul.msk.f32.vlgmr.msra.gmra.mxu0 %vm2621_vm14, %v7747_v23 }
0x273d   : > { %v9729_v7 = vpop.eup %9728 }
0x273e   : > { %v7748_v52 = vmul.f32 %v9729_v7, %v9721_v5  ;;  %v8177_v5 = vld [vmem:[%s13015_s21] sm:$0xff] }
0x273f   : > { %8210 = vmatpush.msra.mxu1 %v8177_v5 }
0x2740   : > { %9019 = vmatmul.msk.f32.gmra.mxu0 %vm2621_vm14, %v7748_v52 }
0x2786   : > { %v7778_v51 = vpop.f32.mrf.mxu3 }
0x2787   : > { %7819 = vxpose.xlu1.b32.start [1/2] (short) (narrow) %v7778_v51, 16 }
0x278e   : > { %v7781_v43 = vpop.f32.mrf.mxu3 }
0x278f   : > { %7820 = vxpose.xlu1.b32.end [2/2] (short) (narrow) %v7781_v43, 16 }
0x27b5   : > { %v7813_v49 = vpop.f32.mrf.mxu0 }
0x27b6   : > { %7851 = vxpose.xlu2.b32.start [1/2] (short) (narrow) %v7813_v49, 16 }
0x27bd   : > { %v7816_v29 = vpop.f32.mrf.mxu0 }
0x27be   : > { %7852 = vxpose.xlu2.b32.end [2/2] (short) (narrow) %v7816_v29, 16 }
0x282b   : > { %v7835_v22 = vpop.trf.xlu1 }
0x282c   : > { %v7883_v56 = vadd.f32 %v7835_v22, %v12852_v57 }
0x282e   : > { %7893 = vxpose.xlu0.b32.start [1/2] (short) (narrow) %v7883_v56, 16 }
0x2833   : > { %v7836_v11 = vpop.trf.xlu1 }
0x2834   : > { %v7884_v55 = vadd.f32 %v7836_v11, %v12857_v45  ;;  %v9795_v11 = vmov 0  }
0x2836   : > { %7894 = vxpose.xlu0.b32.end [2/2] (short) (narrow) %v7884_v55, 16  ;;  %v9376_v55 = vld [vmem:[#allocation5] ss:$0 sm:$0xff] }
0x284f   : > { %v7867_v37 = vpop.trf.xlu2 }
0x2850   : > { %v7885_v42 = vadd.f32 %v7867_v37, %v12862_v53  ;;  %v9373_v53 = vld [vmem:[%s13012_s18] ss:$0 sm:$0xff] }
0x2852   : > { %7925 = vxpose.xlu0.b32.start [1/2] (short) (narrow) %v7885_v42, 16 }
0x2857   : > { %v7868_v57 = vpop.trf.xlu2 }
0x2858   : > { %v7886_v35 = vadd.f32 %v7868_v57, %v12867_v13 }
0x285a   : > { %7926 = vxpose.xlu0.b32.end [2/2] (short) (narrow) %v7886_v35, 16 }
0x28d2   : > { %v7909_v45 = vpop.trf.xlu0 }
0x28d3   : > { %9020 = vmatmul.msk.f32.vlgmr.msra.gmra.mxu2 %vm2621_vm14, %v7909_v45 }
0x28da   : > { %v7910_v27 = vpop.trf.xlu0 }
0x28db   : > { %9021 = vmatmul.msk.f32.gmra.mxu2 %vm2621_vm14, %v7910_v27 }
0x28f6   : > { %v7941_v15 = vpop.trf.xlu0 }
0x28f7   : > { %9022 = vmatmul.msk.f32.gmra.mxu2 %vm2621_vm14, %v7941_v15 }
0x28fe   : > { %v7942_v4 = vpop.trf.xlu0 }
0x28ff   : > { %9023 = vmatmul.msk.f32.gmra.mxu2 %vm2621_vm14, %v7942_v4 }
0x2956   : > { %v7986_v58 = vpop.f32.mrf.mxu2 }
0x2957   : > { %v7987_v17 = vadd.f32 %v9373_v53, %v7986_v58 }
0x2959   : > { %7998 = vxpose.xlu2.b32.start [1/2] (short) (narrow) %v7987_v17, 16 }
0x295e   : > { %v7989_v13 = vpop.f32.mrf.mxu2 }
0x295f   : > { %v7990_v48 = vadd.f32 %v9373_v53, %v7989_v13 }
0x2961   : > { %7999 = vxpose.xlu2.b32.end [2/2] (short) (narrow) %v7990_v48, 16 }
0x297a   : > { %v7992_v33 = vpop.f32.mrf.mxu2 }
0x297b   : > { %v7993_v36 = vadd.f32 %v9373_v53, %v7992_v33 }
0x297d   : > { %8030 = vxpose.xlu1.b32.start [1/2] (short) (narrow) %v7993_v36, 16 }
0x2982   : > { %v7995_v40 = vpop.f32.mrf.mxu2 }
0x2983   : > { %v7996_v9 = vadd.f32 %v9373_v53, %v7995_v40  ;;  %v12963_v40 = vld [vmem:[#allocation4] ss:$0 sm:$0xff] }
0x2985   : > { %8031 = vxpose.xlu1.b32.end [2/2] (short) (narrow) %v7996_v9, 16 }
0x29d8   : > { %9361 = vset.pattern.permute.xlu1 %v9795_v11 }
0x29f2   : > { %v8014_v50 = vpop.trf.xlu2 }
0x29f3   : > { %8062 = vxpose.xlu0.b32.start [1/2] (short) (narrow) %v8014_v50, 16 }
0x29fa   : > { %v8015_v25 = vpop.trf.xlu2 }
0x29fb   : > { %8063 = vxpose.xlu0.b32.end [2/2] (short) (narrow) %v8015_v25, 16 }
0x2a21   : > { %v8046_v32 = vpop.trf.xlu1 }
0x2a22   : > { %8094 = vxpose.xlu2.b32.start [1/2] (short) (narrow) %v8046_v32, 16 }
0x2a29   : > { %v8047_v28 = vpop.trf.xlu1 }
0x2a2a   : > { %8095 = vxpose.xlu2.b32.end [2/2] (short) (narrow) %v8047_v28, 16 }
0x2a62   : > { %9362 = vset.pattern.permute.xlu0 %v9795_v11 }
0x2a8c   : > { %9363 = vset.pattern.permute.xlu2 %v9795_v11 }
0x2a97   : > { %v8078_v26 = vpop.trf.xlu0 }
0x2a98   : > { %9032 = vmatmul.msk.f32.vlgmr.msrb.gmra.mxu0 %vm2621_vm14, %v8078_v26  ;;  %9024 = vmatmul.msk.f32.vlgmr.msra.gmra.mxu3 %vm2621_vm14, %v8078_v26 }
0x2a9f   : > { %v8079_v34 = vpop.trf.xlu0 }
0x2aa0   : > { %9033 = vmatmul.msk.f32.gmra.mxu0 %vm2621_vm14, %v8079_v34  ;;  %9025 = vmatmul.msk.f32.gmra.mxu3 %vm2621_vm14, %v8079_v34 }
0x2abb   : > { %v8110_v16 = vpop.trf.xlu2 }
0x2abc   : > { %9034 = vmatmul.msk.f32.gmra.mxu0 %vm2621_vm14, %v8110_v16  ;;  %9026 = vmatmul.msk.f32.gmra.mxu3 %vm2621_vm14, %v8110_v16 }
0x2ac3   : > { %v8111_v41 = vpop.trf.xlu2 }
0x2ac4   : > { %9035 = vmatmul.msk.f32.gmra.mxu0 %vm2621_vm14, %v8111_v41  ;;  %9027 = vmatmul.msk.f32.gmra.mxu3 %vm2621_vm14, %v8111_v41 }
0x2b15   : > { %v8251_v63 = vpop.f32.mrf.mxu0 }
0x2b16   : > { %v8252_v38 = vadd.f32 %v9374_v1, %v8251_v63 }
0x2b18   : > { %v8263_v6 = vmax.f32 %v8252_v38, 0.0 }
0x2b1a   : > { %9036 = vmatmul.msk.f32.vlgmr.msrb.gmra.mxu2 %vm2621_vm14, %v8263_v6 }
0x2b1b   : > { %v8161_v54 = vpop.f32.mrf.mxu3 }
0x2b1c   : > { %v8162_v24 = vadd.f32 %v9375_v8, %v8161_v54 }
0x2b1d   : > { %v8254_v61 = vpop.f32.mrf.mxu0 }
0x2b1e   : > { %v8255_v39 = vadd.f32 %v9374_v1, %v8254_v61  ;;  %v8173_v44 = vmax.f32 %v8162_v24, 0.0 }
0x2b20   : > { %v8264_v47 = vmax.f32 %v8255_v39, 0.0  ;;  %9028 = vmatmul.msk.f32.vlgmr.msra.gmra.mxu1 %vm2621_vm14, %v8173_v44 }
0x2b22   : > { %9037 = vmatmul.msk.f32.gmra.mxu2 %vm2621_vm14, %v8264_v47 }
0x2b23   : > { %v8164_v30 = vpop.f32.mrf.mxu3 }
0x2b24   : > { %v8165_v59 = vadd.f32 %v9375_v8, %v8164_v30 }
0x2b26   : > { %v8174_v0 = vmax.f32 %v8165_v59, 0.0 }
0x2b28   : > { %9029 = vmatmul.msk.f32.gmra.mxu1 %vm2621_vm14, %v8174_v0 }
0x2b39   : > { %v8257_v18 = vpop.f32.mrf.mxu0 }
0x2b3a   : > { %v8258_v3 = vadd.f32 %v9374_v1, %v8257_v18 }
0x2b3c   : > { %v8265_v23 = vmax.f32 %v8258_v3, 0.0 }
0x2b3e   : > { %9038 = vmatmul.msk.f32.gmra.mxu2 %vm2621_vm14, %v8265_v23 }
0x2b3f   : > { %v8167_v14 = vpop.f32.mrf.mxu3 }
0x2b40   : > { %v8168_v7 = vadd.f32 %v9375_v8, %v8167_v14 }
0x2b41   : > { %v8260_v52 = vpop.f32.mrf.mxu0 }
0x2b42   : > { %v8261_v51 = vadd.f32 %v9374_v1, %v8260_v52  ;;  %v8175_v43 = vmax.f32 %v8168_v7, 0.0 }
0x2b44   : > { %v8266_v49 = vmax.f32 %v8261_v51, 0.0  ;;  %9030 = vmatmul.msk.f32.gmra.mxu1 %vm2621_vm14, %v8175_v43 }
0x2b46   : > { %9039 = vmatmul.msk.f32.gmra.mxu2 %vm2621_vm14, %v8266_v49 }
0x2b47   : > { %v8170_v29 = vpop.f32.mrf.mxu3 }
0x2b48   : > { %v8171_v22 = vadd.f32 %v9375_v8, %v8170_v29 }
0x2b4a   : > { %v8176_v56 = vmax.f32 %v8171_v22, 0.0 }
0x2b4c   : > { %9031 = vmatmul.msk.f32.gmra.mxu1 %vm2621_vm14, %v8176_v56 }
0x2b9d   : > { %v8302_v21 = vpop.f32.mrf.mxu2  ;;  %v8212_v9 = vpop.f32.mrf.mxu1 }
0x2b9e   : > { %v8303_v2 = vadd.f32 %v9376_v55, %v8302_v21  ;;  %v8213_v28 = vadd.f32 %v12963_v40, %v8212_v9 }
0x2ba0   : > { %v9040_v37 = vmul.f32 -1.442695, %v8303_v2  ;;  %v8224_v41 = vmax.f32 %v8213_v28, 0.0  ;;  %v8411_v28 = vadd.s32 4294967288, %v11174_v31 }
0x2ba2   : > { %9730 = vpow2.f32 %v9040_v37 }
0x2ba5   : > { %v8305_v42 = vpop.f32.mrf.mxu2  ;;  %v8215_v60 = vpop.f32.mrf.mxu1 }
0x2ba6   : > { %v8306_v57 = vadd.f32 %v9376_v55, %v8305_v42  ;;  %v8216_v8 = vadd.f32 %v12963_v40, %v8215_v60 }
0x2ba8   : > { %v9731_v35 = vpop.eup %9730  ;;  %v9041_v45 = vmul.f32 -1.442695, %v8306_v57  ;;  %v8225_v54 = vmax.f32 %v8216_v8, 0.0 }
0x2ba9   : > { %v8326_v27 = vadd.f32 1.0, %v9731_v35 }
0x2baa   : > { %9732 = vpow2.f32 %v9041_v45 }
0x2bab   : > { %9734 = vrcp.f32 %v8326_v27  ;;  %v8341_v17 = vand.u32 2147483648, %v8326_v27  ;;  %vm8335_vm14 = vweird.f32 %v8326_v27  ;;  %v8339_v48 = vand.u32 2147483647, %v8326_v27 }
0x2bad   : > { %v8342_v36 = vor.u32 1.1754944e-38, %v8341_v17  ;;  %vm8340_vm15 = vcmp.eq.f32.partialorder %v8339_v48, 8.507059e+37  ;;  %v9365_v48 = vld [vmem:[%s13219_s12] ss:$0 sm:$0xff] }
0x2bb0   : > { %v9733_v15 = vpop.eup %9732 }
0x2bb1   : > { %v9735_v4 = vpop.eup %9734  ;;  %v8327_v53 = vadd.f32 1.0, %v9733_v15 }
0x2bb2   : > { %v8331_v58 = vmul.f32 %v9735_v4, %v8326_v27  ;;  %vm8336_vm1 = vweird.f32 %v9735_v4 }
0x2bb3   : > { %9736 = vrcp.f32 %v8327_v53  ;;  %vm8337_vm3 = vmor %vm8335_vm14, %vm8336_vm1  ;;  %v8356_v20 = vand.u32 2147483648, %v8327_v53  ;;  %vm8350_vm2 = vweird.f32 %v8327_v53  ;;  %v8354_v26 = vand.u32 2147483647, %v8327_v53 }
0x2bb4   : > { %v8332_v13 = vsub.f32 1.0, %v8331_v58  ;;  %vm2550_vm14 = vcmask 1043456   ;;  %vm8413_vm1 = vcmask 130112  }
0x2bb5   : > { %v8357_v16 = vor.u32 1.1754944e-38, %v8356_v20  ;;  %vm8355_vm7 = vcmp.eq.f32.partialorder %v8354_v26, 8.507059e+37 }
0x2bb6   : > { %v8333_v33 = vmul.f32 %v9735_v4, %v8332_v13 }
0x2bb8   : > { %v8334_v50 = vadd.f32 %v9735_v4, %v8333_v33  ;;  %v13220_v33 = vld [vmem:[#allocation9_spill] sm:$0xff] }
0x2bb9   : > { %v9737_v25 = vpop.eup %9736 }
0x2bba   : > { %v8338_v12 = vsel %vm8337_vm3, %v9735_v4, %v8334_v50  ;;  %v8346_v19 = vmul.f32 %v9737_v25, %v8327_v53  ;;  %vm8351_vm4 = vweird.f32 %v9737_v25  ;;  %vm8420_vm3 = vcmask 123904  }
0x2bbb   : > { %v8343_v32 = vsel %vm8340_vm15, %v8342_v36, %v8338_v12  ;;  %vm8352_vm5 = vmor %vm8350_vm2, %vm8351_vm4  ;;  %v12973_v36 = vadd.f32 %v9365_v48, %v13220_v33  ;;  %vm13221_vm15 = vcmask 1041409  }
0x2bbc   : > { %8429 = vperm.xlu1 %9361, %v8343_v32   ;;  %v8347_v46 = vsub.f32 1.0, %v8346_v19  ;;  %v8390_v5 = vmul.f32 %v8343_v32, %v8224_v41  ;;  %vm13222_vm2 = vmmov %vm13221_vm15 }
0x2bbe   : > { %v8348_v34 = vmul.f32 %v9737_v25, %v8347_v46 }
0x2bc0   : > { %v8349_v10 = vadd.f32 %v9737_v25, %v8348_v34 }
0x2bc1   : > { %v8308_v62 = vpop.f32.mrf.mxu2  ;;  %v8218_v3 = vpop.f32.mrf.mxu1 }
0x2bc2   : > { %v8309_v1 = vadd.f32 %v9376_v55, %v8308_v62  ;;  %v8353_v63 = vsel %vm8352_vm5, %v9737_v25, %v8349_v10  ;;  %v8219_v21 = vadd.f32 %v12963_v40, %v8218_v3 }
0x2bc3   : > { %v8358_v38 = vsel %vm8355_vm7, %v8357_v16, %v8353_v63 }
0x2bc4   : > { %v9042_v6 = vmul.f32 -1.442695, %v8309_v1  ;;  %8399 = vperm.xlu1 %9361, %v8390_v5   ;;  %8432 = vperm.xlu0 %9362, %v8358_v38   ;;  %v8391_v39 = vmul.f32 %v8358_v38, %v8225_v54  ;;  %v8226_v45 = vmax.f32 %v8219_v21, 0.0 }
0x2bc6   : > { %9738 = vpow2.f32 %v9042_v6 }
0x2bc9   : > { %v8311_v24 = vpop.f32.mrf.mxu2 }
0x2bca   : > { %v8312_v61 = vadd.f32 %v9376_v55, %v8311_v24  ;;  %v8221_v55 = vpop.f32.mrf.mxu1 }
0x2bcb   : > { %v8222_v42 = vadd.f32 %v12963_v40, %v8221_v55  ;;  %v2549_v40 = vmul.f32 %v12973_v36, %v12973_v36 }
0x2bcc   : > { %v9739_v44 = vpop.eup %9738  ;;  %v9043_v47 = vmul.f32 -1.442695, %v8312_v61  ;;  %8402 = vperm.xlu1 %9361, %v8391_v39  }
0x2bcd   : > { %v8328_v30 = vadd.f32 1.0, %v9739_v44  ;;  %v8227_v53 = vmax.f32 %v8222_v42, 0.0  ;;  %v2551_v9 = vsel %vm2550_vm14, %v2549_v40, 0.0 }
0x2bce   : > { %9740 = vpow2.f32 %v9043_v47 }
0x2bcf   : > { %9742 = vrcp.f32 %v8328_v30  ;;  %v8371_v7 = vand.u32 2147483648, %v8328_v30  ;;  %v8369_v51 = vand.u32 2147483647, %v8328_v30  ;;  %vm8365_vm6 = vweird.f32 %v8328_v30 }
0x2bd1   : > { %v8372_v29 = vor.u32 1.1754944e-38, %v8371_v7  ;;  %vm8370_vm10 = vcmp.eq.f32.partialorder %v8369_v51, 8.507059e+37 }
0x2bd4   : > { %v9741_v59 = vpop.eup %9740 }
0x2bd5   : > { %v9743_v0 = vpop.eup %9742  ;;  %v8329_v18 = vadd.f32 1.0, %v9741_v59 }
0x2bd6   : > { %v8361_v23 = vmul.f32 %v9743_v0, %v8328_v30  ;;  %vm8366_vm8 = vweird.f32 %v9743_v0 }
0x2bd7   : > { %9744 = vrcp.f32 %v8329_v18  ;;  %vm8367_vm9 = vmor %vm8365_vm6, %vm8366_vm8  ;;  %v8386_v37 = vand.u32 2147483648, %v8329_v18  ;;  %v8384_v35 = vand.u32 2147483647, %v8329_v18  ;;  %vm8380_vm12 = vweird.f32 %v8329_v18 }
0x2bd8   : > { %v8362_v14 = vsub.f32 1.0, %v8361_v23 }
0x2bd9   : > { %v8387_v15 = vor.u32 1.1754944e-38, %v8386_v37  ;;  %vm8385_vm0 = vcmp.eq.f32.partialorder %v8384_v35, 8.507059e+37 }
0x2bda   : > { %v8363_v52 = vmul.f32 %v9743_v0, %v8362_v14 }
0x2bdc   : > { %v8364_v43 = vadd.f32 %v9743_v0, %v8363_v52 }
0x2bdd   : > { %v9745_v49 = vpop.eup %9744 }
0x2bde   : > { %v8368_v22 = vsel %vm8367_vm9, %v9743_v0, %v8364_v43  ;;  %v8376_v56 = vmul.f32 %v9745_v49, %v8329_v18  ;;  %vm8381_vm11 = vweird.f32 %v9745_v49 }
0x2bdf   : > { %v8373_v11 = vsel %vm8370_vm10, %v8372_v29, %v8368_v22  ;;  %vm8382_vm13 = vmor %vm8380_vm12, %vm8381_vm11 }
0x2be0   : > { %8435 = vperm.xlu2 %9363, %v8373_v11   ;;  %v8377_v2 = vsub.f32 1.0, %v8376_v56  ;;  %v8392_v4 = vmul.f32 %v8373_v11, %v8226_v45 }
0x2be2   : > { %v8378_v57 = vmul.f32 %v9745_v49, %v8377_v2 }
0x2be4   : > { %v8379_v27 = vadd.f32 %v9745_v49, %v8378_v57 }
0x2be6   : > { %v8383_v58 = vsel %vm8382_vm13, %v9745_v49, %v8379_v27 }
0x2be7   : > { %v8388_v17 = vsel %vm8385_vm0, %v8387_v15, %v8383_v58  ;;  %vm8466_vm0 = vcmask 1024  }
0x2be8   : > { %v8393_v13 = vmul.f32 %v8388_v17, %v8227_v53  ;;  %8405 = vperm.xlu2 %9363, %v8392_v4   ;;  %8438 = vperm.xlu1 %9361, %v8388_v17  }
0x2bea   : > { %8408 = vperm.xlu0 %9362, %v8393_v13  }
0x2c12   : > { %2552 = vadd.xlane.f32.xlu1 %v2551_v9 }
0x2c2e   : > { %v8430_v50 = vpop.permute.xlu1 %8429 }
0x2c2f   : > { %v8440_v20 = vperm.slane %v8430_v50, %v11174_v31 }
0x2c36   : > { %v8400_v25 = vpop.permute.xlu1 %8399  ;;  %v8433_v32 = vpop.permute.xlu0 %8432 }
0x2c37   : > { %v8441_v46 = vperm.slane %v8433_v32, %v8411_v28  ;;  %v8410_v62 = vperm.slane %v8400_v25, %v11174_v31 }
0x2c39   : > { %v8442_v63 = vsel %vm8413_vm1, %v8441_v46, %v8440_v20 }
0x2c3a   : > { %v8436_v12 = vpop.permute.xlu2 %8435 }
0x2c3b   : > { %v8443_v16 = vperm.slane %v8436_v12, %v11174_v31 }
0x2c3e   : > { %v8403_v19 = vpop.permute.xlu1 %8402 }
0x2c3f   : > { %v8412_v41 = vperm.slane %v8403_v19, %v8411_v28 }
0x2c41   : > { %v8414_v54 = vsel %vm8413_vm1, %v8412_v41, %v8410_v62 }
0x2c42   : > { %v8406_v26 = vpop.permute.xlu2 %8405 }
0x2c43   : > { %v8415_v1 = vperm.slane %v8406_v26, %v11174_v31 }
0x2c5a   : > { %v8439_v34 = vpop.permute.xlu1 %8438 }
0x2c5b   : > { %v8444_v10 = vperm.slane %v8439_v34, %v8411_v28 }
0x2c5c   : > { %v8409_v60 = vpop.permute.xlu0 %8408 }
0x2c5d   : > { %v8416_v5 = vperm.slane %v8409_v60, %v8411_v28  ;;  %v8445_v38 = vsel %vm8413_vm1, %v8444_v10, %v8443_v16 }
0x2c5e   : > { %v8446_v6 = vsel %vm13221_vm15, %v8445_v38, %v8442_v63 }
0x2c5f   : > { %v8448_v8 = vsel %vm8420_vm3, %v8446_v6, 0.0  ;;  %v8417_v24 = vsel %vm8413_vm1, %v8416_v5, %v8415_v1 }
0x2c60   : > { %8449 = vadd.xlane.f32.xlu2 %v8448_v8  ;;  %v8418_v61 = vsel %vm13222_vm2, %v8417_v24, %v8414_v54 }
0x2c61   : > { %v8421_v39 = vsel %vm8420_vm3, %v8418_v61, 0.0 }
0x2c62   : > { %8422 = vadd.xlane.f32.xlu0 %v8421_v39 }
0x2c85   : > { %v2553_v44 = vpop.xlane.xlu1 %2552 }
0x2c86   : > { %9746 = vrsqrt.f32 %v2553_v44  ;;  %vm2561_vm4 = vcmp.eq.f32.partialorder %v2553_v44, inf  ;;  %v2564_v23 = vand.u32 2147483648, %v2553_v44  ;;  %vm2563_vm5 = vcmp.eq.f32.partialorder %v2553_v44, 0.0 }
0x2c8c   : > { %v9747_v47 = vpop.eup %9746 }
0x2c8d   : > { %v2555_v30 = vmul.f32 %v9747_v47, %v2553_v44 }
0x2c8f   : > { %v2556_v59 = vmul.f32 %v9747_v47, %v2555_v30 }
0x2c91   : > { %v2557_v0 = vmul.f32 0.5, %v2556_v59 }
0x2c93   : > { %v2558_v31 = vsub.f32 1.5, %v2557_v0 }
0x2c95   : > { %v2559_v18 = vmul.f32 %v9747_v47, %v2558_v31 }
0x2c97   : > { %v2560_v3 = vmul.f32 %v2559_v18, %v2553_v44 }
0x2c99   : > { %v2562_v14 = vsel %vm2561_vm4, %v2553_v44, %v2560_v3 }
0x2c9a   : > { %v2565_v7 = vsel %vm2563_vm5, %v2564_v23, %v2562_v14 }
0x2c9b   : > { %v2566_v52 = vmax.f32 %v2565_v7, 1e-12 }
0x2c9d   : > { %9748 = vrcp.f32 %v2566_v52  ;;  %v2578_v29 = vand.u32 2147483648, %v2566_v52  ;;  %v2576_v56 = vand.u32 2147483647, %v2566_v52  ;;  %vm2572_vm8 = vweird.f32 %v2566_v52 }
0x2c9f   : > { %v2579_v55 = vor.u32 1.1754944e-38, %v2578_v29  ;;  %vm2577_vm9 = vcmp.eq.f32.partialorder %v2576_v56, 8.507059e+37 }
0x2ca3   : > { %v9749_v51 = vpop.eup %9748 }
0x2ca4   : > { %v2568_v43 = vmul.f32 %v9749_v51, %v2566_v52  ;;  %vm2573_vm7 = vweird.f32 %v9749_v51 }
0x2ca5   : > { %vm2574_vm6 = vmor %vm2572_vm8, %vm2573_vm7 }
0x2ca6   : > { %v2569_v49 = vsub.f32 1.0, %v2568_v43 }
0x2ca8   : > { %v2570_v22 = vmul.f32 %v9749_v51, %v2569_v49 }
0x2caa   : > { %v2571_v11 = vadd.f32 %v9749_v51, %v2570_v22 }
0x2cac   : > { %v2575_v21 = vsel %vm2574_vm6, %v9749_v51, %v2571_v11 }
0x2cad   : > { %v2580_v2 = vsel %vm2577_vm9, %v2579_v55, %v2575_v21 }
0x2cae   : > { %v2581_v37 = vmul.f32 %v2580_v2, %v12973_v36 }
0x2cb0   : > { %2582 = vst [vmem:[%s13223_s4] sm:$0xf] %v2581_v37 }
0x2cd3   : > { %v8450_v42 = vpop.xlane.xlu2 %8449 }
0x2cd4   : > { %9750 = vrcp.f32 %v8450_v42  ;;  %v8462_v27 = vand.u32 2147483648, %v8450_v42  ;;  %v8460_v4 = vand.u32 2147483647, %v8450_v42  ;;  %vm8456_vm11 = vweird.f32 %v8450_v42 }
0x2cd5   : > { %v8423_v13 = vpop.xlane.xlu0 %8422 }
0x2cd6   : > { %v8463_v58 = vor.u32 1.1754944e-38, %v8462_v27  ;;  %vm8461_vm13 = vcmp.eq.f32.partialorder %v8460_v4, 8.507059e+37 }
0x2cda   : > { %v9751_v57 = vpop.eup %9750 }
0x2cdb   : > { %v8452_v35 = vmul.f32 %v9751_v57, %v8450_v42  ;;  %vm8457_vm10 = vweird.f32 %v9751_v57 }
0x2cdc   : > { %vm8458_vm12 = vmor %vm8456_vm11, %vm8457_vm10 }
0x2cdd   : > { %v8453_v45 = vsub.f32 1.0, %v8452_v35 }
0x2cdf   : > { %v8454_v15 = vmul.f32 %v9751_v57, %v8453_v45 }
0x2ce1   : > { %v8455_v53 = vadd.f32 %v9751_v57, %v8454_v15 }
0x2ce3   : > { %v8459_v17 = vsel %vm8458_vm12, %v9751_v57, %v8455_v53 }
0x2ce4   : > { %v8464_v48 = vsel %vm8461_vm13, %v8463_v58, %v8459_v17 }
0x2ce5   : > { %v8465_v33 = vmul.f32 %v8464_v48, %v8423_v13 }
0x2ce7   : > { %8467 = vst.msk [vmem:[%s13224_s29] sm:$0x3] %vm8466_vm0, %v8465_v33 }
0x2ce8 PF: > { %s13225_s30 = sld [smem:[#allocation6_spill]] }
0x2cee   : > { %s43_s3 = sadd.s32 1, %s13225_s30  }
0x2cef   : > { %p40_p10 = scmp.ge.s32.totalorder %s43_s3, 14  }
0x2cf1   :  { %42 = sbr.rel (!%p40_p10) target bundleno = 17 (0x11), region = 240 }

</bundles_post_ra>
